<compile_context>
chip_gen: v5e
topology: v5e:2x2
jax: 0.10.0
libtpu: 0.0.40
codegen_flags: <defaults>
</compile_context>

<pallas_src>
import functools

import jax
import jax.numpy as jnp
import numpy as np
from jax import lax
from jax.experimental import pallas as pl
from jax.experimental.pallas import tpu as pltpu

# ----------------------------------------------------------------------------- config
K_PRED = 6
SCORE_TEMPERATURE = 0.5
MPA_NMS_THRESH = []                 # empty -> mpa_nms branch skipped
MTR_NMS_THRESH = [2.5, 1.0, 2.0]    # [veh, ped, cyc] -> mtr_nms branch taken
AGGR_THRESH = []                    # empty -> traj_aggr branch skipped
N_ITER_EM = 0
USE_ADE = False                     # endpoint (last-step) distance for NMS


def _pick_row_block(n_rows: int, cap: int = 1024) -> int:
    """Largest row tile: whole batch if small, else a multiple-of-8 divisor <= cap."""
    if n_rows <= cap:
        return n_rows
    best = 0
    for blk in range(8, cap + 1, 8):
        if n_rows % blk == 0:
            best = blk
    return best if best > 0 else n_rows


# ----------------------------------------------------------------------------- kernel
def _waymo_post_kernel(scores_ref, trajs_ref, thr2_ref,
                       otraj_ref, oscore_ref, oh_ref,
                       *, k_pred, end_col, temperature):
    R, P = scores_ref.shape

    scores = scores_ref[...]                                   # [R, P]     f32
    tf = trajs_ref[...]                                        # [R, P, SD] f32
    # squared threshold, broadcast ONCE before the unrolled loop
    thr2 = jnp.broadcast_to(thr2_ref[...], (R, P))             # [R, P]

    # forward(): scores = scores / scores.sum(-1, keepdim=True)
    # approx reciprocal -> EUP slot; the per-row scale is uniform, so it never
    # changes the argmax order and cancels exactly in the renorm + softmax below.
    s = scores * pl.reciprocal(jnp.sum(scores, axis=-1, keepdims=True), approx=True)

    # use_ade=False -> NMS distance between trajectory endpoints (last step x/y).
    x_end = tf[:, :, end_col]                                  # [R, P]
    y_end = tf[:, :, end_col + 1]                              # [R, P]

    iota_p = lax.broadcasted_iota(jnp.int32, (R, P), 1)

    sc = s                                                     # scores_clone
    for k in range(k_pred):                                    # small -> static unroll
        # argmax along modes with first-index tie break (matches torch .max(-1)[1])
        max_val = jnp.max(sc, axis=-1, keepdims=True)
        masked_iota = jnp.where(sc == max_val, iota_p, P)
        first_idx = jnp.min(masked_iota, axis=-1, keepdims=True)   # [R, 1]
        oh = (iota_p == first_idx).astype(jnp.float32)             # [R, P] one-hot
        oh_ref[:, k, :] = oh          # collect for the single post-loop MXU gather

        # per-iteration [R, P] distance row: gather selected endpoint, compare
        # squared distance against thresh^2 (no sqrt, no [R,P,P] tensor).
        x_sel = jnp.sum(oh * x_end, axis=-1, keepdims=True)        # [R, 1]
        y_sel = jnp.sum(oh * y_end, axis=-1, keepdims=True)        # [R, 1]
        dx = x_end - x_sel
        dy = y_end - y_sel
        within = (dx * dx + dy * dy) < thr2                        # [R, P]
        # w_mask = (~within) * 0.99 + 0.01
        sc = sc * jnp.where(within, 0.01, 1.0)
        sc = jnp.where(oh > 0.0, -1.0, sc)                         # scores_clone[idx] = -1

    oh_all = oh_ref[...]                                           # [R, K, P]

    # one batched MXU gather of the K selected trajectories per row
    trajs_k = jnp.einsum("rkp,rpd->rkd", oh_all, tf,
                         preferred_element_type=jnp.float32)       # [R, K, SD]

    # gather the selected (normalized) scores + mtr_nms renormalization
    scores_k = jnp.sum(oh_all * s[:, None, :], axis=-1)            # [R, K]
    scores_k = scores_k * pl.reciprocal(
        jnp.sum(scores_k, axis=-1, keepdims=True), approx=True)

    # forward(): temperature softmax over log-probs (exact denominator so the
    # output probabilities match the reference to f32 accuracy)
    logits = jnp.log(scores_k) * (1.0 / temperature)
    logits = logits - jnp.max(logits, axis=-1, keepdims=True)
    e = jnp.exp(logits)
    scores_k = e / jnp.sum(e, axis=-1, keepdims=True)

    otraj_ref[...] = trajs_k
    oscore_ref[...] = scores_k


# ----------------------------------------------------------------------------- wrapper
def waymo_post_processing(valid, scores, trajs, agent_type):
    n_scene, n_agent, n_pred, n_step, d_traj = trajs.shape
    assert n_pred > K_PRED, "configured path requires n_pred > k_pred"

    R = n_scene * n_agent
    SD = n_step * d_traj

    scores_r = scores.astype(jnp.float32).reshape(R, n_pred)
    trajs_r = trajs.astype(jnp.float32).reshape(R, n_pred, SD)

    # per-agent NMS threshold computed in the wrapper (tiny fused XLA op),
    # shipped squared so the kernel compares squared distances directly.
    thr = jnp.asarray(MTR_NMS_THRESH, jnp.float32)
    thresh = jnp.einsum("sat,t->sa", agent_type.astype(jnp.float32), thr)
    thresh_sq = (thresh * thresh).reshape(R, 1)

    r_blk = _pick_row_block(R)
    grid = (R // r_blk,)

    kernel = functools.partial(
        _waymo_post_kernel,
        k_pred=K_PRED,
        end_col=(n_step - 1) * d_traj,
        temperature=float(SCORE_TEMPERATURE))

    out_traj, out_score = pl.pallas_call(
        kernel,
        grid=grid,
        in_specs=[
            pl.BlockSpec((r_blk, n_pred), lambda i: (i, 0)),
            pl.BlockSpec((r_blk, n_pred, SD), lambda i: (i, 0, 0)),
            pl.BlockSpec((r_blk, 1), lambda i: (i, 0)),
        ],
        out_specs=(
            pl.BlockSpec((r_blk, K_PRED, SD), lambda i: (i, 0, 0)),
            pl.BlockSpec((r_blk, K_PRED), lambda i: (i, 0)),
        ),
        out_shape=(
            jax.ShapeDtypeStruct((R, K_PRED, SD), jnp.float32),
            jax.ShapeDtypeStruct((R, K_PRED), jnp.float32),
        ),
        scratch_shapes=[pltpu.VMEM((r_blk, K_PRED, n_pred), jnp.float32)],
        compiler_params=pltpu.CompilerParams(
            # rows (scene x agent) are fully independent -> shardable across TCs (v7x)
            dimension_semantics=("parallel",)),
    )(scores_r, trajs_r, thresh_sq)

    # glue: rearrange into forward()'s output dict
    trajs_k = out_traj.reshape(n_scene, n_agent, K_PRED, n_step, d_traj)
    scores_k = out_score.reshape(n_scene, n_agent, K_PRED)
    trajs_moved = jnp.moveaxis(trajs_k, 3, 1)  # [n_scene, n_step, n_agent, k_pred, d_traj]

    pred = {
        "waymo_trajs": trajs_moved[..., :2],
        "waymo_yaw_bbox": trajs_moved[..., 2:3] if d_traj >= 3 else None,
        "waymo_spd": trajs_moved[..., 3:4] if d_traj >= 4 else None,
        "waymo_scores": scores_k,
        "waymo_valid": jnp.broadcast_to(valid[:, None, :], (n_scene, n_step, n_agent)),
    }
    return pred


# ----------------------------------------------------------------------------- pure-JAX reference
def _reference(valid, scores, trajs, agent_type):
    n_scene, n_agent, n_pred, n_step, d_traj = trajs.shape
    s = scores / jnp.sum(scores, axis=-1, keepdims=True)

    thr = jnp.asarray(MTR_NMS_THRESH, jnp.float32)
    thresh = jnp.einsum("sat,t->sa", agent_type, thr)[:, :, None, None]

    xy_end = trajs[..., n_step - 1, :2]                       # [S, A, P, 2]
    diff = xy_end[:, :, None, :, :] - xy_end[:, :, :, None, :]
    within = jnp.linalg.norm(diff, axis=-1) < thresh          # [S, A, P, P]

    sc = s
    mode_idx = []
    for _ in range(K_PRED):
        idx = jnp.argmax(sc, axis=-1)                         # [S, A]
        row = jnp.take_along_axis(within.astype(jnp.float32),
                                  idx[:, :, None, None], axis=2)[:, :, 0, :]
        w_mask = (1.0 - row) * 0.99 + 0.01
        sc = sc * w_mask
        oh = jax.nn.one_hot(idx, n_pred)
        sc = jnp.where(oh > 0, -1.0, sc)
        mode_idx.append(idx)
    mode_idx = jnp.stack(mode_idx, axis=-1)                   # [S, A, K]

    trajs_k = jnp.take_along_axis(trajs, mode_idx[:, :, :, None, None], axis=2)
    scores_k = jnp.take_along_axis(s, mode_idx, axis=2)
    scores_k = scores_k / jnp.sum(scores_k, axis=-1, keepdims=True)
    scores_k = jax.nn.softmax(jnp.log(scores_k) / SCORE_TEMPERATURE, axis=-1)

    trajs_moved = jnp.moveaxis(trajs_k, 3, 1)
    return {
        "waymo_trajs": trajs_moved[..., :2],
        "waymo_yaw_bbox": trajs_moved[..., 2:3] if d_traj >= 3 else None,
        "waymo_spd": trajs_moved[..., 3:4] if d_traj >= 4 else None,
        "waymo_scores": scores_k,
        "waymo_valid": jnp.broadcast_to(valid[:, None, :], (n_scene, n_step, n_agent)),
    }


# ----------------------------------------------------------------------------- main
if __name__ == "__main__":
    n_scene, n_agent, n_pred, n_step, d_traj = 2, 8, 16, 8, 4

    key = jax.random.PRNGKey(0)
    k1, k2, k3, k4 = jax.random.split(key, 4)

    scores = jax.random.uniform(k1, (n_scene, n_agent, n_pred),
                                minval=0.05, maxval=1.0, dtype=jnp.float32)
    trajs = jax.random.normal(k2, (n_scene, n_agent, n_pred, n_step, d_traj),
                              dtype=jnp.float32) * 5.0
    type_ids = jax.random.randint(k3, (n_scene, n_agent), 0, 3)
    agent_type = jax.nn.one_hot(type_ids, 3, dtype=jnp.float32)
    valid = jax.random.bernoulli(k4, 0.9, (n_scene, n_agent))

    out = waymo_post_processing(valid, scores, trajs, agent_type)
    jax.block_until_ready(out)

    ref = _reference(valid, scores, trajs, agent_type)
    for name in ["waymo_trajs", "waymo_yaw_bbox", "waymo_spd", "waymo_scores"]:
        np.testing.assert_allclose(np.asarray(out[name]), np.asarray(ref[name]),
                                   rtol=1e-4, atol=1e-4)
    np.testing.assert_array_equal(np.asarray(out["waymo_valid"]),
                                  np.asarray(ref["waymo_valid"]))

    print("KERNEL_OK")
</pallas_src>

<mosaic_0001>
module attributes {stable_mosaic.version = 11 : i64} {
  func.func @_waymo_post_kernel(%arg0: i32, %arg1: memref<16x16xf32, #tpu.memory_space<vmem>>, %arg2: memref<16x16x32xf32, #tpu.memory_space<vmem>>, %arg3: memref<16x1xf32, #tpu.memory_space<vmem>>, %arg4: memref<16x6x32xf32, #tpu.memory_space<vmem>>, %arg5: memref<16x6xf32, #tpu.memory_space<vmem>>, %arg6: memref<16x6x16xf32, #tpu.memory_space<vmem>>) attributes {dimension_semantics = [#tpu.dimension_semantics<parallel>], iteration_bounds = array<i64: 1>, scalar_prefetch = 0 : i64, scratch_operands = 1 : i64, tpu.core_type = #tpu.core_type<tc>, window_params = [{transform_indices = @transform_0, window_bounds = array<i64: 16, 16>}, {transform_indices = @transform_1, window_bounds = array<i64: 16, 16, 32>}, {transform_indices = @transform_2, window_bounds = array<i64: 16, 1>}, {transform_indices = @transform_3, window_bounds = array<i64: 16, 6, 32>}, {transform_indices = @transform_4, window_bounds = array<i64: 16, 6>}]} {
    %c0 = arith.constant 0 : index
    %c0_0 = arith.constant 0 : index
    %0 = vector.load %arg1[%c0, %c0_0] : memref<16x16xf32, #tpu.memory_space<vmem>>, vector<16x16xf32>
    %c0_1 = arith.constant 0 : index
    %c0_2 = arith.constant 0 : index
    %c0_3 = arith.constant 0 : index
    %1 = vector.load %arg2[%c0_1, %c0_2, %c0_3] : memref<16x16x32xf32, #tpu.memory_space<vmem>>, vector<16x16x32xf32>
    %c0_4 = arith.constant 0 : index
    %c0_5 = arith.constant 0 : index
    %2 = vector.load %arg3[%c0_4, %c0_5] : memref<16x1xf32, #tpu.memory_space<vmem>>, vector<16x1xf32>
    %3 = vector.shape_cast %2 : vector<16x1xf32> to vector<16x1xf32>
    %4 = vector.broadcast %3 : vector<16x1xf32> to vector<16x16xf32>
    %cst = arith.constant dense<0.000000e+00> : vector<16xf32>
    %5 = vector.multi_reduction <add>, %0, %cst [1] : vector<16x16xf32> to vector<16xf32>
    %6 = vector.shape_cast %5 : vector<16xf32> to vector<16x1xf32>
    %7 = tpu.reciprocal %6 {approx = true} : vector<16x1xf32> -> vector<16x1xf32>
    %8 = vector.broadcast %7 : vector<16x1xf32> to vector<16x16xf32>
    %9 = arith.mulf %0, %8 : vector<16x16xf32>
    %10 = vector.extract_strided_slice %1 {offsets = [0, 0, 28], sizes = [16, 16, 1], strides = [1, 1, 1]} : vector<16x16x32xf32> to vector<16x16x1xf32>
    %11 = vector.shape_cast %10 : vector<16x16x1xf32> to vector<16x16xf32>
    %12 = vector.extract_strided_slice %1 {offsets = [0, 0, 29], sizes = [16, 16, 1], strides = [1, 1, 1]} : vector<16x16x32xf32> to vector<16x16x1xf32>
    %13 = vector.shape_cast %12 : vector<16x16x1xf32> to vector<16x16xf32>
    %14 = tpu.iota {dimensions = array<i32: 1>} : vector<16x16xi32>
    %cst_6 = arith.constant dense<0xFF800000> : vector<16xf32>
    %15 = vector.multi_reduction <maximumf>, %9, %cst_6 [1] : vector<16x16xf32> to vector<16xf32>
    %16 = vector.shape_cast %15 : vector<16xf32> to vector<16x1xf32>
    %17 = vector.broadcast %16 : vector<16x1xf32> to vector<16x16xf32>
    %18 = arith.cmpf oeq, %9, %17 : vector<16x16xf32>
    %c16_i32 = arith.constant 16 : i32
    %19 = vector.broadcast %c16_i32 : i32 to vector<16x16xi32>
    %20 = arith.select %18, %14, %19 : vector<16x16xi1>, vector<16x16xi32>
    %cst_7 = arith.constant dense<2147483647> : vector<16xi32>
    %21 = vector.multi_reduction <minsi>, %20, %cst_7 [1] : vector<16x16xi32> to vector<16xi32>
    %22 = vector.shape_cast %21 : vector<16xi32> to vector<16x1xi32>
    %23 = vector.broadcast %22 : vector<16x1xi32> to vector<16x16xi32>
    %24 = arith.cmpi eq, %14, %23 : vector<16x16xi32>
    %25 = arith.extui %24 : vector<16x16xi1> to vector<16x16xi32>
    %26 = arith.sitofp %25 : vector<16x16xi32> to vector<16x16xf32>
    %c0_8 = arith.constant 0 : index
    %c0_9 = arith.constant 0 : index
    %c0_10 = arith.constant 0 : index
    %27 = vector.load %arg6[%c0_8, %c0_9, %c0_10] : memref<16x6x16xf32, #tpu.memory_space<vmem>>, vector<16x1x16xf32>
    %28 = vector.shape_cast %27 : vector<16x1x16xf32> to vector<16x16xf32>
    %29 = vector.shape_cast %26 : vector<16x16xf32> to vector<16x1x16xf32>
    tpu.vector_store %arg6[%c0_8, %c0_9, %c0_10], %29 {strides = array<i32>} : memref<16x6x16xf32, #tpu.memory_space<vmem>>, vector<16x1x16xf32>,
    %30 = arith.mulf %26, %11 : vector<16x16xf32>
    %cst_11 = arith.constant dense<0.000000e+00> : vector<16xf32>
    %31 = vector.multi_reduction <add>, %30, %cst_11 [1] : vector<16x16xf32> to vector<16xf32>
    %32 = vector.shape_cast %31 : vector<16xf32> to vector<16x1xf32>
    %33 = arith.mulf %26, %13 : vector<16x16xf32>
    %cst_12 = arith.constant dense<0.000000e+00> : vector<16xf32>
    %34 = vector.multi_reduction <add>, %33, %cst_12 [1] : vector<16x16xf32> to vector<16xf32>
    %35 = vector.shape_cast %34 : vector<16xf32> to vector<16x1xf32>
    %36 = vector.broadcast %32 : vector<16x1xf32> to vector<16x16xf32>
    %37 = arith.subf %11, %36 : vector<16x16xf32>
    %38 = vector.broadcast %35 : vector<16x1xf32> to vector<16x16xf32>
    %39 = arith.subf %13, %38 : vector<16x16xf32>
    %40 = arith.mulf %37, %37 : vector<16x16xf32>
    %41 = arith.mulf %39, %39 : vector<16x16xf32>
    %42 = arith.addf %40, %41 : vector<16x16xf32>
    %43 = arith.cmpf olt, %42, %4 : vector<16x16xf32>
    %cst_13 = arith.constant 0.00999999977 : f32
    %cst_14 = arith.constant 1.000000e+00 : f32
    %44 = vector.broadcast %cst_13 : f32 to vector<16x16xf32>
    %45 = vector.broadcast %cst_14 : f32 to vector<16x16xf32>
    %46 = arith.select %43, %44, %45 : vector<16x16xi1>, vector<16x16xf32>
    %47 = arith.mulf %9, %46 : vector<16x16xf32>
    %cst_15 = arith.constant 0.000000e+00 : f32
    %48 = vector.broadcast %cst_15 : f32 to vector<16x16xf32>
    %49 = arith.cmpf ogt, %26, %48 : vector<16x16xf32>
    %cst_16 = arith.constant -1.000000e+00 : f32
    %50 = vector.broadcast %cst_16 : f32 to vector<16x16xf32>
    %51 = arith.select %49, %50, %47 : vector<16x16xi1>, vector<16x16xf32>
    %cst_17 = arith.constant dense<0xFF800000> : vector<16xf32>
    %52 = vector.multi_reduction <maximumf>, %51, %cst_17 [1] : vector<16x16xf32> to vector<16xf32>
    %53 = vector.shape_cast %52 : vector<16xf32> to vector<16x1xf32>
    %54 = vector.broadcast %53 : vector<16x1xf32> to vector<16x16xf32>
    %55 = arith.cmpf oeq, %51, %54 : vector<16x16xf32>
    %c16_i32_18 = arith.constant 16 : i32
    %56 = vector.broadcast %c16_i32_18 : i32 to vector<16x16xi32>
    %57 = arith.select %55, %14, %56 : vector<16x16xi1>, vector<16x16xi32>
    %cst_19 = arith.constant dense<2147483647> : vector<16xi32>
    %58 = vector.multi_reduction <minsi>, %57, %cst_19 [1] : vector<16x16xi32> to vector<16xi32>
    %59 = vector.shape_cast %58 : vector<16xi32> to vector<16x1xi32>
    %60 = vector.broadcast %59 : vector<16x1xi32> to vector<16x16xi32>
    %61 = arith.cmpi eq, %14, %60 : vector<16x16xi32>
    %62 = arith.extui %61 : vector<16x16xi1> to vector<16x16xi32>
    %63 = arith.sitofp %62 : vector<16x16xi32> to vector<16x16xf32>
    %c0_20 = arith.constant 0 : index
    %c1 = arith.constant 1 : index
    %c0_21 = arith.constant 0 : index
    %64 = vector.load %arg6[%c0_20, %c1, %c0_21] : memref<16x6x16xf32, #tpu.memory_space<vmem>>, vector<16x1x16xf32>
    %65 = vector.shape_cast %64 : vector<16x1x16xf32> to vector<16x16xf32>
    %66 = vector.shape_cast %63 : vector<16x16xf32> to vector<16x1x16xf32>
    tpu.vector_store %arg6[%c0_20, %c1, %c0_21], %66 {strides = array<i32>} : memref<16x6x16xf32, #tpu.memory_space<vmem>>, vector<16x1x16xf32>,
    %67 = arith.mulf %63, %11 : vector<16x16xf32>
    %cst_22 = arith.constant dense<0.000000e+00> : vector<16xf32>
    %68 = vector.multi_reduction <add>, %67, %cst_22 [1] : vector<16x16xf32> to vector<16xf32>
    %69 = vector.shape_cast %68 : vector<16xf32> to vector<16x1xf32>
    %70 = arith.mulf %63, %13 : vector<16x16xf32>
    %cst_23 = arith.constant dense<0.000000e+00> : vector<16xf32>
    %71 = vector.multi_reduction <add>, %70, %cst_23 [1] : vector<16x16xf32> to vector<16xf32>
    %72 = vector.shape_cast %71 : vector<16xf32> to vector<16x1xf32>
    %73 = vector.broadcast %69 : vector<16x1xf32> to vector<16x16xf32>
    %74 = arith.subf %11, %73 : vector<16x16xf32>
    %75 = vector.broadcast %72 : vector<16x1xf32> to vector<16x16xf32>
    %76 = arith.subf %13, %75 : vector<16x16xf32>
    %77 = arith.mulf %74, %74 : vector<16x16xf32>
    %78 = arith.mulf %76, %76 : vector<16x16xf32>
    %79 = arith.addf %77, %78 : vector<16x16xf32>
    %80 = arith.cmpf olt, %79, %4 : vector<16x16xf32>
    %cst_24 = arith.constant 0.00999999977 : f32
    %cst_25 = arith.constant 1.000000e+00 : f32
    %81 = vector.broadcast %cst_24 : f32 to vector<16x16xf32>
    %82 = vector.broadcast %cst_25 : f32 to vector<16x16xf32>
    %83 = arith.select %80, %81, %82 : vector<16x16xi1>, vector<16x16xf32>
    %84 = arith.mulf %51, %83 : vector<16x16xf32>
    %cst_26 = arith.constant 0.000000e+00 : f32
    %85 = vector.broadcast %cst_26 : f32 to vector<16x16xf32>
    %86 = arith.cmpf ogt, %63, %85 : vector<16x16xf32>
    %cst_27 = arith.constant -1.000000e+00 : f32
    %87 = vector.broadcast %cst_27 : f32 to vector<16x16xf32>
    %88 = arith.select %86, %87, %84 : vector<16x16xi1>, vector<16x16xf32>
    %cst_28 = arith.constant dense<0xFF800000> : vector<16xf32>
    %89 = vector.multi_reduction <maximumf>, %88, %cst_28 [1] : vector<16x16xf32> to vector<16xf32>
    %90 = vector.shape_cast %89 : vector<16xf32> to vector<16x1xf32>
    %91 = vector.broadcast %90 : vector<16x1xf32> to vector<16x16xf32>
    %92 = arith.cmpf oeq, %88, %91 : vector<16x16xf32>
    %c16_i32_29 = arith.constant 16 : i32
    %93 = vector.broadcast %c16_i32_29 : i32 to vector<16x16xi32>
    %94 = arith.select %92, %14, %93 : vector<16x16xi1>, vector<16x16xi32>
    %cst_30 = arith.constant dense<2147483647> : vector<16xi32>
    %95 = vector.multi_reduction <minsi>, %94, %cst_30 [1] : vector<16x16xi32> to vector<16xi32>
    %96 = vector.shape_cast %95 : vector<16xi32> to vector<16x1xi32>
    %97 = vector.broadcast %96 : vector<16x1xi32> to vector<16x16xi32>
    %98 = arith.cmpi eq, %14, %97 : vector<16x16xi32>
    %99 = arith.extui %98 : vector<16x16xi1> to vector<16x16xi32>
    %100 = arith.sitofp %99 : vector<16x16xi32> to vector<16x16xf32>
    %c0_31 = arith.constant 0 : index
    %c2 = arith.constant 2 : index
    %c0_32 = arith.constant 0 : index
    %101 = vector.load %arg6[%c0_31, %c2, %c0_32] : memref<16x6x16xf32, #tpu.memory_space<vmem>>, vector<16x1x16xf32>
    %102 = vector.shape_cast %101 : vector<16x1x16xf32> to vector<16x16xf32>
    %103 = vector.shape_cast %100 : vector<16x16xf32> to vector<16x1x16xf32>
    tpu.vector_store %arg6[%c0_31, %c2, %c0_32], %103 {strides = array<i32>} : memref<16x6x16xf32, #tpu.memory_space<vmem>>, vector<16x1x16xf32>,
    %104 = arith.mulf %100, %11 : vector<16x16xf32>
    %cst_33 = arith.constant dense<0.000000e+00> : vector<16xf32>
    %105 = vector.multi_reduction <add>, %104, %cst_33 [1] : vector<16x16xf32> to vector<16xf32>
    %106 = vector.shape_cast %105 : vector<16xf32> to vector<16x1xf32>
    %107 = arith.mulf %100, %13 : vector<16x16xf32>
    %cst_34 = arith.constant dense<0.000000e+00> : vector<16xf32>
    %108 = vector.multi_reduction <add>, %107, %cst_34 [1] : vector<16x16xf32> to vector<16xf32>
    %109 = vector.shape_cast %108 : vector<16xf32> to vector<16x1xf32>
    %110 = vector.broadcast %106 : vector<16x1xf32> to vector<16x16xf32>
    %111 = arith.subf %11, %110 : vector<16x16xf32>
    %112 = vector.broadcast %109 : vector<16x1xf32> to vector<16x16xf32>
    %113 = arith.subf %13, %112 : vector<16x16xf32>
    %114 = arith.mulf %111, %111 : vector<16x16xf32>
    %115 = arith.mulf %113, %113 : vector<16x16xf32>
    %116 = arith.addf %114, %115 : vector<16x16xf32>
    %117 = arith.cmpf olt, %116, %4 : vector<16x16xf32>
    %cst_35 = arith.constant 0.00999999977 : f32
    %cst_36 = arith.constant 1.000000e+00 : f32
    %118 = vector.broadcast %cst_35 : f32 to vector<16x16xf32>
    %119 = vector.broadcast %cst_36 : f32 to vector<16x16xf32>
    %120 = arith.select %117, %118, %119 : vector<16x16xi1>, vector<16x16xf32>
    %121 = arith.mulf %88, %120 : vector<16x16xf32>
    %cst_37 = arith.constant 0.000000e+00 : f32
    %122 = vector.broadcast %cst_37 : f32 to vector<16x16xf32>
    %123 = arith.cmpf ogt, %100, %122 : vector<16x16xf32>
    %cst_38 = arith.constant -1.000000e+00 : f32
    %124 = vector.broadcast %cst_38 : f32 to vector<16x16xf32>
    %125 = arith.select %123, %124, %121 : vector<16x16xi1>, vector<16x16xf32>
    %cst_39 = arith.constant dense<0xFF800000> : vector<16xf32>
    %126 = vector.multi_reduction <maximumf>, %125, %cst_39 [1] : vector<16x16xf32> to vector<16xf32>
    %127 = vector.shape_cast %126 : vector<16xf32> to vector<16x1xf32>
    %128 = vector.broadcast %127 : vector<16x1xf32> to vector<16x16xf32>
    %129 = arith.cmpf oeq, %125, %128 : vector<16x16xf32>
    %c16_i32_40 = arith.constant 16 : i32
    %130 = vector.broadcast %c16_i32_40 : i32 to vector<16x16xi32>
    %131 = arith.select %129, %14, %130 : vector<16x16xi1>, vector<16x16xi32>
    %cst_41 = arith.constant dense<2147483647> : vector<16xi32>
    %132 = vector.multi_reduction <minsi>, %131, %cst_41 [1] : vector<16x16xi32> to vector<16xi32>
    %133 = vector.shape_cast %132 : vector<16xi32> to vector<16x1xi32>
    %134 = vector.broadcast %133 : vector<16x1xi32> to vector<16x16xi32>
    %135 = arith.cmpi eq, %14, %134 : vector<16x16xi32>
    %136 = arith.extui %135 : vector<16x16xi1> to vector<16x16xi32>
    %137 = arith.sitofp %136 : vector<16x16xi32> to vector<16x16xf32>
    %c0_42 = arith.constant 0 : index
    %c3 = arith.constant 3 : index
    %c0_43 = arith.constant 0 : index
    %138 = vector.load %arg6[%c0_42, %c3, %c0_43] : memref<16x6x16xf32, #tpu.memory_space<vmem>>, vector<16x1x16xf32>
    %139 = vector.shape_cast %138 : vector<16x1x16xf32> to vector<16x16xf32>
    %140 = vector.shape_cast %137 : vector<16x16xf32> to vector<16x1x16xf32>
    tpu.vector_store %arg6[%c0_42, %c3, %c0_43], %140 {strides = array<i32>} : memref<16x6x16xf32, #tpu.memory_space<vmem>>, vector<16x1x16xf32>,
    %141 = arith.mulf %137, %11 : vector<16x16xf32>
    %cst_44 = arith.constant dense<0.000000e+00> : vector<16xf32>
    %142 = vector.multi_reduction <add>, %141, %cst_44 [1] : vector<16x16xf32> to vector<16xf32>
    %143 = vector.shape_cast %142 : vector<16xf32> to vector<16x1xf32>
    %144 = arith.mulf %137, %13 : vector<16x16xf32>
    %cst_45 = arith.constant dense<0.000000e+00> : vector<16xf32>
    %145 = vector.multi_reduction <add>, %144, %cst_45 [1] : vector<16x16xf32> to vector<16xf32>
    %146 = vector.shape_cast %145 : vector<16xf32> to vector<16x1xf32>
    %147 = vector.broadcast %143 : vector<16x1xf32> to vector<16x16xf32>
    %148 = arith.subf %11, %147 : vector<16x16xf32>
    %149 = vector.broadcast %146 : vector<16x1xf32> to vector<16x16xf32>
    %150 = arith.subf %13, %149 : vector<16x16xf32>
    %151 = arith.mulf %148, %148 : vector<16x16xf32>
    %152 = arith.mulf %150, %150 : vector<16x16xf32>
    %153 = arith.addf %151, %152 : vector<16x16xf32>
    %154 = arith.cmpf olt, %153, %4 : vector<16x16xf32>
    %cst_46 = arith.constant 0.00999999977 : f32
    %cst_47 = arith.constant 1.000000e+00 : f32
    %155 = vector.broadcast %cst_46 : f32 to vector<16x16xf32>
    %156 = vector.broadcast %cst_47 : f32 to vector<16x16xf32>
    %157 = arith.select %154, %155, %156 : vector<16x16xi1>, vector<16x16xf32>
    %158 = arith.mulf %125, %157 : vector<16x16xf32>
    %cst_48 = arith.constant 0.000000e+00 : f32
    %159 = vector.broadcast %cst_48 : f32 to vector<16x16xf32>
    %160 = arith.cmpf ogt, %137, %159 : vector<16x16xf32>
    %cst_49 = arith.constant -1.000000e+00 : f32
    %161 = vector.broadcast %cst_49 : f32 to vector<16x16xf32>
    %162 = arith.select %160, %161, %158 : vector<16x16xi1>, vector<16x16xf32>
    %cst_50 = arith.constant dense<0xFF800000> : vector<16xf32>
    %163 = vector.multi_reduction <maximumf>, %162, %cst_50 [1] : vector<16x16xf32> to vector<16xf32>
    %164 = vector.shape_cast %163 : vector<16xf32> to vector<16x1xf32>
    %165 = vector.broadcast %164 : vector<16x1xf32> to vector<16x16xf32>
    %166 = arith.cmpf oeq, %162, %165 : vector<16x16xf32>
    %c16_i32_51 = arith.constant 16 : i32
    %167 = vector.broadcast %c16_i32_51 : i32 to vector<16x16xi32>
    %168 = arith.select %166, %14, %167 : vector<16x16xi1>, vector<16x16xi32>
    %cst_52 = arith.constant dense<2147483647> : vector<16xi32>
    %169 = vector.multi_reduction <minsi>, %168, %cst_52 [1] : vector<16x16xi32> to vector<16xi32>
    %170 = vector.shape_cast %169 : vector<16xi32> to vector<16x1xi32>
    %171 = vector.broadcast %170 : vector<16x1xi32> to vector<16x16xi32>
    %172 = arith.cmpi eq, %14, %171 : vector<16x16xi32>
    %173 = arith.extui %172 : vector<16x16xi1> to vector<16x16xi32>
    %174 = arith.sitofp %173 : vector<16x16xi32> to vector<16x16xf32>
    %c0_53 = arith.constant 0 : index
    %c4 = arith.constant 4 : index
    %c0_54 = arith.constant 0 : index
    %175 = vector.load %arg6[%c0_53, %c4, %c0_54] : memref<16x6x16xf32, #tpu.memory_space<vmem>>, vector<16x1x16xf32>
    %176 = vector.shape_cast %175 : vector<16x1x16xf32> to vector<16x16xf32>
    %177 = vector.shape_cast %174 : vector<16x16xf32> to vector<16x1x16xf32>
    tpu.vector_store %arg6[%c0_53, %c4, %c0_54], %177 {strides = array<i32>} : memref<16x6x16xf32, #tpu.memory_space<vmem>>, vector<16x1x16xf32>,
    %178 = arith.mulf %174, %11 : vector<16x16xf32>
    %cst_55 = arith.constant dense<0.000000e+00> : vector<16xf32>
    %179 = vector.multi_reduction <add>, %178, %cst_55 [1] : vector<16x16xf32> to vector<16xf32>
    %180 = vector.shape_cast %179 : vector<16xf32> to vector<16x1xf32>
    %181 = arith.mulf %174, %13 : vector<16x16xf32>
    %cst_56 = arith.constant dense<0.000000e+00> : vector<16xf32>
    %182 = vector.multi_reduction <add>, %181, %cst_56 [1] : vector<16x16xf32> to vector<16xf32>
    %183 = vector.shape_cast %182 : vector<16xf32> to vector<16x1xf32>
    %184 = vector.broadcast %180 : vector<16x1xf32> to vector<16x16xf32>
    %185 = arith.subf %11, %184 : vector<16x16xf32>
    %186 = vector.broadcast %183 : vector<16x1xf32> to vector<16x16xf32>
    %187 = arith.subf %13, %186 : vector<16x16xf32>
    %188 = arith.mulf %185, %185 : vector<16x16xf32>
    %189 = arith.mulf %187, %187 : vector<16x16xf32>
    %190 = arith.addf %188, %189 : vector<16x16xf32>
    %191 = arith.cmpf olt, %190, %4 : vector<16x16xf32>
    %cst_57 = arith.constant 0.00999999977 : f32
    %cst_58 = arith.constant 1.000000e+00 : f32
    %192 = vector.broadcast %cst_57 : f32 to vector<16x16xf32>
    %193 = vector.broadcast %cst_58 : f32 to vector<16x16xf32>
    %194 = arith.select %191, %192, %193 : vector<16x16xi1>, vector<16x16xf32>
    %195 = arith.mulf %162, %194 : vector<16x16xf32>
    %cst_59 = arith.constant 0.000000e+00 : f32
    %196 = vector.broadcast %cst_59 : f32 to vector<16x16xf32>
    %197 = arith.cmpf ogt, %174, %196 : vector<16x16xf32>
    %cst_60 = arith.constant -1.000000e+00 : f32
    %198 = vector.broadcast %cst_60 : f32 to vector<16x16xf32>
    %199 = arith.select %197, %198, %195 : vector<16x16xi1>, vector<16x16xf32>
    %cst_61 = arith.constant dense<0xFF800000> : vector<16xf32>
    %200 = vector.multi_reduction <maximumf>, %199, %cst_61 [1] : vector<16x16xf32> to vector<16xf32>
    %201 = vector.shape_cast %200 : vector<16xf32> to vector<16x1xf32>
    %202 = vector.broadcast %201 : vector<16x1xf32> to vector<16x16xf32>
    %203 = arith.cmpf oeq, %199, %202 : vector<16x16xf32>
    %c16_i32_62 = arith.constant 16 : i32
    %204 = vector.broadcast %c16_i32_62 : i32 to vector<16x16xi32>
    %205 = arith.select %203, %14, %204 : vector<16x16xi1>, vector<16x16xi32>
    %cst_63 = arith.constant dense<2147483647> : vector<16xi32>
    %206 = vector.multi_reduction <minsi>, %205, %cst_63 [1] : vector<16x16xi32> to vector<16xi32>
    %207 = vector.shape_cast %206 : vector<16xi32> to vector<16x1xi32>
    %208 = vector.broadcast %207 : vector<16x1xi32> to vector<16x16xi32>
    %209 = arith.cmpi eq, %14, %208 : vector<16x16xi32>
    %210 = arith.extui %209 : vector<16x16xi1> to vector<16x16xi32>
    %211 = arith.sitofp %210 : vector<16x16xi32> to vector<16x16xf32>
    %c0_64 = arith.constant 0 : index
    %c5 = arith.constant 5 : index
    %c0_65 = arith.constant 0 : index
    %212 = vector.load %arg6[%c0_64, %c5, %c0_65] : memref<16x6x16xf32, #tpu.memory_space<vmem>>, vector<16x1x16xf32>
    %213 = vector.shape_cast %212 : vector<16x1x16xf32> to vector<16x16xf32>
    %214 = vector.shape_cast %211 : vector<16x16xf32> to vector<16x1x16xf32>
    tpu.vector_store %arg6[%c0_64, %c5, %c0_65], %214 {strides = array<i32>} : memref<16x6x16xf32, #tpu.memory_space<vmem>>, vector<16x1x16xf32>,
    %c0_66 = arith.constant 0 : index
    %c0_67 = arith.constant 0 : index
    %c0_68 = arith.constant 0 : index
    %215 = vector.load %arg6[%c0_66, %c0_67, %c0_68] : memref<16x6x16xf32, #tpu.memory_space<vmem>>, vector<16x6x16xf32>
    "tpu.trace_start"() <{level = 10 : i32, message = "rkp,rpd->rkd"}> : () -> ()
    %cst_69 = arith.constant dense<0.000000e+00> : vector<16x6x32xf32>
    %216 = tpu.matmul %215, %1, %cst_69 {dimension_numbers = #tpu.dot_dimension_numbers<[2], [1], [1], [2], [0, 0, 0, 1, 1, 2], [0], [0]>} : vector<16x6x16xf32>, vector<16x16x32xf32>, vector<16x6x32xf32> -> vector<16x6x32xf32>
    "tpu.trace_stop"() : () -> ()
    %217 = vector.shape_cast %9 : vector<16x16xf32> to vector<16x1x16xf32>
    %218 = vector.broadcast %217 : vector<16x1x16xf32> to vector<16x6x16xf32>
    %219 = arith.mulf %215, %218 : vector<16x6x16xf32>
    %cst_70 = arith.constant dense<0.000000e+00> : vector<16x6xf32>
    %220 = vector.multi_reduction <add>, %219, %cst_70 [2] : vector<16x6x16xf32> to vector<16x6xf32>
    %cst_71 = arith.constant dense<0.000000e+00> : vector<16xf32>
    %221 = vector.multi_reduction <add>, %220, %cst_71 [1] : vector<16x6xf32> to vector<16xf32>
    %222 = vector.shape_cast %221 : vector<16xf32> to vector<16x1xf32>
    %223 = tpu.reciprocal %222 {approx = true} : vector<16x1xf32> -> vector<16x1xf32>
    %224 = vector.broadcast %223 : vector<16x1xf32> to vector<16x6xf32>
    %225 = arith.mulf %220, %224 : vector<16x6xf32>
    %226 = math.log %225 : vector<16x6xf32>
    %cst_72 = arith.constant 2.000000e+00 : f32
    %227 = vector.broadcast %cst_72 : f32 to vector<16x6xf32>
    %228 = arith.mulf %226, %227 : vector<16x6xf32>
    %cst_73 = arith.constant dense<0xFF800000> : vector<16xf32>
    %229 = vector.multi_reduction <maximumf>, %228, %cst_73 [1] : vector<16x6xf32> to vector<16xf32>
    %230 = vector.shape_cast %229 : vector<16xf32> to vector<16x1xf32>
    %231 = vector.broadcast %230 : vector<16x1xf32> to vector<16x6xf32>
    %232 = arith.subf %228, %231 : vector<16x6xf32>
    %233 = math.exp %232 : vector<16x6xf32>
    %cst_74 = arith.constant dense<0.000000e+00> : vector<16xf32>
    %234 = vector.multi_reduction <add>, %233, %cst_74 [1] : vector<16x6xf32> to vector<16xf32>
    %235 = vector.shape_cast %234 : vector<16xf32> to vector<16x1xf32>
    %236 = vector.broadcast %235 : vector<16x1xf32> to vector<16x6xf32>
    %237 = arith.divf %233, %236 : vector<16x6xf32>
    %c0_75 = arith.constant 0 : index
    %c0_76 = arith.constant 0 : index
    %c0_77 = arith.constant 0 : index
    %238 = vector.load %arg4[%c0_75, %c0_76, %c0_77] : memref<16x6x32xf32, #tpu.memory_space<vmem>>, vector<16x6x32xf32>
    tpu.vector_store %arg4[%c0_75, %c0_76, %c0_77], %216 {strides = array<i32>} : memref<16x6x32xf32, #tpu.memory_space<vmem>>, vector<16x6x32xf32>,
    %c0_78 = arith.constant 0 : index
    %c0_79 = arith.constant 0 : index
    %239 = vector.load %arg5[%c0_78, %c0_79] : memref<16x6xf32, #tpu.memory_space<vmem>>, vector<16x6xf32>
    tpu.vector_store %arg5[%c0_78, %c0_79], %237 {strides = array<i32>} : memref<16x6xf32, #tpu.memory_space<vmem>>, vector<16x6xf32>,
    return
  }
  func.func @transform_0(%arg0: i32) -> (i32, i32) {
    %c0_i32 = arith.constant 0 : i32
    %c0_i32_0 = arith.constant 0 : i32
    return %arg0, %c0_i32 : i32, i32
  }
  func.func @transform_1(%arg0: i32) -> (i32, i32, i32) {
    %c0_i32 = arith.constant 0 : i32
    %c0_i32_0 = arith.constant 0 : i32
    %c0_i32_1 = arith.constant 0 : i32
    return %arg0, %c0_i32, %c0_i32_0 : i32, i32, i32
  }
  func.func @transform_2(%arg0: i32) -> (i32, i32) {
    %c0_i32 = arith.constant 0 : i32
    %c0_i32_0 = arith.constant 0 : i32
    return %arg0, %c0_i32 : i32, i32
  }
  func.func @transform_3(%arg0: i32) -> (i32, i32, i32) {
    %c0_i32 = arith.constant 0 : i32
    %c0_i32_0 = arith.constant 0 : i32
    %c0_i32_1 = arith.constant 0 : i32
    return %arg0, %c0_i32, %c0_i32_0 : i32, i32, i32
  }
  func.func @transform_4(%arg0: i32) -> (i32, i32) {
    %c0_i32 = arith.constant 0 : i32
    %c0_i32_0 = arith.constant 0 : i32
    return %arg0, %c0_i32 : i32, i32
  }
}

</mosaic_0001>

<bundles_post_ra>
// kernel: tpu_custom_call.1
= control target key start
LH: loop header
LB: loop body
LE: loop exit
PB: predicated region body
PF: predicated region fallthrough
CT: control target
= control target key end

     0   :  { %10 = vsyncpa [#allocation4], 0  ;;  %s5876_s18 = smov [#allocation3]   ;;  %s5877_s20 = smov 128   ;;  %s9175_s0 = inlined_call_operand.vmem [shape: f32[16,16], index: 0, kind: input, shape index: {}]   ;;  %s9176_s1 = inlined_call_operand.hbm [shape: f32[16,16,32], index: 1, kind: input, shape index: {}]   ;;  %s9177_s2 = inlined_call_operand.vmem [shape: f32[16,1], index: 2, kind: input, shape index: {}]   ;;  %s9178_s3 = inlined_call_operand.vmem [shape: f32[16,6,32], index: 3, kind: output, shape index: {0}]   ;;  %s9179_s4 = inlined_call_operand.vmem [shape: f32[16,6], index: 4, kind: output, shape index: {1}]  }
   0x1   :  { %s17_s17 = sshll.u32 %s9176_s1, 4  ;;  %s19_s19 = sshll.u32 %s5876_s18, 4  ;;  %s18_s17 = int_to_ptr.hbm [resolvable:$true] %s17_s17  ;;  %s20_s19 = int_to_ptr.vmem [resolvable:$true] %s19_s19 }
   0x2   :  { %s5878_s21 = smov 8  }
   0x3   :  { %25 = dma.hbm_to_vmem [thread:$0]  %s18_s17, 4096, %s20_s19, [#allocation4], %s5877_s20, %s5877_s20, %s5878_s21  }
   0x4   :  { %5874 = dma.done.wait [#allocation4], 4096  }
   0x5   :  { %5875 = vsyncadd [#allocation4], 4294963200  ;;  %v5879_v0 = vmov 28   ;;  %v9180_v1 = vmov 0   ;;  %vm76_vm0 = vcmask 130048   ;;  %v66_v2 = vld [vmem:[%s9177_s2] sm:$0xff] }
   0x6   :  { %5579 = vset.pattern.permute.xlu2 %v5879_v0  ;;  %5578 = vset.pattern.permute.xlu0 %v9180_v1  ;;  %v5919_v3 = vld [vmem:[#allocation3] sm:$0xff]  ;;  %v5929_v6 = vld [vmem:[#allocation3 + $0x18] sm:$0xff]  ;;  %v5931_v7 = vld [vmem:[#allocation3 + $0x8] sm:$0xff]  ;;  %v5881_v12 = vmov 29   ;;  %vm313_vm5 = vcmask 130112   ;;  %vm360_vm6 = vcmask 1041409  }
   0x7   :  { %5580 = vset.pattern.permute.xlu1 %v5879_v0  ;;  %9318 = vst [vmem:[#allocation6_spill] sm:$0xff] %v5919_v3  ;;  %v5924_v4 = vld [vmem:[%s9175_s0] sm:$0xff]  ;;  %70 = vperm.xlu0 %5578, %v66_v2   ;;  %v5935_v8 = vld [vmem:[#allocation3 + $0x10] sm:$0xff]  ;;  %v5940_v9 = vld [vmem:[%s9175_s0 + $0x8] sm:$0xff]  ;;  %vm362_vm7 = vcmask 1042434   ;;  %vm364_vm8 = vcmask 1043459  }
   0x8   :  { %215 = vperm.xlu2 %5579, %v5919_v3   ;;  %v77_v5 = vsel %vm76_vm0, %v5924_v4, 0.0  ;;  %9319 = vst [vmem:[#allocation7_spill] sm:$0xff] %v5929_v6  ;;  %4238 = vmatpush.msra.mxu0 %v5931_v7  ;;  %v67_v10 = vld [vmem:[%s9177_s2 + $0x8] sm:$0xff]  ;;  %v80_v11 = vsel %vm76_vm0, %v5940_v9, 0.0  ;;  %v5955_v14 = vld [vmem:[#allocation3 + $0x38] sm:$0xff]  ;;  %v5958_v15 = vld [vmem:[#allocation3 + $0x20] sm:$0xff] }
   0x9   :  { %78 = vadd.xlane.f32.xlu1 %v77_v5  ;;  %9320 = vst [vmem:[#allocation8_spill] sm:$0xff] %v5931_v7  ;;  %4261 = vmatpush.msra.mxu1 %v5929_v6  ;;  %v5952_v13 = vld [vmem:[#allocation3 + $0x28] sm:$0xff]  ;;  %v5961_v16 = vld [vmem:[#allocation3 + $0x30] sm:$0xff]  ;;  %v5970_v18 = vld [vmem:[#allocation3 + $0x40] sm:$0xff]  ;;  %vm366_vm9 = vcmask 1044484   ;;  %vm368_vm10 = vcmask 1045509  }
   0xa   :  { %9321 = vst [vmem:[#allocation9_spill] sm:$0xff] %v5935_v8  ;;  %4239 = vmatpush.msra.mxu0 %v5919_v3  ;;  %4284 = vmatpush.msra.mxu2 %v5952_v13  ;;  %v5967_v17 = vld [vmem:[#allocation3 + $0x48] sm:$0xff]  ;;  %v5975_v19 = vld [vmem:[#allocation3 + $0x58] sm:$0xff]  ;;  %v5979_v20 = vld [vmem:[#allocation3 + $0x50] sm:$0xff]  ;;  %vm370_vm11 = vcmask 1046534   ;;  %vm9317_vm12 = vcmask 1047559  }
   0xb   :  { %4262 = vmatpush.msra.mxu1 %v5935_v8  ;;  %9322 = vst [vmem:[#allocation10_spill] sm:$0xff] %v5952_v13  ;;  %4307 = vmatpush.msra.mxu3 %v5955_v14  ;;  %v5984_v21 = vld [vmem:[#allocation3 + $0x68] sm:$0xff]  ;;  %v5988_v22 = vld [vmem:[#allocation3 + $0x60] sm:$0xff]  ;;  %v5993_v23 = vld [vmem:[#allocation3 + $0x78] sm:$0xff]  ;;  %vm165_vm13 = vcmask 122880   ;;  %s5883_s0 = smov 127  }
   0xc   :  { %9323 = vst [vmem:[#allocation11_spill] sm:$0xff] %v5955_v14  ;;  %4285 = vmatpush.msra.mxu2 %v5958_v15  ;;  %4330 = vmatpush.msrb.mxu0 %v5967_v17  ;;  %v5997_v24 = vld [vmem:[#allocation3 + $0x70] sm:$0xff]  ;;  %v6003_v25 = vld [vmem:[#allocation3 + $0x88] sm:$0xff]  ;;  %v6008_v26 = vld [vmem:[#allocation3 + $0xa0] sm:$0xff] }
   0xd   :  { %9324 = vst [vmem:[#allocation12_spill] sm:$0xff] %v5958_v15  ;;  %4308 = vmatpush.msra.mxu3 %v5961_v16  ;;  %4353 = vmatpush.msrb.mxu1 %v5975_v19  ;;  %v6013_v27 = vld [vmem:[#allocation3 + $0xb8] sm:$0xff]  ;;  %v6018_v28 = vld [vmem:[#allocation3 + $0xd0] sm:$0xff]  ;;  %v6020_v29 = vld [vmem:[#allocation3 + $0x80] sm:$0xff] }
   0xe   :  { %9325 = vst [vmem:[#allocation13_spill] sm:$0xff] %v5961_v16  ;;  %4331 = vmatpush.msrb.mxu0 %v5970_v18  ;;  %4376 = vmatpush.msrb.mxu2 %v5984_v21  ;;  %v6022_v30 = vld [vmem:[#allocation3 + $0x90] sm:$0xff]  ;;  %v6027_v31 = vld [vmem:[#allocation3 + $0xe8] sm:$0xff]  ;;  %v6029_v32 = vld [vmem:[#allocation3 + $0x98] sm:$0xff] }
   0xf   :  { %74 = vperm.xlu0 %5578, %v67_v10   ;;  %9326 = vst [vmem:[#allocation14_spill] sm:$0xff] %v5967_v17  ;;  %4354 = vmatpush.msrb.mxu1 %v5979_v20  ;;  %v6031_v33 = vld [vmem:[#allocation3 + $0xa8] sm:$0xff]  ;;  %v6036_v34 = vld [vmem:[#allocation3 + $0xb0] sm:$0xff]  ;;  %v6038_v35 = vld [vmem:[#allocation3 + $0xc0] sm:$0xff] }
  0x10   :  { %221 = vperm.xlu2 %5579, %v5935_v8   ;;  %9327 = vst [vmem:[#allocation15_spill] sm:$0xff] %v5970_v18  ;;  %4377 = vmatpush.msrb.mxu2 %v5988_v22  ;;  %v6043_v36 = vld [vmem:[#allocation3 + $0xc8] sm:$0xff]  ;;  %v6045_v37 = vld [vmem:[#allocation3 + $0xd8] sm:$0xff]  ;;  %v6049_v39 = vld [vmem:[#allocation3 + $0xe0] sm:$0xff] }
  0x11   :  { %81 = vadd.xlane.f32.xlu1 %v80_v11  ;;  %9328 = vst [vmem:[#allocation16_spill] sm:$0xff] %v5975_v19  ;;  %4399 = vmatpush.msrb.mxu3 %v5993_v23  ;;  %v6051_v40 = vld [vmem:[#allocation3 + $0xf0] sm:$0xff]  ;;  %v6057_v42 = vld [vmem:[#allocation3 + $0xf8] sm:$0xff] }
  0x12   :  { %9329 = vst [vmem:[#allocation17_spill] sm:$0xff] %v5979_v20 }
  0x13   :  { %9330 = vst [vmem:[#allocation18_spill] sm:$0xff] %v5984_v21  ;;  %4400 = vmatpush.msrb.mxu3 %v5997_v24 }
  0x14   :  { %9331 = vst [vmem:[#allocation19_spill] sm:$0xff] %v5988_v22 }
  0x15   :  { %9332 = vst [vmem:[#allocation20_spill] sm:$0xff] %v5993_v23 }
  0x16   :  { %9333 = vst [vmem:[#allocation21_spill] sm:$0xff] %v5997_v24 }
  0x17   :  { %5581 = vset.pattern.permute.xlu0 %v5881_v12  ;;  %9334 = vst [vmem:[#allocation22_spill] sm:$0xff] %v6003_v25 }
  0x18   :  { %224 = vperm.xlu2 %5579, %v5929_v6   ;;  %392 = vperm.xlu0 %5581, %v5919_v3   ;;  %9335 = vst [vmem:[#allocation23_spill] sm:$0xff] %v6008_v26 }
  0x19   :  { %9336 = vst [vmem:[#allocation24_spill] sm:$0xff] %v6013_v27 }
  0x1a   :  { %9337 = vst [vmem:[#allocation25_spill] sm:$0xff] %v6018_v28 }
  0x1b   :  { %9338 = vst [vmem:[#allocation26_spill] sm:$0xff] %v6020_v29 }
  0x1c   :  { %9339 = vst [vmem:[#allocation27_spill] sm:$0xff] %v6022_v30 }
  0x1d   :  { %9340 = vst [vmem:[#allocation28_spill] sm:$0xff] %v6027_v31 }
  0x1e   :  { %9341 = vst [vmem:[#allocation29_spill] sm:$0xff] %v6029_v32 }
  0x1f   :  { %9342 = vst [vmem:[#allocation30_spill] sm:$0xff] %v6031_v33 }
  0x20   :  { %233 = vperm.xlu2 %5579, %v5961_v16   ;;  %395 = vperm.xlu0 %5581, %v5931_v7   ;;  %9343 = vst [vmem:[#allocation31_spill] sm:$0xff] %v6036_v34 }
  0x21   :  { %9344 = vst [vmem:[#allocation32_spill] sm:$0xff] %v6038_v35 }
  0x22   :  { %9345 = vst [vmem:[#allocation33_spill] sm:$0xff] %v6043_v36 }
  0x23   :  { %9346 = vst [vmem:[#allocation34_spill] sm:$0xff] %v6045_v37 }
  0x24   :  { %9347 = vst [vmem:[#allocation35_spill] sm:$0xff] %v6049_v39 }
  0x25   :  { %9348 = vst [vmem:[#allocation36_spill] sm:$0xff] %v6051_v40 }
  0x26   :  { %9349 = vst [vmem:[#allocation37_spill] sm:$0xff] %v6057_v42 }
  0x28   :  { %239 = vperm.xlu2 %5579, %v5970_v18   ;;  %398 = vperm.xlu0 %5581, %v5935_v8  }
  0x2a   :  { %218 = vperm.xlu1 %5580, %v5931_v7  }
  0x30   :  { %245 = vperm.xlu2 %5579, %v5979_v20   ;;  %401 = vperm.xlu0 %5581, %v5929_v6  }
  0x32   :  { %227 = vperm.xlu1 %5580, %v5958_v15  }
  0x38   :  { %251 = vperm.xlu2 %5579, %v5988_v22   ;;  %407 = vperm.xlu0 %5581, %v5952_v13  }
  0x3a   :  { %236 = vperm.xlu1 %5580, %v5955_v14  }
  0x40   :  { %257 = vperm.xlu2 %5579, %v5997_v24   ;;  %413 = vperm.xlu0 %5581, %v5955_v14  }
  0x42   :  { %242 = vperm.xlu1 %5580, %v5967_v17  }
  0x48   :  { %266 = vperm.xlu2 %5579, %v6003_v25   ;;  %416 = vperm.xlu0 %5581, %v5970_v18  }
  0x4a   :  { %248 = vperm.xlu1 %5580, %v5975_v19  }
  0x50   :  { %275 = vperm.xlu2 %5579, %v6008_v26   ;;  %422 = vperm.xlu0 %5581, %v5979_v20  }
  0x52   :  { %254 = vperm.xlu1 %5580, %v5984_v21  }
  0x58   :  { %284 = vperm.xlu2 %5579, %v6013_v27   ;;  %431 = vperm.xlu0 %5581, %v5984_v21  }
  0x5a   :  { %260 = vperm.xlu1 %5580, %v5993_v23  }
  0x60   :  { %293 = vperm.xlu2 %5579, %v6018_v28   ;;  %440 = vperm.xlu0 %5581, %v6020_v29  }
  0x62   :  { %269 = vperm.xlu1 %5580, %v6022_v30   ;;  %v6055_v41 = vpop.permute.xlu2 %215 }
  0x68   :  { %302 = vperm.xlu2 %5579, %v6027_v31   ;;  %449 = vperm.xlu0 %5581, %v6029_v32  }
  0x6a   :  { %278 = vperm.xlu1 %5580, %v6031_v33   ;;  %v6065_v46 = vpop.permute.xlu2 %221 }
  0x70   :  { %5582 = vset.pattern.permute.xlu2 %v5881_v12  ;;  %458 = vperm.xlu0 %5581, %v6036_v34  }
  0x72   :  { %287 = vperm.xlu1 %5580, %v6038_v35   ;;  %v6077_v51 = vpop.permute.xlu2 %224 }
  0x78   :  { %467 = vperm.xlu0 %5581, %v6043_v36  }
  0x79   :  { %v6080_v52 = vpop.permute.xlu0 %70 }
  0x7a   :  { %296 = vperm.xlu1 %5580, %v6045_v37   ;;  %9352 = vst [vmem:[#allocation40_spill] sm:$0xff] %v6080_v52  ;;  %v6083_v53 = vpop.permute.xlu2 %233 }
  0x7c   :  { %v79_v38 = vpop.xlane.xlu1 %78 }
  0x7d   :  { %5590 = vrcp.f32 %v79_v38 }
  0x80   :  { %476 = vperm.xlu0 %5581, %v6049_v39  }
  0x81   :  { %v6087_v54 = vpop.permute.xlu0 %74 }
  0x82   :  { %305 = vperm.xlu1 %5580, %v6051_v40   ;;  %9353 = vst [vmem:[#allocation41_spill] sm:$0xff] %v6087_v54  ;;  %v6091_v55 = vpop.permute.xlu2 %239 }
  0x83   :  { %v5591_v44 = vpop.eup %5590 }
  0x84   :  { %v82_v43 = vpop.xlane.xlu1 %81  ;;  %v6061_v45 = vmul.f32 %v5591_v44, %v5924_v4  ;;  %v87_v44 = vlaneseq }
  0x85   :  { %5592 = vrcp.f32 %v82_v43 }
  0x86   :  { %9350 = vst [vmem:[#allocation38_spill] sm:$0xff] %v6061_v45  ;;  %v89_v47 = vsel %vm76_vm0, %v6061_v45, -inf }
  0x88   :  { %485 = vperm.xlu0 %5581, %v6057_v42  }
  0x8a   :  { %5583 = vset.pattern.permute.xlu1 %v5881_v12  ;;  %v6093_v56 = vpop.permute.xlu0 %392  ;;  %v6098_v57 = vpop.permute.xlu2 %245 }
  0x8b   :  { %410 = vperm.xlu1 %5583, %v5961_v16   ;;  %v5593_v48 = vpop.eup %5592 }
  0x8c   :  { %v6071_v49 = vmul.f32 %v5593_v48, %v5940_v9 }
  0x8e   :  { %9351 = vst [vmem:[#allocation39_spill] sm:$0xff] %v6071_v49  ;;  %v92_v50 = vsel %vm76_vm0, %v6071_v49, -inf }
  0x90   :  { %5584 = vset.pattern.permute.xlu0 %v5879_v0 }
  0x91   :  { %90 = vmax.xlane.f32.xlu2 %v89_v47  ;;  %230 = vperm.xlu0 %5584, %v5952_v13   ;;  %v6143_v47 = vand.u32 127, %v87_v44 }
  0x92   :  { %v6100_v58 = vpop.permute.xlu0 %395  ;;  %v6105_v59 = vpop.permute.xlu2 %251 }
  0x93   :  { %425 = vperm.xlu1 %5583, %v5975_v19  }
  0x99   :  { %93 = vmax.xlane.f32.xlu2 %v92_v50  ;;  %263 = vperm.xlu0 %5584, %v6020_v29  }
  0x9a   :  { %v6108_v60 = vpop.permute.xlu0 %398  ;;  %v6112_v61 = vpop.permute.xlu2 %257 }
  0x9b   :  { %434 = vperm.xlu1 %5583, %v5997_v24  }
  0xa1   :  { %272 = vperm.xlu0 %5584, %v6029_v32  }
  0xa2   :  { %v6115_v62 = vpop.permute.xlu0 %401  ;;  %v6118_v63 = vpop.permute.xlu2 %266 }
  0xa3   :  { %443 = vperm.xlu1 %5583, %v6003_v25  }
  0xa9   :  { %281 = vperm.xlu0 %5584, %v6036_v34  }
  0xaa   :  { %v6120_v2 = vpop.permute.xlu0 %407  ;;  %v6123_v4 = vpop.permute.xlu2 %275 }
  0xab   :  { %452 = vperm.xlu1 %5583, %v6008_v26  }
  0xb1   :  { %404 = vperm.xlu2 %5582, %v5958_v15   ;;  %290 = vperm.xlu0 %5584, %v6043_v36  }
  0xb2   :  { %v6125_v5 = vpop.permute.xlu0 %413  ;;  %v6128_v9 = vpop.permute.xlu2 %284 }
  0xb3   :  { %461 = vperm.xlu1 %5583, %v6013_v27  }
  0xb9   :  { %419 = vperm.xlu2 %5582, %v5967_v17   ;;  %299 = vperm.xlu0 %5584, %v6049_v39  }
  0xba   :  { %v6131_v10 = vpop.permute.xlu0 %416  ;;  %v6134_v11 = vpop.permute.xlu2 %293 }
  0xbb   :  { %470 = vperm.xlu1 %5583, %v6018_v28  }
  0xc1   :  { %428 = vperm.xlu2 %5582, %v5988_v22  }
  0xc2   :  { %v6136_v12 = vpop.permute.xlu0 %422  ;;  %v6139_v38 = vpop.permute.xlu2 %302 }
  0xc3   :  { %479 = vperm.xlu1 %5583, %v6027_v31   ;;  %9354 = vst [vmem:[#allocation42_spill] sm:$0xff] %v6136_v12 }
  0xc9   :  { %437 = vperm.xlu2 %5582, %v5993_v23  }
  0xca   :  { %v6141_v43 = vpop.permute.xlu0 %431 }
  0xcb   :  { %5586 = vset.pattern.permute.xlu1 %v5879_v0 }
  0xd1   :  { %446 = vperm.xlu2 %5582, %v6022_v30  }
  0xd2   :  { %v6148_v52 = vpop.permute.xlu0 %440 }
  0xd9   :  { %455 = vperm.xlu2 %5582, %v6031_v33  }
  0xda   :  { %v6153_v27 = vpop.permute.xlu0 %449 }
  0xe1   :  { %464 = vperm.xlu2 %5582, %v6038_v35  }
  0xe9   :  { %473 = vperm.xlu2 %5582, %v6045_v37  }
  0xf1   :  { %482 = vperm.xlu2 %5582, %v6051_v40  }
  0xf9   :  { %5585 = vset.pattern.permute.xlu2 %v5879_v0 }
 0x104   :  { %v91_v48 = vpop.xlane.xlu2 %90 }
 0x105   :  { %vm95_vm1 = vcmp.eq.f32.partialorder %v6061_v45, %v91_v48  ;;  %v6155_v45 = vpop.permute.xlu0 %458 }
 0x106   :  { %v97_v50 = vsel %vm95_vm1, %v6143_v47, 16 }
 0x107   :  { %v99_v1 = vsel %vm76_vm0, %v97_v50, 2147483647 }
 0x108   :  { %v101_v54 = vshra.s32 %v99_v1, 16  ;;  %v100_v8 = vand.u32 65535, %v99_v1 }
 0x10a   :  { %v103_v31 = vcvt.s32.f32 %v101_v54  ;;  %v219_v54 = vpop.permute.xlu1 %218  ;;  %v102_v7 = vcvt.s32.f32 %v100_v8 }
 0x10c   :  { %104 = vmin.xlane.f32.xlu0 %v103_v31  ;;  %v94_v0 = vpop.xlane.xlu2 %93 }
 0x10d   :  { %vm96_vm2 = vcmp.eq.f32.partialorder %v6071_v49, %v94_v0  ;;  %v6158_v50 = vpop.permute.xlu0 %467 }
 0x10e   :  { %v98_v28 = vsel %vm96_vm2, %v6143_v47, 16 }
 0x10f   :  { %v114_v44 = vsel %vm76_vm0, %v98_v28, 2147483647 }
 0x110   :  { %v116_v26 = vshra.s32 %v114_v44, 16  ;;  %v115_v13 = vand.u32 65535, %v114_v44 }
 0x112   :  { %v118_v48 = vcvt.s32.f32 %v116_v26  ;;  %v228_v0 = vpop.permute.xlu1 %227  ;;  %v117_v12 = vcvt.s32.f32 %v115_v13  ;;  %v6231_v13 = vadd.s32 4294967288, %v6143_v47 }
 0x114   :  { %v6162_v24 = vpop.permute.xlu2 %404 }
 0x115   :  { %v6160_v25 = vpop.permute.xlu0 %476 }
 0x11a   :  { %119 = vmin.xlane.f32.xlu2 %v118_v48  ;;  %v6168_v19 = vpop.permute.xlu1 %236 }
 0x11c   :  { %v6166_v28 = vpop.permute.xlu2 %419 }
 0x11d   :  { %v6164_v49 = vpop.permute.xlu0 %485  ;;  %9355 = vst [vmem:[#allocation43_spill] sm:$0xff] %v6166_v28  ;;  %v315_v28 = vperm.slane %v6065_v46, %v6143_v47 }
 0x120   :  { %308 = vperm.xlu0 %5584, %v6057_v42  }
 0x122   :  { %v6172_v39 = vpop.permute.xlu1 %242 }
 0x124   :  { %v6170_v17 = vpop.permute.xlu2 %428 }
 0x125   :  { %v231_v26 = vpop.permute.xlu0 %230  ;;  %9356 = vst [vmem:[#allocation44_spill] sm:$0xff] %v6170_v17 }
 0x12a   :  { %v6178_v18 = vpop.permute.xlu1 %248 }
 0x12c   :  { %v6176_v40 = vpop.permute.xlu2 %437 }
 0x12d   :  { %v6174_v42 = vpop.permute.xlu0 %263  ;;  %9357 = vst [vmem:[#allocation45_spill] sm:$0xff] %v6176_v40 }
 0x132   :  { %v6184_v16 = vpop.permute.xlu1 %254 }
 0x134   :  { %v6182_v37 = vpop.permute.xlu2 %446 }
 0x135   :  { %v6180_v36 = vpop.permute.xlu0 %272 }
 0x13a   :  { %v6190_v15 = vpop.permute.xlu1 %260 }
 0x13c   :  { %v6188_v35 = vpop.permute.xlu2 %455 }
 0x13d   :  { %v6186_v34 = vpop.permute.xlu0 %281 }
 0x142   :  { %v6196_v6 = vpop.permute.xlu1 %269 }
 0x144   :  { %v6194_v33 = vpop.permute.xlu2 %464 }
 0x145   :  { %v6192_v32 = vpop.permute.xlu0 %290 }
 0x14a   :  { %v6202_v21 = vpop.permute.xlu1 %278 }
 0x14c   :  { %v6200_v30 = vpop.permute.xlu2 %473 }
 0x14d   :  { %v6198_v29 = vpop.permute.xlu0 %299 }
 0x14e   :  { %9358 = vst [vmem:[#allocation46_spill] sm:$0xff] %v6198_v29 }
 0x152   :  { %v6209_v3 = vpop.permute.xlu1 %287 }
 0x154   :  { %v6207_v22 = vpop.permute.xlu2 %482 }
 0x155   :  { %9359 = vst [vmem:[#allocation47_spill] sm:$0xff] %v6207_v22 }
 0x15a   :  { %v6214_v40 = vpop.permute.xlu1 %296 }
 0x162   :  { %v6216_v17 = vpop.permute.xlu1 %305 }
 0x16a   :  { %v6218_v8 = vpop.permute.xlu1 %410 }
 0x16b   :  { %9361 = vst [vmem:[#allocation49_spill] sm:$0xff] %v6218_v8 }
 0x17f   :  { %v6204_v23 = vpop.xlane.xlu0 %104 }
 0x180   :  { %vm106_vm3 = vcmp.eq.f32.partialorder %v103_v31, %v6204_v23 }
 0x181   :  { %v107_v20 = vsel %vm106_vm3, %v102_v7, inf  ;;  %v6220_v7 = vpop.permute.xlu1 %425 }
 0x182   :  { %108 = vmin.xlane.f32.xlu1 %v107_v20  ;;  %9362 = vst [vmem:[#allocation50_spill] sm:$0xff] %v6220_v7  ;;  %v316_v7 = vperm.slane %v6077_v51, %v6231_v13 }
 0x184   :  { %v317_v46 = vsel %vm313_vm5, %v316_v7, %v315_v28  ;;  %v324_v28 = vperm.slane %v6091_v55, %v6143_v47  ;;  %v330_v7 = vperm.slane %v6105_v59, %v6143_v47  ;;  %v337_v55 = vperm.slane %v6118_v63, %v6231_v13 }
 0x185   :  { %v331_v59 = vperm.slane %v6184_v16, %v6231_v13  ;;  %v343_v16 = vperm.slane %v6202_v21, %v6231_v13 }
 0x189   :  { %v6222_v20 = vpop.permute.xlu1 %434 }
 0x18a   :  { %9363 = vst [vmem:[#allocation51_spill] sm:$0xff] %v6222_v20  ;;  %v310_v20 = vperm.slane %v6055_v41, %v6143_v47  ;;  %v491_v41 = vperm.slane %v6115_v62, %v6231_v13 }
 0x18d   :  { %v6211_v14 = vpop.xlane.xlu2 %119 }
 0x18e   :  { %9360 = vst [vmem:[#allocation48_spill] sm:$0xff] %v6211_v14  ;;  %vm121_vm4 = vcmp.eq.f32.partialorder %v118_v48, %v6211_v14  ;;  %v318_v48 = vperm.slane %v228_v0, %v6143_v47  ;;  %v487_v14 = vperm.slane %v6093_v56, %v6143_v47  ;;  %v322_v56 = vperm.slane %v6168_v19, %v6231_v13 }
 0x18f   :  { %v122_v1 = vsel %vm121_vm4, %v117_v12, inf  ;;  %v312_v12 = vperm.slane %v219_v54, %v6231_v13  ;;  %v488_v54 = vperm.slane %v6100_v58, %v6231_v13  ;;  %v321_v58 = vperm.slane %v6083_v53, %v6143_v47 }
 0x190   :  { %123 = vmin.xlane.f32.xlu1 %v122_v1  ;;  %v319_v1 = vperm.slane %v231_v26, %v6231_v13  ;;  %v490_v26 = vperm.slane %v6108_v60, %v6143_v47  ;;  %v327_v19 = vperm.slane %v6098_v57, %v6143_v47 }
 0x191   :  { %v6224_v31 = vpop.permute.xlu1 %443  ;;  %v314_v0 = vsel %vm313_vm5, %v312_v12, %v310_v20  ;;  %v489_v60 = vsel %vm313_vm5, %v488_v54, %v487_v14  ;;  %v325_v12 = vperm.slane %v6172_v39, %v6231_v13  ;;  %v323_v53 = vsel %vm313_vm5, %v322_v56, %v321_v58 }
 0x192   :  { %v320_v51 = vsel %vm313_vm5, %v319_v1, %v318_v48  ;;  %v361_v8 = vsel %vm360_vm6, %v317_v46, %v314_v0  ;;  %v492_v62 = vsel %vm313_vm5, %v491_v41, %v490_v26  ;;  %v328_v14 = vperm.slane %v6178_v18, %v6231_v13 }
 0x193   :  { %v363_v20 = vsel %vm362_vm7, %v320_v51, %v361_v8  ;;  %v333_v8 = vperm.slane %v6112_v61, %v6143_v47  ;;  %v6282_v57 = vsel %vm360_vm6, %v492_v62, %v489_v60  ;;  %v334_v61 = vperm.slane %v6190_v15, %v6231_v13 }
 0x194   :  { %v365_v39 = vsel %vm364_vm8, %v323_v53, %v363_v20  ;;  %v342_v18 = vperm.slane %v6123_v4, %v6143_v47  ;;  %v494_v1 = vperm.slane %v6120_v2, %v6231_v13  ;;  %v346_v54 = vperm.slane %v6128_v9, %v6231_v13 }
 0x195   :  { %v326_v63 = vsel %vm313_vm5, %v325_v12, %v324_v28  ;;  %v497_v0 = vperm.slane %v6125_v5, %v6231_v13  ;;  %v351_v15 = vperm.slane %v6134_v11, %v6143_v47  ;;  %v499_v4 = vperm.slane %v6131_v10, %v6143_v47 }
 0x196   :  { %v367_v26 = vsel %vm366_vm9, %v326_v63, %v365_v39  ;;  %v329_v41 = vsel %vm313_vm5, %v328_v14, %v327_v19  ;;  %v355_v9 = vperm.slane %v6139_v38, %v6231_v13  ;;  %v332_v51 = vsel %vm313_vm5, %v331_v59, %v330_v7 }
 0x197   :  { %v506_v46 = vperm.slane %v6141_v43, %v6231_v13  ;;  %v335_v21 = vsel %vm313_vm5, %v334_v61, %v333_v8  ;;  %v111_v56 = vcvt.f32.s32 %v6204_v23  ;;  %v511_v11 = vperm.slane %v6148_v52, %v6143_v47 }
 0x198   :  { %v352_v58 = vperm.slane %v6214_v40, %v6231_v13  ;;  %v369_v20 = vsel %vm368_vm10, %v329_v41, %v367_v26  ;;  %v339_v60 = vperm.slane %v6196_v6, %v6143_v47  ;;  %v515_v62 = vperm.slane %v6153_v27, %v6231_v13 }
 0x199   :  { %v6226_v44 = vpop.permute.xlu1 %452  ;;  %v344_v12 = vsel %vm313_vm5, %v343_v16, %v342_v18  ;;  %v340_v23 = vperm.slane %v6180_v36, %v6231_v13  ;;  %v520_v52 = vperm.slane %v6155_v45, %v6143_v47  ;;  %v348_v40 = vperm.slane %v6209_v3, %v6143_v47 }
 0x19a   :  { %v524_v28 = vperm.slane %v6158_v50, %v6231_v13  ;;  %v336_v6 = vperm.slane %v6174_v42, %v6143_v47  ;;  %v112_v27 = vshll.u32 %v111_v56, 16  ;;  %v371_v53 = vsel %vm370_vm11, %v332_v51, %v369_v20 }
 0x19b   :  { %v6334_v36 = vsel %vm313_vm5, %v352_v58, %v351_v15  ;;  %v529_v8 = vperm.slane %v6160_v25, %v6143_v47  ;;  %v357_v3 = vperm.slane %v6216_v17, %v6143_v47  ;;  %v512_v50 = vperm.slane %v6224_v31, %v6231_v13 }
 0x19c   :  { %v341_v14 = vsel %vm313_vm5, %v340_v23, %v339_v60  ;;  %v345_v42 = vperm.slane %v6186_v34, %v6143_v47  ;;  %v533_v59 = vperm.slane %v6164_v49, %v6231_v13  ;;  %v514_v61 = vperm.slane %v6182_v37, %v6143_v47  ;;  %v9372_v49 = vld [vmem:[#allocation45_spill] sm:$0xff] }
 0x19d   :  { %v6350_v18 = vsel %vm9317_vm12, %v335_v21, %v371_v53  ;;  %v338_v63 = vsel %vm313_vm5, %v337_v55, %v336_v6  ;;  %v517_v31 = vperm.slane %v6226_v44, %v6143_v47  ;;  %v518_v16 = vperm.slane %v6188_v35, %v6231_v13 }
 0x19e   :  { %v374_v34 = vsel %vm360_vm6, %v341_v14, %v338_v63  ;;  %v493_v26 = vperm.slane %v6162_v24, %v6143_v47  ;;  %v513_v37 = vsel %vm313_vm5, %v512_v50, %v511_v11  ;;  %v9221_v15 = vmov 0.0   ;;  %v9366_v50 = vld [vmem:[#allocation43_spill] sm:$0xff] }
 0x19f   :  { %v347_v55 = vsel %vm313_vm5, %v346_v54, %v345_v42  ;;  %v349_v24 = vperm.slane %v6192_v32, %v6231_v13  ;;  %v516_v21 = vsel %vm313_vm5, %v515_v62, %v514_v61  ;;  %v519_v58 = vsel %vm313_vm5, %v518_v16, %v517_v31  ;;  %v9367_v31 = vld [vmem:[#allocation46_spill] sm:$0xff] }
 0x1a0   :  { %v523_v20 = vperm.slane %v6194_v33, %v6143_v47  ;;  %v527_v62 = vperm.slane %v6200_v30, %v6231_v13  ;;  %v542_v33 = vsel %vm360_vm6, %v516_v21, %v513_v37  ;;  %v375_v30 = vsel %vm362_vm7, %v344_v12, %v374_v34  ;;  %v9370_v21 = vld [vmem:[#allocation51_spill] sm:$0xff] }
 0x1a1   :  { %v6228_v22 = vpop.permute.xlu1 %461  ;;  %v500_v14 = vperm.slane %v9366_v50, %v6231_v13  ;;  %v543_v42 = vsel %vm362_vm7, %v519_v58, %v542_v33  ;;  %v376_v61 = vsel %vm364_vm8, %v347_v55, %v375_v30  ;;  %v350_v63 = vsel %vm313_vm5, %v349_v24, %v348_v40 }
 0x1a2   :  { %v521_v54 = vperm.slane %v6228_v22, %v6231_v13  ;;  %v9364_v22 = vld [vmem:[#allocation49_spill] sm:$0xff]  ;;  %v354_v16 = vperm.slane %v9367_v31, %v6143_v47  ;;  %v525_v2 = vsel %vm313_vm5, %v524_v28, %v523_v20  ;;  %v9371_v20 = vld [vmem:[#allocation44_spill] sm:$0xff] }
 0x1a3   :  { %v496_v6 = vperm.slane %v9364_v22, %v6143_v47  ;;  %v501_v58 = vsel %vm313_vm5, %v500_v14, %v499_v4 }
 0x1a5   :  { %v498_v45 = vsel %vm313_vm5, %v497_v0, %v496_v6  ;;  %v9373_v6 = vld [vmem:[#allocation42_spill] sm:$0xff] }
 0x1a6   :  { %v502_v33 = vperm.slane %v9373_v6, %v6143_v47 }
 0x1a9   :  { %v6236_v29 = vpop.permute.xlu1 %470 }
 0x1aa   :  { %v526_v32 = vperm.slane %v6236_v29, %v6143_v47  ;;  %v495_v29 = vsel %vm313_vm5, %v494_v1, %v493_v26  ;;  %v522_v1 = vsel %vm313_vm5, %v521_v54, %v520_v52  ;;  %v9368_v26 = vld [vmem:[#allocation47_spill] sm:$0xff] }
 0x1ab   :  { %v532_v40 = vperm.slane %v9368_v26, %v6143_v47  ;;  %v544_v28 = vsel %vm364_vm8, %v522_v1, %v543_v42  ;;  %v536_v0 = vsel %vm362_vm7, %v495_v29, %v6282_v57 }
 0x1ac   :  { %v528_v34 = vsel %vm313_vm5, %v527_v62, %v526_v32  ;;  %v545_v24 = vsel %vm366_vm9, %v525_v2, %v544_v28  ;;  %v537_v62 = vsel %vm364_vm8, %v498_v45, %v536_v0  ;;  %v9375_v28 = vld [vmem:[#allocation10_spill] sm:$0xff]  ;;  %v9379_v0 = vld [vmem:[#allocation8_spill] sm:$0xff] }
 0x1ad   :  { %v546_v54 = vsel %vm368_vm10, %v528_v34, %v545_v24  ;;  %v534_v38 = vsel %vm313_vm5, %v533_v59, %v532_v40  ;;  %v509_v59 = vperm.slane %v9372_v49, %v6231_v13  ;;  %v9374_v40 = vld [vmem:[#allocation11_spill] sm:$0xff]  ;;  %v9381_v49 = vld [vmem:[#allocation18_spill] sm:$0xff] }
 0x1b1   :  { %v6277_v48 = vpop.permute.xlu1 %479 }
 0x1b2   :  { %v530_v12 = vperm.slane %v6277_v48, %v6231_v13  ;;  %v9369_v48 = vld [vmem:[#allocation50_spill] sm:$0xff] }
 0x1b3   :  { %v503_v52 = vperm.slane %v9369_v48, %v6231_v13 }
 0x1b4   :  { %v531_v57 = vsel %vm313_vm5, %v530_v12, %v529_v8 }
 0x1b5   :  { %v547_v32 = vsel %vm370_vm11, %v531_v57, %v546_v54  ;;  %v504_v14 = vsel %vm313_vm5, %v503_v52, %v502_v33  ;;  %v9383_v33 = vld [vmem:[#allocation27_spill] sm:$0xff] }
 0x1b6   :  { %v6471_v25 = vsel %vm9317_vm12, %v534_v38, %v547_v32 }
 0x1f5   :  { %v109_v19 = vpop.xlane.xlu1 %108 }
 0x1f6   :  { %v110_v7 = vcvt.f32.s32 %v109_v19 }
 0x1f8   :  { %v113_v39 = vadd.s32 %v112_v27, %v110_v7  ;;  %v9365_v27 = vld [vmem:[#allocation48_spill] sm:$0xff] }
 0x1f9   :  { %v126_v7 = vcvt.f32.s32 %v9365_v27  ;;  %v538_v27 = vsel %vm366_vm9, %v501_v58, %v537_v62 }
 0x1fa   :  { %vm129_vm14 = vcmp.eq.s32.totalorder %v6143_v47, %v113_v39  ;;  %v309_v39 = vpop.permute.xlu0 %308  ;;  %v539_v43 = vsel %vm368_vm10, %v504_v14, %v538_v27 }
 0x1fb   :  { %v6363_v41 = vsel %vm129_vm14, 1.0, %v9221_v15  ;;  %v127_v55 = vshll.u32 %v126_v7, 16 }
 0x1fc   :  { %v137_v44 = vrot.slane %v6363_v41, 1  ;;  %v138_v51 = vrot.slane %v6363_v41, 2  ;;  %v139_v35 = vrot.slane %v6363_v41, 3  ;;  %166 = vst.msk [vmem:[#allocation2] sm:$0x1] %vm165_vm13, %v6363_v41  ;;  %v140_v56 = vrot.slane %v6363_v41, 4 }
 0x1fd   :  { %v383_v11 = vmul.f32 %v6363_v41, %v6350_v18  ;;  %v141_v60 = vrot.slane %v6363_v41, 5  ;;  %v142_v23 = vrot.slane %v6363_v41, 6  ;;  %v143_v53 = vrot.slane %v6363_v41, 7 }
 0x1fe   :  { %167 = vst.msk [vmem:[#allocation2 + $0x8] sm:$0x1] %vm165_vm13, %v137_v44  ;;  %v358_v44 = vperm.slane %v309_v39, %v6231_v13 }
 0x1ff   :  { %v385_v19 = vsel %vm76_vm0, %v383_v11, 0.0  ;;  %168 = vst.msk [vmem:[#allocation2 + $0x10] sm:$0x1] %vm165_vm13, %v138_v51  ;;  %v356_v11 = vsel %vm313_vm5, %v355_v9, %v354_v16 }
 0x200   :  { %386 = vadd.xlane.f32.xlu2 %v385_v19  ;;  %169 = vst.msk [vmem:[#allocation2 + $0x18] sm:$0x1] %vm165_vm13, %v139_v35  ;;  %v377_v35 = vsel %vm366_vm9, %v350_v63, %v376_v61  ;;  %v359_v10 = vsel %vm313_vm5, %v358_v44, %v357_v3  ;;  %v9376_v44 = vld [vmem:[#allocation6_spill] sm:$0xff] }
 0x201   :  { %170 = vst.msk [vmem:[#allocation2 + $0x20] sm:$0x1] %vm165_vm13, %v140_v56  ;;  %v508_v56 = vperm.slane %v9370_v21, %v6143_v47  ;;  %v378_v9 = vsel %vm368_vm10, %v6334_v36, %v377_v35  ;;  %v9377_v21 = vld [vmem:[#allocation19_spill] sm:$0xff] }
 0x202   :  { %171 = vst.msk [vmem:[#allocation2 + $0x28] sm:$0x1] %vm165_vm13, %v141_v60  ;;  %v505_v60 = vperm.slane %v9371_v20, %v6143_v47  ;;  %v379_v4 = vsel %vm370_vm11, %v356_v11, %v378_v9  ;;  %v9378_v11 = vld [vmem:[#allocation17_spill] sm:$0xff] }
 0x203   :  { %v124_v37 = vpop.xlane.xlu1 %123  ;;  %172 = vst.msk [vmem:[#allocation2 + $0x30] sm:$0x1] %vm165_vm13, %v142_v23  ;;  %v6480_v23 = vsel %vm9317_vm12, %v359_v10, %v379_v4  ;;  %v510_v42 = vsel %vm313_vm5, %v509_v59, %v508_v56  ;;  %v9380_v10 = vld [vmem:[#allocation20_spill] sm:$0xff] }
 0x204   :  { %v125_v51 = vcvt.f32.s32 %v124_v37  ;;  %173 = vst.msk [vmem:[#allocation2 + $0x38] sm:$0x1] %vm165_vm13, %v143_v53  ;;  %v507_v29 = vsel %vm313_vm5, %v506_v46, %v505_v60 }
 0x205   :  { %v540_v46 = vsel %vm370_vm11, %v507_v29, %v539_v43  ;;  %v9385_v29 = vld [vmem:[#allocation7_spill] sm:$0xff] }
 0x206   :  { %v128_v5 = vadd.s32 %v127_v55, %v125_v51  ;;  %v6509_v63 = vsel %vm9317_vm12, %v510_v42, %v540_v46  ;;  %v9387_v46 = vld [vmem:[#allocation29_spill] sm:$0xff] }
 0x207   :  { %v551_v31 = vmul.f32 %v6363_v41, %v6509_v63 }
 0x208   :  { %vm130_vm15 = vcmp.eq.s32.totalorder %v6143_v47, %v128_v5 }
 0x209   :  { %v6468_v36 = vsel %vm130_vm15, 1.0, %v9221_v15  ;;  %v553_v16 = vsel %vm76_vm0, %v551_v31, 0.0 }
 0x20a   :  { %v144_v8 = vrot.slane %v6468_v36, 1  ;;  %v145_v17 = vrot.slane %v6468_v36, 2  ;;  %v146_v3 = vrot.slane %v6468_v36, 3  ;;  %174 = vst.msk [vmem:[#allocation2 + $0x40] sm:$0x1] %vm165_vm13, %v6468_v36  ;;  %v147_v19 = vrot.slane %v6468_v36, 4 }
 0x20b   :  { %v552_v22 = vmul.f32 %v6468_v36, %v6471_v25  ;;  %v148_v7 = vrot.slane %v6468_v36, 5  ;;  %v384_v53 = vmul.f32 %v6468_v36, %v6480_v23  ;;  %v149_v30 = vrot.slane %v6468_v36, 6 }
 0x20c   :  { %175 = vst.msk [vmem:[#allocation2 + $0x48] sm:$0x1] %vm165_vm13, %v144_v8  ;;  %v150_v39 = vrot.slane %v6468_v36, 7  ;;  %v9382_v8 = vld [vmem:[#allocation9_spill] sm:$0xff] }
 0x20d   :  { %v556_v50 = vsel %vm76_vm0, %v552_v22, 0.0  ;;  %176 = vst.msk [vmem:[#allocation2 + $0x50] sm:$0x1] %vm165_vm13, %v145_v17  ;;  %v388_v61 = vsel %vm76_vm0, %v384_v53, 0.0 }
 0x20e   :  { %557 = vadd.xlane.f32.xlu2 %v556_v50  ;;  %177 = vst.msk [vmem:[#allocation2 + $0x58] sm:$0x1] %vm165_vm13, %v146_v3  ;;  %389 = vadd.xlane.f32.xlu1 %v388_v61  ;;  %v9386_v61 = vld [vmem:[#allocation30_spill] sm:$0xff] }
 0x20f   :  { %178 = vst.msk [vmem:[#allocation2 + $0x60] sm:$0x1] %vm165_vm13, %v147_v19 }
 0x210   :  { %179 = vst.msk [vmem:[#allocation2 + $0x68] sm:$0x1] %vm165_vm13, %v148_v7  ;;  %v9384_v7 = vld [vmem:[#allocation26_spill] sm:$0xff] }
 0x211   :  { %180 = vst.msk [vmem:[#allocation2 + $0x70] sm:$0x1] %vm165_vm13, %v149_v30 }
 0x212   :  { %181 = vst.msk [vmem:[#allocation2 + $0x78] sm:$0x1] %vm165_vm13, %v150_v39 }
 0x216   :  { %554 = vadd.xlane.f32.xlu1 %v553_v16  ;;  %v9388_v16 = vld [vmem:[#allocation12_spill] sm:$0xff] }
 0x273   :  { %v6535_v5 = vpop.xlane.xlu2 %386 }
 0x281   :  { %v6516_v2 = vpop.xlane.xlu1 %389  ;;  %v6547_v32 = vpop.xlane.xlu2 %557 }
 0x282   :  { %v636_v19 = vperm.slane %v6547_v32, 1  ;;  %v635_v22 = vperm.slane %v6547_v32, 0  ;;  %v637_v42 = vperm.slane %v6547_v32, 2 }
 0x284   :  { %v677_v27 = vsub.f32 %v9383_v33, %v636_v19  ;;  %v675_v53 = vsub.f32 %v9384_v7, %v635_v22  ;;  %v680_v43 = vsub.f32 %v9386_v61, %v637_v42  ;;  %v678_v31 = vsub.f32 %v9387_v46, %v636_v19 }
 0x286   :  { %v741_v50 = vmul.f32 %v677_v27, %v677_v27  ;;  %v739_v14 = vmul.f32 %v675_v53, %v675_v53 }
 0x289   :  { %v6518_v1 = vpop.xlane.xlu1 %554 }
 0x28a   :  { %v630_v12 = vperm.slane %v6518_v1, 3  ;;  %v629_v34 = vperm.slane %v6518_v1, 2  ;;  %v627_v26 = vperm.slane %v6518_v1, 0  ;;  %v633_v45 = vperm.slane %v6518_v1, 6 }
 0x28b   :  { %v632_v24 = vperm.slane %v6518_v1, 5  ;;  %v634_v38 = vperm.slane %v6518_v1, 7  ;;  %v628_v57 = vperm.slane %v6518_v1, 1 }
 0x28c   :  { %v666_v37 = vsub.f32 %v9374_v40, %v630_v12  ;;  %v664_v55 = vsub.f32 %v9375_v28, %v629_v34  ;;  %v659_v51 = vsub.f32 %v9376_v44, %v627_v26  ;;  %v671_v56 = vsub.f32 %v9377_v21, %v633_v45 }
 0x28d   :  { %v669_v54 = vsub.f32 %v9378_v11, %v632_v24  ;;  %v660_v58 = vsub.f32 %v9379_v0, %v627_v26  ;;  %v674_v4 = vsub.f32 %v9380_v10, %v634_v38  ;;  %v672_v59 = vsub.f32 %v9381_v49, %v633_v45 }
 0x28e   :  { %v730_v48 = vmul.f32 %v666_v37, %v666_v37  ;;  %v728_v52 = vmul.f32 %v664_v55, %v664_v55  ;;  %v723_v35 = vmul.f32 %v659_v51, %v659_v51  ;;  %v735_v20 = vmul.f32 %v671_v56, %v671_v56  ;;  %v9389_v51 = vld [vmem:[#allocation32_spill] sm:$0xff] }
 0x28f   :  { %v733_v60 = vmul.f32 %v669_v54, %v669_v54  ;;  %v724_v9 = vmul.f32 %v660_v58, %v660_v58  ;;  %v661_v17 = vsub.f32 %v9382_v8, %v628_v57  ;;  %v738_v3 = vmul.f32 %v674_v4, %v674_v4  ;;  %v9392_v58 = vld [vmem:[#allocation34_spill] sm:$0xff] }
 0x290   :  { %801 = vrot.lane.b32.xlu2 %v730_v48, %s5883_s0  ;;  %797 = vrot.lane.b32.xlu1 %v728_v52, %s5883_s0  ;;  %v736_v62 = vmul.f32 %v672_v59, %v672_v59  ;;  %v662_v30 = vsub.f32 %v9385_v29, %v628_v57  ;;  %v663_v26 = vsub.f32 %v9388_v16, %v629_v34  ;;  %v639_v28 = vperm.slane %v6547_v32, 4  ;;  %v9390_v48 = vld [vmem:[#allocation31_spill] sm:$0xff]  ;;  %v9398_v29 = vld [vmem:[#allocation37_spill] sm:$0xff]  ;;  %v9401_v16 = vld [vmem:[#allocation22_spill] sm:$0xff] }
 0x291   :  { %787 = vrot.lane.b32.xlu0 %v723_v35, %s5883_s0  ;;  %v725_v6 = vmul.f32 %v661_v17, %v661_v17  ;;  %v744_v40 = vmul.f32 %v680_v43, %v680_v43  ;;  %v742_v37 = vmul.f32 %v678_v31, %v678_v31  ;;  %v638_v55 = vperm.slane %v6547_v32, 3  ;;  %v9391_v35 = vld [vmem:[#allocation13_spill] sm:$0xff]  ;;  %v9394_v57 = vld [vmem:[#allocation15_spill] sm:$0xff]  ;;  %v9395_v17 = vld [vmem:[#allocation36_spill] sm:$0xff] }
 0x292   :  { %v726_v39 = vmul.f32 %v662_v30, %v662_v30  ;;  %v727_v44 = vmul.f32 %v663_v26, %v663_v26  ;;  %v683_v45 = vsub.f32 %v9389_v51, %v639_v28  ;;  %v665_v21 = vsub.f32 %v9391_v35, %v630_v12  ;;  %v9400_v43 = vld [vmem:[#allocation21_spill] sm:$0xff]  ;;  %v6616_v35 = vld [vmem:[#allocation3] sm:$0xff] }
 0x293   :  { %v681_v52 = vsub.f32 %v9390_v48, %v638_v55  ;;  %v640_v11 = vperm.slane %v6547_v32, 5  ;;  %v631_v0 = vperm.slane %v6518_v1, 4  ;;  %v642_v49 = vperm.slane %v6547_v32, 7 }
 0x294   :  { %v747_v34 = vmul.f32 %v683_v45, %v683_v45  ;;  %v729_v54 = vmul.f32 %v665_v21, %v665_v21  ;;  %v641_v59 = vperm.slane %v6547_v32, 6  ;;  %v673_v46 = vsub.f32 %v9400_v43, %v634_v38  ;;  %v9404_v38 = vld [vmem:[#allocation25_spill] sm:$0xff] }
 0x295   :  { %v745_v56 = vmul.f32 %v681_v52, %v681_v52  ;;  %v667_v10 = vsub.f32 %v9394_v57, %v631_v0  ;;  %v690_v30 = vsub.f32 %v9398_v29, %v642_v49  ;;  %v676_v26 = vsub.f32 %v9401_v16, %v635_v22  ;;  %v9405_v22 = vld [vmem:[#allocation28_spill] sm:$0xff]  ;;  %v6653_v16 = vld [vmem:[#allocation3 + $0x20] sm:$0xff] }
 0x296   :  { %v737_v31 = vmul.f32 %v673_v46, %v673_v46  ;;  %v685_v45 = vsub.f32 %v9404_v38, %v640_v11  ;;  %v561_v32 = vperm.slane %v6535_v5, 0  ;;  %v688_v52 = vsub.f32 %v9405_v22, %v641_v59 }
 0x297   :  { %v731_v8 = vmul.f32 %v667_v10, %v667_v10 }
 0x298   :  { %811 = vrot.lane.b32.xlu2 %v735_v20, %s5883_s0  ;;  %807 = vrot.lane.b32.xlu1 %v733_v60, %s5883_s0  ;;  %v686_v20 = vsub.f32 %v9392_v58, %v640_v11  ;;  %v9393_v60 = vld [vmem:[#allocation33_spill] sm:$0xff]  ;;  %v749_v48 = vmul.f32 %v685_v45, %v685_v45  ;;  %v752_v21 = vmul.f32 %v688_v52, %v688_v52 }
 0x299   :  { %789 = vrot.lane.b32.xlu0 %v724_v9, %s5883_s0  ;;  %v684_v9 = vsub.f32 %v9393_v60, %v639_v28 }
 0x29a   :  { %v750_v12 = vmul.f32 %v686_v20, %v686_v20 }
 0x29b   :  { %v748_v4 = vmul.f32 %v684_v9, %v684_v9  ;;  %v6628_v9 = vld [vmem:[#allocation3 + $0x8] sm:$0xff] }
 0x29c   :  { %v594_v57 = vsub.f32 %v6628_v9, %v561_v32 }
 0x2a0   :  { %817 = vrot.lane.b32.xlu2 %v738_v3, %s5883_s0  ;;  %813 = vrot.lane.b32.xlu1 %v736_v62, %s5883_s0  ;;  %v689_v3 = vsub.f32 %v9395_v17, %v642_v49  ;;  %v9396_v62 = vld [vmem:[#allocation35_spill] sm:$0xff] }
 0x2a1   :  { %791 = vrot.lane.b32.xlu0 %v725_v6, %s5883_s0  ;;  %v687_v19 = vsub.f32 %v9396_v62, %v641_v59  ;;  %v9397_v6 = vld [vmem:[#allocation14_spill] sm:$0xff]  ;;  %v692_v59 = vmul.f32 %v594_v57, %v594_v57 }
 0x2a2   :  { %v668_v33 = vsub.f32 %v9397_v6, %v631_v0  ;;  %v753_v27 = vmul.f32 %v689_v3, %v689_v3  ;;  %v9406_v0 = vld [vmem:[#allocation40_spill] sm:$0xff] }
 0x2a3   :  { %v751_v7 = vmul.f32 %v687_v19, %v687_v19  ;;  %v6625_v58 = vperm.slane %v9406_v0, 0  ;;  %v6634_v17 = vperm.slane %v9406_v0, 2  ;;  %v6638_v19 = vld [vmem:[#allocation3 + $0x10] sm:$0xff]  ;;  %v6644_v29 = vperm.slane %v9406_v0, 1 }
 0x2a4   :  { %v732_v53 = vmul.f32 %v668_v33, %v668_v33 }
 0x2a5   :  { %9407 = vst [vmem:[#allocation49_spill] sm:$0xff] %v6625_v58 }
 0x2a6   :  { %9408 = vst [vmem:[#allocation48_spill] sm:$0xff] %v6634_v17 }
 0x2a7   :  { %9409 = vst [vmem:[#allocation43_spill] sm:$0xff] %v6644_v29 }
 0x2a8   :  { %823 = vrot.lane.b32.xlu2 %v741_v50, %s5883_s0  ;;  %819 = vrot.lane.b32.xlu1 %v739_v14, %s5883_s0  ;;  %v9399_v50 = vld [vmem:[#allocation16_spill] sm:$0xff] }
 0x2a9   :  { %793 = vrot.lane.b32.xlu0 %v726_v39, %s5883_s0  ;;  %v670_v14 = vsub.f32 %v9399_v50, %v632_v24  ;;  %v754_v39 = vmul.f32 %v690_v30, %v690_v30  ;;  %v9402_v24 = vld [vmem:[#allocation23_spill] sm:$0xff]  ;;  %v6647_v50 = vld [vmem:[#allocation3 + $0x18] sm:$0xff] }
 0x2ab   :  { %v734_v61 = vmul.f32 %v670_v14, %v670_v14 }
 0x2b0   :  { %829 = vrot.lane.b32.xlu2 %v744_v40, %s5883_s0  ;;  %825 = vrot.lane.b32.xlu1 %v742_v37, %s5883_s0  ;;  %v740_v40 = vmul.f32 %v676_v26, %v676_v26  ;;  %v679_v37 = vsub.f32 %v9402_v24, %v637_v42  ;;  %v593_v42 = vsub.f32 %v6616_v35, %v561_v32  ;;  %v6662_v32 = vld [vmem:[#allocation3 + $0x30] sm:$0xff] }
 0x2b1   :  { %795 = vrot.lane.b32.xlu0 %v727_v44, %s5883_s0  ;;  %v9403_v44 = vld [vmem:[#allocation24_spill] sm:$0xff] }
 0x2b2   :  { %v743_v28 = vmul.f32 %v679_v37, %v679_v37  ;;  %v682_v51 = vsub.f32 %v9403_v44, %v638_v55  ;;  %v691_v55 = vmul.f32 %v593_v42, %v593_v42  ;;  %v6657_v37 = vld [vmem:[#allocation3 + $0x38] sm:$0xff] }
 0x2b4   :  { %v746_v1 = vmul.f32 %v682_v51, %v682_v51 }
 0x2b8   :  { %835 = vrot.lane.b32.xlu2 %v747_v34, %s5883_s0  ;;  %831 = vrot.lane.b32.xlu1 %v745_v56, %s5883_s0  ;;  %v563_v34 = vperm.slane %v6535_v5, 2  ;;  %v6621_v56 = vld [vmem:[#allocation3 + $0x28] sm:$0xff] }
 0x2b9   :  { %799 = vrot.lane.b32.xlu0 %v729_v54, %s5883_s0 }
 0x2ba   :  { %v598_v11 = vsub.f32 %v6621_v56, %v563_v34  ;;  %v597_v26 = vsub.f32 %v6653_v16, %v563_v34  ;;  %v6667_v34 = vperm.slane %v9406_v0, 3 }
 0x2bc   :  { %v696_v10 = vmul.f32 %v598_v11, %v598_v11  ;;  %v695_v44 = vmul.f32 %v597_v26, %v597_v26  ;;  %9410 = vst [vmem:[#allocation46_spill] sm:$0xff] %v6667_v34 }
 0x2c0   :  { %841 = vrot.lane.b32.xlu2 %v750_v12, %s5883_s0  ;;  %837 = vrot.lane.b32.xlu1 %v748_v4, %s5883_s0  ;;  %v9224_v12 = vmov 1.0  }
 0x2c1   :  { %803 = vrot.lane.b32.xlu0 %v731_v8, %s5883_s0  ;;  %v562_v8 = vperm.slane %v6535_v5, 1 }
 0x2c3   :  { %v595_v6 = vsub.f32 %v6638_v19, %v562_v8  ;;  %v596_v14 = vsub.f32 %v6647_v50, %v562_v8 }
 0x2c8   :  { %847 = vrot.lane.b32.xlu2 %v753_v27, %s5883_s0  ;;  %843 = vrot.lane.b32.xlu1 %v751_v7, %s5883_s0  ;;  %v693_v7 = vmul.f32 %v595_v6, %v595_v6 }
 0x2c9   :  { %805 = vrot.lane.b32.xlu0 %v732_v53, %s5883_s0 }
 0x2d0   :  { %849 = vrot.lane.b32.xlu1 %v754_v39, %s5883_s0 }
 0x2d1   :  { %809 = vrot.lane.b32.xlu0 %v734_v61, %s5883_s0  ;;  %v694_v61 = vmul.f32 %v596_v14, %v596_v14 }
 0x2d9   :  { %815 = vrot.lane.b32.xlu0 %v737_v31, %s5883_s0  ;;  %v564_v31 = vperm.slane %v6535_v5, 3 }
 0x2db   :  { %v599_v22 = vsub.f32 %v6662_v32, %v564_v31 }
 0x2e1   :  { %821 = vrot.lane.b32.xlu0 %v740_v40, %s5883_s0 }
 0x2e9   :  { %827 = vrot.lane.b32.xlu0 %v743_v28, %s5883_s0  ;;  %v600_v28 = vsub.f32 %v6657_v37, %v564_v31  ;;  %v6695_v31 = vld [vmem:[#allocation3 + $0x48] sm:$0xff] }
 0x2ea   :  { %v802_v38 = vpop.permute.xlu2 %801 }
 0x2eb   :  { %v698_v45 = vmul.f32 %v600_v28, %v600_v28 }
 0x2ed   :  { %v890_v42 = vadd.f32 %v802_v38, %v698_v45  ;;  %v6706_v38 = vld [vmem:[#allocation3 + $0x80] sm:$0xff] }
 0x2f1   :  { %833 = vrot.lane.b32.xlu0 %v746_v1, %s5883_s0 }
 0x2f2   :  { %v812_v6 = vpop.permute.xlu2 %811 }
 0x2f9   :  { %839 = vrot.lane.b32.xlu0 %v749_v48, %s5883_s0  ;;  %v566_v48 = vperm.slane %v6535_v5, 5 }
 0x301   :  { %845 = vrot.lane.b32.xlu0 %v752_v21, %s5883_s0 }
 0x302   :  { %v798_v60 = vpop.permute.xlu1 %797 }
 0x303   :  { %v788_v54 = vpop.permute.xlu0 %787  ;;  %v888_v49 = vadd.f32 %v798_v60, %v696_v10  ;;  %v567_v10 = vperm.slane %v6535_v5, 6 }
 0x304   :  { %v883_v20 = vadd.f32 %v788_v54, %v691_v55  ;;  %v6669_v55 = vld [vmem:[#allocation3 + $0x50] sm:$0xff]  ;;  %v697_v54 = vmul.f32 %v599_v22, %v599_v22 }
 0x305   :  { %vm952_vm2 = vcmp.lt.f32.partialorder %v888_v49, %v6634_v17  ;;  %v603_v11 = vsub.f32 %v6669_v55, %v566_v48  ;;  %v6678_v49 = vld [vmem:[#allocation3 + $0x40] sm:$0xff] }
 0x306   :  { %vm947_vm1 = vcmp.lt.f32.partialorder %v883_v20, %v6625_v58  ;;  %v984_v27 = vsel %vm952_vm2, 0.01, %v9224_v12  ;;  %v565_v20 = vperm.slane %v6535_v5, 4 }
 0x307   :  { %v979_v4 = vsel %vm947_vm1, 0.01, %v9224_v12  ;;  %vm954_vm1 = vcmp.lt.f32.partialorder %v890_v42, %v6667_v34 }
 0x308   :  { %v986_v8 = vsel %vm954_vm1, 0.01, %v9224_v12  ;;  %v602_v26 = vsub.f32 %v6695_v31, %v565_v20 }
 0x309   :  { %1044 = vperm.xlu0 %5584, %v979_v4   ;;  %v701_v4 = vmul.f32 %v603_v11, %v603_v11 }
 0x30a   :  { %v808_v40 = vpop.permute.xlu1 %807  ;;  %v700_v22 = vmul.f32 %v602_v26, %v602_v26 }
 0x30b   :  { %v790_v3 = vpop.permute.xlu0 %789 }
 0x30c   :  { %v884_v62 = vadd.f32 %v790_v3, %v692_v59  ;;  %v601_v59 = vsub.f32 %v6678_v49, %v565_v20 }
 0x30e   :  { %vm948_vm3 = vcmp.lt.f32.partialorder %v884_v62, %v6625_v58  ;;  %v893_v62 = vadd.f32 %v808_v40, %v701_v4 }
 0x30f   :  { %v980_v33 = vsel %vm948_vm3, 0.01, %v9224_v12 }
 0x310   :  { %1047 = vperm.xlu2 %5585, %v980_v33   ;;  %v6684_v33 = vperm.slane %v9406_v0, 5 }
 0x311   :  { %1059 = vperm.xlu0 %5584, %v984_v27   ;;  %v6686_v27 = vld [vmem:[#allocation3 + $0x68] sm:$0xff] }
 0x312   :  { %v814_v21 = vpop.permute.xlu1 %813  ;;  %9411 = vst [vmem:[#allocation47_spill] sm:$0xff] %v6684_v33  ;;  %vm957_vm3 = vcmp.lt.f32.partialorder %v893_v62, %v6684_v33 }
 0x313   :  { %v792_v53 = vpop.permute.xlu0 %791  ;;  %v989_v40 = vsel %vm957_vm3, 0.01, %v9224_v12 }
 0x314   :  { %v885_v30 = vadd.f32 %v792_v53, %v693_v7  ;;  %v606_v7 = vsub.f32 %v6686_v27, %v567_v10  ;;  %v699_v53 = vmul.f32 %v601_v59, %v601_v59 }
 0x316   :  { %vm949_vm4 = vcmp.lt.f32.partialorder %v885_v30, %v6644_v29 }
 0x317   :  { %v981_v39 = vsel %vm949_vm4, 0.01, %v9224_v12 }
 0x318   :  { %1050 = vperm.xlu1 %5586, %v981_v39   ;;  %v6690_v39 = vperm.slane %v9406_v0, 4 }
 0x31a   :  { %v820_v30 = vpop.permute.xlu1 %819  ;;  %9412 = vst [vmem:[#allocation50_spill] sm:$0xff] %v6690_v39 }
 0x31b   :  { %v794_v43 = vpop.permute.xlu0 %793 }
 0x31c   :  { %v886_v46 = vadd.f32 %v794_v43, %v694_v61  ;;  %v704_v43 = vmul.f32 %v606_v7, %v606_v7  ;;  %v6722_v7 = vld [vmem:[#allocation3 + $0x78] sm:$0xff] }
 0x31e   :  { %vm950_vm14 = vcmp.lt.f32.partialorder %v886_v46, %v6644_v29  ;;  %v569_v46 = vperm.slane %v6516_v2, 0  ;;  %v896_v28 = vadd.f32 %v814_v21, %v704_v43  ;;  %v6728_v43 = vld [vmem:[#allocation3 + $0x98] sm:$0xff] }
 0x31f   :  { %v982_v24 = vsel %vm950_vm14, 0.01, %v9224_v12 }
 0x320   :  { %1053 = vperm.xlu2 %5585, %v982_v24   ;;  %v609_v45 = vsub.f32 %v6706_v38, %v569_v46 }
 0x322   :  { %v826_v20 = vpop.permute.xlu1 %825 }
 0x323   :  { %v796_v51 = vpop.permute.xlu0 %795 }
 0x324   :  { %v887_v1 = vadd.f32 %v796_v51, %v695_v44  ;;  %v6700_v44 = vld [vmem:[#allocation3 + $0x60] sm:$0xff] }
 0x325   :  { %v605_v51 = vsub.f32 %v6700_v44, %v567_v10  ;;  %v6715_v10 = vld [vmem:[#allocation3 + $0x58] sm:$0xff] }
 0x326   :  { %vm951_vm15 = vcmp.lt.f32.partialorder %v887_v1, %v6634_v17  ;;  %v6704_v1 = vperm.slane %v9406_v0, 6  ;;  %v604_v4 = vsub.f32 %v6715_v10, %v566_v48 }
 0x327   :  { %v983_v52 = vsel %vm951_vm15, 0.01, %v9224_v12  ;;  %v703_v21 = vmul.f32 %v605_v51, %v605_v51  ;;  %v6735_v51 = vld [vmem:[#allocation3 + $0x70] sm:$0xff] }
 0x328   :  { %1056 = vperm.xlu1 %5586, %v983_v52   ;;  %9413 = vst [vmem:[#allocation51_spill] sm:$0xff] %v6704_v1  ;;  %v818_v52 = vpop.permute.xlu2 %817  ;;  %vm960_vm14 = vcmp.lt.f32.partialorder %v896_v28, %v6704_v1  ;;  %v702_v48 = vmul.f32 %v604_v4, %v604_v4  ;;  %v9223_v28 = vperm.slane %v6516_v2, 3 }
 0x329   :  { %v992_v59 = vsel %vm960_vm14, 0.01, %v9224_v12 }
 0x32b   :  { %v800_v60 = vpop.permute.xlu0 %799 }
 0x32c   :  { %v889_v57 = vadd.f32 %v800_v60, %v697_v54  ;;  %v568_v54 = vperm.slane %v6535_v5, 7  ;;  %v570_v60 = vperm.slane %v6516_v2, 1 }
 0x32e   :  { %vm953_vm2 = vcmp.lt.f32.partialorder %v889_v57, %v6667_v34  ;;  %v707_v57 = vmul.f32 %v609_v45, %v609_v45  ;;  %v612_v5 = vsub.f32 %v6728_v43, %v570_v60  ;;  %v607_v45 = vsub.f32 %v6735_v51, %v568_v54 }
 0x32f   :  { %v985_v3 = vsel %vm953_vm2, 0.01, %v9224_v12 }
 0x330   :  { %1065 = vperm.xlu1 %5586, %v986_v8   ;;  %1062 = vperm.xlu2 %5585, %v985_v3   ;;  %v895_v3 = vadd.f32 %v812_v6, %v703_v21  ;;  %v899_v62 = vadd.f32 %v820_v30, %v707_v57  ;;  %v824_v30 = vpop.permute.xlu2 %823 }
 0x332   :  { %vm959_vm2 = vcmp.lt.f32.partialorder %v895_v3, %v6704_v1  ;;  %v6747_v3 = vld [vmem:[#allocation3 + $0x90] sm:$0xff] }
 0x333   :  { %v804_v14 = vpop.permute.xlu0 %803 }
 0x334   :  { %v891_v61 = vadd.f32 %v804_v14, %v699_v53  ;;  %v608_v53 = vsub.f32 %v6722_v7, %v568_v54  ;;  %v9414_v14 = vld [vmem:[#allocation41_spill] sm:$0xff]  ;;  %v611_v54 = vsub.f32 %v6747_v3, %v570_v60  ;;  %v6760_v60 = vld [vmem:[#allocation3 + $0x88] sm:$0xff] }
 0x336   :  { %vm955_vm4 = vcmp.lt.f32.partialorder %v891_v61, %v6690_v39  ;;  %v6726_v61 = vperm.slane %v9414_v14, 0  ;;  %v706_v6 = vmul.f32 %v608_v53, %v608_v53 }
 0x337   :  { %v987_v24 = vsel %vm955_vm4, 0.01, %v9224_v12 }
 0x338   :  { %1074 = vperm.xlu1 %5586, %v989_v40   ;;  %1068 = vperm.xlu0 %5584, %v987_v24   ;;  %9415 = vst [vmem:[#allocation44_spill] sm:$0xff] %v6726_v61  ;;  %vm963_vm1 = vcmp.lt.f32.partialorder %v899_v62, %v6726_v61  ;;  %v710_v24 = vmul.f32 %v612_v5, %v612_v5  ;;  %v6750_v62 = vld [vmem:[#allocation3 + $0xb0] sm:$0xff] }
 0x339   :  { %v898_v57 = vadd.f32 %v818_v52, %v706_v6  ;;  %v615_v52 = vsub.f32 %v6750_v62, %v9223_v28  ;;  %v610_v6 = vsub.f32 %v6760_v60, %v569_v46 }
 0x33a   :  { %v902_v4 = vadd.f32 %v826_v20, %v710_v24  ;;  %v705_v20 = vmul.f32 %v607_v45, %v607_v45  ;;  %v830_v24 = vpop.permute.xlu2 %829 }
 0x33b   :  { %v806_v42 = vpop.permute.xlu0 %805 }
 0x33c   :  { %v892_v11 = vadd.f32 %v806_v42, %v700_v22  ;;  %v832_v22 = vpop.permute.xlu1 %831  ;;  %v995_v42 = vsel %vm963_vm1, 0.01, %v9224_v12 }
 0x33e   :  { %vm956_vm15 = vcmp.lt.f32.partialorder %v892_v11, %v6690_v39  ;;  %v991_v11 = vsel %vm959_vm2, 0.01, %v9224_v12 }
 0x33f   :  { %v988_v8 = vsel %vm956_vm15, 0.01, %v9224_v12 }
 0x340   :  { %1083 = vperm.xlu1 %5586, %v992_v59   ;;  %1071 = vperm.xlu2 %5585, %v988_v8   ;;  %v6742_v59 = vperm.slane %v9406_v0, 7  ;;  %v6745_v8 = vperm.slane %v9414_v14, 1  ;;  %v571_v0 = vperm.slane %v6516_v2, 2 }
 0x342   :  { %9416 = vst [vmem:[#allocation45_spill] sm:$0xff] %v6742_v59  ;;  %vm966_vm4 = vcmp.lt.f32.partialorder %v902_v4, %v6745_v8  ;;  %vm962_vm14 = vcmp.lt.f32.partialorder %v898_v57, %v6742_v59 }
 0x343   :  { %v810_v26 = vpop.permute.xlu0 %809  ;;  %9417 = vst [vmem:[#allocation42_spill] sm:$0xff] %v6745_v8  ;;  %v998_v45 = vsel %vm966_vm4, 0.01, %v9224_v12 }
 0x344   :  { %v894_v40 = vadd.f32 %v810_v26, %v702_v48  ;;  %v573_v48 = vperm.slane %v6516_v2, 4  ;;  %v709_v26 = vmul.f32 %v611_v54, %v611_v54  ;;  %v838_v4 = vpop.permute.xlu1 %837  ;;  %v6769_v54 = vperm.slane %v9414_v14, 3 }
 0x346   :  { %vm958_vm3 = vcmp.lt.f32.partialorder %v894_v40, %v6684_v33  ;;  %v713_v40 = vmul.f32 %v615_v52, %v615_v52  ;;  %9418 = vst [vmem:[#allocation11_spill] sm:$0xff] %v6769_v54  ;;  %v6771_v52 = vld [vmem:[#allocation3 + $0xa8] sm:$0xff] }
 0x347   :  { %v990_v21 = vsel %vm958_vm3, 0.01, %v9224_v12  ;;  %v614_v46 = vsub.f32 %v6771_v52, %v571_v0 }
 0x348   :  { %1092 = vperm.xlu1 %5586, %v995_v42   ;;  %1080 = vperm.xlu2 %5585, %v991_v11   ;;  %v994_v42 = vsel %vm962_vm14, 0.01, %v9224_v12  ;;  %v905_v57 = vadd.f32 %v832_v22, %v713_v40  ;;  %v6781_v40 = vld [vmem:[#allocation3 + $0xa0] sm:$0xff] }
 0x349   :  { %1077 = vperm.xlu0 %5584, %v990_v21   ;;  %v901_v21 = vadd.f32 %v824_v30, %v709_v26  ;;  %v9228_v30 = vperm.slane %v6516_v2, 6  ;;  %v712_v22 = vmul.f32 %v614_v46, %v614_v46  ;;  %v836_v46 = vpop.permute.xlu2 %835 }
 0x34a   :  { %vm969_vm1 = vcmp.lt.f32.partialorder %v905_v57, %v6769_v54 }
 0x34b   :  { %v816_v53 = vpop.permute.xlu0 %815  ;;  %vm965_vm2 = vcmp.lt.f32.partialorder %v901_v21, %v6745_v8  ;;  %v6788_v21 = vperm.slane %v9414_v14, 2  ;;  %v6806_v8 = vld [vmem:[#allocation3 + $0xb8] sm:$0xff] }
 0x34c   :  { %v897_v5 = vadd.f32 %v816_v53, %v705_v20  ;;  %v6774_v20 = vld [vmem:[#allocation3 + $0xc8] sm:$0xff] }
 0x34d   :  { %v618_v53 = vsub.f32 %v6774_v20, %v573_v48  ;;  %9419 = vst [vmem:[#allocation10_spill] sm:$0xff] %v6788_v21 }
 0x34e   :  { %vm961_vm15 = vcmp.lt.f32.partialorder %v897_v5, %v6742_v59  ;;  %v708_v5 = vmul.f32 %v610_v6, %v610_v6  ;;  %v997_v6 = vsel %vm965_vm2, 0.01, %v9224_v12 }
 0x34f   :  { %v993_v11 = vsel %vm961_vm15, 0.01, %v9224_v12  ;;  %v716_v26 = vmul.f32 %v618_v53, %v618_v53  ;;  %v6793_v53 = vld [vmem:[#allocation3 + $0xc0] sm:$0xff] }
 0x350   :  { %1101 = vperm.xlu1 %5586, %v998_v45   ;;  %1089 = vperm.xlu2 %5585, %v994_v42   ;;  %v613_v45 = vsub.f32 %v6781_v40, %v571_v0  ;;  %v1001_v42 = vsel %vm969_vm1, 0.01, %v9224_v12  ;;  %v617_v0 = vsub.f32 %v6793_v53, %v573_v48 }
 0x351   :  { %1086 = vperm.xlu0 %5584, %v993_v11   ;;  %v904_v11 = vadd.f32 %v830_v24, %v712_v22  ;;  %v908_v57 = vadd.f32 %v838_v4, %v716_v26  ;;  %v844_v22 = vpop.permute.xlu1 %843  ;;  %v842_v33 = vpop.permute.xlu2 %841 }
 0x352   :  { %v711_v4 = vmul.f32 %v613_v45, %v613_v45 }
 0x353   :  { %v822_v15 = vpop.permute.xlu0 %821  ;;  %vm968_vm14 = vcmp.lt.f32.partialorder %v904_v11, %v6788_v21 }
 0x354   :  { %v900_v28 = vadd.f32 %v822_v15, %v708_v5  ;;  %v6796_v5 = vld [vmem:[#allocation3 + $0xe0] sm:$0xff] }
 0x355   :  { %9421 = vst [vmem:[#allocation19_spill] sm:$0xff] %v6796_v5  ;;  %v621_v24 = vsub.f32 %v6796_v5, %v9228_v30  ;;  %v9422_v30 = vperm.slane %v6516_v2, 3 }
 0x356   :  { %vm964_vm3 = vcmp.lt.f32.partialorder %v900_v28, %v6726_v61  ;;  %v6791_v28 = vperm.slane %v9414_v14, 4  ;;  %v9423_v61 = vmov 1.0  }
 0x357   :  { %v996_v15 = vsel %vm964_vm3, 0.01, %v9224_v12  ;;  %v715_v12 = vmul.f32 %v617_v0, %v617_v0  ;;  %v719_v48 = vmul.f32 %v621_v24, %v621_v24  ;;  %v616_v45 = vsub.f32 %v6806_v8, %v9422_v30  ;;  %v6817_v24 = vld [vmem:[#allocation3 + $0xd8] sm:$0xff] }
 0x358   :  { %1110 = vperm.xlu1 %5586, %v1001_v42   ;;  %1098 = vperm.xlu2 %5585, %v997_v6   ;;  %9420 = vst [vmem:[#allocation6_spill] sm:$0xff] %v6791_v28  ;;  %vm972_vm4 = vcmp.lt.f32.partialorder %v908_v57, %v6791_v28  ;;  %v574_v6 = vperm.slane %v6516_v2, 5  ;;  %v1000_v57 = vsel %vm968_vm14, 0.01, %v9423_v61  ;;  %v6815_v0 = vperm.slane %v9414_v14, 6 }
 0x359   :  { %1095 = vperm.xlu0 %5584, %v996_v15   ;;  %v576_v15 = vperm.slane %v6516_v2, 7  ;;  %v911_v59 = vadd.f32 %v844_v22, %v719_v48  ;;  %v714_v1 = vmul.f32 %v616_v45, %v616_v45  ;;  %v6826_v48 = vld [vmem:[#allocation3 + $0xd0] sm:$0xff] }
 0x35a   :  { %9424 = vst [vmem:[#allocation17_spill] sm:$0xff] %v6815_v0 }
 0x35b   :  { %v828_v26 = vpop.permute.xlu0 %827  ;;  %vm975_vm1 = vcmp.lt.f32.partialorder %v911_v59, %v6815_v0  ;;  %v6833_v59 = vperm.slane %v9414_v14, 5 }
 0x35c   :  { %v903_v42 = vadd.f32 %v828_v26, %v711_v4  ;;  %v1004_v4 = vsel %vm972_vm4, 0.01, %v9423_v61  ;;  %v907_v26 = vadd.f32 %v836_v46, %v715_v12  ;;  %v850_v12 = vpop.permute.xlu1 %849 }
 0x35d   :  { %9426 = vst [vmem:[#allocation20_spill] sm:$0xff] %v6833_v59 }
 0x35e   :  { %vm967_vm15 = vcmp.lt.f32.partialorder %v903_v42, %v6788_v21  ;;  %v620_v42 = vsub.f32 %v6817_v24, %v574_v6  ;;  %v6820_v21 = vld [vmem:[#allocation3 + $0xf8] sm:$0xff]  ;;  %vm971_vm2 = vcmp.lt.f32.partialorder %v907_v26, %v6791_v28  ;;  %v6838_v26 = vld [vmem:[#allocation3 + $0xf0] sm:$0xff] }
 0x35f   :  { %v999_v11 = vsel %vm967_vm15, 0.01, %v9423_v61  ;;  %9425 = vst [vmem:[#allocation8_spill] sm:$0xff] %v6820_v21  ;;  %v624_v30 = vsub.f32 %v6820_v21, %v576_v15  ;;  %v1003_v45 = vsel %vm971_vm2, 0.01, %v9423_v61 }
 0x360   :  { %1119 = vperm.xlu1 %5586, %v1004_v4   ;;  %1107 = vperm.xlu2 %5585, %v1000_v57   ;;  %v718_v46 = vmul.f32 %v620_v42, %v620_v42  ;;  %v619_v4 = vsub.f32 %v6826_v48, %v574_v6  ;;  %v1007_v57 = vsel %vm975_vm1, 0.01, %v9423_v61  ;;  %v623_v6 = vsub.f32 %v6838_v26, %v576_v15 }
 0x361   :  { %1104 = vperm.xlu0 %5584, %v999_v11   ;;  %v722_v22 = vmul.f32 %v624_v30, %v624_v30 }
 0x362   :  { %v717_v42 = vmul.f32 %v619_v4, %v619_v4 }
 0x363   :  { %v834_v39 = vpop.permute.xlu0 %833 }
 0x364   :  { %v906_v34 = vadd.f32 %v834_v39, %v714_v1  ;;  %v910_v39 = vadd.f32 %v842_v33, %v718_v46  ;;  %v914_v1 = vadd.f32 %v850_v12, %v722_v22  ;;  %v848_v33 = vpop.permute.xlu2 %847  ;;  %v721_v12 = vmul.f32 %v623_v6, %v623_v6  ;;  %v6844_v46 = vld [vmem:[#allocation3 + $0xe8] sm:$0xff] }
 0x366   :  { %vm970_vm3 = vcmp.lt.f32.partialorder %v906_v34, %v6769_v54  ;;  %v6836_v34 = vperm.slane %v9414_v14, 7  ;;  %vm974_vm14 = vcmp.lt.f32.partialorder %v910_v39, %v6833_v59  ;;  %v9428_v14 = vperm.slane %v6516_v2, 6 }
 0x367   :  { %v1002_v11 = vsel %vm970_vm3, 0.01, %v9423_v61  ;;  %v1006_v15 = vsel %vm974_vm14, 0.01, %v9423_v61  ;;  %vm1205_vm3 = vcmp.gt.f32.partialorder %v6363_v41, 0.0 }
 0x368   :  { %1128 = vperm.xlu1 %5586, %v1007_v57   ;;  %1116 = vperm.xlu2 %5585, %v1003_v45   ;;  %9427 = vst [vmem:[#allocation18_spill] sm:$0xff] %v6836_v34  ;;  %vm978_vm4 = vcmp.lt.f32.partialorder %v914_v1, %v6836_v34  ;;  %v622_v22 = vsub.f32 %v6844_v46, %v9428_v14 }
 0x369   :  { %1113 = vperm.xlu0 %5584, %v1002_v11   ;;  %v1010_v57 = vsel %vm978_vm4, 0.01, %v9423_v61  ;;  %v913_v45 = vadd.f32 %v848_v33, %v721_v12  ;;  %vm1206_vm4 = vcmp.gt.f32.partialorder %v6468_v36, 0.0 }
 0x36a   :  { %v720_v11 = vmul.f32 %v622_v22, %v622_v22 }
 0x36b   :  { %v840_v30 = vpop.permute.xlu0 %839  ;;  %vm977_vm1 = vcmp.lt.f32.partialorder %v913_v45, %v6836_v34 }
 0x36c   :  { %v909_v28 = vadd.f32 %v840_v30, %v717_v42  ;;  %v1009_v2 = vsel %vm977_vm1, 0.01, %v9423_v61  ;;  %v1048_v6 = vpop.permute.xlu2 %1047 }
 0x36d   :  { %v1140_v29 = vperm.slane %v1048_v6, %v6231_v13 }
 0x36e   :  { %vm973_vm15 = vcmp.lt.f32.partialorder %v909_v28, %v6833_v59 }
 0x36f   :  { %v1005_v4 = vsel %vm973_vm15, 0.01, %v9423_v61 }
 0x370   :  { %1137 = vperm.xlu1 %5586, %v1010_v57   ;;  %1125 = vperm.xlu2 %5585, %v1006_v15  }
 0x371   :  { %1122 = vperm.xlu0 %5584, %v1005_v4  }
 0x373   :  { %v846_v39 = vpop.permute.xlu0 %845 }
 0x374   :  { %v912_v1 = vadd.f32 %v846_v39, %v720_v11 }
 0x376   :  { %vm976_vm2 = vcmp.lt.f32.partialorder %v912_v1, %v6815_v0 }
 0x377   :  { %v1008_v28 = vsel %vm976_vm2, 0.01, %v9423_v61 }
 0x378   :  { %1134 = vperm.xlu2 %5585, %v1009_v2  }
 0x379   :  { %1131 = vperm.xlu0 %5584, %v1008_v28  }
 0x37a   :  { %v1054_v30 = vpop.permute.xlu2 %1053 }
 0x37b   :  { %v1045_v14 = vpop.permute.xlu0 %1044  ;;  %v1143_v2 = vperm.slane %v1054_v30, %v6231_v13 }
 0x37c   :  { %v1139_v28 = vperm.slane %v1045_v14, %v6143_v47 }
 0x383   :  { %v1060_v4 = vpop.permute.xlu0 %1059 }
 0x384   :  { %v1146_v17 = vperm.slane %v1060_v4, %v6231_v13 }
 0x38a   :  { %v1051_v42 = vpop.permute.xlu1 %1050  ;;  %v1063_v12 = vpop.permute.xlu2 %1062 }
 0x38b   :  { %v1142_v1 = vperm.slane %v1051_v42, %v6143_v47  ;;  %v1148_v42 = vperm.slane %v1063_v12, %v6143_v47 }
 0x38d   :  { %v1144_v21 = vsel %vm313_vm5, %v1143_v2, %v1142_v1 }
 0x39a   :  { %v1057_v33 = vpop.permute.xlu1 %1056  ;;  %v1072_v22 = vpop.permute.xlu2 %1071 }
 0x39b   :  { %v1145_v0 = vperm.slane %v1057_v33, %v6143_v47  ;;  %v1152_v14 = vperm.slane %v1072_v22, %v6231_v13 }
 0x39d   :  { %v1147_v30 = vsel %vm313_vm5, %v1146_v17, %v1145_v0 }
 0x3a2   :  { %v1066_v57 = vpop.permute.xlu1 %1065  ;;  %v1081_v11 = vpop.permute.xlu2 %1080 }
 0x3a3   :  { %v1149_v59 = vperm.slane %v1066_v57, %v6231_v13  ;;  %v1141_v57 = vsel %vm313_vm5, %v1140_v29, %v1139_v28 }
 0x3a5   :  { %v1150_v5 = vsel %vm313_vm5, %v1149_v59, %v1148_v42  ;;  %v1157_v59 = vperm.slane %v1081_v11, %v6143_v47 }
 0x3aa   :  { %v1075_v15 = vpop.permute.xlu1 %1074  ;;  %v1069_v39 = vpop.permute.xlu0 %1068 }
 0x3ab   :  { %v1090_v34 = vpop.permute.xlu2 %1089  ;;  %v1151_v58 = vperm.slane %v1069_v39, %v6143_v47  ;;  %v1154_v4 = vperm.slane %v1075_v15, %v6143_v47  ;;  %v1187_v39 = vsel %vm360_vm6, %v1144_v21, %v1141_v57 }
 0x3ac   :  { %v1188_v1 = vsel %vm362_vm7, %v1147_v30, %v1187_v39  ;;  %v1161_v21 = vperm.slane %v1090_v34, %v6231_v13 }
 0x3ad   :  { %v1153_v6 = vsel %vm313_vm5, %v1152_v14, %v1151_v58 }
 0x3b2   :  { %v1084_v45 = vpop.permute.xlu1 %1083 }
 0x3b3   :  { %v1158_v17 = vperm.slane %v1084_v45, %v6231_v13  ;;  %v1099_v22 = vpop.permute.xlu2 %1098 }
 0x3b5   :  { %v1159_v28 = vsel %vm313_vm5, %v1158_v17, %v1157_v59 }
 0x3ba   :  { %v1093_v54 = vpop.permute.xlu1 %1092 }
 0x3bb   :  { %v1078_v61 = vpop.permute.xlu0 %1077  ;;  %v1163_v41 = vperm.slane %v1093_v54, %v6143_v47 }
 0x3bc   :  { %v1155_v33 = vperm.slane %v1078_v61, %v6231_v13  ;;  %v1189_v61 = vsel %vm364_vm8, %v1150_v5, %v1188_v1 }
 0x3bd   :  { %v1190_v0 = vsel %vm366_vm9, %v1153_v6, %v1189_v61 }
 0x3be   :  { %v1156_v12 = vsel %vm313_vm5, %v1155_v33, %v1154_v4  ;;  %v9429_v33 = vld [vmem:[#allocation38_spill] sm:$0xff]  ;;  %v1108_v4 = vpop.permute.xlu2 %1107 }
 0x3bf   :  { %v1191_v15 = vsel %vm368_vm10, %v1156_v12, %v1190_v0 }
 0x3c0   :  { %v1192_v5 = vsel %vm370_vm11, %v1159_v28, %v1191_v15  ;;  %v1166_v28 = vperm.slane %v1099_v22, %v6143_v47 }
 0x3c2   :  { %v1102_v29 = vpop.permute.xlu1 %1101 }
 0x3c3   :  { %v1087_v2 = vpop.permute.xlu0 %1086  ;;  %v1167_v15 = vperm.slane %v1102_v29, %v6231_v13 }
 0x3c4   :  { %v1160_v58 = vperm.slane %v1087_v2, %v6143_v47 }
 0x3c6   :  { %v1162_v42 = vsel %vm313_vm5, %v1161_v21, %v1160_v58  ;;  %v1117_v1 = vpop.permute.xlu2 %1116  ;;  %v1170_v58 = vperm.slane %v1108_v4, %v6231_v13 }
 0x3c7   :  { %v1193_v45 = vsel %vm9317_vm12, %v1162_v42, %v1192_v5 }
 0x3c8   :  { %v1203_v30 = vmul.f32 %v1193_v45, %v9429_v33 }
 0x3ca   :  { %v1111_v11 = vpop.permute.xlu1 %1110  ;;  %v6889_v14 = vsel %vm1205_vm3, -1.0, %v1203_v30  ;;  %v1168_v30 = vsel %vm313_vm5, %v1167_v15, %v1166_v28 }
 0x3cb   :  { %v1096_v57 = vpop.permute.xlu0 %1095  ;;  %v1209_v34 = vsel %vm76_vm0, %v6889_v14, -inf  ;;  %v1172_v42 = vperm.slane %v1111_v11, %v6143_v47  ;;  %v1175_v11 = vperm.slane %v1117_v1, %v6143_v47 }
 0x3cc   :  { %1210 = vmax.xlane.f32.xlu0 %v1209_v34  ;;  %v1164_v0 = vperm.slane %v1096_v57, %v6231_v13 }
 0x3ce   :  { %v1126_v17 = vpop.permute.xlu2 %1125  ;;  %v1165_v5 = vsel %vm313_vm5, %v1164_v0, %v1163_v41 }
 0x3cf   :  { %v1194_v29 = vsel %vm360_vm6, %v1168_v30, %v1165_v5  ;;  %v1179_v4 = vperm.slane %v1126_v17, %v6231_v13  ;;  %v9430_v30 = vld [vmem:[#allocation39_spill] sm:$0xff] }
 0x3d2   :  { %v1120_v6 = vpop.permute.xlu1 %1119 }
 0x3d3   :  { %v1105_v39 = vpop.permute.xlu0 %1104  ;;  %v1176_v34 = vperm.slane %v1120_v6, %v6231_v13 }
 0x3d4   :  { %v1169_v59 = vperm.slane %v1105_v39, %v6143_v47 }
 0x3d6   :  { %v1171_v45 = vsel %vm313_vm5, %v1170_v58, %v1169_v59 }
 0x3d7   :  { %v1195_v22 = vsel %vm362_vm7, %v1171_v45, %v1194_v29 }
 0x3da   :  { %v1129_v61 = vpop.permute.xlu1 %1128 }
 0x3db   :  { %v1114_v12 = vpop.permute.xlu0 %1113 }
 0x3dc   :  { %v1173_v2 = vperm.slane %v1114_v12, %v6231_v13  ;;  %v1135_v12 = vpop.permute.xlu2 %1134 }
 0x3dd   :  { %v1184_v17 = vperm.slane %v1135_v12, %v6143_v47 }
 0x3de   :  { %v1174_v57 = vsel %vm313_vm5, %v1173_v2, %v1172_v42  ;;  %v1177_v2 = vsel %vm313_vm5, %v1176_v34, %v1175_v11 }
 0x3df   :  { %v1196_v0 = vsel %vm364_vm8, %v1174_v57, %v1195_v22 }
 0x3e0   :  { %v1197_v58 = vsel %vm366_vm9, %v1177_v2, %v1196_v0 }
 0x3e2   :  { %v1138_v39 = vpop.permute.xlu1 %1137 }
 0x3e3   :  { %v1123_v21 = vpop.permute.xlu0 %1122  ;;  %v1185_v59 = vperm.slane %v1138_v39, %v6231_v13 }
 0x3e4   :  { %v1178_v54 = vperm.slane %v1123_v21, %v6143_v47  ;;  %v1181_v21 = vperm.slane %v1129_v61, %v6143_v47 }
 0x3e5   :  { %v1186_v42 = vsel %vm313_vm5, %v1185_v59, %v1184_v17 }
 0x3e6   :  { %v1180_v41 = vsel %vm313_vm5, %v1179_v4, %v1178_v54 }
 0x3e7   :  { %v1198_v1 = vsel %vm368_vm10, %v1180_v41, %v1197_v58 }
 0x3eb   :  { %v1132_v15 = vpop.permute.xlu0 %1131 }
 0x3ec   :  { %v1182_v6 = vperm.slane %v1132_v15, %v6231_v13 }
 0x3ee   :  { %v1183_v28 = vsel %vm313_vm5, %v1182_v6, %v1181_v21 }
 0x3ef   :  { %v1199_v5 = vsel %vm370_vm11, %v1183_v28, %v1198_v1 }
 0x3f0   :  { %v1200_v45 = vsel %vm9317_vm12, %v1186_v42, %v1199_v5 }
 0x3f1   :  { %v1204_v57 = vmul.f32 %v1200_v45, %v9430_v30  ;;  %v9444_v30 = vld [vmem:[#allocation42_spill] sm:$0xff] }
 0x3f3   :  { %v6926_v61 = vsel %vm1206_vm4, -1.0, %v1204_v57 }
 0x3f4   :  { %v1212_v54 = vsel %vm76_vm0, %v6926_v61, -inf }
 0x3f5   :  { %1213 = vmax.xlane.f32.xlu2 %v1212_v54  ;;  %v9431_v54 = vmov 0.0  }
 0x43f   :  { %v1211_v29 = vpop.xlane.xlu0 %1210 }
 0x440   :  { %vm1215_vm14 = vcmp.eq.f32.partialorder %v6889_v14, %v1211_v29 }
 0x441   :  { %v1217_v34 = vsel %vm1215_vm14, %v6143_v47, 16 }
 0x442   :  { %v1219_v39 = vsel %vm76_vm0, %v1217_v34, 2147483647 }
 0x443   :  { %v1221_v4 = vshra.s32 %v1219_v39, 16  ;;  %v1220_v41 = vand.u32 65535, %v1219_v39 }
 0x445   :  { %v1223_v22 = vcvt.s32.f32 %v1221_v4  ;;  %v1222_v2 = vcvt.s32.f32 %v1220_v41 }
 0x447   :  { %1224 = vmin.xlane.f32.xlu1 %v1223_v22 }
 0x468   :  { %v1214_v11 = vpop.xlane.xlu2 %1213 }
 0x469   :  { %vm1216_vm15 = vcmp.eq.f32.partialorder %v6926_v61, %v1214_v11 }
 0x46a   :  { %v1218_v36 = vsel %vm1216_vm15, %v6143_v47, 16 }
 0x46b   :  { %v1234_v12 = vsel %vm76_vm0, %v1218_v36, 2147483647 }
 0x46c   :  { %v1236_v0 = vshra.s32 %v1234_v12, 16  ;;  %v1235_v6 = vand.u32 65535, %v1234_v12 }
 0x46e   :  { %v1238_v59 = vcvt.s32.f32 %v1236_v0  ;;  %v1237_v58 = vcvt.s32.f32 %v1235_v6 }
 0x470   :  { %1239 = vmin.xlane.f32.xlu0 %v1238_v59 }
 0x4ba   :  { %v1225_v15 = vpop.xlane.xlu1 %1224 }
 0x4bb   :  { %vm1226_vm1 = vcmp.eq.f32.partialorder %v1223_v22, %v1225_v15  ;;  %v1231_v28 = vcvt.f32.s32 %v1225_v15 }
 0x4bc   :  { %v1227_v21 = vsel %vm1226_vm1, %v1222_v2, inf }
 0x4bd   :  { %1228 = vmin.xlane.f32.xlu2 %v1227_v21  ;;  %v1232_v5 = vshll.u32 %v1231_v28, 16 }
 0x4e3   :  { %v1240_v17 = vpop.xlane.xlu0 %1239 }
 0x4e4   :  { %vm1241_vm2 = vcmp.eq.f32.partialorder %v1238_v59, %v1240_v17  ;;  %v1246_v2 = vcvt.f32.s32 %v1240_v17 }
 0x4e5   :  { %v1242_v1 = vsel %vm1241_vm2, %v1237_v58, inf }
 0x4e6   :  { %1243 = vmin.xlane.f32.xlu1 %v1242_v1  ;;  %v1247_v6 = vshll.u32 %v1246_v2, 16 }
 0x530   :  { %v1229_v42 = vpop.xlane.xlu2 %1228 }
 0x531   :  { %v1230_v45 = vcvt.f32.s32 %v1229_v42 }
 0x533   :  { %v1233_v57 = vadd.s32 %v1232_v5, %v1230_v45 }
 0x535   :  { %vm1249_vm3 = vcmp.eq.s32.totalorder %v6143_v47, %v1233_v57 }
 0x536   :  { %v6938_v29 = vsel %vm1249_vm3, 1.0, %v9431_v54 }
 0x537   :  { %v1257_v34 = vrot.slane %v6938_v29, 1  ;;  %v1258_v39 = vrot.slane %v6938_v29, 2  ;;  %v1259_v4 = vrot.slane %v6938_v29, 3  ;;  %1285 = vst.msk [vmem:[#allocation2 + $0x1] sm:$0x1] %vm165_vm13, %v6938_v29  ;;  %v1260_v22 = vrot.slane %v6938_v29, 4 }
 0x538   :  { %v1301_v11 = vmul.f32 %v6938_v29, %v6350_v18  ;;  %v1261_v36 = vrot.slane %v6938_v29, 5  ;;  %v1309_v12 = vmul.f32 %v6938_v29, %v6509_v63  ;;  %v1262_v0 = vrot.slane %v6938_v29, 6 }
 0x539   :  { %1286 = vst.msk [vmem:[#allocation2 + $0x9] sm:$0x1] %vm165_vm13, %v1257_v34  ;;  %v1263_v41 = vrot.slane %v6938_v29, 7 }
 0x53a   :  { %v1303_v59 = vsel %vm76_vm0, %v1301_v11, 0.0  ;;  %1287 = vst.msk [vmem:[#allocation2 + $0x11] sm:$0x1] %vm165_vm13, %v1258_v39  ;;  %v1311_v15 = vsel %vm76_vm0, %v1309_v12, 0.0 }
 0x53b   :  { %1304 = vadd.xlane.f32.xlu2 %v1303_v59  ;;  %1288 = vst.msk [vmem:[#allocation2 + $0x19] sm:$0x1] %vm165_vm13, %v1259_v4  ;;  %1312 = vadd.xlane.f32.xlu1 %v1311_v15 }
 0x53c   :  { %1289 = vst.msk [vmem:[#allocation2 + $0x21] sm:$0x1] %vm165_vm13, %v1260_v22 }
 0x53d   :  { %1290 = vst.msk [vmem:[#allocation2 + $0x29] sm:$0x1] %vm165_vm13, %v1261_v36 }
 0x53e   :  { %1291 = vst.msk [vmem:[#allocation2 + $0x31] sm:$0x1] %vm165_vm13, %v1262_v0 }
 0x53f   :  { %1292 = vst.msk [vmem:[#allocation2 + $0x39] sm:$0x1] %vm165_vm13, %v1263_v41 }
 0x559   :  { %v1244_v21 = vpop.xlane.xlu1 %1243 }
 0x55a   :  { %v1245_v58 = vcvt.f32.s32 %v1244_v21 }
 0x55c   :  { %v1248_v1 = vadd.s32 %v1247_v6, %v1245_v58 }
 0x55e   :  { %vm1250_vm4 = vcmp.eq.s32.totalorder %v6143_v47, %v1248_v1 }
 0x55f   :  { %v6964_v28 = vsel %vm1250_vm4, 1.0, %v9431_v54 }
 0x560   :  { %v1264_v42 = vrot.slane %v6964_v28, 1  ;;  %v1265_v5 = vrot.slane %v6964_v28, 2  ;;  %v1266_v45 = vrot.slane %v6964_v28, 3  ;;  %1293 = vst.msk [vmem:[#allocation2 + $0x41] sm:$0x1] %vm165_vm13, %v6964_v28  ;;  %v1267_v17 = vrot.slane %v6964_v28, 4 }
 0x561   :  { %v1310_v57 = vmul.f32 %v6964_v28, %v6471_v25  ;;  %v1268_v34 = vrot.slane %v6964_v28, 5  ;;  %v1302_v39 = vmul.f32 %v6964_v28, %v6480_v23  ;;  %v1269_v4 = vrot.slane %v6964_v28, 6 }
 0x562   :  { %1294 = vst.msk [vmem:[#allocation2 + $0x49] sm:$0x1] %vm165_vm13, %v1264_v42  ;;  %v1270_v11 = vrot.slane %v6964_v28, 7 }
 0x563   :  { %v1314_v22 = vsel %vm76_vm0, %v1310_v57, 0.0  ;;  %1295 = vst.msk [vmem:[#allocation2 + $0x51] sm:$0x1] %vm165_vm13, %v1265_v5  ;;  %v1306_v36 = vsel %vm76_vm0, %v1302_v39, 0.0 }
 0x564   :  { %1315 = vadd.xlane.f32.xlu2 %v1314_v22  ;;  %1296 = vst.msk [vmem:[#allocation2 + $0x59] sm:$0x1] %vm165_vm13, %v1266_v45  ;;  %1307 = vadd.xlane.f32.xlu0 %v1306_v36 }
 0x565   :  { %1297 = vst.msk [vmem:[#allocation2 + $0x61] sm:$0x1] %vm165_vm13, %v1267_v17 }
 0x566   :  { %1298 = vst.msk [vmem:[#allocation2 + $0x69] sm:$0x1] %vm165_vm13, %v1268_v34 }
 0x567   :  { %1299 = vst.msk [vmem:[#allocation2 + $0x71] sm:$0x1] %vm165_vm13, %v1269_v4 }
 0x568   :  { %1300 = vst.msk [vmem:[#allocation2 + $0x79] sm:$0x1] %vm165_vm13, %v1270_v11 }
 0x5ae   :  { %v1313_v12 = vpop.xlane.xlu1 %1312 }
 0x5af   :  { %v1386_v0 = vperm.slane %v1313_v12, 1  ;;  %v1385_v59 = vperm.slane %v1313_v12, 0  ;;  %v1388_v21 = vperm.slane %v1313_v12, 3  ;;  %v1387_v42 = vperm.slane %v1313_v12, 2 }
 0x5b0   :  { %v1391_v22 = vperm.slane %v1313_v12, 6 }
 0x5b1   :  { %v1419_v41 = vsub.f32 %v6638_v19, %v1386_v0  ;;  %v1418_v15 = vsub.f32 %v6628_v9, %v1385_v59  ;;  %v1417_v2 = vsub.f32 %v6616_v35, %v1385_v59  ;;  %v1423_v5 = vsub.f32 %v6662_v32, %v1388_v21 }
 0x5b2   :  { %v1422_v45 = vsub.f32 %v6621_v56, %v1387_v42  ;;  %v1420_v19 = vsub.f32 %v6647_v50, %v1386_v0  ;;  %v1389_v35 = vperm.slane %v1313_v12, 4  ;;  %v1421_v32 = vsub.f32 %v6653_v16, %v1387_v42 }
 0x5b3   :  { %v1483_v6 = vmul.f32 %v1419_v41, %v1419_v41  ;;  %v1482_v58 = vmul.f32 %v1418_v15, %v1418_v15  ;;  %v1481_v1 = vmul.f32 %v1417_v2, %v1417_v2  ;;  %v1487_v9 = vmul.f32 %v1423_v5, %v1423_v5  ;;  %v7011_v15 = vpop.xlane.xlu2 %1304 }
 0x5b4   :  { %v1486_v17 = vmul.f32 %v1422_v45, %v1422_v45  ;;  %v1484_v57 = vmul.f32 %v1420_v19, %v1420_v19  ;;  %v1426_v34 = vsub.f32 %v6695_v31, %v1389_v35  ;;  %v1425_v39 = vsub.f32 %v6678_v49, %v1389_v35 }
 0x5b5   :  { %1549 = vrot.lane.b32.xlu2 %v1483_v6, %s5883_s0  ;;  %1547 = vrot.lane.b32.xlu1 %v1482_v58, %s5883_s0  ;;  %v1390_v50 = vperm.slane %v1313_v12, 5  ;;  %v1485_v11 = vmul.f32 %v1421_v32, %v1421_v32  ;;  %v1429_v36 = vsub.f32 %v6700_v44, %v1391_v22  ;;  %v1424_v31 = vsub.f32 %v6657_v37, %v1388_v21 }
 0x5b6   :  { %1545 = vrot.lane.b32.xlu0 %v1481_v1, %s5883_s0  ;;  %v1490_v4 = vmul.f32 %v1426_v34, %v1426_v34  ;;  %v1489_v56 = vmul.f32 %v1425_v39, %v1425_v39  ;;  %v1392_v16 = vperm.slane %v1313_v12, 7  ;;  %v1430_v42 = vsub.f32 %v6686_v27, %v1391_v22 }
 0x5b7   :  { %v1428_v0 = vsub.f32 %v6715_v10, %v1390_v50  ;;  %v1493_v49 = vmul.f32 %v1429_v36, %v1429_v36  ;;  %v1488_v41 = vmul.f32 %v1424_v31, %v1424_v31  ;;  %v1427_v10 = vsub.f32 %v6669_v55, %v1390_v50 }
 0x5b8   :  { %v1432_v2 = vsub.f32 %v6722_v7, %v1392_v16  ;;  %v1431_v44 = vsub.f32 %v6735_v51, %v1392_v16  ;;  %v1494_v19 = vmul.f32 %v1430_v42, %v1430_v42 }
 0x5b9   :  { %v1492_v59 = vmul.f32 %v1428_v0, %v1428_v0  ;;  %v1491_v21 = vmul.f32 %v1427_v10, %v1427_v10 }
 0x5ba   :  { %v1496_v6 = vmul.f32 %v1432_v2, %v1432_v2  ;;  %v1495_v37 = vmul.f32 %v1431_v44, %v1431_v44  ;;  %v9432_v44 = vld [vmem:[#allocation19_spill] sm:$0xff] }
 0x5bd   :  { %1557 = vrot.lane.b32.xlu2 %v1487_v9, %s5883_s0  ;;  %1555 = vrot.lane.b32.xlu1 %v1486_v17, %s5883_s0 }
 0x5be   :  { %1551 = vrot.lane.b32.xlu0 %v1484_v57, %s5883_s0 }
 0x5c5   :  { %1563 = vrot.lane.b32.xlu2 %v1490_v4, %s5883_s0  ;;  %1561 = vrot.lane.b32.xlu1 %v1489_v56, %s5883_s0 }
 0x5c6   :  { %1553 = vrot.lane.b32.xlu0 %v1485_v11, %s5883_s0 }
 0x5cd   :  { %1569 = vrot.lane.b32.xlu2 %v1493_v49, %s5883_s0  ;;  %1567 = vrot.lane.b32.xlu1 %v1492_v59, %s5883_s0 }
 0x5ce   :  { %1559 = vrot.lane.b32.xlu0 %v1488_v41, %s5883_s0 }
 0x5d5   :  { %1575 = vrot.lane.b32.xlu2 %v1496_v6, %s5883_s0  ;;  %1573 = vrot.lane.b32.xlu1 %v1495_v37, %s5883_s0  ;;  %v9433_v37 = vld [vmem:[#allocation8_spill] sm:$0xff] }
 0x5d6   :  { %1565 = vrot.lane.b32.xlu0 %v1491_v21, %s5883_s0  ;;  %v7054_v21 = vld [vmem:[#allocation3 + $0x10] sm:$0xff] }
 0x5d7   :  { %v1316_v12 = vpop.xlane.xlu2 %1315 }
 0x5d8   :  { %v1394_v58 = vperm.slane %v1316_v12, 1  ;;  %v1393_v1 = vperm.slane %v1316_v12, 0  ;;  %v1395_v45 = vperm.slane %v1316_v12, 2  ;;  %v1397_v57 = vperm.slane %v1316_v12, 4 }
 0x5d9   :  { %v1400_v31 = vperm.slane %v1316_v12, 7 }
 0x5da   :  { %v1435_v7 = vsub.f32 %v6747_v3, %v1394_v58  ;;  %v1434_v51 = vsub.f32 %v6760_v60, %v1393_v1  ;;  %v1438_v9 = vsub.f32 %v6771_v52, %v1395_v45  ;;  %v1437_v17 = vsub.f32 %v6781_v40, %v1395_v45  ;;  %v7061_v45 = vpop.xlane.xlu0 %1307 }
 0x5db   :  { %v1433_v27 = vsub.f32 %v6706_v38, %v1393_v1  ;;  %v1396_v60 = vperm.slane %v1316_v12, 3  ;;  %v1441_v39 = vsub.f32 %v6793_v53, %v1397_v57  ;;  %v1436_v52 = vsub.f32 %v6728_v43, %v1394_v58 }
 0x5dc   :  { %v1499_v5 = vmul.f32 %v1435_v7, %v1435_v7  ;;  %v1498_v55 = vmul.f32 %v1434_v51, %v1434_v51  ;;  %v1502_v35 = vmul.f32 %v1438_v9, %v1438_v9  ;;  %v1501_v3 = vmul.f32 %v1437_v17, %v1437_v17  ;;  %v9434_v7 = vld [vmem:[#allocation43_spill] sm:$0xff] }
 0x5dd   :  { %v1497_v34 = vmul.f32 %v1433_v27, %v1433_v27  ;;  %v1440_v32 = vsub.f32 %v6806_v8, %v1396_v60  ;;  %v1505_v4 = vmul.f32 %v1441_v39, %v1441_v39  ;;  %v1398_v38 = vperm.slane %v1316_v12, 5  ;;  %v7063_v9 = vld [vmem:[#allocation3 + $0x8] sm:$0xff]  ;;  %v7066_v27 = vld [vmem:[#allocation3] sm:$0xff] }
 0x5de   :  { %1581 = vrot.lane.b32.xlu2 %v1499_v5, %s5883_s0  ;;  %1579 = vrot.lane.b32.xlu1 %v1498_v55, %s5883_s0  ;;  %v1500_v22 = vmul.f32 %v1436_v52, %v1436_v52  ;;  %v1439_v53 = vsub.f32 %v6750_v62, %v1396_v60  ;;  %v1399_v43 = vperm.slane %v1316_v12, 6  ;;  %v1447_v59 = vsub.f32 %v6838_v26, %v1400_v31 }
 0x5df   :  { %1571 = vrot.lane.b32.xlu0 %v1494_v19, %s5883_s0  ;;  %v1504_v56 = vmul.f32 %v1440_v32, %v1440_v32  ;;  %v1444_v50 = vsub.f32 %v6817_v24, %v1398_v38  ;;  %v1443_v11 = vsub.f32 %v6826_v48, %v1398_v38  ;;  %v1442_v24 = vsub.f32 %v6774_v20, %v1397_v57 }
 0x5e0   :  { %v1503_v49 = vmul.f32 %v1439_v53, %v1439_v53  ;;  %v1446_v16 = vsub.f32 %v6844_v46, %v1399_v43  ;;  %v1511_v41 = vmul.f32 %v1447_v59, %v1447_v59  ;;  %v1445_v10 = vsub.f32 %v9432_v44, %v1399_v43  ;;  %v9437_v44 = vld [vmem:[#allocation48_spill] sm:$0xff] }
 0x5e1   :  { %v1508_v36 = vmul.f32 %v1444_v50, %v1444_v50  ;;  %v1507_v0 = vmul.f32 %v1443_v11, %v1443_v11  ;;  %v1506_v62 = vmul.f32 %v1442_v24, %v1442_v24  ;;  %v1320_v26 = vperm.slane %v7011_v15, 1  ;;  %v7077_v11 = vld [vmem:[#allocation3 + $0x18] sm:$0xff] }
 0x5e2   :  { %v1510_v2 = vmul.f32 %v1446_v16, %v1446_v16  ;;  %v1509_v6 = vmul.f32 %v1445_v10, %v1445_v10  ;;  %v1448_v46 = vsub.f32 %v9433_v37, %v1400_v31  ;;  %v9435_v51 = vmov 1.0   ;;  %v7086_v10 = vld [vmem:[#allocation3 + $0x40] sm:$0xff] }
 0x5e3   :  { %v1353_v20 = vsub.f32 %v7054_v21, %v1320_v26  ;;  %v1319_v55 = vperm.slane %v7011_v15, 0  ;;  %v1321_v57 = vperm.slane %v7011_v15, 2  ;;  %v1354_v53 = vsub.f32 %v7077_v11, %v1320_v26 }
 0x5e4   :  { %v1512_v12 = vmul.f32 %v1448_v46, %v1448_v46  ;;  %v1323_v31 = vperm.slane %v7011_v15, 4  ;;  %v7091_v46 = vld [vmem:[#allocation3 + $0x20] sm:$0xff] }
 0x5e5   :  { %v1451_v58 = vmul.f32 %v1353_v20, %v1353_v20  ;;  %v1352_v17 = vsub.f32 %v7063_v9, %v1319_v55  ;;  %v1452_v24 = vmul.f32 %v1354_v53, %v1354_v53  ;;  %v1355_v20 = vsub.f32 %v7091_v46, %v1321_v57 }
 0x5e6   :  { %1587 = vrot.lane.b32.xlu2 %v1502_v35, %s5883_s0  ;;  %1585 = vrot.lane.b32.xlu1 %v1501_v3, %s5883_s0  ;;  %v1351_v35 = vsub.f32 %v7066_v27, %v1319_v55  ;;  %v7096_v55 = vld [vmem:[#allocation3 + $0x48] sm:$0xff] }
 0x5e7   :  { %1577 = vrot.lane.b32.xlu0 %v1497_v34, %s5883_s0  ;;  %v1450_v3 = vmul.f32 %v1352_v17, %v1352_v17  ;;  %v1360_v17 = vsub.f32 %v7096_v55, %v1323_v31 }
 0x5e8   :  { %v1449_v34 = vmul.f32 %v1351_v35, %v1351_v35 }
 0x5ee   :  { %1593 = vrot.lane.b32.xlu2 %v1505_v4, %s5883_s0  ;;  %1591 = vrot.lane.b32.xlu1 %v1504_v56, %s5883_s0  ;;  %v9436_v4 = vld [vmem:[#allocation49_spill] sm:$0xff]  ;;  %v7071_v56 = vld [vmem:[#allocation3 + $0x28] sm:$0xff] }
 0x5ef   :  { %1583 = vrot.lane.b32.xlu0 %v1500_v22, %s5883_s0  ;;  %v1356_v38 = vsub.f32 %v7071_v56, %v1321_v57  ;;  %v1322_v22 = vperm.slane %v7011_v15, 3 }
 0x5f1   :  { %v1454_v43 = vmul.f32 %v1356_v38, %v1356_v38 }
 0x5f6   :  { %1599 = vrot.lane.b32.xlu2 %v1508_v36, %s5883_s0  ;;  %1597 = vrot.lane.b32.xlu1 %v1507_v0, %s5883_s0 }
 0x5f7   :  { %1589 = vrot.lane.b32.xlu0 %v1503_v49, %s5883_s0  ;;  %v7082_v49 = vld [vmem:[#allocation3 + $0x30] sm:$0xff] }
 0x5f8   :  { %v1357_v59 = vsub.f32 %v7082_v49, %v1322_v22 }
 0x5fa   :  { %v1455_v26 = vmul.f32 %v1357_v59, %v1357_v59 }
 0x5fe   :  { %1605 = vrot.lane.b32.xlu2 %v1511_v41, %s5883_s0  ;;  %1603 = vrot.lane.b32.xlu1 %v1510_v2, %s5883_s0 }
 0x5ff   :  { %1595 = vrot.lane.b32.xlu0 %v1506_v62, %s5883_s0 }
 0x607   :  { %1601 = vrot.lane.b32.xlu0 %v1509_v6, %s5883_s0  ;;  %v1359_v6 = vsub.f32 %v7086_v10, %v1323_v31 }
 0x60f   :  { %1607 = vrot.lane.b32.xlu0 %v1512_v12, %s5883_s0  ;;  %v1550_v1 = vpop.permute.xlu2 %1549 }
 0x610   :  { %v1643_v42 = vadd.f32 %v1550_v1, %v1451_v58 }
 0x612   :  { %vm1675_vm14 = vcmp.lt.f32.partialorder %v1643_v42, %v9434_v7  ;;  %v1457_v42 = vmul.f32 %v1359_v6, %v1359_v6 }
 0x613   :  { %v1707_v5 = vsel %vm1675_vm14, 0.01, %v9435_v51 }
 0x617   :  { %1776 = vperm.xlu0 %5584, %v1707_v5   ;;  %v1558_v19 = vpop.permute.xlu2 %1557  ;;  %v1324_v5 = vperm.slane %v7011_v15, 5 }
 0x618   :  { %v1647_v58 = vadd.f32 %v1558_v19, %v1455_v26  ;;  %v7102_v19 = vld [vmem:[#allocation3 + $0x58] sm:$0xff] }
 0x619   :  { %v1362_v38 = vsub.f32 %v7102_v19, %v1324_v5 }
 0x61f   :  { %v1564_v36 = vpop.permute.xlu2 %1563 }
 0x627   :  { %v1548_v60 = vpop.permute.xlu1 %1547  ;;  %v1570_v1 = vpop.permute.xlu2 %1569 }
 0x628   :  { %v1642_v39 = vadd.f32 %v1548_v60, %v1450_v3  ;;  %v1546_v32 = vpop.permute.xlu0 %1545  ;;  %v1453_v3 = vmul.f32 %v1355_v20, %v1355_v20 }
 0x629   :  { %v1641_v52 = vadd.f32 %v1546_v32, %v1449_v34  ;;  %v1325_v32 = vperm.slane %v7011_v15, 6 }
 0x62a   :  { %vm1674_vm15 = vcmp.lt.f32.partialorder %v1642_v39, %v9436_v4  ;;  %v9438_v39 = vld [vmem:[#allocation46_spill] sm:$0xff] }
 0x62b   :  { %vm1673_vm1 = vcmp.lt.f32.partialorder %v1641_v52, %v9436_v4  ;;  %v1706_v50 = vsel %vm1674_vm15, 0.01, %v9435_v51  ;;  %vm1679_vm4 = vcmp.lt.f32.partialorder %v1647_v58, %v9438_v39  ;;  %v9439_v52 = vld [vmem:[#allocation50_spill] sm:$0xff]  ;;  %v9440_v58 = vld [vmem:[#allocation47_spill] sm:$0xff] }
 0x62c   :  { %1773 = vperm.xlu2 %5585, %v1706_v50   ;;  %v1705_v0 = vsel %vm1673_vm1, 0.01, %v9435_v51  ;;  %v1458_v50 = vmul.f32 %v1360_v17, %v1360_v17 }
 0x62d   :  { %1770 = vperm.xlu1 %5586, %v1705_v0   ;;  %v7107_v0 = vld [vmem:[#allocation3 + $0x38] sm:$0xff] }
 0x62e   :  { %v1358_v31 = vsub.f32 %v7107_v0, %v1322_v22 }
 0x62f   :  { %v1556_v16 = vpop.permute.xlu1 %1555 }
 0x630   :  { %v1646_v41 = vadd.f32 %v1556_v16, %v1454_v43  ;;  %v1552_v2 = vpop.permute.xlu0 %1551  ;;  %v1711_v43 = vsel %vm1679_vm4, 0.01, %v9435_v51  ;;  %v1650_v16 = vadd.f32 %v1564_v36, %v1458_v50  ;;  %v1456_v26 = vmul.f32 %v1358_v31, %v1358_v31  ;;  %v7118_v36 = vld [vmem:[#allocation3 + $0x70] sm:$0xff] }
 0x631   :  { %v1644_v62 = vadd.f32 %v1552_v2, %v1452_v24  ;;  %v1326_v24 = vperm.slane %v7011_v15, 7  ;;  %v7113_v2 = vld [vmem:[#allocation3 + $0x60] sm:$0xff]  ;;  %v1327_v31 = vperm.slane %v7061_v45, 0 }
 0x632   :  { %vm1678_vm2 = vcmp.lt.f32.partialorder %v1646_v41, %v9437_v44  ;;  %v1460_v41 = vmul.f32 %v1362_v38, %v1362_v38  ;;  %vm1682_vm1 = vcmp.lt.f32.partialorder %v1650_v16, %v9439_v52  ;;  %v7128_v38 = vld [vmem:[#allocation3 + $0x78] sm:$0xff] }
 0x633   :  { %vm1676_vm3 = vcmp.lt.f32.partialorder %v1644_v62, %v9434_v7  ;;  %v1710_v37 = vsel %vm1678_vm2, 0.01, %v9435_v51  ;;  %v1363_v62 = vsub.f32 %v7113_v2, %v1325_v32  ;;  %v1366_v50 = vsub.f32 %v7128_v38, %v1326_v24 }
 0x634   :  { %1785 = vperm.xlu0 %5584, %v1710_v37   ;;  %v1708_v12 = vsel %vm1676_vm3, 0.01, %v9435_v51  ;;  %v1576_v37 = vpop.permute.xlu2 %1575 }
 0x635   :  { %1779 = vperm.xlu1 %5586, %v1708_v12   ;;  %v1461_v15 = vmul.f32 %v1363_v62, %v1363_v62 }
 0x637   :  { %v1562_v35 = vpop.permute.xlu1 %1561 }
 0x638   :  { %v1649_v60 = vadd.f32 %v1562_v35, %v1457_v42  ;;  %v1554_v34 = vpop.permute.xlu0 %1553  ;;  %v1365_v42 = vsub.f32 %v7118_v36, %v1326_v24  ;;  %v7123_v35 = vld [vmem:[#allocation3 + $0x50] sm:$0xff]  ;;  %v1328_v24 = vperm.slane %v7061_v45, 1 }
 0x639   :  { %v1645_v57 = vadd.f32 %v1554_v34, %v1453_v3  ;;  %v1361_v3 = vsub.f32 %v7123_v35, %v1324_v5  ;;  %v9441_v5 = vld [vmem:[#allocation51_spill] sm:$0xff] }
 0x63a   :  { %vm1681_vm14 = vcmp.lt.f32.partialorder %v1649_v60, %v9439_v52  ;;  %v1714_v60 = vsel %vm1682_vm1, 0.01, %v9435_v51  ;;  %v9449_v52 = vld [vmem:[#allocation17_spill] sm:$0xff] }
 0x63b   :  { %vm1677_vm15 = vcmp.lt.f32.partialorder %v1645_v57, %v9437_v44  ;;  %v1713_v53 = vsel %vm1681_vm14, 0.01, %v9435_v51  ;;  %v1653_v57 = vadd.f32 %v1570_v1, %v1461_v15  ;;  %v7134_v1 = vld [vmem:[#allocation3 + $0x88] sm:$0xff] }
 0x63c   :  { %1794 = vperm.xlu0 %5584, %v1713_v53   ;;  %v1709_v59 = vsel %vm1677_vm15, 0.01, %v9435_v51  ;;  %v1463_v53 = vmul.f32 %v1365_v42, %v1365_v42  ;;  %v7140_v42 = vld [vmem:[#allocation3 + $0x68] sm:$0xff] }
 0x63d   :  { %1788 = vperm.xlu1 %5586, %v1711_v43   ;;  %1782 = vperm.xlu2 %5585, %v1709_v59   ;;  %v1459_v59 = vmul.f32 %v1361_v3, %v1361_v3  ;;  %vm1685_vm4 = vcmp.lt.f32.partialorder %v1653_v57, %v9441_v5  ;;  %v1364_v15 = vsub.f32 %v7140_v42, %v1325_v32 }
 0x63f   :  { %v1568_v6 = vpop.permute.xlu1 %1567 }
 0x640   :  { %v1652_v20 = vadd.f32 %v1568_v6, %v1460_v41  ;;  %v1560_v22 = vpop.permute.xlu0 %1559  ;;  %v1464_v6 = vmul.f32 %v1366_v50, %v1366_v50  ;;  %v7146_v50 = vld [vmem:[#allocation3 + $0x90] sm:$0xff] }
 0x641   :  { %v1648_v12 = vadd.f32 %v1560_v22, %v1456_v26  ;;  %v1582_v26 = vpop.permute.xlu2 %1581  ;;  %v1368_v22 = vsub.f32 %v7134_v1, %v1327_v31 }
 0x642   :  { %vm1684_vm2 = vcmp.lt.f32.partialorder %v1652_v20, %v9440_v58  ;;  %v9442_v20 = vld [vmem:[#allocation45_spill] sm:$0xff] }
 0x643   :  { %vm1680_vm3 = vcmp.lt.f32.partialorder %v1648_v12, %v9438_v39  ;;  %v1716_v17 = vsel %vm1684_vm2, 0.01, %v9435_v51  ;;  %v1466_v57 = vmul.f32 %v1368_v22, %v1368_v22 }
 0x644   :  { %1803 = vperm.xlu0 %5584, %v1716_v17   ;;  %v1712_v34 = vsel %vm1680_vm3, 0.01, %v9435_v51  ;;  %v1717_v17 = vsel %vm1685_vm4, 0.01, %v9435_v51 }
 0x645   :  { %1797 = vperm.xlu1 %5586, %v1714_v60   ;;  %1791 = vperm.xlu2 %5585, %v1712_v34   ;;  %v1656_v60 = vadd.f32 %v1576_v37, %v1464_v6  ;;  %v1329_v34 = vperm.slane %v7061_v45, 2 }
 0x647   :  { %v1574_v43 = vpop.permute.xlu1 %1573  ;;  %vm1688_vm1 = vcmp.lt.f32.partialorder %v1656_v60, %v9442_v20  ;;  %v1371_v37 = vsub.f32 %v6781_v40, %v1329_v34  ;;  %v1330_v40 = vperm.slane %v7061_v45, 3 }
 0x648   :  { %v1655_v16 = vadd.f32 %v1574_v43, %v1463_v53  ;;  %v1566_v41 = vpop.permute.xlu0 %1565  ;;  %v1369_v53 = vsub.f32 %v7146_v50, %v1328_v24  ;;  %v1462_v43 = vmul.f32 %v1364_v15, %v1364_v15 }
 0x649   :  { %v1651_v62 = vadd.f32 %v1566_v41, %v1459_v59  ;;  %v1588_v15 = vpop.permute.xlu2 %1587 }
 0x64a   :  { %vm1687_vm14 = vcmp.lt.f32.partialorder %v1655_v16, %v9442_v20  ;;  %v1467_v6 = vmul.f32 %v1369_v53, %v1369_v53  ;;  %v7160_v53 = vld [vmem:[#allocation3 + $0xa8] sm:$0xff]  ;;  %v1331_v20 = vperm.slane %v7061_v45, 4 }
 0x64b   :  { %vm1683_vm15 = vcmp.lt.f32.partialorder %v1651_v62, %v9440_v58  ;;  %v1719_v12 = vsel %vm1687_vm14, 0.01, %v9435_v51  ;;  %v9443_v62 = vld [vmem:[#allocation44_spill] sm:$0xff] }
 0x64c   :  { %1812 = vperm.xlu0 %5584, %v1719_v12   ;;  %v1715_v3 = vsel %vm1683_vm15, 0.01, %v9435_v51  ;;  %v7154_v12 = vld [vmem:[#allocation3 + $0x80] sm:$0xff]  ;;  %v1659_v60 = vadd.f32 %v1582_v26, %v1467_v6  ;;  %v1374_v26 = vsub.f32 %v6806_v8, %v1330_v40  ;;  %v1332_v8 = vperm.slane %v7061_v45, 5 }
 0x64d   :  { %1806 = vperm.xlu1 %5586, %v1717_v17   ;;  %1800 = vperm.xlu2 %5585, %v1715_v3   ;;  %v1367_v17 = vsub.f32 %v7154_v12, %v1327_v31  ;;  %v1720_v3 = vsel %vm1688_vm1, 0.01, %v9435_v51 }
 0x64e   :  { %vm1691_vm4 = vcmp.lt.f32.partialorder %v1659_v60, %v9444_v30 }
 0x650   :  { %v1580_v59 = vpop.permute.xlu1 %1579 }
 0x651   :  { %v1572_v16 = vpop.permute.xlu0 %1571  ;;  %v1658_v41 = vadd.f32 %v1580_v59, %v1466_v57  ;;  %v1372_v59 = vsub.f32 %v7160_v53, %v1329_v34 }
 0x652   :  { %v1654_v32 = vadd.f32 %v1572_v16, %v1462_v43  ;;  %v1469_v43 = vmul.f32 %v1371_v37, %v1371_v37  ;;  %v1465_v16 = vmul.f32 %v1367_v17, %v1367_v17  ;;  %v1723_v17 = vsel %vm1691_vm4, 0.01, %v9435_v51 }
 0x653   :  { %vm1690_vm2 = vcmp.lt.f32.partialorder %v1658_v41, %v9443_v62  ;;  %v1470_v37 = vmul.f32 %v1372_v59, %v1372_v59  ;;  %v1472_v59 = vmul.f32 %v1374_v26, %v1374_v26 }
 0x654   :  { %vm1686_vm3 = vcmp.lt.f32.partialorder %v1654_v32, %v9441_v5  ;;  %v1722_v22 = vsel %vm1690_vm2, 0.01, %v9435_v51  ;;  %v9446_v5 = vld [vmem:[#allocation11_spill] sm:$0xff] }
 0x655   :  { %v1718_v57 = vsel %vm1686_vm3, 0.01, %v9435_v51  ;;  %1821 = vperm.xlu0 %5584, %v1722_v22   ;;  %1815 = vperm.xlu1 %5586, %v1720_v3   ;;  %v9445_v22 = vld [vmem:[#allocation10_spill] sm:$0xff]  ;;  %v7169_v3 = vld [vmem:[#allocation3 + $0x98] sm:$0xff]  ;;  %v1662_v60 = vadd.f32 %v1588_v15, %v1470_v37  ;;  %v1377_v15 = vsub.f32 %v6826_v48, %v1332_v8  ;;  %v1333_v48 = vperm.slane %v7061_v45, 6 }
 0x656   :  { %1809 = vperm.xlu2 %5585, %v1718_v57   ;;  %v1370_v34 = vsub.f32 %v7169_v3, %v1328_v24 }
 0x657   :  { %vm1694_vm1 = vcmp.lt.f32.partialorder %v1662_v60, %v9445_v22 }
 0x658   :  { %v1586_v41 = vpop.permute.xlu1 %1585 }
 0x659   :  { %v1578_v32 = vpop.permute.xlu0 %1577  ;;  %v1661_v31 = vadd.f32 %v1586_v41, %v1469_v43  ;;  %v1594_v43 = vpop.permute.xlu2 %1593  ;;  %v1468_v41 = vmul.f32 %v1370_v34, %v1370_v34  ;;  %v1726_v34 = vsel %vm1694_vm1, 0.01, %v9435_v51 }
 0x65a   :  { %v1657_v33 = vadd.f32 %v1578_v32, %v1465_v16  ;;  %v7175_v16 = vld [vmem:[#allocation3 + $0xc0] sm:$0xff] }
 0x65b   :  { %vm1693_vm14 = vcmp.lt.f32.partialorder %v1661_v31, %v9445_v22  ;;  %v9447_v22 = vld [vmem:[#allocation6_spill] sm:$0xff] }
 0x65c   :  { %vm1689_vm15 = vcmp.lt.f32.partialorder %v1657_v33, %v9443_v62  ;;  %v1725_v6 = vsel %vm1693_vm14, 0.01, %v9435_v51  ;;  %v1375_v33 = vsub.f32 %v7175_v16, %v1331_v20 }
 0x65d   :  { %v1721_v57 = vsel %vm1689_vm15, 0.01, %v9435_v51  ;;  %1830 = vperm.xlu0 %5584, %v1725_v6   ;;  %1824 = vperm.xlu1 %5586, %v1723_v17   ;;  %v7183_v6 = vld [vmem:[#allocation3 + $0xb0] sm:$0xff] }
 0x65e   :  { %1818 = vperm.xlu2 %5585, %v1721_v57   ;;  %v1473_v37 = vmul.f32 %v1375_v33, %v1375_v33  ;;  %v1373_v17 = vsub.f32 %v7183_v6, %v1330_v40  ;;  %v7189_v33 = vld [vmem:[#allocation3 + $0xd8] sm:$0xff] }
 0x660   :  { %v1592_v32 = vpop.permute.xlu1 %1591  ;;  %v1665_v60 = vadd.f32 %v1594_v43, %v1473_v37  ;;  %v9448_v43 = vld [vmem:[#allocation20_spill] sm:$0xff]  ;;  %v7195_v37 = vld [vmem:[#allocation3 + $0xe8] sm:$0xff] }
 0x661   :  { %v1584_v31 = vpop.permute.xlu0 %1583  ;;  %v1664_v24 = vadd.f32 %v1592_v32, %v1472_v59  ;;  %v1475_v59 = vmul.f32 %v1377_v15, %v1377_v15  ;;  %v1380_v15 = vsub.f32 %v7195_v37, %v1333_v48 }
 0x662   :  { %v1660_v62 = vadd.f32 %v1584_v31, %v1468_v41  ;;  %v1471_v41 = vmul.f32 %v1373_v17, %v1373_v17  ;;  %v1600_v31 = vpop.permute.xlu2 %1599  ;;  %vm1697_vm4 = vcmp.lt.f32.partialorder %v1665_v60, %v9447_v22  ;;  %v7200_v17 = vld [vmem:[#allocation3 + $0xc8] sm:$0xff] }
 0x663   :  { %vm1696_vm2 = vcmp.lt.f32.partialorder %v1664_v24, %v9446_v5  ;;  %v1729_v60 = vsel %vm1697_vm4, 0.01, %v9435_v51 }
 0x664   :  { %vm1692_vm3 = vcmp.lt.f32.partialorder %v1660_v62, %v9444_v30  ;;  %v1728_v26 = vsel %vm1696_vm2, 0.01, %v9435_v51  ;;  %v1378_v62 = vsub.f32 %v7189_v33, %v1332_v8 }
 0x665   :  { %v1724_v57 = vsel %vm1692_vm3, 0.01, %v9435_v51  ;;  %1839 = vperm.xlu0 %5584, %v1728_v26   ;;  %1833 = vperm.xlu1 %5586, %v1726_v34   ;;  %v1334_v26 = vperm.slane %v7061_v45, 7 }
 0x666   :  { %1827 = vperm.xlu2 %5585, %v1724_v57   ;;  %v1476_v34 = vmul.f32 %v1378_v62, %v1378_v62  ;;  %v1376_v57 = vsub.f32 %v7200_v17, %v1331_v20 }
 0x668   :  { %v1598_v32 = vpop.permute.xlu1 %1597  ;;  %v1668_v45 = vadd.f32 %v1600_v31, %v1476_v34 }
 0x669   :  { %v1590_v24 = vpop.permute.xlu0 %1589  ;;  %v1667_v40 = vadd.f32 %v1598_v32, %v1475_v59  ;;  %v7205_v32 = vld [vmem:[#allocation3 + $0xf0] sm:$0xff] }
 0x66a   :  { %v1663_v30 = vadd.f32 %v1590_v24, %v1471_v41  ;;  %v1478_v41 = vmul.f32 %v1380_v15, %v1380_v15  ;;  %v1381_v62 = vsub.f32 %v7205_v32, %v1334_v26  ;;  %vm1700_vm1 = vcmp.lt.f32.partialorder %v1668_v45, %v9448_v43  ;;  %v1606_v58 = vpop.permute.xlu2 %1605  ;;  %v7212_v15 = vld [vmem:[#allocation3 + $0xe0] sm:$0xff] }
 0x66b   :  { %vm1699_vm14 = vcmp.lt.f32.partialorder %v1667_v40, %v9448_v43  ;;  %v1379_v34 = vsub.f32 %v7212_v15, %v1333_v48 }
 0x66c   :  { %vm1695_vm15 = vcmp.lt.f32.partialorder %v1663_v30, %v9446_v5  ;;  %v1731_v8 = vsel %vm1699_vm14, 0.01, %v9435_v51  ;;  %v1474_v30 = vmul.f32 %v1376_v57, %v1376_v57  ;;  %v1479_v39 = vmul.f32 %v1381_v62, %v1381_v62  ;;  %v7219_v62 = vld [vmem:[#allocation3 + $0xf8] sm:$0xff] }
 0x66d   :  { %v1727_v59 = vsel %vm1695_vm15, 0.01, %v9435_v51  ;;  %1848 = vperm.xlu0 %5584, %v1731_v8   ;;  %1842 = vperm.xlu1 %5586, %v1729_v60   ;;  %v1732_v8 = vsel %vm1700_vm1, 0.01, %v9435_v51  ;;  %9451 = vst [vmem:[#allocation9_spill] sm:$0xff] %v7219_v62  ;;  %vm1931_vm1 = vcmp.gt.f32.partialorder %v6938_v29, 0.0 }
 0x66e   :  { %1836 = vperm.xlu2 %5585, %v1727_v59   ;;  %v1671_v60 = vadd.f32 %v1606_v58, %v1479_v39  ;;  %v1477_v59 = vmul.f32 %v1379_v34, %v1379_v34 }
 0x670   :  { %v1604_v24 = vpop.permute.xlu1 %1603 }
 0x671   :  { %v1596_v40 = vpop.permute.xlu0 %1595  ;;  %v1670_v5 = vadd.f32 %v1604_v24, %v1478_v41 }
 0x672   :  { %v1666_v20 = vadd.f32 %v1596_v40, %v1474_v30  ;;  %v1382_v30 = vsub.f32 %v7219_v62, %v1334_v26 }
 0x673   :  { %vm1702_vm2 = vcmp.lt.f32.partialorder %v1670_v5, %v9449_v52  ;;  %v9450_v5 = vld [vmem:[#allocation18_spill] sm:$0xff] }
 0x674   :  { %vm1698_vm3 = vcmp.lt.f32.partialorder %v1666_v20, %v9447_v22  ;;  %v1734_v31 = vsel %vm1702_vm2, 0.01, %v9435_v51  ;;  %vm1703_vm4 = vcmp.lt.f32.partialorder %v1671_v60, %v9450_v5  ;;  %v1480_v39 = vmul.f32 %v1382_v30, %v1382_v30 }
 0x675   :  { %v1730_v57 = vsel %vm1698_vm3, 0.01, %v9435_v51  ;;  %1857 = vperm.xlu0 %5584, %v1734_v31   ;;  %1851 = vperm.xlu1 %5586, %v1732_v8   ;;  %v1735_v48 = vsel %vm1703_vm4, 0.01, %v9435_v51  ;;  %vm1932_vm2 = vcmp.gt.f32.partialorder %v6964_v28, 0.0 }
 0x676   :  { %1845 = vperm.xlu2 %5585, %v1730_v57  }
 0x679   :  { %v1602_v45 = vpop.permute.xlu0 %1601 }
 0x67a   :  { %v1669_v41 = vadd.f32 %v1602_v45, %v1477_v59 }
 0x67c   :  { %vm1701_vm14 = vcmp.lt.f32.partialorder %v1669_v41, %v9449_v52 }
 0x67d   :  { %v1733_v24 = vsel %vm1701_vm14, 0.01, %v9435_v51  ;;  %1860 = vperm.xlu1 %5586, %v1735_v48  }
 0x67e   :  { %1854 = vperm.xlu2 %5585, %v1733_v24  }
 0x681   :  { %v1608_v58 = vpop.permute.xlu0 %1607 }
 0x682   :  { %v1672_v40 = vadd.f32 %v1608_v58, %v1480_v39 }
 0x684   :  { %vm1704_vm15 = vcmp.lt.f32.partialorder %v1672_v40, %v9450_v5 }
 0x685   :  { %v1736_v20 = vsel %vm1704_vm15, 0.01, %v9435_v51 }
 0x686   :  { %1863 = vperm.xlu2 %5585, %v1736_v20   ;;  %v1774_v31 = vpop.permute.xlu2 %1773 }
 0x687   :  { %v1866_v43 = vperm.slane %v1774_v31, %v6231_v13 }
 0x689   :  { %v1777_v8 = vpop.permute.xlu0 %1776 }
 0x68a   :  { %v1868_v40 = vperm.slane %v1777_v8, %v6143_v47 }
 0x697   :  { %v1783_v34 = vpop.permute.xlu2 %1782 }
 0x698   :  { %v1871_v51 = vperm.slane %v1783_v34, %v6143_v47 }
 0x69f   :  { %v1771_v57 = vpop.permute.xlu1 %1770  ;;  %v1792_v60 = vpop.permute.xlu2 %1791 }
 0x6a0   :  { %v1865_v20 = vperm.slane %v1771_v57, %v6143_v47  ;;  %v1875_v8 = vperm.slane %v1792_v60, %v6231_v13 }
 0x6a2   :  { %v1867_v62 = vsel %vm313_vm5, %v1866_v43, %v1865_v20 }
 0x6a6   :  { %v1786_v26 = vpop.permute.xlu0 %1785 }
 0x6a7   :  { %v1780_v59 = vpop.permute.xlu1 %1779  ;;  %v1801_v45 = vpop.permute.xlu2 %1800  ;;  %v1872_v5 = vperm.slane %v1786_v26, %v6231_v13 }
 0x6a8   :  { %v1869_v39 = vperm.slane %v1780_v59, %v6231_v13 }
 0x6a9   :  { %v1873_v26 = vsel %vm313_vm5, %v1872_v5, %v1871_v51 }
 0x6aa   :  { %v1870_v22 = vsel %vm313_vm5, %v1869_v39, %v1868_v40 }
 0x6ab   :  { %v1913_v57 = vsel %vm360_vm6, %v1870_v22, %v1867_v62 }
 0x6ac   :  { %v1914_v43 = vsel %vm362_vm7, %v1873_v26, %v1913_v57 }
 0x6ae   :  { %v1795_v41 = vpop.permute.xlu0 %1794 }
 0x6af   :  { %v1789_v52 = vpop.permute.xlu1 %1788  ;;  %v1877_v31 = vperm.slane %v1795_v41, %v6143_v47 }
 0x6b0   :  { %v1810_v48 = vpop.permute.xlu2 %1809  ;;  %v1874_v44 = vperm.slane %v1789_v52, %v6143_v47 }
 0x6b1   :  { %v1884_v22 = vperm.slane %v1810_v48, %v6231_v13 }
 0x6b2   :  { %v1876_v39 = vsel %vm313_vm5, %v1875_v8, %v1874_v44 }
 0x6b3   :  { %v1915_v60 = vsel %vm364_vm8, %v1876_v39, %v1914_v43 }
 0x6b6   :  { %v1804_v24 = vpop.permute.xlu0 %1803 }
 0x6b7   :  { %v1798_v30 = vpop.permute.xlu1 %1797  ;;  %v1881_v52 = vperm.slane %v1804_v24, %v6231_v13 }
 0x6b8   :  { %v7227_v58 = vpop.permute.xlu2 %1818  ;;  %v1878_v4 = vperm.slane %v1798_v30, %v6231_v13  ;;  %v1880_v30 = vperm.slane %v1801_v45, %v6143_v47 }
 0x6ba   :  { %v1879_v40 = vsel %vm313_vm5, %v1878_v4, %v1877_v31  ;;  %v1882_v5 = vsel %vm313_vm5, %v1881_v52, %v1880_v30 }
 0x6bb   :  { %v1916_v51 = vsel %vm366_vm9, %v1879_v40, %v1915_v60 }
 0x6bc   :  { %v1917_v45 = vsel %vm368_vm10, %v1882_v5, %v1916_v51 }
 0x6be   :  { %v1813_v7 = vpop.permute.xlu0 %1812 }
 0x6bf   :  { %v1807_v59 = vpop.permute.xlu1 %1806  ;;  %v1886_v4 = vperm.slane %v1813_v7, %v6143_v47 }
 0x6c0   :  { %v1883_v34 = vperm.slane %v1807_v59, %v6143_v47  ;;  %v1828_v62 = vpop.permute.xlu2 %1827 }
 0x6c1   :  { %v1893_v29 = vperm.slane %v1828_v62, %v6231_v13 }
 0x6c2   :  { %v1885_v41 = vsel %vm313_vm5, %v1884_v22, %v1883_v34 }
 0x6c3   :  { %v1918_v59 = vsel %vm370_vm11, %v1885_v41, %v1917_v45 }
 0x6c7   :  { %v1822_v44 = vpop.permute.xlu0 %1821  ;;  %v1816_v24 = vpop.permute.xlu1 %1815 }
 0x6c8   :  { %v1887_v20 = vperm.slane %v1816_v24, %v6231_v13  ;;  %v1837_v39 = vpop.permute.xlu2 %1836  ;;  %v1890_v5 = vperm.slane %v1822_v44, %v6231_v13  ;;  %v1889_v24 = vperm.slane %v7227_v58, %v6143_v47 }
 0x6ca   :  { %v1888_v8 = vsel %vm313_vm5, %v1887_v20, %v1886_v4  ;;  %v1891_v62 = vsel %vm313_vm5, %v1890_v5, %v1889_v24 }
 0x6cb   :  { %v1919_v48 = vsel %vm9317_vm12, %v1888_v8, %v1918_v59 }
 0x6cc   :  { %v1929_v57 = vmul.f32 %v1919_v48, %v6889_v14  ;;  %v1898_v48 = vperm.slane %v1837_v39, %v6143_v47 }
 0x6ce   :  { %v7261_v26 = vsel %vm1931_vm1, -1.0, %v1929_v57 }
 0x6cf   :  { %v1831_v31 = vpop.permute.xlu0 %1830  ;;  %v1825_v52 = vpop.permute.xlu1 %1824  ;;  %v1935_v7 = vsel %vm76_vm0, %v7261_v26, -inf }
 0x6d0   :  { %1936 = vmax.xlane.f32.xlu0 %v1935_v7  ;;  %v1846_v30 = vpop.permute.xlu2 %1845  ;;  %v1892_v22 = vperm.slane %v1825_v52, %v6143_v47  ;;  %v1895_v41 = vperm.slane %v1831_v31, %v6143_v47 }
 0x6d1   :  { %v1902_v58 = vperm.slane %v1846_v30, %v6231_v13 }
 0x6d2   :  { %v1894_v4 = vsel %vm313_vm5, %v1893_v29, %v1892_v22 }
 0x6d3   :  { %v1920_v31 = vsel %vm360_vm6, %v1894_v4, %v1891_v62 }
 0x6d7   :  { %v1840_v40 = vpop.permute.xlu0 %1839  ;;  %v1834_v34 = vpop.permute.xlu1 %1833 }
 0x6d8   :  { %v1896_v14 = vperm.slane %v1834_v34, %v6231_v13  ;;  %v1855_v51 = vpop.permute.xlu2 %1854  ;;  %v1899_v20 = vperm.slane %v1840_v40, %v6231_v13 }
 0x6d9   :  { %v1907_v22 = vperm.slane %v1855_v51, %v6143_v47 }
 0x6da   :  { %v1897_v45 = vsel %vm313_vm5, %v1896_v14, %v1895_v41  ;;  %v1900_v7 = vsel %vm313_vm5, %v1899_v20, %v1898_v48 }
 0x6db   :  { %v1921_v52 = vsel %vm362_vm7, %v1897_v45, %v1920_v31 }
 0x6dc   :  { %v1922_v14 = vsel %vm364_vm8, %v1900_v7, %v1921_v52 }
 0x6df   :  { %v1849_v43 = vpop.permute.xlu0 %1848  ;;  %v1843_v60 = vpop.permute.xlu1 %1842 }
 0x6e0   :  { %v1901_v59 = vperm.slane %v1843_v60, %v6143_v47  ;;  %v1904_v40 = vperm.slane %v1849_v43, %v6143_v47  ;;  %v1864_v29 = vpop.permute.xlu2 %1863 }
 0x6e1   :  { %v1911_v43 = vperm.slane %v1864_v29, %v6231_v13 }
 0x6e2   :  { %v1903_v34 = vsel %vm313_vm5, %v1902_v58, %v1901_v59 }
 0x6e3   :  { %v1923_v5 = vsel %vm366_vm9, %v1903_v34, %v1922_v14 }
 0x6e7   :  { %v1852_v8 = vpop.permute.xlu1 %1851  ;;  %v1858_v57 = vpop.permute.xlu0 %1857 }
 0x6e8   :  { %v1905_v44 = vperm.slane %v1852_v8, %v6231_v13  ;;  %v1908_v60 = vperm.slane %v1858_v57, %v6231_v13 }
 0x6ea   :  { %v1906_v39 = vsel %vm313_vm5, %v1905_v44, %v1904_v40  ;;  %v1909_v41 = vsel %vm313_vm5, %v1908_v60, %v1907_v22 }
 0x6eb   :  { %v1924_v30 = vsel %vm368_vm10, %v1906_v39, %v1923_v5 }
 0x6ec   :  { %v1925_v20 = vsel %vm370_vm11, %v1909_v41, %v1924_v30 }
 0x6ef   :  { %v1861_v24 = vpop.permute.xlu1 %1860 }
 0x6f0   :  { %v1910_v4 = vperm.slane %v1861_v24, %v6143_v47 }
 0x6f2   :  { %v1912_v45 = vsel %vm313_vm5, %v1911_v43, %v1910_v4 }
 0x6f3   :  { %v1926_v51 = vsel %vm9317_vm12, %v1912_v45, %v1925_v20 }
 0x6f4   :  { %v1930_v59 = vmul.f32 %v1926_v51, %v6926_v61 }
 0x6f6   :  { %v7299_v8 = vsel %vm1932_vm2, -1.0, %v1930_v59 }
 0x6f7   :  { %v1938_v48 = vsel %vm76_vm0, %v7299_v8, -inf }
 0x6f8   :  { %1939 = vmax.xlane.f32.xlu1 %v1938_v48 }
 0x743   :  { %v1937_v62 = vpop.xlane.xlu0 %1936 }
 0x744   :  { %vm1941_vm3 = vcmp.eq.f32.partialorder %v7261_v26, %v1937_v62 }
 0x745   :  { %v1943_v44 = vsel %vm1941_vm3, %v6143_v47, 16 }
 0x746   :  { %v1945_v57 = vsel %vm76_vm0, %v1943_v44, 2147483647 }
 0x747   :  { %v1947_v31 = vshra.s32 %v1945_v57, 16  ;;  %v1946_v34 = vand.u32 65535, %v1945_v57 }
 0x749   :  { %v1949_v58 = vcvt.s32.f32 %v1947_v31  ;;  %v1948_v39 = vcvt.s32.f32 %v1946_v34 }
 0x74b   :  { %1950 = vmin.xlane.f32.xlu2 %v1949_v58 }
 0x76b   :  { %v1940_v52 = vpop.xlane.xlu1 %1939 }
 0x76c   :  { %vm1942_vm4 = vcmp.eq.f32.partialorder %v7299_v8, %v1940_v52 }
 0x76d   :  { %v1944_v61 = vsel %vm1942_vm4, %v6143_v47, 16 }
 0x76e   :  { %v1960_v28 = vsel %vm76_vm0, %v1944_v61, 2147483647 }
 0x76f   :  { %v1962_v7 = vshra.s32 %v1960_v28, 16  ;;  %v1961_v14 = vand.u32 65535, %v1960_v28 }
 0x771   :  { %v1964_v40 = vcvt.s32.f32 %v1962_v7  ;;  %v1963_v5 = vcvt.s32.f32 %v1961_v14 }
 0x773   :  { %1965 = vmin.xlane.f32.xlu1 %v1964_v40 }
 0x7be   :  { %v1951_v60 = vpop.xlane.xlu2 %1950 }
 0x7bf   :  { %vm1952_vm14 = vcmp.eq.f32.partialorder %v1949_v58, %v1951_v60  ;;  %v1957_v41 = vcvt.f32.s32 %v1951_v60 }
 0x7c0   :  { %v1953_v22 = vsel %vm1952_vm14, %v1948_v39, inf }
 0x7c1   :  { %1954 = vmin.xlane.f32.xlu0 %v1953_v22  ;;  %v1958_v43 = vshll.u32 %v1957_v41, 16 }
 0x7e6   :  { %v1966_v29 = vpop.xlane.xlu1 %1965 }
 0x7e7   :  { %vm1967_vm15 = vcmp.eq.f32.partialorder %v1964_v40, %v1966_v29  ;;  %v1972_v7 = vcvt.f32.s32 %v1966_v29 }
 0x7e8   :  { %v1968_v30 = vsel %vm1967_vm15, %v1963_v5, inf }
 0x7e9   :  { %1969 = vmin.xlane.f32.xlu2 %v1968_v30  ;;  %v1973_v34 = vshll.u32 %v1972_v7, 16 }
 0x834   :  { %v1955_v24 = vpop.xlane.xlu0 %1954 }
 0x835   :  { %v1956_v4 = vcvt.f32.s32 %v1955_v24 }
 0x837   :  { %v1959_v20 = vadd.s32 %v1958_v43, %v1956_v4 }
 0x839   :  { %vm1975_vm1 = vcmp.eq.s32.totalorder %v6143_v47, %v1959_v20 }
 0x83a   :  { %v7311_v45 = vsel %vm1975_vm1, 1.0, %v9431_v54 }
 0x83b   :  { %v1983_v51 = vrot.slane %v7311_v45, 1  ;;  %v1984_v59 = vrot.slane %v7311_v45, 2  ;;  %v1985_v48 = vrot.slane %v7311_v45, 3  ;;  %2011 = vst.msk [vmem:[#allocation2 + $0x2] sm:$0x1] %vm165_vm13, %v7311_v45  ;;  %v1986_v62 = vrot.slane %v7311_v45, 4 }
 0x83c   :  { %v2035_v44 = vmul.f32 %v7311_v45, %v6509_v63  ;;  %v1987_v57 = vrot.slane %v7311_v45, 5  ;;  %v2027_v31 = vmul.f32 %v7311_v45, %v6350_v18  ;;  %v1988_v58 = vrot.slane %v7311_v45, 6 }
 0x83d   :  { %2012 = vst.msk [vmem:[#allocation2 + $0xa] sm:$0x1] %vm165_vm13, %v1983_v51  ;;  %v1989_v61 = vrot.slane %v7311_v45, 7 }
 0x83e   :  { %v2037_v52 = vsel %vm76_vm0, %v2035_v44, 0.0  ;;  %2013 = vst.msk [vmem:[#allocation2 + $0x12] sm:$0x1] %vm165_vm13, %v1984_v59  ;;  %v2029_v28 = vsel %vm76_vm0, %v2027_v31, 0.0 }
 0x83f   :  { %2038 = vadd.xlane.f32.xlu2 %v2037_v52  ;;  %2014 = vst.msk [vmem:[#allocation2 + $0x1a] sm:$0x1] %vm165_vm13, %v1985_v48  ;;  %2030 = vadd.xlane.f32.xlu0 %v2029_v28 }
 0x840   :  { %2015 = vst.msk [vmem:[#allocation2 + $0x22] sm:$0x1] %vm165_vm13, %v1986_v62 }
 0x841   :  { %2016 = vst.msk [vmem:[#allocation2 + $0x2a] sm:$0x1] %vm165_vm13, %v1987_v57 }
 0x842   :  { %2017 = vst.msk [vmem:[#allocation2 + $0x32] sm:$0x1] %vm165_vm13, %v1988_v58 }
 0x843   :  { %2018 = vst.msk [vmem:[#allocation2 + $0x3a] sm:$0x1] %vm165_vm13, %v1989_v61 }
 0x85c   :  { %v1970_v40 = vpop.xlane.xlu2 %1969 }
 0x85d   :  { %v1971_v60 = vcvt.f32.s32 %v1970_v40 }
 0x85f   :  { %v1974_v39 = vadd.s32 %v1973_v34, %v1971_v60 }
 0x861   :  { %vm1976_vm2 = vcmp.eq.s32.totalorder %v6143_v47, %v1974_v39 }
 0x862   :  { %v7337_v22 = vsel %vm1976_vm2, 1.0, %v9431_v54 }
 0x863   :  { %v1990_v14 = vrot.slane %v7337_v22, 1  ;;  %v1991_v5 = vrot.slane %v7337_v22, 2  ;;  %v1992_v30 = vrot.slane %v7337_v22, 3  ;;  %2019 = vst.msk [vmem:[#allocation2 + $0x42] sm:$0x1] %vm165_vm13, %v7337_v22  ;;  %v1993_v29 = vrot.slane %v7337_v22, 4 }
 0x864   :  { %v2028_v41 = vmul.f32 %v7337_v22, %v6480_v23  ;;  %v1994_v24 = vrot.slane %v7337_v22, 5  ;;  %v2036_v43 = vmul.f32 %v7337_v22, %v6471_v25  ;;  %v1995_v4 = vrot.slane %v7337_v22, 6 }
 0x865   :  { %2020 = vst.msk [vmem:[#allocation2 + $0x4a] sm:$0x1] %vm165_vm13, %v1990_v14  ;;  %v1996_v51 = vrot.slane %v7337_v22, 7 }
 0x866   :  { %v2032_v20 = vsel %vm76_vm0, %v2028_v41, 0.0  ;;  %2021 = vst.msk [vmem:[#allocation2 + $0x52] sm:$0x1] %vm165_vm13, %v1991_v5  ;;  %v2040_v59 = vsel %vm76_vm0, %v2036_v43, 0.0 }
 0x867   :  { %2033 = vadd.xlane.f32.xlu1 %v2032_v20  ;;  %2022 = vst.msk [vmem:[#allocation2 + $0x5a] sm:$0x1] %vm165_vm13, %v1992_v30  ;;  %2041 = vadd.xlane.f32.xlu0 %v2040_v59 }
 0x868   :  { %2023 = vst.msk [vmem:[#allocation2 + $0x62] sm:$0x1] %vm165_vm13, %v1993_v29 }
 0x869   :  { %2024 = vst.msk [vmem:[#allocation2 + $0x6a] sm:$0x1] %vm165_vm13, %v1994_v24 }
 0x86a   :  { %2025 = vst.msk [vmem:[#allocation2 + $0x72] sm:$0x1] %vm165_vm13, %v1995_v4 }
 0x86b   :  { %2026 = vst.msk [vmem:[#allocation2 + $0x7a] sm:$0x1] %vm165_vm13, %v1996_v51 }
 0x8b2   :  { %v2039_v48 = vpop.xlane.xlu2 %2038  ;;  %v7385_v59 = vpop.xlane.xlu0 %2030 }
 0x8b3   :  { %v2111_v62 = vperm.slane %v2039_v48, 0  ;;  %v2112_v44 = vperm.slane %v2039_v48, 1  ;;  %v2113_v7 = vperm.slane %v2039_v48, 2  ;;  %v2114_v39 = vperm.slane %v2039_v48, 3 }
 0x8b4   :  { %v2115_v14 = vperm.slane %v2039_v48, 4  ;;  %v2117_v20 = vperm.slane %v2039_v48, 6  ;;  %v2118_v51 = vperm.slane %v2039_v48, 7 }
 0x8b5   :  { %v2144_v57 = vsub.f32 %v7063_v9, %v2111_v62  ;;  %v2143_v31 = vsub.f32 %v7066_v27, %v2111_v62  ;;  %v2145_v58 = vsub.f32 %v7054_v21, %v2112_v44  ;;  %v2146_v40 = vsub.f32 %v7077_v11, %v2112_v44 }
 0x8b6   :  { %v2147_v34 = vsub.f32 %v7091_v46, %v2113_v7  ;;  %v2148_v9 = vsub.f32 %v7071_v56, %v2113_v7  ;;  %v2149_v5 = vsub.f32 %v7082_v49, %v2114_v39  ;;  %v2150_v30 = vsub.f32 %v7107_v0, %v2114_v39 }
 0x8b7   :  { %v2208_v52 = vmul.f32 %v2144_v57, %v2144_v57  ;;  %v2207_v61 = vmul.f32 %v2143_v31, %v2143_v31  ;;  %v2209_v28 = vmul.f32 %v2145_v58, %v2145_v58  ;;  %v2210_v60 = vmul.f32 %v2146_v40, %v2146_v40 }
 0x8b8   :  { %v2211_v27 = vmul.f32 %v2147_v34, %v2147_v34  ;;  %v2212_v21 = vmul.f32 %v2148_v9, %v2148_v9  ;;  %v2151_v11 = vsub.f32 %v7086_v10, %v2115_v14  ;;  %v2213_v46 = vmul.f32 %v2149_v5, %v2149_v5  ;;  %v7400_v34 = vld [vmem:[#allocation3 + $0xa0] sm:$0xff] }
 0x8b9   :  { %2273 = vrot.lane.b32.xlu2 %v2208_v52, %s5883_s0  ;;  %2271 = vrot.lane.b32.xlu1 %v2207_v61, %s5883_s0  ;;  %v2214_v29 = vmul.f32 %v2150_v30, %v2150_v30  ;;  %v2116_v56 = vperm.slane %v2039_v48, 5  ;;  %v2152_v24 = vsub.f32 %v7096_v55, %v2115_v14  ;;  %v2155_v62 = vsub.f32 %v7113_v2, %v2117_v20 }
 0x8ba   :  { %2275 = vrot.lane.b32.xlu0 %v2209_v28, %s5883_s0  ;;  %v2215_v41 = vmul.f32 %v2151_v11, %v2151_v11  ;;  %v2156_v55 = vsub.f32 %v7140_v42, %v2117_v20  ;;  %v2158_v31 = vsub.f32 %v7128_v38, %v2118_v51 }
 0x8bb   :  { %v2153_v43 = vsub.f32 %v7123_v35, %v2116_v56  ;;  %v2154_v49 = vsub.f32 %v7102_v19, %v2116_v56  ;;  %v2216_v4 = vmul.f32 %v2152_v24, %v2152_v24  ;;  %v2157_v35 = vsub.f32 %v7118_v36, %v2118_v51 }
 0x8bc   :  { %v2219_v19 = vmul.f32 %v2155_v62, %v2155_v62  ;;  %v2220_v44 = vmul.f32 %v2156_v55, %v2156_v55  ;;  %v2222_v42 = vmul.f32 %v2158_v31, %v2158_v31  ;;  %v9452_v55 = vld [vmem:[#allocation9_spill] sm:$0xff] }
 0x8bd   :  { %v2217_v0 = vmul.f32 %v2153_v43, %v2153_v43  ;;  %v2218_v10 = vmul.f32 %v2154_v49, %v2154_v49  ;;  %v2221_v57 = vmul.f32 %v2157_v35, %v2157_v35 }
 0x8c1   :  { %2277 = vrot.lane.b32.xlu2 %v2210_v60, %s5883_s0  ;;  %2279 = vrot.lane.b32.xlu1 %v2211_v27, %s5883_s0 }
 0x8c2   :  { %2281 = vrot.lane.b32.xlu0 %v2212_v21, %s5883_s0  ;;  %v7408_v21 = vld [vmem:[#allocation3 + $0xb8] sm:$0xff] }
 0x8c9   :  { %2283 = vrot.lane.b32.xlu2 %v2213_v46, %s5883_s0  ;;  %2285 = vrot.lane.b32.xlu1 %v2214_v29, %s5883_s0 }
 0x8ca   :  { %2287 = vrot.lane.b32.xlu0 %v2215_v41, %s5883_s0 }
 0x8d1   :  { %2289 = vrot.lane.b32.xlu2 %v2216_v4, %s5883_s0  ;;  %2291 = vrot.lane.b32.xlu1 %v2217_v0, %s5883_s0 }
 0x8d2   :  { %2293 = vrot.lane.b32.xlu0 %v2218_v10, %s5883_s0 }
 0x8d9   :  { %2295 = vrot.lane.b32.xlu2 %v2219_v19, %s5883_s0  ;;  %2297 = vrot.lane.b32.xlu1 %v2220_v44, %s5883_s0 }
 0x8da   :  { %2299 = vrot.lane.b32.xlu0 %v2221_v57, %s5883_s0  ;;  %v2042_v48 = vpop.xlane.xlu0 %2041 }
 0x8db   :  { %v2119_v58 = vperm.slane %v2042_v48, 0  ;;  %v2120_v61 = vperm.slane %v2042_v48, 1  ;;  %v2121_v7 = vperm.slane %v2042_v48, 2  ;;  %v2122_v27 = vperm.slane %v2042_v48, 3 }
 0x8dc   :  { %v2124_v46 = vperm.slane %v2042_v48, 5  ;;  %v2125_v49 = vperm.slane %v2042_v48, 6  ;;  %v2126_v10 = vperm.slane %v2042_v48, 7 }
 0x8dd   :  { %v2160_v52 = vsub.f32 %v7134_v1, %v2119_v58  ;;  %v2159_v2 = vsub.f32 %v7154_v12, %v2119_v58  ;;  %v2161_v40 = vsub.f32 %v7146_v50, %v2120_v61  ;;  %v2163_v38 = vsub.f32 %v7400_v34, %v2121_v7  ;;  %v9453_v58 = vld [vmem:[#allocation49_spill] sm:$0xff] }
 0x8de   :  { %v2162_v1 = vsub.f32 %v7169_v3, %v2120_v61  ;;  %v2164_v39 = vsub.f32 %v7160_v53, %v2121_v7  ;;  %v2166_v50 = vsub.f32 %v7408_v21, %v2122_v27  ;;  %v2165_v14 = vsub.f32 %v7183_v6, %v2122_v27  ;;  %v7416_v53 = vld [vmem:[#allocation3 + $0xd0] sm:$0xff] }
 0x8df   :  { %v2224_v36 = vmul.f32 %v2160_v52, %v2160_v52  ;;  %v2223_v28 = vmul.f32 %v2159_v2, %v2159_v2  ;;  %v2225_v12 = vmul.f32 %v2161_v40, %v2161_v40  ;;  %v2227_v9 = vmul.f32 %v2163_v38, %v2163_v38  ;;  %v7445_v40 = vld [vmem:[#allocation3 + $0x10] sm:$0xff] }
 0x8e0   :  { %v2226_v60 = vmul.f32 %v2162_v1, %v2162_v1  ;;  %v2228_v5 = vmul.f32 %v2164_v39, %v2164_v39  ;;  %v2123_v3 = vperm.slane %v2042_v48, 4  ;;  %v2230_v30 = vmul.f32 %v2166_v50, %v2166_v50  ;;  %v7448_v1 = vld [vmem:[#allocation3 + $0x18] sm:$0xff] }
 0x8e1   :  { %2301 = vrot.lane.b32.xlu2 %v2222_v42, %s5883_s0  ;;  %2303 = vrot.lane.b32.xlu1 %v2223_v28, %s5883_s0  ;;  %v2229_v11 = vmul.f32 %v2165_v14, %v2165_v14  ;;  %v2169_v56 = vsub.f32 %v7416_v53, %v2124_v46  ;;  %v2170_v4 = vsub.f32 %v7189_v33, %v2124_v46  ;;  %v7439_v42 = vpop.xlane.xlu1 %2033  ;;  %v2046_v61 = vperm.slane %v7385_v59, 1  ;;  %v7442_v28 = vld [vmem:[#allocation3] sm:$0xff] }
 0x8e2   :  { %2305 = vrot.lane.b32.xlu0 %v2224_v36, %s5883_s0  ;;  %v2167_v29 = vsub.f32 %v7175_v16, %v2123_v3  ;;  %v2168_v41 = vsub.f32 %v7200_v17, %v2123_v3  ;;  %v2172_v16 = vsub.f32 %v7195_v37, %v2125_v49  ;;  %v2171_v0 = vsub.f32 %v7212_v15, %v2125_v49  ;;  %v7434_v15 = vld [vmem:[#allocation3 + $0x8] sm:$0xff] }
 0x8e3   :  { %v2233_v24 = vmul.f32 %v2169_v56, %v2169_v56  ;;  %v2234_v20 = vmul.f32 %v2170_v4, %v2170_v4  ;;  %v2173_v62 = vsub.f32 %v7205_v32, %v2126_v10  ;;  %v2174_v35 = vsub.f32 %v9452_v55, %v2126_v10  ;;  %v9455_v56 = vld [vmem:[#allocation43_spill] sm:$0xff]  ;;  %v7463_v4 = vld [vmem:[#allocation3 + $0x30] sm:$0xff] }
 0x8e4   :  { %v2231_v6 = vmul.f32 %v2167_v29, %v2167_v29  ;;  %v2232_v43 = vmul.f32 %v2168_v41, %v2168_v41  ;;  %v2236_v51 = vmul.f32 %v2172_v16, %v2172_v16  ;;  %v2235_v17 = vmul.f32 %v2171_v0, %v2171_v0 }
 0x8e5   :  { %v2237_v19 = vmul.f32 %v2173_v62, %v2173_v62  ;;  %v2238_v33 = vmul.f32 %v2174_v35, %v2174_v35  ;;  %v2045_v37 = vperm.slane %v7385_v59, 0  ;;  %v9454_v32 = vmov 1.0  }
 0x8e6   :  { %v2079_v38 = vsub.f32 %v7445_v40, %v2046_v61 }
 0x8e7   :  { %v2078_v44 = vsub.f32 %v7434_v15, %v2045_v37  ;;  %v2077_v7 = vsub.f32 %v7442_v28, %v2045_v37 }
 0x8e8   :  { %v2177_v39 = vmul.f32 %v2079_v38, %v2079_v38 }
 0x8e9   :  { %2307 = vrot.lane.b32.xlu2 %v2225_v12, %s5883_s0  ;;  %2309 = vrot.lane.b32.xlu1 %v2226_v60, %s5883_s0  ;;  %v2176_v57 = vmul.f32 %v2078_v44, %v2078_v44  ;;  %v2080_v12 = vsub.f32 %v7448_v1, %v2046_v61  ;;  %v2047_v60 = vperm.slane %v7385_v59, 2 }
 0x8ea   :  { %2311 = vrot.lane.b32.xlu0 %v2227_v9, %s5883_s0  ;;  %v2175_v9 = vmul.f32 %v2077_v7, %v2077_v7  ;;  %v7479_v7 = vld [vmem:[#allocation3 + $0x48] sm:$0xff] }
 0x8eb   :  { %v2178_v3 = vmul.f32 %v2080_v12, %v2080_v12 }
 0x8f1   :  { %2313 = vrot.lane.b32.xlu2 %v2228_v5, %s5883_s0  ;;  %2315 = vrot.lane.b32.xlu1 %v2229_v11, %s5883_s0  ;;  %v7454_v11 = vld [vmem:[#allocation3 + $0x20] sm:$0xff] }
 0x8f2   :  { %2317 = vrot.lane.b32.xlu0 %v2230_v30, %s5883_s0  ;;  %v2048_v30 = vperm.slane %v7385_v59, 3  ;;  %v2081_v46 = vsub.f32 %v7454_v11, %v2047_v60 }
 0x8f4   :  { %v2083_v16 = vsub.f32 %v7463_v4, %v2048_v30  ;;  %v2179_v0 = vmul.f32 %v2081_v46, %v2081_v46 }
 0x8f6   :  { %v2181_v35 = vmul.f32 %v2083_v16, %v2083_v16 }
 0x8f9   :  { %2319 = vrot.lane.b32.xlu2 %v2231_v6, %s5883_s0  ;;  %2321 = vrot.lane.b32.xlu1 %v2232_v43, %s5883_s0  ;;  %v7459_v6 = vld [vmem:[#allocation3 + $0x28] sm:$0xff] }
 0x8fa   :  { %2323 = vrot.lane.b32.xlu0 %v2233_v24, %s5883_s0  ;;  %v2082_v24 = vsub.f32 %v7459_v6, %v2047_v60 }
 0x901   :  { %2325 = vrot.lane.b32.xlu2 %v2234_v20, %s5883_s0  ;;  %2327 = vrot.lane.b32.xlu1 %v2235_v17, %s5883_s0  ;;  %v2049_v20 = vperm.slane %v7385_v59, 4 }
 0x902   :  { %2329 = vrot.lane.b32.xlu0 %v2236_v51, %s5883_s0  ;;  %v2180_v51 = vmul.f32 %v2082_v24, %v2082_v24 }
 0x903   :  { %v2086_v38 = vsub.f32 %v7479_v7, %v2049_v20 }
 0x909   :  { %2331 = vrot.lane.b32.xlu2 %v2237_v19, %s5883_s0  ;;  %2333 = vrot.lane.b32.xlu1 %v2238_v33, %s5883_s0  ;;  %v9456_v19 = vld [vmem:[#allocation48_spill] sm:$0xff]  ;;  %v7469_v33 = vld [vmem:[#allocation3 + $0x38] sm:$0xff] }
 0x90a   :  { %v2084_v37 = vsub.f32 %v7469_v33, %v2048_v30  ;;  %v7486_v30 = vld [vmem:[#allocation3 + $0x50] sm:$0xff] }
 0x90c   :  { %v2182_v12 = vmul.f32 %v2084_v37, %v2084_v37 }
 0x913   :  { %v2274_v48 = vpop.permute.xlu2 %2273 }
 0x914   :  { %v2368_v31 = vadd.f32 %v2274_v48, %v2176_v57  ;;  %v7475_v48 = vld [vmem:[#allocation3 + $0x40] sm:$0xff] }
 0x916   :  { %vm2400_vm3 = vcmp.lt.f32.partialorder %v2368_v31, %v9453_v58  ;;  %v2085_v31 = vsub.f32 %v7475_v48, %v2049_v20 }
 0x917   :  { %v2432_v52 = vsel %vm2400_vm3, 0.01, %v9454_v32 }
 0x918   :  { %2499 = vperm.xlu2 %5585, %v2432_v52  }
 0x91b   :  { %v2278_v2 = vpop.permute.xlu2 %2277 }
 0x91c   :  { %v2370_v43 = vadd.f32 %v2278_v2, %v2178_v3  ;;  %v2051_v3 = vperm.slane %v7385_v59, 6 }
 0x91e   :  { %vm2402_vm15 = vcmp.lt.f32.partialorder %v2370_v43, %v9455_v56 }
 0x91f   :  { %v2434_v57 = vsel %vm2402_vm15, 0.01, %v9454_v32 }
 0x923   :  { %v2284_v36 = vpop.permute.xlu2 %2283 }
 0x924   :  { %v2373_v52 = vadd.f32 %v2284_v36, %v2181_v35 }
 0x92b   :  { %v2272_v27 = vpop.permute.xlu1 %2271  ;;  %v2290_v29 = vpop.permute.xlu2 %2289 }
 0x92c   :  { %v2367_v50 = vadd.f32 %v2272_v27, %v2175_v9  ;;  %v2276_v14 = vpop.permute.xlu0 %2275  ;;  %v2050_v9 = vperm.slane %v7385_v59, 5  ;;  %v2183_v27 = vmul.f32 %v2085_v31, %v2085_v31 }
 0x92d   :  { %v2369_v5 = vadd.f32 %v2276_v14, %v2177_v39  ;;  %v9457_v39 = vld [vmem:[#allocation46_spill] sm:$0xff] }
 0x92e   :  { %vm2399_vm4 = vcmp.lt.f32.partialorder %v2367_v50, %v9453_v58  ;;  %vm2405_vm3 = vcmp.lt.f32.partialorder %v2373_v52, %v9457_v39  ;;  %v2087_v46 = vsub.f32 %v7486_v30, %v2050_v9  ;;  %v9459_v52 = vld [vmem:[#allocation47_spill] sm:$0xff] }
 0x92f   :  { %vm2401_vm14 = vcmp.lt.f32.partialorder %v2369_v5, %v9455_v56  ;;  %v2431_v41 = vsel %vm2399_vm4, 0.01, %v9454_v32  ;;  %v2184_v5 = vmul.f32 %v2086_v38, %v2086_v38  ;;  %v2437_v43 = vsel %vm2405_vm3, 0.01, %v9454_v32 }
 0x930   :  { %2496 = vperm.xlu0 %5584, %v2431_v41   ;;  %v2433_v49 = vsel %vm2401_vm14, 0.01, %v9454_v32  ;;  %v9458_v41 = vld [vmem:[#allocation50_spill] sm:$0xff] }
 0x931   :  { %2502 = vperm.xlu1 %5586, %v2433_v49   ;;  %v7492_v49 = vld [vmem:[#allocation3 + $0x58] sm:$0xff] }
 0x932   :  { %v2088_v16 = vsub.f32 %v7492_v49, %v2050_v9  ;;  %v7508_v9 = vld [vmem:[#allocation3 + $0x70] sm:$0xff] }
 0x933   :  { %v2280_v10 = vpop.permute.xlu1 %2279  ;;  %v2296_v61 = vpop.permute.xlu2 %2295 }
 0x934   :  { %v2371_v17 = vadd.f32 %v2280_v10, %v2179_v0  ;;  %v2282_v62 = vpop.permute.xlu0 %2281  ;;  %v2376_v0 = vadd.f32 %v2290_v29, %v2184_v5  ;;  %v7496_v10 = vld [vmem:[#allocation3 + $0x60] sm:$0xff]  ;;  %v2186_v37 = vmul.f32 %v2088_v16, %v2088_v16 }
 0x935   :  { %v2372_v55 = vadd.f32 %v2282_v62, %v2180_v51  ;;  %v2089_v51 = vsub.f32 %v7496_v10, %v2051_v3 }
 0x936   :  { %vm2403_vm1 = vcmp.lt.f32.partialorder %v2371_v17, %v9456_v19  ;;  %v2185_v17 = vmul.f32 %v2087_v46, %v2087_v46  ;;  %vm2408_vm15 = vcmp.lt.f32.partialorder %v2376_v0, %v9458_v41 }
 0x937   :  { %vm2404_vm2 = vcmp.lt.f32.partialorder %v2372_v55, %v9456_v19  ;;  %v2435_v44 = vsel %vm2403_vm1, 0.01, %v9454_v32  ;;  %v2052_v55 = vperm.slane %v7385_v59, 7  ;;  %v2187_v31 = vmul.f32 %v2089_v51, %v2089_v51 }
 0x938   :  { %2508 = vperm.xlu2 %5585, %v2435_v44   ;;  %2505 = vperm.xlu0 %5584, %v2434_v57   ;;  %v2436_v2 = vsel %vm2404_vm2, 0.01, %v9454_v32  ;;  %v2440_v59 = vsel %vm2408_vm15, 0.01, %v9454_v32 }
 0x939   :  { %2511 = vperm.xlu1 %5586, %v2436_v2   ;;  %v7502_v2 = vld [vmem:[#allocation3 + $0x68] sm:$0xff] }
 0x93a   :  { %v2090_v38 = vsub.f32 %v7502_v2, %v2051_v3  ;;  %v2053_v3 = vperm.slane %v7439_v42, 0 }
 0x93b   :  { %v2286_v60 = vpop.permute.xlu1 %2285  ;;  %v2302_v62 = vpop.permute.xlu2 %2301 }
 0x93c   :  { %v2374_v50 = vadd.f32 %v2286_v60, %v2182_v12  ;;  %v2288_v14 = vpop.permute.xlu0 %2287  ;;  %v2091_v60 = vsub.f32 %v7508_v9, %v2052_v55  ;;  %v2188_v5 = vmul.f32 %v2090_v38, %v2090_v38 }
 0x93d   :  { %v2375_v36 = vadd.f32 %v2288_v14, %v2183_v27  ;;  %v2379_v27 = vadd.f32 %v2296_v61, %v2187_v31  ;;  %v7512_v14 = vld [vmem:[#allocation3 + $0x78] sm:$0xff] }
 0x93e   :  { %vm2406_vm4 = vcmp.lt.f32.partialorder %v2374_v50, %v9457_v39 }
 0x93f   :  { %vm2407_vm14 = vcmp.lt.f32.partialorder %v2375_v36, %v9458_v41  ;;  %v2438_v24 = vsel %vm2406_vm4, 0.01, %v9454_v32  ;;  %v2092_v36 = vsub.f32 %v7512_v14, %v2052_v55 }
 0x940   :  { %2517 = vperm.xlu2 %5585, %v2438_v24   ;;  %2514 = vperm.xlu0 %5584, %v2437_v43   ;;  %v2439_v20 = vsel %vm2407_vm14, 0.01, %v9454_v32  ;;  %v2189_v24 = vmul.f32 %v2091_v60, %v2091_v60  ;;  %v9460_v43 = vld [vmem:[#allocation51_spill] sm:$0xff] }
 0x941   :  { %2520 = vperm.xlu1 %5586, %v2439_v20   ;;  %vm2411_vm3 = vcmp.lt.f32.partialorder %v2379_v27, %v9460_v43  ;;  %v2190_v51 = vmul.f32 %v2092_v36, %v2092_v36  ;;  %v2055_v27 = vperm.slane %v7439_v42, 2 }
 0x943   :  { %v2292_v35 = vpop.permute.xlu1 %2291  ;;  %v2308_v20 = vpop.permute.xlu2 %2307  ;;  %v2382_v38 = vadd.f32 %v2302_v62, %v2190_v51  ;;  %v9462_v51 = vld [vmem:[#allocation44_spill] sm:$0xff] }
 0x944   :  { %v2377_v44 = vadd.f32 %v2292_v35, %v2185_v17  ;;  %v2294_v57 = vpop.permute.xlu0 %2293  ;;  %v2054_v17 = vperm.slane %v7439_v42, 1  ;;  %v7519_v35 = vld [vmem:[#allocation3 + $0x80] sm:$0xff] }
 0x945   :  { %v2378_v29 = vadd.f32 %v2294_v57, %v2186_v37  ;;  %v2093_v55 = vsub.f32 %v7519_v35, %v2053_v3  ;;  %v9461_v37 = vld [vmem:[#allocation45_spill] sm:$0xff]  ;;  %v2443_v57 = vsel %vm2411_vm3, 0.01, %v9454_v32 }
 0x946   :  { %vm2409_vm1 = vcmp.lt.f32.partialorder %v2377_v44, %v9459_v52  ;;  %vm2414_vm15 = vcmp.lt.f32.partialorder %v2382_v38, %v9461_v37 }
 0x947   :  { %vm2410_vm2 = vcmp.lt.f32.partialorder %v2378_v29, %v9459_v52  ;;  %v2441_v12 = vsel %vm2409_vm1, 0.01, %v9454_v32  ;;  %v7525_v29 = vld [vmem:[#allocation3 + $0x88] sm:$0xff] }
 0x948   :  { %2526 = vperm.xlu2 %5585, %v2441_v12   ;;  %2523 = vperm.xlu0 %5584, %v2440_v59   ;;  %v2442_v50 = vsel %vm2410_vm2, 0.01, %v9454_v32  ;;  %v2094_v31 = vsub.f32 %v7525_v29, %v2053_v3  ;;  %v7529_v59 = vld [vmem:[#allocation3 + $0x90] sm:$0xff] }
 0x949   :  { %2529 = vperm.xlu1 %5586, %v2442_v50   ;;  %v2095_v60 = vsub.f32 %v7529_v59, %v2054_v17  ;;  %v2191_v50 = vmul.f32 %v2093_v55, %v2093_v55  ;;  %v2097_v55 = vsub.f32 %v7400_v34, %v2055_v27 }
 0x94a   :  { %v2192_v36 = vmul.f32 %v2094_v31, %v2094_v31 }
 0x94b   :  { %v2298_v46 = vpop.permute.xlu1 %2297  ;;  %v2193_v62 = vmul.f32 %v2095_v60, %v2095_v60  ;;  %v2056_v60 = vperm.slane %v7439_v42, 3 }
 0x94c   :  { %v2380_v16 = vadd.f32 %v2298_v46, %v2188_v5  ;;  %v2300_v0 = vpop.permute.xlu0 %2299 }
 0x94d   :  { %v2381_v61 = vadd.f32 %v2300_v0, %v2189_v24 }
 0x94e   :  { %vm2412_vm4 = vcmp.lt.f32.partialorder %v2380_v16, %v9460_v43  ;;  %v7534_v16 = vld [vmem:[#allocation3 + $0x98] sm:$0xff] }
 0x94f   :  { %vm2413_vm14 = vcmp.lt.f32.partialorder %v2381_v61, %v9461_v37  ;;  %v2444_v44 = vsel %vm2412_vm4, 0.01, %v9454_v32  ;;  %v2096_v0 = vsub.f32 %v7534_v16, %v2054_v17  ;;  %v2314_v61 = vpop.permute.xlu2 %2313 }
 0x950   :  { %2535 = vperm.xlu2 %5585, %v2444_v44   ;;  %2532 = vperm.xlu0 %5584, %v2443_v57   ;;  %v2445_v12 = vsel %vm2413_vm14, 0.01, %v9454_v32  ;;  %v2446_v44 = vsel %vm2414_vm15, 0.01, %v9454_v32  ;;  %v2385_v57 = vadd.f32 %v2308_v20, %v2193_v62  ;;  %v2057_v62 = vperm.slane %v7439_v42, 4 }
 0x951   :  { %2538 = vperm.xlu1 %5586, %v2445_v12   ;;  %v7543_v12 = vld [vmem:[#allocation3 + $0xa8] sm:$0xff] }
 0x952   :  { %v2098_v17 = vsub.f32 %v7543_v12, %v2055_v27  ;;  %v9464_v27 = vld [vmem:[#allocation10_spill] sm:$0xff] }
 0x953   :  { %v2304_v5 = vpop.permute.xlu1 %2303 }
 0x954   :  { %v2306_v46 = vpop.permute.xlu0 %2305  ;;  %v2383_v24 = vadd.f32 %v2304_v5, %v2191_v50  ;;  %v2194_v50 = vmul.f32 %v2096_v0, %v2096_v0  ;;  %v9463_v5 = vld [vmem:[#allocation42_spill] sm:$0xff] }
 0x955   :  { %v2384_v3 = vadd.f32 %v2306_v46, %v2192_v36  ;;  %v2195_v36 = vmul.f32 %v2097_v55, %v2097_v55  ;;  %vm2417_vm3 = vcmp.lt.f32.partialorder %v2385_v57, %v9463_v5  ;;  %v2100_v55 = vsub.f32 %v7408_v21, %v2056_v60 }
 0x956   :  { %vm2415_vm1 = vcmp.lt.f32.partialorder %v2383_v24, %v9462_v51  ;;  %v2449_v0 = vsel %vm2417_vm3, 0.01, %v9454_v32 }
 0x957   :  { %vm2416_vm2 = vcmp.lt.f32.partialorder %v2384_v3, %v9462_v51  ;;  %v2447_v31 = vsel %vm2415_vm1, 0.01, %v9454_v32  ;;  %v2196_v3 = vmul.f32 %v2098_v17, %v2098_v17 }
 0x958   :  { %2541 = vperm.xlu0 %5584, %v2446_v44   ;;  %v2448_v38 = vsel %vm2416_vm2, 0.01, %v9454_v32  ;;  %2544 = vperm.xlu2 %5585, %v2447_v31   ;;  %v7549_v44 = vld [vmem:[#allocation3 + $0xb0] sm:$0xff] }
 0x959   :  { %2547 = vperm.xlu1 %5586, %v2448_v38   ;;  %v2099_v31 = vsub.f32 %v7549_v44, %v2056_v60  ;;  %v2388_v57 = vadd.f32 %v2314_v61, %v2196_v3 }
 0x95b   :  { %v2310_v46 = vpop.permute.xlu1 %2309  ;;  %vm2420_vm15 = vcmp.lt.f32.partialorder %v2388_v57, %v9464_v27 }
 0x95c   :  { %v2312_v34 = vpop.permute.xlu0 %2311  ;;  %v2386_v20 = vadd.f32 %v2310_v46, %v2194_v50  ;;  %v2320_v50 = vpop.permute.xlu2 %2319  ;;  %v2452_v51 = vsel %vm2420_vm15, 0.01, %v9454_v32 }
 0x95d   :  { %v2387_v24 = vadd.f32 %v2312_v34, %v2195_v36  ;;  %v7558_v36 = vld [vmem:[#allocation3 + $0xc0] sm:$0xff]  ;;  %v2058_v34 = vperm.slane %v7439_v42, 5 }
 0x95e   :  { %vm2418_vm4 = vcmp.lt.f32.partialorder %v2386_v20, %v9463_v5  ;;  %v2101_v46 = vsub.f32 %v7558_v36, %v2057_v62  ;;  %v2197_v20 = vmul.f32 %v2099_v31, %v2099_v31  ;;  %v7563_v5 = vld [vmem:[#allocation3 + $0xc8] sm:$0xff] }
 0x95f   :  { %vm2419_vm14 = vcmp.lt.f32.partialorder %v2387_v24, %v9464_v27  ;;  %v2450_v38 = vsel %vm2418_vm4, 0.01, %v9454_v32  ;;  %v2198_v24 = vmul.f32 %v2100_v55, %v2100_v55  ;;  %v2103_v31 = vsub.f32 %v7416_v53, %v2058_v34 }
 0x960   :  { %2550 = vperm.xlu0 %5584, %v2449_v0   ;;  %v2451_v17 = vsel %vm2419_vm14, 0.01, %v9454_v32  ;;  %2553 = vperm.xlu2 %5585, %v2450_v38   ;;  %v2199_v0 = vmul.f32 %v2101_v46, %v2101_v46  ;;  %v2102_v38 = vsub.f32 %v7563_v5, %v2057_v62  ;;  %v7572_v46 = vld [vmem:[#allocation3 + $0xd8] sm:$0xff]  ;;  %v2060_v27 = vperm.slane %v7439_v42, 7 }
 0x961   :  { %2556 = vperm.xlu1 %5586, %v2451_v17   ;;  %v9465_v17 = vld [vmem:[#allocation11_spill] sm:$0xff]  ;;  %v2104_v62 = vsub.f32 %v7572_v46, %v2058_v34  ;;  %v9467_v34 = vld [vmem:[#allocation20_spill] sm:$0xff] }
 0x962   :  { %v2391_v55 = vadd.f32 %v2320_v50, %v2199_v0 }
 0x963   :  { %v2316_v21 = vpop.permute.xlu1 %2315 }
 0x964   :  { %v2318_v61 = vpop.permute.xlu0 %2317  ;;  %v2389_v60 = vadd.f32 %v2316_v21, %v2197_v20  ;;  %v2326_v21 = vpop.permute.xlu2 %2325 }
 0x965   :  { %v2390_v3 = vadd.f32 %v2318_v61, %v2198_v24  ;;  %v2059_v24 = vperm.slane %v7439_v42, 6  ;;  %v2200_v61 = vmul.f32 %v2102_v38, %v2102_v38 }
 0x966   :  { %vm2421_vm1 = vcmp.lt.f32.partialorder %v2389_v60, %v9465_v17  ;;  %v2201_v60 = vmul.f32 %v2103_v31, %v2103_v31  ;;  %v7584_v31 = vld [vmem:[#allocation3 + $0xe8] sm:$0xff] }
 0x967   :  { %vm2422_vm2 = vcmp.lt.f32.partialorder %v2390_v3, %v9465_v17  ;;  %v2453_v57 = vsel %vm2421_vm1, 0.01, %v9454_v32  ;;  %v9466_v3 = vld [vmem:[#allocation6_spill] sm:$0xff]  ;;  %v2202_v17 = vmul.f32 %v2104_v62, %v2104_v62 }
 0x968   :  { %2559 = vperm.xlu0 %5584, %v2452_v51   ;;  %v2454_v20 = vsel %vm2422_vm2, 0.01, %v9454_v32  ;;  %2562 = vperm.xlu2 %5585, %v2453_v57   ;;  %vm2423_vm3 = vcmp.lt.f32.partialorder %v2391_v55, %v9466_v3  ;;  %v7578_v57 = vld [vmem:[#allocation3 + $0xe0] sm:$0xff]  ;;  %v2106_v55 = vsub.f32 %v7584_v31, %v2059_v24 }
 0x969   :  { %2565 = vperm.xlu1 %5586, %v2454_v20   ;;  %v2105_v20 = vsub.f32 %v7578_v57, %v2059_v24  ;;  %v2455_v38 = vsel %vm2423_vm3, 0.01, %v9454_v32  ;;  %v2394_v43 = vadd.f32 %v2326_v21, %v2202_v17 }
 0x96b   :  { %v2322_v53 = vpop.permute.xlu1 %2321  ;;  %vm2426_vm15 = vcmp.lt.f32.partialorder %v2394_v43, %v9467_v34 }
 0x96c   :  { %v2324_v50 = vpop.permute.xlu0 %2323  ;;  %v2392_v51 = vadd.f32 %v2322_v53, %v2200_v61  ;;  %v7589_v61 = vld [vmem:[#allocation3 + $0xf0] sm:$0xff]  ;;  %v2203_v53 = vmul.f32 %v2105_v20, %v2105_v20 }
 0x96d   :  { %v2393_v0 = vadd.f32 %v2324_v50, %v2201_v60  ;;  %v2107_v60 = vsub.f32 %v7589_v61, %v2060_v27  ;;  %v2204_v50 = vmul.f32 %v2106_v55, %v2106_v55 }
 0x96e   :  { %vm2424_vm4 = vcmp.lt.f32.partialorder %v2392_v51, %v9466_v3  ;;  %v2332_v3 = vpop.permute.xlu2 %2331 }
 0x96f   :  { %vm2425_vm14 = vcmp.lt.f32.partialorder %v2393_v0, %v9467_v34  ;;  %v2456_v62 = vsel %vm2424_vm4, 0.01, %v9454_v32  ;;  %v2205_v21 = vmul.f32 %v2107_v60, %v2107_v60  ;;  %v9470_v60 = vld [vmem:[#allocation18_spill] sm:$0xff] }
 0x970   :  { %2568 = vperm.xlu0 %5584, %v2455_v38   ;;  %v2457_v42 = vsel %vm2425_vm14, 0.01, %v9454_v32  ;;  %2571 = vperm.xlu2 %5585, %v2456_v62   ;;  %v9468_v38 = vld [vmem:[#allocation17_spill] sm:$0xff]  ;;  %v2458_v62 = vsel %vm2426_vm15, 0.01, %v9454_v32  ;;  %vm2657_vm14 = vcmp.gt.f32.partialorder %v7311_v45, 0.0 }
 0x971   :  { %2574 = vperm.xlu1 %5586, %v2457_v42   ;;  %v7596_v42 = vld [vmem:[#allocation3 + $0xf8] sm:$0xff]  ;;  %v2397_v20 = vadd.f32 %v2332_v3, %v2205_v21  ;;  %vm2658_vm15 = vcmp.gt.f32.partialorder %v7337_v22, 0.0 }
 0x972   :  { %9469 = vst [vmem:[#allocation27_spill] sm:$0xff] %v7596_v42  ;;  %v2108_v37 = vsub.f32 %v7596_v42, %v2060_v27 }
 0x973   :  { %v2328_v51 = vpop.permute.xlu1 %2327  ;;  %vm2429_vm3 = vcmp.lt.f32.partialorder %v2397_v20, %v9470_v60 }
 0x974   :  { %v2330_v0 = vpop.permute.xlu0 %2329  ;;  %v2395_v24 = vadd.f32 %v2328_v51, %v2203_v53  ;;  %v2206_v53 = vmul.f32 %v2108_v37, %v2108_v37 }
 0x975   :  { %v2396_v17 = vadd.f32 %v2330_v0, %v2204_v50  ;;  %v2461_v0 = vsel %vm2429_vm3, 0.01, %v9454_v32 }
 0x976   :  { %vm2427_vm1 = vcmp.lt.f32.partialorder %v2395_v24, %v9468_v38  ;;  %v2500_v3 = vpop.permute.xlu2 %2499 }
 0x977   :  { %vm2428_vm2 = vcmp.lt.f32.partialorder %v2396_v17, %v9468_v38  ;;  %v2459_v43 = vsel %vm2427_vm1, 0.01, %v9454_v32  ;;  %v2592_v39 = vperm.slane %v2500_v3, %v6231_v13 }
 0x978   :  { %2577 = vperm.xlu0 %5584, %v2458_v62   ;;  %v2460_v55 = vsel %vm2428_vm2, 0.01, %v9454_v32  ;;  %2580 = vperm.xlu2 %5585, %v2459_v43  }
 0x979   :  { %2583 = vperm.xlu1 %5586, %v2460_v55  }
 0x97b   :  { %v2334_v50 = vpop.permute.xlu1 %2333 }
 0x97c   :  { %v2398_v51 = vadd.f32 %v2334_v50, %v2206_v53 }
 0x97e   :  { %vm2430_vm4 = vcmp.lt.f32.partialorder %v2398_v51, %v9470_v60 }
 0x97f   :  { %v2462_v27 = vsel %vm2430_vm4, 0.01, %v9454_v32 }
 0x980   :  { %2586 = vperm.xlu0 %5584, %v2461_v0   ;;  %2589 = vperm.xlu2 %5585, %v2462_v27  }
 0x992   :  { %v2509_v24 = vpop.permute.xlu2 %2508 }
 0x993   :  { %v2597_v56 = vperm.slane %v2509_v24, %v6143_v47 }
 0x99a   :  { %v2518_v17 = vpop.permute.xlu2 %2517 }
 0x9a2   :  { %v2497_v21 = vpop.permute.xlu0 %2496  ;;  %v2527_v43 = vpop.permute.xlu2 %2526 }
 0x9a3   :  { %v2503_v62 = vpop.permute.xlu1 %2502  ;;  %v2591_v27 = vperm.slane %v2497_v21, %v6143_v47 }
 0x9a4   :  { %v2594_v0 = vperm.slane %v2503_v62, %v6143_v47 }
 0x9a5   :  { %v2593_v42 = vsel %vm313_vm5, %v2592_v39, %v2591_v27 }
 0x9aa   :  { %v2506_v55 = vpop.permute.xlu0 %2505  ;;  %v2536_v34 = vpop.permute.xlu2 %2535 }
 0x9ab   :  { %v2512_v37 = vpop.permute.xlu1 %2511  ;;  %v2595_v51 = vperm.slane %v2506_v55, %v6231_v13  ;;  %v2601_v55 = vperm.slane %v2518_v17, %v6231_v13  ;;  %v2610_v39 = vperm.slane %v2536_v34, %v6231_v13 }
 0x9ac   :  { %v2598_v52 = vperm.slane %v2512_v37, %v6231_v13 }
 0x9ad   :  { %v2596_v41 = vsel %vm313_vm5, %v2595_v51, %v2594_v0  ;;  %v2606_v0 = vperm.slane %v2527_v43, %v6143_v47 }
 0x9ae   :  { %v2599_v21 = vsel %vm313_vm5, %v2598_v52, %v2597_v56  ;;  %v2639_v37 = vsel %vm360_vm6, %v2596_v41, %v2593_v42 }
 0x9af   :  { %v2640_v17 = vsel %vm362_vm7, %v2599_v21, %v2639_v37 }
 0x9b2   :  { %v2515_v38 = vpop.permute.xlu0 %2514  ;;  %v7606_v60 = vpop.permute.xlu2 %2544 }
 0x9b3   :  { %v2521_v20 = vpop.permute.xlu1 %2520  ;;  %v2600_v19 = vperm.slane %v2515_v38, %v6143_v47 }
 0x9b4   :  { %v2603_v3 = vperm.slane %v2521_v20, %v6143_v47 }
 0x9b5   :  { %v2602_v51 = vsel %vm313_vm5, %v2601_v55, %v2600_v19 }
 0x9b6   :  { %v2641_v56 = vsel %vm364_vm8, %v2602_v51, %v2640_v17 }
 0x9ba   :  { %v2524_v53 = vpop.permute.xlu0 %2523  ;;  %v2554_v52 = vpop.permute.xlu2 %2553 }
 0x9bb   :  { %v2530_v50 = vpop.permute.xlu1 %2529  ;;  %v2604_v32 = vperm.slane %v2524_v53, %v6231_v13  ;;  %v2619_v45 = vperm.slane %v2554_v52, %v6231_v13 }
 0x9bc   :  { %v2607_v38 = vperm.slane %v2530_v50, %v6231_v13 }
 0x9bd   :  { %v2605_v24 = vsel %vm313_vm5, %v2604_v32, %v2603_v3 }
 0x9be   :  { %v2608_v41 = vsel %vm313_vm5, %v2607_v38, %v2606_v0  ;;  %v2642_v42 = vsel %vm366_vm9, %v2605_v24, %v2641_v56 }
 0x9bf   :  { %v2643_v43 = vsel %vm368_vm10, %v2608_v41, %v2642_v42 }
 0x9c2   :  { %v2533_v58 = vpop.permute.xlu0 %2532  ;;  %v2563_v3 = vpop.permute.xlu2 %2562 }
 0x9c3   :  { %v2539_v62 = vpop.permute.xlu1 %2538  ;;  %v2609_v53 = vperm.slane %v2533_v58, %v6143_v47 }
 0x9c4   :  { %v2612_v32 = vperm.slane %v2539_v62, %v6143_v47 }
 0x9c5   :  { %v2611_v19 = vsel %vm313_vm5, %v2610_v39, %v2609_v53 }
 0x9c6   :  { %v2644_v27 = vsel %vm370_vm11, %v2611_v19, %v2643_v43 }
 0x9ca   :  { %v2542_v20 = vpop.permute.xlu0 %2541  ;;  %v2572_v0 = vpop.permute.xlu2 %2571 }
 0x9cb   :  { %v2548_v50 = vpop.permute.xlu1 %2547  ;;  %v2613_v58 = vperm.slane %v2542_v20, %v6231_v13  ;;  %v2615_v20 = vperm.slane %v7606_v60, %v6143_v47 }
 0x9cc   :  { %v2616_v42 = vperm.slane %v2548_v50, %v6231_v13 }
 0x9cd   :  { %v2614_v34 = vsel %vm313_vm5, %v2613_v58, %v2612_v32 }
 0x9ce   :  { %v2645_v55 = vsel %vm9317_vm12, %v2614_v34, %v2644_v27  ;;  %v2617_v52 = vsel %vm313_vm5, %v2616_v42, %v2615_v20 }
 0x9cf   :  { %v2655_v21 = vmul.f32 %v2645_v55, %v7261_v26  ;;  %v2624_v55 = vperm.slane %v2563_v3, %v6143_v47 }
 0x9d1   :  { %v7640_v37 = vsel %vm2657_vm14, -1.0, %v2655_v21 }
 0x9d2   :  { %v2551_v51 = vpop.permute.xlu0 %2550  ;;  %v2661_v62 = vsel %vm76_vm0, %v7640_v37, -inf  ;;  %v2581_v41 = vpop.permute.xlu2 %2580 }
 0x9d3   :  { %v2557_v38 = vpop.permute.xlu1 %2556  ;;  %2662 = vmax.xlane.f32.xlu1 %v2661_v62  ;;  %v2618_v56 = vperm.slane %v2551_v51, %v6143_v47  ;;  %v2628_v51 = vperm.slane %v2572_v0, %v6231_v13 }
 0x9d4   :  { %v2621_v19 = vperm.slane %v2557_v38, %v6143_v47 }
 0x9d5   :  { %v2620_v32 = vsel %vm313_vm5, %v2619_v45, %v2618_v56  ;;  %v2633_v56 = vperm.slane %v2581_v41, %v6143_v47 }
 0x9d6   :  { %v2646_v60 = vsel %vm360_vm6, %v2620_v32, %v2617_v52 }
 0x9da   :  { %v2560_v24 = vpop.permute.xlu0 %2559 }
 0x9db   :  { %v2566_v53 = vpop.permute.xlu1 %2565  ;;  %v2622_v26 = vperm.slane %v2560_v24, %v6231_v13 }
 0x9dc   :  { %v2625_v58 = vperm.slane %v2566_v53, %v6231_v13 }
 0x9dd   :  { %v2623_v43 = vsel %vm313_vm5, %v2622_v26, %v2621_v19  ;;  %v2590_v26 = vpop.permute.xlu2 %2589 }
 0x9de   :  { %v2626_v62 = vsel %vm313_vm5, %v2625_v58, %v2624_v55  ;;  %v2647_v38 = vsel %vm362_vm7, %v2623_v43, %v2646_v60 }
 0x9df   :  { %v2648_v45 = vsel %vm364_vm8, %v2626_v62, %v2647_v38 }
 0x9e2   :  { %v2569_v17 = vpop.permute.xlu0 %2568 }
 0x9e3   :  { %v2575_v39 = vpop.permute.xlu1 %2574  ;;  %v2627_v27 = vperm.slane %v2569_v17, %v6143_v47 }
 0x9e4   :  { %v2630_v24 = vperm.slane %v2575_v39, %v6143_v47  ;;  %v2637_v39 = vperm.slane %v2590_v26, %v6231_v13 }
 0x9e5   :  { %v2629_v53 = vsel %vm313_vm5, %v2628_v51, %v2627_v27 }
 0x9e6   :  { %v2649_v0 = vsel %vm366_vm9, %v2629_v53, %v2648_v45 }
 0x9ea   :  { %v2578_v34 = vpop.permute.xlu0 %2577 }
 0x9eb   :  { %v2584_v21 = vpop.permute.xlu1 %2583  ;;  %v2631_v50 = vperm.slane %v2578_v34, %v6231_v13 }
 0x9ec   :  { %v2634_v17 = vperm.slane %v2584_v21, %v6231_v13 }
 0x9ed   :  { %v2632_v3 = vsel %vm313_vm5, %v2631_v50, %v2630_v24 }
 0x9ee   :  { %v2635_v42 = vsel %vm313_vm5, %v2634_v17, %v2633_v56  ;;  %v2650_v19 = vsel %vm368_vm10, %v2632_v3, %v2649_v0 }
 0x9ef   :  { %v2651_v43 = vsel %vm370_vm11, %v2635_v42, %v2650_v19 }
 0x9f2   :  { %v2587_v20 = vpop.permute.xlu0 %2586 }
 0x9f3   :  { %v2636_v32 = vperm.slane %v2587_v20, %v6143_v47 }
 0x9f5   :  { %v2638_v58 = vsel %vm313_vm5, %v2637_v39, %v2636_v32 }
 0x9f6   :  { %v2652_v41 = vsel %vm9317_vm12, %v2638_v58, %v2651_v43 }
 0x9f7   :  { %v2656_v27 = vmul.f32 %v2652_v41, %v7299_v8 }
 0x9f9   :  { %v7678_v34 = vsel %vm2658_vm15, -1.0, %v2656_v27 }
 0x9fa   :  { %v2664_v55 = vsel %vm76_vm0, %v7678_v34, -inf }
 0x9fb   :  { %2665 = vmax.xlane.f32.xlu0 %v2664_v55 }
 0xa46   :  { %v2663_v52 = vpop.xlane.xlu1 %2662 }
 0xa47   :  { %vm2667_vm1 = vcmp.eq.f32.partialorder %v7640_v37, %v2663_v52 }
 0xa48   :  { %v2669_v21 = vsel %vm2667_vm1, %v6143_v47, 16 }
 0xa49   :  { %v2671_v50 = vsel %vm76_vm0, %v2669_v21, 2147483647 }
 0xa4a   :  { %v2673_v51 = vshra.s32 %v2671_v50, 16  ;;  %v2672_v53 = vand.u32 65535, %v2671_v50 }
 0xa4c   :  { %v2675_v60 = vcvt.s32.f32 %v2673_v51  ;;  %v2674_v3 = vcvt.s32.f32 %v2672_v53 }
 0xa4e   :  { %2676 = vmin.xlane.f32.xlu2 %v2675_v60 }
 0xa6e   :  { %v2666_v62 = vpop.xlane.xlu0 %2665 }
 0xa6f   :  { %vm2668_vm2 = vcmp.eq.f32.partialorder %v7678_v34, %v2666_v62 }
 0xa70   :  { %v2670_v8 = vsel %vm2668_vm2, %v6143_v47, 16 }
 0xa71   :  { %v2686_v22 = vsel %vm76_vm0, %v2670_v8, 2147483647 }
 0xa72   :  { %v2688_v38 = vshra.s32 %v2686_v22, 16  ;;  %v2687_v26 = vand.u32 65535, %v2686_v22 }
 0xa74   :  { %v2690_v24 = vcvt.s32.f32 %v2688_v38  ;;  %v2689_v0 = vcvt.s32.f32 %v2687_v26 }
 0xa76   :  { %2691 = vmin.xlane.f32.xlu0 %v2690_v24 }
 0xac1   :  { %v2677_v17 = vpop.xlane.xlu2 %2676 }
 0xac2   :  { %vm2678_vm3 = vcmp.eq.f32.partialorder %v2675_v60, %v2677_v17  ;;  %v2683_v19 = vcvt.f32.s32 %v2677_v17 }
 0xac3   :  { %v2679_v56 = vsel %vm2678_vm3, %v2674_v3, inf }
 0xac4   :  { %2680 = vmin.xlane.f32.xlu1 %v2679_v56  ;;  %v2684_v39 = vshll.u32 %v2683_v19, 16 }
 0xae9   :  { %v2692_v45 = vpop.xlane.xlu0 %2691 }
 0xaea   :  { %vm2693_vm4 = vcmp.eq.f32.partialorder %v2690_v24, %v2692_v45  ;;  %v2698_v38 = vcvt.f32.s32 %v2692_v45 }
 0xaeb   :  { %v2694_v42 = vsel %vm2693_vm4, %v2689_v0, inf }
 0xaec   :  { %2695 = vmin.xlane.f32.xlu2 %v2694_v42  ;;  %v2699_v53 = vshll.u32 %v2698_v38, 16 }
 0xb37   :  { %v2681_v20 = vpop.xlane.xlu1 %2680 }
 0xb38   :  { %v2682_v32 = vcvt.f32.s32 %v2681_v20 }
 0xb3a   :  { %v2685_v58 = vadd.s32 %v2684_v39, %v2682_v32 }
 0xb3c   :  { %vm2701_vm14 = vcmp.eq.s32.totalorder %v6143_v47, %v2685_v58 }
 0xb3d   :  { %v7690_v43 = vsel %vm2701_vm14, 1.0, %v9431_v54 }
 0xb3e   :  { %v2709_v41 = vrot.slane %v7690_v43, 1  ;;  %v2710_v27 = vrot.slane %v7690_v43, 2  ;;  %v2711_v55 = vrot.slane %v7690_v43, 3  ;;  %2737 = vst.msk [vmem:[#allocation2 + $0x3] sm:$0x1] %vm165_vm13, %v7690_v43  ;;  %v2712_v52 = vrot.slane %v7690_v43, 4 }
 0xb3f   :  { %v2753_v21 = vmul.f32 %v7690_v43, %v6350_v18  ;;  %v2713_v50 = vrot.slane %v7690_v43, 5  ;;  %v2761_v51 = vmul.f32 %v7690_v43, %v6509_v63  ;;  %v2714_v60 = vrot.slane %v7690_v43, 6 }
 0xb40   :  { %2738 = vst.msk [vmem:[#allocation2 + $0xb] sm:$0x1] %vm165_vm13, %v2709_v41  ;;  %v2715_v8 = vrot.slane %v7690_v43, 7 }
 0xb41   :  { %v2755_v62 = vsel %vm76_vm0, %v2753_v21, 0.0  ;;  %2739 = vst.msk [vmem:[#allocation2 + $0x13] sm:$0x1] %vm165_vm13, %v2710_v27  ;;  %v2763_v22 = vsel %vm76_vm0, %v2761_v51, 0.0 }
 0xb42   :  { %2756 = vadd.xlane.f32.xlu1 %v2755_v62  ;;  %2740 = vst.msk [vmem:[#allocation2 + $0x1b] sm:$0x1] %vm165_vm13, %v2711_v55  ;;  %2764 = vadd.xlane.f32.xlu2 %v2763_v22 }
 0xb43   :  { %2741 = vst.msk [vmem:[#allocation2 + $0x23] sm:$0x1] %vm165_vm13, %v2712_v52 }
 0xb44   :  { %2742 = vst.msk [vmem:[#allocation2 + $0x2b] sm:$0x1] %vm165_vm13, %v2713_v50 }
 0xb45   :  { %2743 = vst.msk [vmem:[#allocation2 + $0x33] sm:$0x1] %vm165_vm13, %v2714_v60 }
 0xb46   :  { %2744 = vst.msk [vmem:[#allocation2 + $0x3b] sm:$0x1] %vm165_vm13, %v2715_v8 }
 0xb5f   :  { %v2696_v24 = vpop.xlane.xlu2 %2695 }
 0xb60   :  { %v2697_v17 = vcvt.f32.s32 %v2696_v24 }
 0xb62   :  { %v2700_v3 = vadd.s32 %v2699_v53, %v2697_v17 }
 0xb64   :  { %vm2702_vm15 = vcmp.eq.s32.totalorder %v6143_v47, %v2700_v3 }
 0xb65   :  { %v7716_v56 = vsel %vm2702_vm15, 1.0, %v9431_v54 }
 0xb66   :  { %v2716_v26 = vrot.slane %v7716_v56, 1  ;;  %v2717_v0 = vrot.slane %v7716_v56, 2  ;;  %v2718_v42 = vrot.slane %v7716_v56, 3  ;;  %2745 = vst.msk [vmem:[#allocation2 + $0x43] sm:$0x1] %vm165_vm13, %v7716_v56  ;;  %v2719_v45 = vrot.slane %v7716_v56, 4 }
 0xb67   :  { %v2762_v19 = vmul.f32 %v7716_v56, %v6471_v25  ;;  %v2720_v20 = vrot.slane %v7716_v56, 5  ;;  %v2754_v39 = vmul.f32 %v7716_v56, %v6480_v23  ;;  %v2721_v32 = vrot.slane %v7716_v56, 6 }
 0xb68   :  { %2746 = vst.msk [vmem:[#allocation2 + $0x4b] sm:$0x1] %vm165_vm13, %v2716_v26  ;;  %v2722_v41 = vrot.slane %v7716_v56, 7 }
 0xb69   :  { %v2766_v58 = vsel %vm76_vm0, %v2762_v19, 0.0  ;;  %2747 = vst.msk [vmem:[#allocation2 + $0x53] sm:$0x1] %vm165_vm13, %v2717_v0  ;;  %v2758_v27 = vsel %vm76_vm0, %v2754_v39, 0.0 }
 0xb6a   :  { %2767 = vadd.xlane.f32.xlu1 %v2766_v58  ;;  %2748 = vst.msk [vmem:[#allocation2 + $0x5b] sm:$0x1] %vm165_vm13, %v2718_v42  ;;  %2759 = vadd.xlane.f32.xlu0 %v2758_v27 }
 0xb6b   :  { %2749 = vst.msk [vmem:[#allocation2 + $0x63] sm:$0x1] %vm165_vm13, %v2719_v45 }
 0xb6c   :  { %2750 = vst.msk [vmem:[#allocation2 + $0x6b] sm:$0x1] %vm165_vm13, %v2720_v20 }
 0xb6d   :  { %2751 = vst.msk [vmem:[#allocation2 + $0x73] sm:$0x1] %vm165_vm13, %v2721_v32 }
 0xb6e   :  { %2752 = vst.msk [vmem:[#allocation2 + $0x7b] sm:$0x1] %vm165_vm13, %v2722_v41 }
 0xbb5   :  { %v2765_v55 = vpop.xlane.xlu2 %2764  ;;  %v7761_v27 = vpop.xlane.xlu1 %2756 }
 0xbb6   :  { %v2838_v52 = vperm.slane %v2765_v55, 1  ;;  %v2837_v21 = vperm.slane %v2765_v55, 0  ;;  %v2840_v62 = vperm.slane %v2765_v55, 3  ;;  %v2839_v24 = vperm.slane %v2765_v55, 2 }
 0xbb7   :  { %v2843_v19 = vperm.slane %v2765_v55, 6 }
 0xbb8   :  { %v2871_v50 = vsub.f32 %v7445_v40, %v2838_v52  ;;  %v2870_v51 = vsub.f32 %v7434_v15, %v2837_v21  ;;  %v2869_v60 = vsub.f32 %v7442_v28, %v2837_v21  ;;  %v2875_v53 = vsub.f32 %v7463_v4, %v2840_v62 }
 0xbb9   :  { %v2874_v17 = vsub.f32 %v7459_v6, %v2839_v24  ;;  %v2872_v40 = vsub.f32 %v7448_v1, %v2838_v52  ;;  %v2841_v28 = vperm.slane %v2765_v55, 4  ;;  %v2873_v4 = vsub.f32 %v7454_v11, %v2839_v24 }
 0xbba   :  { %v2935_v8 = vmul.f32 %v2871_v50, %v2871_v50  ;;  %v2934_v22 = vmul.f32 %v2870_v51, %v2870_v51  ;;  %v2933_v38 = vmul.f32 %v2869_v60, %v2869_v60  ;;  %v2939_v15 = vmul.f32 %v2875_v53, %v2875_v53  ;;  %v7784_v53 = vld [vmem:[#allocation3 + $0xa0] sm:$0xff] }
 0xbbb   :  { %v2938_v3 = vmul.f32 %v2874_v17, %v2874_v17  ;;  %v2936_v26 = vmul.f32 %v2872_v40, %v2872_v40  ;;  %v2878_v0 = vsub.f32 %v7479_v7, %v2841_v28  ;;  %v2877_v42 = vsub.f32 %v7475_v48, %v2841_v28  ;;  %v7794_v28 = vld [vmem:[#allocation3 + $0xb8] sm:$0xff] }
 0xbbc   :  { %3001 = vrot.lane.b32.xlu1 %v2935_v8, %s5883_s0  ;;  %2999 = vrot.lane.b32.xlu2 %v2934_v22, %s5883_s0  ;;  %v2842_v1 = vperm.slane %v2765_v55, 5  ;;  %v2937_v20 = vmul.f32 %v2873_v4, %v2873_v4  ;;  %v2881_v39 = vsub.f32 %v7496_v10, %v2843_v19  ;;  %v2876_v7 = vsub.f32 %v7469_v33, %v2840_v62 }
 0xbbd   :  { %2997 = vrot.lane.b32.xlu0 %v2933_v38, %s5883_s0  ;;  %v2942_v45 = vmul.f32 %v2878_v0, %v2878_v0  ;;  %v2941_v6 = vmul.f32 %v2877_v42, %v2877_v42  ;;  %v2844_v11 = vperm.slane %v2765_v55, 7 }
 0xbbe   :  { %v2880_v32 = vsub.f32 %v7492_v49, %v2842_v1  ;;  %v2945_v48 = vmul.f32 %v2881_v39, %v2881_v39  ;;  %v2940_v41 = vmul.f32 %v2876_v7, %v2876_v7  ;;  %v2879_v49 = vsub.f32 %v7486_v30, %v2842_v1 }
 0xbbf   :  { %v2884_v52 = vsub.f32 %v7512_v14, %v2844_v11  ;;  %v2883_v10 = vsub.f32 %v7508_v9, %v2844_v11  ;;  %v2882_v30 = vsub.f32 %v7502_v2, %v2843_v19 }
 0xbc0   :  { %v2944_v58 = vmul.f32 %v2880_v32, %v2880_v32  ;;  %v2943_v50 = vmul.f32 %v2879_v49, %v2879_v49  ;;  %v9471_v49 = vld [vmem:[#allocation27_spill] sm:$0xff] }
 0xbc1   :  { %v2948_v21 = vmul.f32 %v2884_v52, %v2884_v52  ;;  %v2947_v33 = vmul.f32 %v2883_v10, %v2883_v10  ;;  %v2946_v38 = vmul.f32 %v2882_v30, %v2882_v30  ;;  %v2772_v30 = vperm.slane %v7761_v27, 1 }
 0xbc4   :  { %3009 = vrot.lane.b32.xlu1 %v2939_v15, %s5883_s0  ;;  %3007 = vrot.lane.b32.xlu2 %v2938_v3, %s5883_s0 }
 0xbc5   :  { %3003 = vrot.lane.b32.xlu0 %v2936_v26, %s5883_s0 }
 0xbcc   :  { %3015 = vrot.lane.b32.xlu1 %v2942_v45, %s5883_s0  ;;  %3013 = vrot.lane.b32.xlu2 %v2941_v6, %s5883_s0 }
 0xbcd   :  { %3005 = vrot.lane.b32.xlu0 %v2937_v20, %s5883_s0 }
 0xbd4   :  { %3021 = vrot.lane.b32.xlu1 %v2945_v48, %s5883_s0  ;;  %3019 = vrot.lane.b32.xlu2 %v2944_v58, %s5883_s0 }
 0xbd5   :  { %3011 = vrot.lane.b32.xlu0 %v2940_v41, %s5883_s0 }
 0xbdc   :  { %3027 = vrot.lane.b32.xlu1 %v2948_v21, %s5883_s0  ;;  %3025 = vrot.lane.b32.xlu2 %v2947_v33, %s5883_s0  ;;  %v7822_v21 = vld [vmem:[#allocation3 + $0x8] sm:$0xff] }
 0xbdd   :  { %v7771_v55 = vpop.xlane.xlu1 %2767  ;;  %3017 = vrot.lane.b32.xlu0 %v2943_v50, %s5883_s0 }
 0xbde   :  { %v2846_v51 = vperm.slane %v7771_v55, 1  ;;  %v2845_v60 = vperm.slane %v7771_v55, 0  ;;  %v2847_v22 = vperm.slane %v7771_v55, 2  ;;  %v2849_v40 = vperm.slane %v7771_v55, 4 }
 0xbdf   :  { %v2848_v15 = vperm.slane %v7771_v55, 3  ;;  %v2850_v4 = vperm.slane %v7771_v55, 5  ;;  %v2852_v39 = vperm.slane %v7771_v55, 7  ;;  %v2851_v32 = vperm.slane %v7771_v55, 6 }
 0xbe0   :  { %v2887_v14 = vsub.f32 %v7529_v59, %v2846_v51  ;;  %v2886_v9 = vsub.f32 %v7525_v29, %v2845_v60  ;;  %v2890_v24 = vsub.f32 %v7543_v12, %v2847_v22  ;;  %v2889_v59 = vsub.f32 %v7784_v53, %v2847_v22  ;;  %v7832_v22 = vld [vmem:[#allocation3 + $0x10] sm:$0xff] }
 0xbe1   :  { %v2885_v29 = vsub.f32 %v7519_v35, %v2845_v60  ;;  %v2893_v12 = vsub.f32 %v7558_v36, %v2849_v40  ;;  %v2892_v26 = vsub.f32 %v7794_v28, %v2848_v15  ;;  %v2888_v35 = vsub.f32 %v7534_v16, %v2846_v51  ;;  %v7803_v36 = vld [vmem:[#allocation3 + $0xd0] sm:$0xff]  ;;  %v9472_v60 = vld [vmem:[#allocation49_spill] sm:$0xff] }
 0xbe2   :  { %v2951_v62 = vmul.f32 %v2887_v14, %v2887_v14  ;;  %v2950_v8 = vmul.f32 %v2886_v9, %v2886_v9  ;;  %v2954_v2 = vmul.f32 %v2890_v24, %v2890_v24  ;;  %v2953_v17 = vmul.f32 %v2889_v59, %v2889_v59  ;;  %v7835_v59 = vld [vmem:[#allocation3] sm:$0xff] }
 0xbe3   :  { %v2949_v3 = vmul.f32 %v2885_v29, %v2885_v29  ;;  %v2957_v0 = vmul.f32 %v2893_v12, %v2893_v12  ;;  %v2956_v42 = vmul.f32 %v2892_v26, %v2892_v26  ;;  %v2952_v45 = vmul.f32 %v2888_v35, %v2888_v35 }
 0xbe4   :  { %3033 = vrot.lane.b32.xlu1 %v2951_v62, %s5883_s0  ;;  %3031 = vrot.lane.b32.xlu2 %v2950_v8, %s5883_s0  ;;  %v2896_v6 = vsub.f32 %v7572_v46, %v2850_v4  ;;  %v2895_v19 = vsub.f32 %v7803_v36, %v2850_v4  ;;  %v2891_v1 = vsub.f32 %v7549_v44, %v2848_v15  ;;  %v7829_v62 = vpop.xlane.xlu0 %2759  ;;  %v2773_v8 = vperm.slane %v7761_v27, 2  ;;  %v9474_v4 = vld [vmem:[#allocation43_spill] sm:$0xff] }
 0xbe5   :  { %3023 = vrot.lane.b32.xlu0 %v2946_v38, %s5883_s0  ;;  %v2899_v46 = vsub.f32 %v7589_v61, %v2852_v39  ;;  %v2898_v48 = vsub.f32 %v7584_v31, %v2851_v32  ;;  %v2894_v58 = vsub.f32 %v7563_v5, %v2849_v40  ;;  %v2897_v52 = vsub.f32 %v7578_v57, %v2851_v32  ;;  %v7850_v32 = vld [vmem:[#allocation3 + $0x40] sm:$0xff] }
 0xbe6   :  { %v2960_v16 = vmul.f32 %v2896_v6, %v2896_v6  ;;  %v2959_v20 = vmul.f32 %v2895_v19, %v2895_v19  ;;  %v2955_v7 = vmul.f32 %v2891_v1, %v2891_v1  ;;  %v2771_v61 = vperm.slane %v7761_v27, 0  ;;  %v7846_v19 = vld [vmem:[#allocation3 + $0x18] sm:$0xff] }
 0xbe7   :  { %v2963_v44 = vmul.f32 %v2899_v46, %v2899_v46  ;;  %v2962_v11 = vmul.f32 %v2898_v48, %v2898_v48  ;;  %v2958_v41 = vmul.f32 %v2894_v58, %v2894_v58  ;;  %v2961_v10 = vmul.f32 %v2897_v52, %v2897_v52  ;;  %v7853_v46 = vld [vmem:[#allocation3 + $0x30] sm:$0xff] }
 0xbe8   :  { %v2900_v31 = vsub.f32 %v9471_v49, %v2852_v39  ;;  %v2804_v5 = vsub.f32 %v7822_v21, %v2771_v61  ;;  %v9473_v57 = vmov 1.0   ;;  %v2805_v38 = vsub.f32 %v7832_v22, %v2772_v30 }
 0xbe9   :  { %v2803_v29 = vsub.f32 %v7835_v59, %v2771_v61  ;;  %v2774_v6 = vperm.slane %v7761_v27, 3  ;;  %v2806_v1 = vsub.f32 %v7846_v19, %v2772_v30  ;;  %v2776_v61 = vperm.slane %v7761_v27, 5 }
 0xbea   :  { %v2964_v33 = vmul.f32 %v2900_v31, %v2900_v31  ;;  %v2902_v50 = vmul.f32 %v2804_v5, %v2804_v5  ;;  %v2903_v40 = vmul.f32 %v2805_v38, %v2805_v38  ;;  %v7860_v5 = vld [vmem:[#allocation3 + $0x20] sm:$0xff]  ;;  %v7867_v38 = vld [vmem:[#allocation3 + $0x48] sm:$0xff] }
 0xbeb   :  { %v2809_v48 = vsub.f32 %v7853_v46, %v2774_v6 }
 0xbec   :  { %3039 = vrot.lane.b32.xlu1 %v2954_v2, %s5883_s0  ;;  %3037 = vrot.lane.b32.xlu2 %v2953_v17, %s5883_s0  ;;  %v7838_v2 = vld [vmem:[#allocation3 + $0x28] sm:$0xff] }
 0xbed   :  { %3029 = vrot.lane.b32.xlu0 %v2949_v3, %s5883_s0  ;;  %v2808_v17 = vsub.f32 %v7838_v2, %v2773_v8  ;;  %v2901_v3 = vmul.f32 %v2803_v29, %v2803_v29  ;;  %v2907_v49 = vmul.f32 %v2809_v48, %v2809_v48 }
 0xbf4   :  { %3045 = vrot.lane.b32.xlu1 %v2957_v0, %s5883_s0  ;;  %3043 = vrot.lane.b32.xlu2 %v2956_v42, %s5883_s0  ;;  %v2906_v0 = vmul.f32 %v2808_v17, %v2808_v17  ;;  %v2775_v42 = vperm.slane %v7761_v27, 4 }
 0xbf5   :  { %3035 = vrot.lane.b32.xlu0 %v2952_v45, %s5883_s0 }
 0xbf6   :  { %v2812_v29 = vsub.f32 %v7867_v38, %v2775_v42 }
 0xbfc   :  { %3051 = vrot.lane.b32.xlu1 %v2960_v16, %s5883_s0  ;;  %3049 = vrot.lane.b32.xlu2 %v2959_v20, %s5883_s0 }
 0xbfd   :  { %3041 = vrot.lane.b32.xlu0 %v2955_v7, %s5883_s0  ;;  %v2811_v7 = vsub.f32 %v7850_v32, %v2775_v42 }
 0xc04   :  { %3057 = vrot.lane.b32.xlu1 %v2963_v44, %s5883_s0  ;;  %3055 = vrot.lane.b32.xlu2 %v2962_v11, %s5883_s0  ;;  %v2904_v44 = vmul.f32 %v2806_v1, %v2806_v1  ;;  %v9475_v11 = vld [vmem:[#allocation48_spill] sm:$0xff]  ;;  %v7876_v1 = vld [vmem:[#allocation3 + $0x38] sm:$0xff] }
 0xc05   :  { %3047 = vrot.lane.b32.xlu0 %v2958_v41, %s5883_s0  ;;  %v2810_v42 = vsub.f32 %v7876_v1, %v2774_v6  ;;  %v9478_v6 = vld [vmem:[#allocation47_spill] sm:$0xff] }
 0xc0d   :  { %3053 = vrot.lane.b32.xlu0 %v2961_v10, %s5883_s0  ;;  %v2909_v10 = vmul.f32 %v2811_v7, %v2811_v7 }
 0xc15   :  { %3059 = vrot.lane.b32.xlu0 %v2964_v33, %s5883_s0  ;;  %v2807_v33 = vsub.f32 %v7860_v5, %v2773_v8 }
 0xc16   :  { %v3000_v55 = vpop.permute.xlu2 %2999 }
 0xc17   :  { %v3094_v51 = vadd.f32 %v3000_v55, %v2902_v50 }
 0xc19   :  { %vm3126_vm1 = vcmp.lt.f32.partialorder %v3094_v51, %v9472_v60 }
 0xc1a   :  { %v3158_v14 = vsel %vm3126_vm1, 0.01, %v9473_v57 }
 0xc1b   :  { %3225 = vperm.xlu1 %5586, %v3158_v14   ;;  %v7864_v14 = vld [vmem:[#allocation3 + $0x58] sm:$0xff] }
 0xc1e   :  { %v3008_v9 = vpop.permute.xlu2 %3007 }
 0xc1f   :  { %v3098_v16 = vadd.f32 %v3008_v9, %v2906_v0  ;;  %v2814_v9 = vsub.f32 %v7864_v14, %v2776_v61  ;;  %v2910_v0 = vmul.f32 %v2812_v29, %v2812_v29 }
 0xc21   :  { %vm3130_vm4 = vcmp.lt.f32.partialorder %v3098_v16, %v9475_v11 }
 0xc22   :  { %v3162_v31 = vsel %vm3130_vm4, 0.01, %v9473_v57 }
 0xc26   :  { %v3014_v24 = vpop.permute.xlu2 %3013 }
 0xc27   :  { %v3101_v50 = vadd.f32 %v3014_v24, %v2909_v10  ;;  %v9477_v24 = vld [vmem:[#allocation46_spill] sm:$0xff]  ;;  %v2908_v10 = vmul.f32 %v2810_v42, %v2810_v42 }
 0xc2e   :  { %v3002_v15 = vpop.permute.xlu1 %3001  ;;  %v3020_v39 = vpop.permute.xlu2 %3019 }
 0xc2f   :  { %v3095_v12 = vadd.f32 %v3002_v15, %v2903_v40  ;;  %v2998_v26 = vpop.permute.xlu0 %2997  ;;  %v2905_v40 = vmul.f32 %v2807_v33, %v2807_v33  ;;  %v9476_v15 = vld [vmem:[#allocation50_spill] sm:$0xff] }
 0xc30   :  { %v3093_v35 = vadd.f32 %v2998_v26, %v2901_v3  ;;  %vm3133_vm15 = vcmp.lt.f32.partialorder %v3101_v50, %v9476_v15  ;;  %v2778_v26 = vperm.slane %v7761_v27, 7  ;;  %v2779_v50 = vperm.slane %v7829_v62, 0 }
 0xc31   :  { %vm3127_vm2 = vcmp.lt.f32.partialorder %v3095_v12, %v9474_v4  ;;  %v2912_v12 = vmul.f32 %v2814_v9, %v2814_v9  ;;  %v7892_v9 = vld [vmem:[#allocation3 + $0x50] sm:$0xff] }
 0xc32   :  { %vm3125_vm3 = vcmp.lt.f32.partialorder %v3093_v35, %v9472_v60  ;;  %v3159_v45 = vsel %vm3127_vm2, 0.01, %v9473_v57  ;;  %v2777_v35 = vperm.slane %v7761_v27, 6  ;;  %v2813_v29 = vsub.f32 %v7892_v9, %v2776_v61  ;;  %v9479_v61 = vld [vmem:[#allocation45_spill] sm:$0xff] }
 0xc33   :  { %3228 = vperm.xlu0 %5584, %v3159_v45   ;;  %v3157_v20 = vsel %vm3125_vm3, 0.01, %v9473_v57  ;;  %v3165_v45 = vsel %vm3133_vm15, 0.01, %v9473_v57  ;;  %v3104_v16 = vadd.f32 %v3020_v39, %v2912_v12  ;;  %v7897_v12 = vld [vmem:[#allocation3 + $0x88] sm:$0xff] }
 0xc34   :  { %3222 = vperm.xlu2 %5585, %v3157_v20  }
 0xc35   :  { %vm3136_vm3 = vcmp.lt.f32.partialorder %v3104_v16, %v9478_v6 }
 0xc36   :  { %v3010_v58 = vpop.permute.xlu1 %3009  ;;  %v3026_v30 = vpop.permute.xlu2 %3025 }
 0xc37   :  { %v3004_v41 = vpop.permute.xlu0 %3003  ;;  %v3099_v51 = vadd.f32 %v3010_v58, %v2907_v49  ;;  %v7881_v58 = vld [vmem:[#allocation3 + $0x70] sm:$0xff] }
 0xc38   :  { %v3096_v52 = vadd.f32 %v3004_v41, %v2904_v44  ;;  %v2817_v27 = vsub.f32 %v7881_v58, %v2778_v26  ;;  %v7884_v44 = vld [vmem:[#allocation3 + $0x60] sm:$0xff] }
 0xc39   :  { %vm3131_vm1 = vcmp.lt.f32.partialorder %v3099_v51, %v9477_v24  ;;  %v2815_v41 = vsub.f32 %v7884_v44, %v2777_v35  ;;  %v3168_v51 = vsel %vm3136_vm3, 0.01, %v9473_v57 }
 0xc3a   :  { %vm3128_vm14 = vcmp.lt.f32.partialorder %v3096_v52, %v9474_v4  ;;  %v3163_v20 = vsel %vm3131_vm1, 0.01, %v9473_v57  ;;  %v2915_v33 = vmul.f32 %v2817_v27, %v2817_v27 }
 0xc3b   :  { %3237 = vperm.xlu0 %5584, %v3162_v31   ;;  %v3160_v55 = vsel %vm3128_vm14, 0.01, %v9473_v57 }
 0xc3c   :  { %3231 = vperm.xlu2 %5585, %v3160_v55   ;;  %v2913_v55 = vmul.f32 %v2815_v41, %v2815_v41  ;;  %v2781_v41 = vperm.slane %v7829_v62, 2 }
 0xc3e   :  { %v3016_v17 = vpop.permute.xlu1 %3015  ;;  %v3032_v49 = vpop.permute.xlu2 %3031 }
 0xc3f   :  { %v3006_v8 = vpop.permute.xlu0 %3005  ;;  %v3102_v48 = vadd.f32 %v3016_v17, %v2910_v0  ;;  %v3107_v17 = vadd.f32 %v3026_v30, %v2915_v33  ;;  %v2820_v0 = vsub.f32 %v7897_v12, %v2779_v50 }
 0xc40   :  { %v3097_v3 = vadd.f32 %v3006_v8, %v2905_v40 }
 0xc41   :  { %vm3134_vm4 = vcmp.lt.f32.partialorder %v3102_v48, %v9476_v15  ;;  %vm3139_vm15 = vcmp.lt.f32.partialorder %v3107_v17, %v9479_v61  ;;  %v2918_v27 = vmul.f32 %v2820_v0, %v2820_v0 }
 0xc42   :  { %vm3129_vm2 = vcmp.lt.f32.partialorder %v3097_v3, %v9475_v11  ;;  %v3166_v40 = vsel %vm3134_vm4, 0.01, %v9473_v57 }
 0xc43   :  { %3246 = vperm.xlu0 %5584, %v3165_v45   ;;  %v3161_v7 = vsel %vm3129_vm2, 0.01, %v9473_v57  ;;  %v7900_v45 = vld [vmem:[#allocation3 + $0x78] sm:$0xff] }
 0xc44   :  { %3240 = vperm.xlu2 %5585, %v3163_v20   ;;  %3234 = vperm.xlu1 %5586, %v3161_v7   ;;  %v2818_v42 = vsub.f32 %v7900_v45, %v2778_v26  ;;  %v2911_v20 = vmul.f32 %v2813_v29, %v2813_v29  ;;  %v9480_v7 = vld [vmem:[#allocation51_spill] sm:$0xff] }
 0xc45   :  { %v7909_v26 = vld [vmem:[#allocation3 + $0x68] sm:$0xff] }
 0xc46   :  { %v3022_v52 = vpop.permute.xlu1 %3021  ;;  %v2816_v33 = vsub.f32 %v7909_v26, %v2777_v35 }
 0xc47   :  { %v3012_v39 = vpop.permute.xlu0 %3011  ;;  %v3105_v3 = vadd.f32 %v3022_v52, %v2913_v55  ;;  %v2916_v52 = vmul.f32 %v2818_v42, %v2818_v42  ;;  %v3110_v55 = vadd.f32 %v3032_v49, %v2918_v27  ;;  %v7923_v27 = vld [vmem:[#allocation3 + $0x80] sm:$0xff] }
 0xc48   :  { %v3100_v31 = vadd.f32 %v3012_v39, %v2908_v10  ;;  %v3038_v10 = vpop.permute.xlu2 %3037  ;;  %v3171_v39 = vsel %vm3139_vm15, 0.01, %v9473_v57  ;;  %v2914_v42 = vmul.f32 %v2816_v33, %v2816_v33 }
 0xc49   :  { %vm3137_vm1 = vcmp.lt.f32.partialorder %v3105_v3, %v9480_v7 }
 0xc4a   :  { %vm3132_vm14 = vcmp.lt.f32.partialorder %v3100_v31, %v9477_v24  ;;  %v2780_v31 = vperm.slane %v7829_v62, 1 }
 0xc4b   :  { %3255 = vperm.xlu0 %5584, %v3168_v51   ;;  %v3164_v8 = vsel %vm3132_vm14, 0.01, %v9473_v57  ;;  %v3169_v51 = vsel %vm3137_vm1, 0.01, %v9473_v57 }
 0xc4c   :  { %3249 = vperm.xlu2 %5585, %v3166_v40   ;;  %3243 = vperm.xlu1 %5586, %v3164_v8   ;;  %v2823_v40 = vsub.f32 %v7784_v53, %v2781_v41  ;;  %v7915_v8 = vld [vmem:[#allocation3 + $0x90] sm:$0xff] }
 0xc4d   :  { %v2821_v3 = vsub.f32 %v7915_v8, %v2780_v31 }
 0xc4e   :  { %v3028_v16 = vpop.permute.xlu1 %3027 }
 0xc4f   :  { %v3018_v30 = vpop.permute.xlu0 %3017  ;;  %v3108_v17 = vadd.f32 %v3028_v16, %v2916_v52  ;;  %v2919_v16 = vmul.f32 %v2821_v3, %v2821_v3  ;;  %v2819_v52 = vsub.f32 %v7923_v27, %v2779_v50 }
 0xc50   :  { %v3103_v48 = vadd.f32 %v3018_v30, %v2911_v20  ;;  %v9481_v20 = vld [vmem:[#allocation44_spill] sm:$0xff]  ;;  %v2921_v30 = vmul.f32 %v2823_v40, %v2823_v40  ;;  %v7929_v40 = vld [vmem:[#allocation3 + $0xa8] sm:$0xff] }
 0xc51   :  { %vm3142_vm3 = vcmp.lt.f32.partialorder %v3110_v55, %v9481_v20  ;;  %vm3140_vm4 = vcmp.lt.f32.partialorder %v3108_v17, %v9479_v61  ;;  %v2824_v3 = vsub.f32 %v7929_v40, %v2781_v41  ;;  %v2784_v61 = vperm.slane %v7829_v62, 5 }
 0xc52   :  { %vm3135_vm2 = vcmp.lt.f32.partialorder %v3103_v48, %v9478_v6  ;;  %v2782_v48 = vperm.slane %v7829_v62, 3  ;;  %v3174_v53 = vsel %vm3142_vm3, 0.01, %v9473_v57  ;;  %v3172_v33 = vsel %vm3140_vm4, 0.01, %v9473_v57  ;;  %v9484_v6 = vld [vmem:[#allocation11_spill] sm:$0xff] }
 0xc53   :  { %3264 = vperm.xlu0 %5584, %v3171_v39   ;;  %v3167_v29 = vsel %vm3135_vm2, 0.01, %v9473_v57  ;;  %v3113_v39 = vadd.f32 %v3038_v10, %v2921_v30  ;;  %v9483_v10 = vld [vmem:[#allocation42_spill] sm:$0xff] }
 0xc54   :  { %3258 = vperm.xlu2 %5585, %v3169_v51   ;;  %3252 = vperm.xlu1 %5586, %v3167_v29   ;;  %v3044_v51 = vpop.permute.xlu2 %3043  ;;  %v2826_v17 = vsub.f32 %v7794_v28, %v2782_v48 }
 0xc56   :  { %v3034_v0 = vpop.permute.xlu1 %3033 }
 0xc57   :  { %v3024_v35 = vpop.permute.xlu0 %3023  ;;  %v3111_v29 = vadd.f32 %v3034_v0, %v2919_v16  ;;  %v2783_v0 = vperm.slane %v7829_v62, 4  ;;  %v2922_v16 = vmul.f32 %v2824_v3, %v2824_v3 }
 0xc58   :  { %v3106_v49 = vadd.f32 %v3024_v35, %v2914_v42  ;;  %v2917_v35 = vmul.f32 %v2819_v52, %v2819_v52 }
 0xc59   :  { %vm3143_vm1 = vcmp.lt.f32.partialorder %v3111_v29, %v9483_v10 }
 0xc5a   :  { %vm3138_vm14 = vcmp.lt.f32.partialorder %v3106_v49, %v9480_v7  ;;  %v9482_v49 = vld [vmem:[#allocation10_spill] sm:$0xff] }
 0xc5b   :  { %3273 = vperm.xlu0 %5584, %v3174_v53   ;;  %v3170_v55 = vsel %vm3138_vm14, 0.01, %v9473_v57  ;;  %vm3145_vm15 = vcmp.lt.f32.partialorder %v3113_v39, %v9482_v49  ;;  %v2924_v53 = vmul.f32 %v2826_v17, %v2826_v17  ;;  %v3175_v39 = vsel %vm3143_vm1, 0.01, %v9473_v57 }
 0xc5c   :  { %3267 = vperm.xlu2 %5585, %v3172_v33   ;;  %3261 = vperm.xlu1 %5586, %v3170_v55   ;;  %v3177_v28 = vsel %vm3145_vm15, 0.01, %v9473_v57  ;;  %v7938_v33 = vld [vmem:[#allocation3 + $0x98] sm:$0xff]  ;;  %v2829_v17 = vsub.f32 %v7803_v36, %v2784_v61  ;;  %v3050_v3 = vpop.permute.xlu2 %3049 }
 0xc5d   :  { %v2822_v41 = vsub.f32 %v7938_v33, %v2780_v31  ;;  %v3116_v52 = vadd.f32 %v3044_v51, %v2924_v53 }
 0xc5e   :  { %v3040_v42 = vpop.permute.xlu1 %3039  ;;  %v2927_v53 = vmul.f32 %v2829_v17, %v2829_v17 }
 0xc5f   :  { %v3030_v50 = vpop.permute.xlu0 %3029  ;;  %v3114_v29 = vadd.f32 %v3040_v42, %v2922_v16  ;;  %v2920_v7 = vmul.f32 %v2822_v41, %v2822_v41  ;;  %vm3148_vm3 = vcmp.lt.f32.partialorder %v3116_v52, %v9484_v6  ;;  %v2785_v42 = vperm.slane %v7829_v62, 6 }
 0xc60   :  { %v3109_v30 = vadd.f32 %v3030_v50, %v2917_v35  ;;  %v7944_v35 = vld [vmem:[#allocation3 + $0xc0] sm:$0xff]  ;;  %v3180_v36 = vsel %vm3148_vm3, 0.01, %v9473_v57 }
 0xc61   :  { %v2827_v50 = vsub.f32 %v7944_v35, %v2783_v0  ;;  %vm3146_vm4 = vcmp.lt.f32.partialorder %v3114_v29, %v9482_v49  ;;  %v7968_v49 = vld [vmem:[#allocation3 + $0xc8] sm:$0xff] }
 0xc62   :  { %vm3141_vm2 = vcmp.lt.f32.partialorder %v3109_v30, %v9481_v20  ;;  %v3178_v41 = vsel %vm3146_vm4, 0.01, %v9473_v57  ;;  %v9485_v20 = vld [vmem:[#allocation20_spill] sm:$0xff] }
 0xc63   :  { %3282 = vperm.xlu0 %5584, %v3177_v28   ;;  %v3173_v55 = vsel %vm3141_vm2, 0.01, %v9473_v57  ;;  %v2925_v16 = vmul.f32 %v2827_v50, %v2827_v50  ;;  %v7952_v28 = vld [vmem:[#allocation3 + $0xb0] sm:$0xff]  ;;  %v7960_v50 = vld [vmem:[#allocation3 + $0xd8] sm:$0xff] }
 0xc64   :  { %3276 = vperm.xlu2 %5585, %v3175_v39   ;;  %3270 = vperm.xlu1 %5586, %v3173_v55   ;;  %v2825_v39 = vsub.f32 %v7952_v28, %v2782_v48  ;;  %v3119_v55 = vadd.f32 %v3050_v3, %v2927_v53  ;;  %v3056_v53 = vpop.permute.xlu2 %3055 }
 0xc66   :  { %v3046_v30 = vpop.permute.xlu1 %3045  ;;  %vm3151_vm15 = vcmp.lt.f32.partialorder %v3119_v55, %v9485_v20 }
 0xc67   :  { %v3036_v31 = vpop.permute.xlu0 %3035  ;;  %v3117_v29 = vadd.f32 %v3046_v30, %v2925_v16  ;;  %v2786_v16 = vperm.slane %v7829_v62, 7 }
 0xc68   :  { %v3112_v51 = vadd.f32 %v3036_v31, %v2920_v7  ;;  %v7957_v7 = vld [vmem:[#allocation3 + $0xe8] sm:$0xff]  ;;  %v2830_v31 = vsub.f32 %v7960_v50, %v2784_v61  ;;  %v2828_v61 = vsub.f32 %v7968_v49, %v2783_v0 }
 0xc69   :  { %v2832_v17 = vsub.f32 %v7957_v7, %v2785_v42 }
 0xc6a   :  { %vm3144_vm14 = vcmp.lt.f32.partialorder %v3112_v51, %v9483_v10  ;;  %v2923_v51 = vmul.f32 %v2825_v39, %v2825_v39 }
 0xc6b   :  { %3291 = vperm.xlu0 %5584, %v3180_v36   ;;  %v3176_v52 = vsel %vm3144_vm14, 0.01, %v9473_v57  ;;  %v9486_v36 = vld [vmem:[#allocation6_spill] sm:$0xff]  ;;  %v2930_v30 = vmul.f32 %v2832_v17, %v2832_v17  ;;  %v7973_v17 = vld [vmem:[#allocation3 + $0xf0] sm:$0xff] }
 0xc6c   :  { %3285 = vperm.xlu2 %5585, %v3178_v41   ;;  %3279 = vperm.xlu1 %5586, %v3176_v52   ;;  %vm3149_vm1 = vcmp.lt.f32.partialorder %v3117_v29, %v9486_v36  ;;  %v2928_v41 = vmul.f32 %v2830_v31, %v2830_v31  ;;  %v3183_v52 = vsel %vm3151_vm15, 0.01, %v9473_v57  ;;  %v2833_v62 = vsub.f32 %v7973_v17, %v2786_v16  ;;  %v9487_v31 = vld [vmem:[#allocation17_spill] sm:$0xff] }
 0xc6d   :  { %v3122_v39 = vadd.f32 %v3056_v53, %v2930_v30  ;;  %v3181_v55 = vsel %vm3149_vm1, 0.01, %v9473_v57 }
 0xc6e   :  { %v3052_v48 = vpop.permute.xlu1 %3051  ;;  %v2931_v53 = vmul.f32 %v2833_v62, %v2833_v62 }
 0xc6f   :  { %v3042_v3 = vpop.permute.xlu0 %3041  ;;  %v3120_v29 = vadd.f32 %v3052_v48, %v2928_v41  ;;  %vm3154_vm3 = vcmp.lt.f32.partialorder %v3122_v39, %v9487_v31  ;;  %v7980_v48 = vld [vmem:[#allocation3 + $0xe0] sm:$0xff] }
 0xc70   :  { %v3115_v15 = vadd.f32 %v3042_v3, %v2923_v51  ;;  %v3186_v30 = vsel %vm3154_vm3, 0.01, %v9473_v57  ;;  %vm3383_vm3 = vcmp.gt.f32.partialorder %v7690_v43, 0.0 }
 0xc71   :  { %vm3152_vm4 = vcmp.lt.f32.partialorder %v3120_v29, %v9485_v20  ;;  %v9488_v29 = vld [vmem:[#allocation18_spill] sm:$0xff] }
 0xc72   :  { %vm3147_vm2 = vcmp.lt.f32.partialorder %v3115_v15, %v9484_v6  ;;  %v2926_v15 = vmul.f32 %v2828_v61, %v2828_v61  ;;  %v3184_v41 = vsel %vm3152_vm4, 0.01, %v9473_v57  ;;  %vm3384_vm4 = vcmp.gt.f32.partialorder %v7716_v56, 0.0 }
 0xc73   :  { %3300 = vperm.xlu0 %5584, %v3183_v52   ;;  %v3179_v10 = vsel %vm3147_vm2, 0.01, %v9473_v57 }
 0xc74   :  { %3294 = vperm.xlu2 %5585, %v3181_v55   ;;  %3288 = vperm.xlu1 %5586, %v3179_v10   ;;  %v2831_v10 = vsub.f32 %v7980_v48, %v2785_v42 }
 0xc76   :  { %v3058_v3 = vpop.permute.xlu1 %3057  ;;  %v2929_v39 = vmul.f32 %v2831_v10, %v2831_v10 }
 0xc77   :  { %v3048_v51 = vpop.permute.xlu0 %3047  ;;  %v3123_v61 = vadd.f32 %v3058_v3, %v2931_v53 }
 0xc78   :  { %v3118_v0 = vadd.f32 %v3048_v51, %v2926_v15  ;;  %v7987_v15 = vld [vmem:[#allocation3 + $0xf8] sm:$0xff] }
 0xc79   :  { %vm3155_vm15 = vcmp.lt.f32.partialorder %v3123_v61, %v9488_v29  ;;  %9489 = vst [vmem:[#allocation26_spill] sm:$0xff] %v7987_v15  ;;  %v2834_v51 = vsub.f32 %v7987_v15, %v2786_v16 }
 0xc7a   :  { %vm3150_vm14 = vcmp.lt.f32.partialorder %v3118_v0, %v9486_v36  ;;  %v3187_v42 = vsel %vm3155_vm15, 0.01, %v9473_v57 }
 0xc7b   :  { %3309 = vperm.xlu0 %5584, %v3186_v30   ;;  %v3182_v52 = vsel %vm3150_vm14, 0.01, %v9473_v57  ;;  %v2932_v3 = vmul.f32 %v2834_v51, %v2834_v51 }
 0xc7c   :  { %3303 = vperm.xlu2 %5585, %v3184_v41   ;;  %3297 = vperm.xlu1 %5586, %v3182_v52  }
 0xc7f   :  { %v3054_v55 = vpop.permute.xlu0 %3053 }
 0xc80   :  { %v3121_v62 = vadd.f32 %v3054_v55, %v2929_v39 }
 0xc82   :  { %vm3153_vm1 = vcmp.lt.f32.partialorder %v3121_v62, %v9487_v31 }
 0xc83   :  { %v3185_v0 = vsel %vm3153_vm1, 0.01, %v9473_v57 }
 0xc84   :  { %3312 = vperm.xlu2 %5585, %v3187_v42   ;;  %3306 = vperm.xlu1 %5586, %v3185_v0  }
 0xc87   :  { %v3060_v53 = vpop.permute.xlu0 %3059 }
 0xc88   :  { %v3124_v30 = vadd.f32 %v3060_v53, %v2932_v3 }
 0xc8a   :  { %vm3156_vm2 = vcmp.lt.f32.partialorder %v3124_v30, %v9488_v29 }
 0xc8b   :  { %v3188_v10 = vsel %vm3156_vm2, 0.01, %v9473_v57 }
 0xc8c   :  { %3315 = vperm.xlu1 %5586, %v3188_v10  }
 0xc8d   :  { %v3226_v16 = vpop.permute.xlu1 %3225 }
 0xc8e   :  { %v3223_v41 = vpop.permute.xlu2 %3222  ;;  %v3318_v53 = vperm.slane %v3226_v16, %v6231_v13 }
 0xc8f   :  { %v3317_v30 = vperm.slane %v3223_v41, %v6143_v47 }
 0xc96   :  { %v3232_v52 = vpop.permute.xlu2 %3231 }
 0xc97   :  { %v3321_v10 = vperm.slane %v3232_v52, %v6231_v13 }
 0xc9e   :  { %v3241_v39 = vpop.permute.xlu2 %3240 }
 0xc9f   :  { %v3326_v4 = vperm.slane %v3241_v39, %v6143_v47 }
 0xca5   :  { %v3229_v61 = vpop.permute.xlu0 %3228 }
 0xca6   :  { %v3250_v31 = vpop.permute.xlu2 %3249  ;;  %v3320_v51 = vperm.slane %v3229_v61, %v6143_v47 }
 0xca7   :  { %v3330_v39 = vperm.slane %v3250_v31, %v6231_v13 }
 0xca8   :  { %v3322_v57 = vsel %vm313_vm5, %v3321_v10, %v3320_v51 }
 0xcad   :  { %v3238_v55 = vpop.permute.xlu0 %3237 }
 0xcae   :  { %v3259_v0 = vpop.permute.xlu2 %3258  ;;  %v3324_v11 = vperm.slane %v3238_v55, %v6231_v13 }
 0xcb5   :  { %v3247_v62 = vpop.permute.xlu0 %3246 }
 0xcb6   :  { %v3235_v20 = vpop.permute.xlu1 %3234  ;;  %v3268_v60 = vpop.permute.xlu2 %3267 }
 0xcb7   :  { %v3323_v3 = vperm.slane %v3235_v20, %v6143_v47  ;;  %v3319_v20 = vsel %vm313_vm5, %v3318_v53, %v3317_v30 }
 0xcb8   :  { %v3365_v52 = vsel %vm360_vm6, %v3322_v57, %v3319_v20 }
 0xcb9   :  { %v3325_v61 = vsel %vm313_vm5, %v3324_v11, %v3323_v3 }
 0xcba   :  { %v3366_v55 = vsel %vm362_vm7, %v3325_v61, %v3365_v52 }
 0xcbd   :  { %v3256_v36 = vpop.permute.xlu0 %3255 }
 0xcbe   :  { %v3244_v42 = vpop.permute.xlu1 %3243  ;;  %v3333_v15 = vperm.slane %v3256_v36, %v6231_v13 }
 0xcbf   :  { %v3327_v29 = vperm.slane %v3244_v42, %v6231_v13  ;;  %v3329_v42 = vperm.slane %v3247_v62, %v6143_v47 }
 0xcc1   :  { %v3328_v16 = vsel %vm313_vm5, %v3327_v29, %v3326_v4  ;;  %v3335_v4 = vperm.slane %v3259_v0, %v6143_v47  ;;  %v3339_v29 = vperm.slane %v3268_v60, %v6231_v13  ;;  %v3277_v0 = vpop.permute.xlu2 %3276 }
 0xcc2   :  { %v3367_v51 = vsel %vm364_vm8, %v3328_v16, %v3366_v55  ;;  %v3344_v43 = vperm.slane %v3277_v0, %v6143_v47 }
 0xcc5   :  { %v3265_v24 = vpop.permute.xlu0 %3264 }
 0xcc6   :  { %v3253_v6 = vpop.permute.xlu1 %3252  ;;  %v3338_v3 = vperm.slane %v3265_v24, %v6143_v47 }
 0xcc7   :  { %v3332_v41 = vperm.slane %v3253_v6, %v6143_v47  ;;  %v3331_v6 = vsel %vm313_vm5, %v3330_v39, %v3329_v42 }
 0xcc8   :  { %v3368_v62 = vsel %vm366_vm9, %v3331_v6, %v3367_v51 }
 0xcc9   :  { %v3334_v11 = vsel %vm313_vm5, %v3333_v15, %v3332_v41  ;;  %v3340_v15 = vsel %vm313_vm5, %v3339_v29, %v3338_v3  ;;  %v3286_v52 = vpop.permute.xlu2 %3285 }
 0xcca   :  { %v3369_v36 = vsel %vm368_vm10, %v3334_v11, %v3368_v62 }
 0xccd   :  { %v3274_v30 = vpop.permute.xlu0 %3273 }
 0xcce   :  { %v3262_v53 = vpop.permute.xlu1 %3261  ;;  %v3342_v6 = vperm.slane %v3274_v30, %v6231_v13 }
 0xccf   :  { %v3336_v57 = vperm.slane %v3262_v53, %v6231_v13 }
 0xcd1   :  { %v3337_v31 = vsel %vm313_vm5, %v3336_v57, %v3335_v4  ;;  %v3295_v51 = vpop.permute.xlu2 %3294 }
 0xcd2   :  { %v3370_v24 = vsel %vm370_vm11, %v3337_v31, %v3369_v36  ;;  %v3353_v0 = vperm.slane %v3295_v51, %v6143_v47 }
 0xcd3   :  { %v3371_v10 = vsel %vm9317_vm12, %v3340_v15, %v3370_v24 }
 0xcd4   :  { %v3381_v61 = vmul.f32 %v3371_v10, %v7640_v37  ;;  %v3348_v10 = vperm.slane %v3286_v52, %v6231_v13 }
 0xcd5   :  { %v3283_v41 = vpop.permute.xlu0 %3282 }
 0xcd6   :  { %v3271_v20 = vpop.permute.xlu1 %3270  ;;  %v8027_v60 = vsel %vm3383_vm3, -1.0, %v3381_v61  ;;  %v3347_v62 = vperm.slane %v3283_v41, %v6143_v47 }
 0xcd7   :  { %v3387_v16 = vsel %vm76_vm0, %v8027_v60, -inf  ;;  %v3341_v4 = vperm.slane %v3271_v20, %v6143_v47 }
 0xcd8   :  { %3388 = vmax.xlane.f32.xlu0 %v3387_v16  ;;  %v3349_v16 = vsel %vm313_vm5, %v3348_v10, %v3347_v62 }
 0xcd9   :  { %v3304_v37 = vpop.permute.xlu2 %3303  ;;  %v3343_v15 = vsel %vm313_vm5, %v3342_v6, %v3341_v4 }
 0xcdd   :  { %v3292_v55 = vpop.permute.xlu0 %3291 }
 0xcde   :  { %v3280_v42 = vpop.permute.xlu1 %3279  ;;  %v3351_v24 = vperm.slane %v3292_v55, %v6231_v13 }
 0xcdf   :  { %v3345_v53 = vperm.slane %v3280_v42, %v6231_v13 }
 0xce1   :  { %v3346_v57 = vsel %vm313_vm5, %v3345_v53, %v3344_v43  ;;  %v3313_v55 = vpop.permute.xlu2 %3312  ;;  %v3357_v53 = vperm.slane %v3304_v37, %v6231_v13 }
 0xce2   :  { %v3372_v61 = vsel %vm360_vm6, %v3346_v57, %v3343_v15  ;;  %v3362_v57 = vperm.slane %v3313_v55, %v6143_v47 }
 0xce5   :  { %v3301_v3 = vpop.permute.xlu0 %3300 }
 0xce6   :  { %v3289_v39 = vpop.permute.xlu1 %3288 }
 0xce7   :  { %v3350_v29 = vperm.slane %v3289_v39, %v6143_v47  ;;  %v3373_v39 = vsel %vm362_vm7, %v3349_v16, %v3372_v61 }
 0xce9   :  { %v3352_v30 = vsel %vm313_vm5, %v3351_v24, %v3350_v29 }
 0xcea   :  { %v3374_v52 = vsel %vm364_vm8, %v3352_v30, %v3373_v39 }
 0xced   :  { %v3310_v20 = vpop.permute.xlu0 %3309 }
 0xcee   :  { %v3298_v11 = vpop.permute.xlu1 %3297  ;;  %v3360_v51 = vperm.slane %v3310_v20, %v6231_v13 }
 0xcef   :  { %v3354_v36 = vperm.slane %v3298_v11, %v6231_v13  ;;  %v3356_v11 = vperm.slane %v3301_v3, %v6143_v47 }
 0xcf1   :  { %v3355_v41 = vsel %vm313_vm5, %v3354_v36, %v3353_v0  ;;  %v3358_v29 = vsel %vm313_vm5, %v3357_v53, %v3356_v11 }
 0xcf2   :  { %v3375_v43 = vsel %vm366_vm9, %v3355_v41, %v3374_v52 }
 0xcf3   :  { %v3376_v3 = vsel %vm368_vm10, %v3358_v29, %v3375_v43 }
 0xcf6   :  { %v3307_v31 = vpop.permute.xlu1 %3306 }
 0xcf7   :  { %v3359_v42 = vperm.slane %v3307_v31, %v6143_v47 }
 0xcf9   :  { %v3361_v4 = vsel %vm313_vm5, %v3360_v51, %v3359_v42 }
 0xcfa   :  { %v3377_v36 = vsel %vm370_vm11, %v3361_v4, %v3376_v3 }
 0xcfe   :  { %v3316_v6 = vpop.permute.xlu1 %3315 }
 0xcff   :  { %v3363_v62 = vperm.slane %v3316_v6, %v6231_v13 }
 0xd01   :  { %v3364_v31 = vsel %vm313_vm5, %v3363_v62, %v3362_v57 }
 0xd02   :  { %v3378_v15 = vsel %vm9317_vm12, %v3364_v31, %v3377_v36 }
 0xd03   :  { %v3382_v37 = vmul.f32 %v3378_v15, %v7678_v34 }
 0xd05   :  { %v8064_v24 = vsel %vm3384_vm4, -1.0, %v3382_v37 }
 0xd06   :  { %v3390_v10 = vsel %vm76_vm0, %v8064_v24, -inf }
 0xd07   :  { %3391 = vmax.xlane.f32.xlu2 %v3390_v10 }
 0xd4b   :  { %v3389_v0 = vpop.xlane.xlu0 %3388 }
 0xd4c   :  { %vm3393_vm14 = vcmp.eq.f32.partialorder %v8027_v60, %v3389_v0 }
 0xd4d   :  { %v3395_v61 = vsel %vm3393_vm14, %v6143_v47, 16 }
 0xd4e   :  { %v3397_v30 = vsel %vm76_vm0, %v3395_v61, 2147483647 }
 0xd4f   :  { %v3399_v20 = vshra.s32 %v3397_v30, 16  ;;  %v3398_v11 = vand.u32 65535, %v3397_v30 }
 0xd51   :  { %v3401_v16 = vcvt.s32.f32 %v3399_v20  ;;  %v3400_v52 = vcvt.s32.f32 %v3398_v11 }
 0xd53   :  { %3402 = vmin.xlane.f32.xlu1 %v3401_v16 }
 0xd7a   :  { %v3392_v41 = vpop.xlane.xlu2 %3391 }
 0xd7b   :  { %vm3394_vm15 = vcmp.eq.f32.partialorder %v8064_v24, %v3392_v41 }
 0xd7c   :  { %v3396_v34 = vsel %vm3394_vm15, %v6143_v47, 16 }
 0xd7d   :  { %v3412_v56 = vsel %vm76_vm0, %v3396_v34, 2147483647 }
 0xd7e   :  { %v3414_v42 = vshra.s32 %v3412_v56, 16  ;;  %v3413_v53 = vand.u32 65535, %v3412_v56 }
 0xd80   :  { %v3416_v39 = vcvt.s32.f32 %v3414_v42  ;;  %v3415_v4 = vcvt.s32.f32 %v3413_v53 }
 0xd82   :  { %3417 = vmin.xlane.f32.xlu0 %v3416_v39 }
 0xdc6   :  { %v3403_v55 = vpop.xlane.xlu1 %3402 }
 0xdc7   :  { %vm3404_vm1 = vcmp.eq.f32.partialorder %v3401_v16, %v3403_v55  ;;  %v3409_v57 = vcvt.f32.s32 %v3403_v55 }
 0xdc8   :  { %v3405_v51 = vsel %vm3404_vm1, %v3400_v52, inf }
 0xdc9   :  { %3406 = vmin.xlane.f32.xlu2 %v3405_v51  ;;  %v3410_v62 = vshll.u32 %v3409_v57, 16 }
 0xdf5   :  { %v3418_v43 = vpop.xlane.xlu0 %3417 }
 0xdf6   :  { %vm3419_vm2 = vcmp.eq.f32.partialorder %v3416_v39, %v3418_v43 }
 0xdf7   :  { %v3420_v6 = vsel %vm3419_vm2, %v3415_v4, inf }
 0xdf8   :  { %3421 = vmin.xlane.f32.xlu1 %v3420_v6 }
 0xe3c   :  { %v3407_v29 = vpop.xlane.xlu2 %3406 }
 0xe3d   :  { %v3408_v3 = vcvt.f32.s32 %v3407_v29 }
 0xe3f   :  { %v3411_v36 = vadd.s32 %v3410_v62, %v3408_v3 }
 0xe41   :  { %vm3427_vm3 = vcmp.eq.s32.totalorder %v6143_v47, %v3411_v36 }
 0xe42   :  { %v8076_v31 = vsel %vm3427_vm3, 1.0, %v9431_v54 }
 0xe43   :  { %v3435_v15 = vrot.slane %v8076_v31, 1  ;;  %v3436_v37 = vrot.slane %v8076_v31, 2  ;;  %v3437_v10 = vrot.slane %v8076_v31, 3  ;;  %3463 = vst.msk [vmem:[#allocation2 + $0x4] sm:$0x1] %vm165_vm13, %v8076_v31  ;;  %v3438_v0 = vrot.slane %v8076_v31, 4 }
 0xe44   :  { %v3479_v61 = vmul.f32 %v8076_v31, %v6350_v18  ;;  %v3439_v30 = vrot.slane %v8076_v31, 5  ;;  %v3487_v20 = vmul.f32 %v8076_v31, %v6509_v63  ;;  %v3440_v16 = vrot.slane %v8076_v31, 6 }
 0xe45   :  { %3464 = vst.msk [vmem:[#allocation2 + $0xc] sm:$0x1] %vm165_vm13, %v3435_v15  ;;  %v3441_v34 = vrot.slane %v8076_v31, 7  ;;  %v3424_v18 = vcvt.f32.s32 %v3418_v43 }
 0xe46   :  { %v3481_v41 = vsel %vm76_vm0, %v3479_v61, 0.0  ;;  %3465 = vst.msk [vmem:[#allocation2 + $0x14] sm:$0x1] %vm165_vm13, %v3436_v37  ;;  %v3489_v56 = vsel %vm76_vm0, %v3487_v20, 0.0 }
 0xe47   :  { %3482 = vadd.xlane.f32.xlu0 %v3481_v41  ;;  %3466 = vst.msk [vmem:[#allocation2 + $0x1c] sm:$0x1] %vm165_vm13, %v3437_v10  ;;  %3490 = vadd.xlane.f32.xlu1 %v3489_v56  ;;  %v3425_v42 = vshll.u32 %v3424_v18, 16 }
 0xe48   :  { %3467 = vst.msk [vmem:[#allocation2 + $0x24] sm:$0x1] %vm165_vm13, %v3438_v0 }
 0xe49   :  { %3468 = vst.msk [vmem:[#allocation2 + $0x2c] sm:$0x1] %vm165_vm13, %v3439_v30 }
 0xe4a   :  { %3469 = vst.msk [vmem:[#allocation2 + $0x34] sm:$0x1] %vm165_vm13, %v3440_v16 }
 0xe4b   :  { %3470 = vst.msk [vmem:[#allocation2 + $0x3c] sm:$0x1] %vm165_vm13, %v3441_v34 }
 0xe6b   :  { %v3422_v63 = vpop.xlane.xlu1 %3421 }
 0xe6c   :  { %v3423_v39 = vcvt.f32.s32 %v3422_v63 }
 0xe6e   :  { %v3426_v11 = vadd.s32 %v3425_v42, %v3423_v39 }
 0xe70   :  { %vm3428_vm4 = vcmp.eq.s32.totalorder %v6143_v47, %v3426_v11 }
 0xe71   :  { %v8102_v55 = vsel %vm3428_vm4, 1.0, %v9431_v54 }
 0xe72   :  { %v3442_v52 = vrot.slane %v8102_v55, 1  ;;  %v3443_v51 = vrot.slane %v8102_v55, 2  ;;  %v3444_v53 = vrot.slane %v8102_v55, 3  ;;  %3471 = vst.msk [vmem:[#allocation2 + $0x44] sm:$0x1] %vm165_vm13, %v8102_v55  ;;  %v3445_v43 = vrot.slane %v8102_v55, 4 }
 0xe73   :  { %v3488_v4 = vmul.f32 %v8102_v55, %v6471_v25  ;;  %v3446_v6 = vrot.slane %v8102_v55, 5  ;;  %v3480_v57 = vmul.f32 %v8102_v55, %v6480_v23  ;;  %v3447_v29 = vrot.slane %v8102_v55, 6 }
 0xe74   :  { %3472 = vst.msk [vmem:[#allocation2 + $0x4c] sm:$0x1] %vm165_vm13, %v3442_v52  ;;  %v3448_v3 = vrot.slane %v8102_v55, 7 }
 0xe75   :  { %v3492_v62 = vsel %vm76_vm0, %v3488_v4, 0.0  ;;  %3473 = vst.msk [vmem:[#allocation2 + $0x54] sm:$0x1] %vm165_vm13, %v3443_v51  ;;  %v3484_v36 = vsel %vm76_vm0, %v3480_v57, 0.0 }
 0xe76   :  { %3493 = vadd.xlane.f32.xlu0 %v3492_v62  ;;  %3474 = vst.msk [vmem:[#allocation2 + $0x5c] sm:$0x1] %vm165_vm13, %v3444_v53  ;;  %3485 = vadd.xlane.f32.xlu2 %v3484_v36 }
 0xe77   :  { %3475 = vst.msk [vmem:[#allocation2 + $0x64] sm:$0x1] %vm165_vm13, %v3445_v43 }
 0xe78   :  { %3476 = vst.msk [vmem:[#allocation2 + $0x6c] sm:$0x1] %vm165_vm13, %v3446_v6 }
 0xe79   :  { %3477 = vst.msk [vmem:[#allocation2 + $0x74] sm:$0x1] %vm165_vm13, %v3447_v29 }
 0xe7a   :  { %3478 = vst.msk [vmem:[#allocation2 + $0x7c] sm:$0x1] %vm165_vm13, %v3448_v3 }
 0xeba   :  { %v3491_v25 = vpop.xlane.xlu1 %3490 }
 0xebb   :  { %v3564_v23 = vperm.slane %v3491_v25, 1  ;;  %v3563_v15 = vperm.slane %v3491_v25, 0  ;;  %v3565_v16 = vperm.slane %v3491_v25, 2  ;;  %v3566_v18 = vperm.slane %v3491_v25, 3 }
 0xebc   :  { %v3569_v4 = vperm.slane %v3491_v25, 6 }
 0xebd   :  { %v3597_v37 = vsub.f32 %v7832_v22, %v3564_v23  ;;  %v3596_v10 = vsub.f32 %v7822_v21, %v3563_v15  ;;  %v3595_v0 = vsub.f32 %v7835_v59, %v3563_v15  ;;  %v3599_v41 = vsub.f32 %v7860_v5, %v3565_v16 }
 0xebe   :  { %v3600_v34 = vsub.f32 %v7838_v2, %v3565_v16  ;;  %v3598_v22 = vsub.f32 %v7846_v19, %v3564_v23  ;;  %v3567_v59 = vperm.slane %v3491_v25, 4  ;;  %v3602_v42 = vsub.f32 %v7876_v1, %v3566_v18 }
 0xebf   :  { %v3661_v61 = vmul.f32 %v3597_v37, %v3597_v37  ;;  %v3660_v30 = vmul.f32 %v3596_v10, %v3596_v10  ;;  %v3659_v20 = vmul.f32 %v3595_v0, %v3595_v0  ;;  %v3663_v56 = vmul.f32 %v3599_v41, %v3599_v41 }
 0xec0   :  { %v3664_v21 = vmul.f32 %v3600_v34, %v3600_v34  ;;  %v3662_v63 = vmul.f32 %v3598_v22, %v3598_v22  ;;  %v3603_v39 = vsub.f32 %v7850_v32, %v3567_v59  ;;  %v3601_v5 = vsub.f32 %v7853_v46, %v3566_v18 }
 0xec1   :  { %3727 = vrot.lane.b32.xlu0 %v3661_v61, %s5883_s0  ;;  %3725 = vrot.lane.b32.xlu1 %v3660_v30, %s5883_s0  ;;  %v3666_v2 = vmul.f32 %v3602_v42, %v3602_v42  ;;  %v3568_v19 = vperm.slane %v3491_v25, 5  ;;  %v3604_v1 = vsub.f32 %v7867_v38, %v3567_v59  ;;  %v3570_v46 = vperm.slane %v3491_v25, 7  ;;  %v8153_v38 = vpop.xlane.xlu0 %3482  ;;  %v8173_v59 = vld [vmem:[#allocation3 + $0xb8] sm:$0xff] }
 0xec2   :  { %3723 = vrot.lane.b32.xlu2 %v3659_v20, %s5883_s0  ;;  %v3667_v11 = vmul.f32 %v3603_v39, %v3603_v39  ;;  %v3665_v52 = vmul.f32 %v3601_v5, %v3601_v5  ;;  %v3608_v57 = vsub.f32 %v7909_v26, %v3569_v4  ;;  %v8165_v20 = vld [vmem:[#allocation3 + $0xa0] sm:$0xff] }
 0xec3   :  { %v3605_v51 = vsub.f32 %v7892_v9, %v3568_v19  ;;  %v3606_v53 = vsub.f32 %v7864_v14, %v3568_v19  ;;  %v3668_v6 = vmul.f32 %v3604_v1, %v3604_v1  ;;  %v3609_v29 = vsub.f32 %v7881_v58, %v3570_v46 }
 0xec4   :  { %v3607_v9 = vsub.f32 %v7884_v44, %v3569_v4  ;;  %v3672_v14 = vmul.f32 %v3608_v57, %v3608_v57  ;;  %v3610_v36 = vsub.f32 %v7900_v45, %v3570_v46 }
 0xec5   :  { %v3669_v43 = vmul.f32 %v3605_v51, %v3605_v51  ;;  %v3670_v32 = vmul.f32 %v3606_v53, %v3606_v53  ;;  %v3673_v62 = vmul.f32 %v3609_v29, %v3609_v29 }
 0xec6   :  { %v3671_v3 = vmul.f32 %v3607_v9, %v3607_v9  ;;  %v3674_v25 = vmul.f32 %v3610_v36, %v3610_v36  ;;  %v3497_v36 = vperm.slane %v8153_v38, 0 }
 0xec9   :  { %3731 = vrot.lane.b32.xlu0 %v3663_v56, %s5883_s0  ;;  %3733 = vrot.lane.b32.xlu1 %v3664_v21, %s5883_s0 }
 0xeca   :  { %3729 = vrot.lane.b32.xlu2 %v3662_v63, %s5883_s0 }
 0xed1   :  { %3737 = vrot.lane.b32.xlu0 %v3666_v2, %s5883_s0  ;;  %3739 = vrot.lane.b32.xlu1 %v3667_v11, %s5883_s0 }
 0xed2   :  { %3735 = vrot.lane.b32.xlu2 %v3665_v52, %s5883_s0  ;;  %v8181_v52 = vld [vmem:[#allocation3 + $0xd0] sm:$0xff] }
 0xed9   :  { %3743 = vrot.lane.b32.xlu0 %v3669_v43, %s5883_s0  ;;  %3745 = vrot.lane.b32.xlu1 %v3670_v32, %s5883_s0 }
 0xeda   :  { %3741 = vrot.lane.b32.xlu2 %v3668_v6, %s5883_s0 }
 0xee1   :  { %3749 = vrot.lane.b32.xlu0 %v3672_v14, %s5883_s0  ;;  %3751 = vrot.lane.b32.xlu1 %v3673_v62, %s5883_s0  ;;  %v9490_v62 = vld [vmem:[#allocation26_spill] sm:$0xff] }
 0xee2   :  { %3747 = vrot.lane.b32.xlu2 %v3671_v3, %s5883_s0 }
 0xee9   :  { %v3494_v23 = vpop.xlane.xlu0 %3493 }
 0xeea   :  { %v3571_v26 = vperm.slane %v3494_v23, 0  ;;  %v3572_v15 = vperm.slane %v3494_v23, 1  ;;  %3753 = vrot.lane.b32.xlu2 %v3674_v25, %s5883_s0  ;;  %v3573_v61 = vperm.slane %v3494_v23, 2  ;;  %v3574_v56 = vperm.slane %v3494_v23, 3  ;;  %v5822_v25 = vld [vmem:[#allocation3] sm:$0xff] }
 0xeeb   :  { %v3575_v18 = vperm.slane %v3494_v23, 4  ;;  %v3576_v11 = vperm.slane %v3494_v23, 5  ;;  %v3577_v32 = vperm.slane %v3494_v23, 6  ;;  %v3578_v46 = vperm.slane %v3494_v23, 7 }
 0xeec   :  { %v3612_v58 = vsub.f32 %v7897_v12, %v3571_v26  ;;  %v3611_v44 = vsub.f32 %v7923_v27, %v3571_v26  ;;  %v3613_v37 = vsub.f32 %v7915_v8, %v3572_v15  ;;  %v3615_v16 = vsub.f32 %v8165_v20, %v3573_v61 }
 0xeed   :  { %v3614_v41 = vsub.f32 %v7938_v33, %v3572_v15  ;;  %v3616_v12 = vsub.f32 %v7929_v40, %v3573_v61  ;;  %v3618_v63 = vsub.f32 %v8173_v59, %v3574_v56  ;;  %v3617_v42 = vsub.f32 %v7952_v28, %v3574_v56 }
 0xeee   :  { %v3676_v10 = vmul.f32 %v3612_v58, %v3612_v58  ;;  %v3675_v0 = vmul.f32 %v3611_v44, %v3611_v44  ;;  %v3677_v30 = vmul.f32 %v3613_v37, %v3613_v37  ;;  %v3679_v34 = vmul.f32 %v3615_v16, %v3615_v16  ;;  %v9491_v44 = vld [vmem:[#allocation49_spill] sm:$0xff] }
 0xeef   :  { %v3678_v22 = vmul.f32 %v3614_v41, %v3614_v41  ;;  %v3680_v21 = vmul.f32 %v3616_v12, %v3616_v12  ;;  %v3619_v39 = vsub.f32 %v7944_v35, %v3575_v18  ;;  %v3682_v5 = vmul.f32 %v3618_v63, %v3618_v63  ;;  %v5823_v37 = vld [vmem:[#allocation3 + $0x18] sm:$0xff] }
 0xef0   :  { %3757 = vrot.lane.b32.xlu1 %v3676_v10, %s5883_s0  ;;  %3755 = vrot.lane.b32.xlu0 %v3675_v0, %s5883_s0  ;;  %v3681_v2 = vmul.f32 %v3617_v42, %v3617_v42  ;;  %v3621_v51 = vsub.f32 %v8181_v52, %v3576_v11  ;;  %v3620_v53 = vsub.f32 %v7968_v49, %v3575_v18  ;;  %v3498_v26 = vperm.slane %v8153_v38, 1 }
 0xef1   :  { %v3683_v19 = vmul.f32 %v3619_v39, %v3619_v39  ;;  %v3622_v1 = vsub.f32 %v7960_v50, %v3576_v11  ;;  %v3624_v6 = vsub.f32 %v7957_v7, %v3577_v32  ;;  %v3623_v57 = vsub.f32 %v7980_v48, %v3577_v32  ;;  %v8198_v7 = vpop.xlane.xlu2 %3485  ;;  %v5826_v11 = vld [vmem:[#allocation3 + $0x10] sm:$0xff] }
 0xef2   :  { %3759 = vrot.lane.b32.xlu2 %v3677_v30, %s5883_s0  ;;  %v3685_v43 = vmul.f32 %v3621_v51, %v3621_v51  ;;  %v3684_v35 = vmul.f32 %v3620_v53, %v3620_v53  ;;  %v3625_v29 = vsub.f32 %v7973_v17, %v3578_v46  ;;  %v3626_v3 = vsub.f32 %v9490_v62, %v3578_v46  ;;  %v9494_v51 = vld [vmem:[#allocation46_spill] sm:$0xff]  ;;  %v5827_v53 = vld [vmem:[#allocation3 + $0x48] sm:$0xff] }
 0xef3   :  { %v3686_v4 = vmul.f32 %v3622_v1, %v3622_v1  ;;  %v3688_v9 = vmul.f32 %v3624_v6, %v3624_v6  ;;  %v3687_v14 = vmul.f32 %v3623_v57, %v3623_v57  ;;  %v3529_v17 = vsub.f32 %v5822_v25, %v3497_v36 }
 0xef4   :  { %v3689_v50 = vmul.f32 %v3625_v29, %v3625_v29  ;;  %v3690_v48 = vmul.f32 %v3626_v3, %v3626_v3  ;;  %v3532_v10 = vsub.f32 %v5823_v37, %v3498_v26  ;;  %v9492_v0 = vmov 1.0   ;;  %v5828_v3 = vld [vmem:[#allocation3 + $0x28] sm:$0xff] }
 0xef5   :  { %v3627_v23 = vmul.f32 %v3529_v17, %v3529_v17  ;;  %v3500_v16 = vperm.slane %v8153_v38, 3  ;;  %v3501_v63 = vperm.slane %v8153_v38, 4  ;;  %v3503_v29 = vperm.slane %v8153_v38, 6 }
 0xef6   :  { %v3630_v30 = vmul.f32 %v3532_v10, %v3532_v10 }
 0xef7   :  { %v3538_v1 = vsub.f32 %v5827_v53, %v3501_v63  ;;  %v3506_v53 = vperm.slane %v8198_v7, 1 }
 0xef8   :  { %3763 = vrot.lane.b32.xlu1 %v3679_v34, %s5883_s0  ;;  %3761 = vrot.lane.b32.xlu0 %v3678_v22, %s5883_s0  ;;  %v9493_v34 = vld [vmem:[#allocation43_spill] sm:$0xff]  ;;  %v5824_v22 = vld [vmem:[#allocation3 + $0x30] sm:$0xff] }
 0xef9   :  { %v3535_v56 = vsub.f32 %v5824_v22, %v3500_v16  ;;  %v3636_v6 = vmul.f32 %v3538_v1, %v3538_v1 }
 0xefa   :  { %3765 = vrot.lane.b32.xlu2 %v3680_v21, %s5883_s0 }
 0xefb   :  { %v3633_v18 = vmul.f32 %v3535_v56, %v3535_v56  ;;  %v9495_v56 = vld [vmem:[#allocation48_spill] sm:$0xff] }
 0xf00   :  { %3769 = vrot.lane.b32.xlu1 %v3682_v5, %s5883_s0  ;;  %3767 = vrot.lane.b32.xlu0 %v3681_v2, %s5883_s0  ;;  %v5825_v5 = vld [vmem:[#allocation3 + $0x8] sm:$0xff] }
 0xf01   :  { %v3530_v2 = vsub.f32 %v5825_v5, %v3497_v36 }
 0xf02   :  { %3771 = vrot.lane.b32.xlu2 %v3683_v19, %s5883_s0  ;;  %v3531_v19 = vsub.f32 %v5826_v11, %v3498_v26  ;;  %v5830_v26 = vld [vmem:[#allocation3 + $0x60] sm:$0xff] }
 0xf04   :  { %v3629_v32 = vmul.f32 %v3531_v19, %v3531_v19 }
 0xf08   :  { %3775 = vrot.lane.b32.xlu1 %v3685_v43, %s5883_s0  ;;  %3773 = vrot.lane.b32.xlu0 %v3684_v35, %s5883_s0  ;;  %v3628_v35 = vmul.f32 %v3530_v2, %v3530_v2 }
 0xf0a   :  { %3777 = vrot.lane.b32.xlu2 %v3686_v4, %s5883_s0  ;;  %v3499_v4 = vperm.slane %v8153_v38, 2 }
 0xf0c   :  { %v3534_v36 = vsub.f32 %v5828_v3, %v3499_v4 }
 0xf10   :  { %3781 = vrot.lane.b32.xlu1 %v3688_v9, %s5883_s0  ;;  %3779 = vrot.lane.b32.xlu0 %v3687_v14, %s5883_s0 }
 0xf12   :  { %3783 = vrot.lane.b32.xlu2 %v3689_v50, %s5883_s0 }
 0xf18   :  { %3785 = vrot.lane.b32.xlu0 %v3690_v48, %s5883_s0  ;;  %v5829_v48 = vld [vmem:[#allocation3 + $0x20] sm:$0xff] }
 0xf19   :  { %v3533_v25 = vsub.f32 %v5829_v48, %v3499_v4  ;;  %v3547_v4 = vsub.f32 %v7915_v8, %v3506_v53 }
 0xf1b   :  { %v3631_v37 = vmul.f32 %v3533_v25, %v3533_v25 }
 0xf1c   :  { %v3724_v15 = vpop.permute.xlu2 %3723 }
 0xf1d   :  { %v3819_v58 = vadd.f32 %v3724_v15, %v3627_v23  ;;  %v3541_v15 = vsub.f32 %v5830_v26, %v3503_v29  ;;  %v9497_v26 = vld [vmem:[#allocation10_spill] sm:$0xff] }
 0xf1f   :  { %vm3851_vm14 = vcmp.lt.f32.partialorder %v3819_v58, %v9491_v44  ;;  %v3632_v58 = vmul.f32 %v3534_v36, %v3534_v36  ;;  %v5832_v36 = vld [vmem:[#allocation3 + $0x40] sm:$0xff] }
 0xf20   :  { %v3883_v61 = vsel %vm3851_vm14, 0.01, %v9492_v0  ;;  %v3537_v8 = vsub.f32 %v5832_v36, %v3501_v63 }
 0xf21   :  { %3948 = vperm.xlu1 %5586, %v3883_v61  }
 0xf24   :  { %v3730_v41 = vpop.permute.xlu2 %3729 }
 0xf25   :  { %v3822_v12 = vadd.f32 %v3730_v41, %v3630_v30  ;;  %v3504_v30 = vperm.slane %v8153_v38, 7 }
 0xf27   :  { %vm3854_vm15 = vcmp.lt.f32.partialorder %v3822_v12, %v9493_v34  ;;  %v3544_v5 = vsub.f32 %v7900_v45, %v3504_v30  ;;  %v3645_v45 = vmul.f32 %v3547_v4, %v3547_v4 }
 0xf28   :  { %v3886_v21 = vsel %vm3854_vm15, 0.01, %v9492_v0 }
 0xf29   :  { %3957 = vperm.xlu1 %5586, %v3886_v21   ;;  %v5831_v21 = vld [vmem:[#allocation3 + $0x38] sm:$0xff]  ;;  %v3642_v11 = vmul.f32 %v3544_v5, %v3544_v5  ;;  %v9499_v5 = vld [vmem:[#allocation44_spill] sm:$0xff] }
 0xf2c   :  { %v3736_v42 = vpop.permute.xlu2 %3735 }
 0xf2d   :  { %v3825_v39 = vadd.f32 %v3736_v42, %v3633_v18  ;;  %v3536_v18 = vsub.f32 %v5831_v21, %v3500_v16 }
 0xf2f   :  { %vm3857_vm1 = vcmp.lt.f32.partialorder %v3825_v39, %v9494_v51  ;;  %v3634_v2 = vmul.f32 %v3536_v18, %v3536_v18 }
 0xf30   :  { %v3889_v43 = vsel %vm3857_vm1, 0.01, %v9492_v0 }
 0xf31   :  { %3966 = vperm.xlu1 %5586, %v3889_v43  }
 0xf33   :  { %v3726_v46 = vpop.permute.xlu1 %3725  ;;  %v3728_v57 = vpop.permute.xlu0 %3727 }
 0xf34   :  { %v3820_v9 = vadd.f32 %v3726_v46, %v3628_v35  ;;  %v3742_v14 = vpop.permute.xlu2 %3741  ;;  %v3821_v50 = vadd.f32 %v3728_v57, %v3629_v32  ;;  %v3507_v46 = vperm.slane %v8198_v7, 2 }
 0xf35   :  { %v8214_v62 = vadd.f32 %v3742_v14, %v3636_v6  ;;  %v9496_v14 = vld [vmem:[#allocation42_spill] sm:$0xff] }
 0xf36   :  { %vm3852_vm2 = vcmp.lt.f32.partialorder %v3820_v9, %v9491_v44  ;;  %vm3853_vm3 = vcmp.lt.f32.partialorder %v3821_v50, %v9493_v34  ;;  %v3639_v44 = vmul.f32 %v3541_v15, %v3541_v15  ;;  %v3550_v3 = vsub.f32 %v7929_v40, %v3507_v46 }
 0xf37   :  { %v3884_v17 = vsel %vm3852_vm2, 0.01, %v9492_v0  ;;  %v3885_v23 = vsel %vm3853_vm3, 0.01, %v9492_v0 }
 0xf38   :  { %3951 = vperm.xlu2 %5585, %v3884_v17   ;;  %3954 = vperm.xlu0 %5584, %v3885_v23   ;;  %v3648_v48 = vmul.f32 %v3550_v3, %v3550_v3  ;;  %v3635_v23 = vmul.f32 %v3537_v8, %v3537_v8 }
 0xf3b   :  { %v3734_v10 = vpop.permute.xlu1 %3733  ;;  %v3732_v61 = vpop.permute.xlu0 %3731 }
 0xf3c   :  { %v3824_v41 = vadd.f32 %v3734_v10, %v3632_v58  ;;  %v3748_v12 = vpop.permute.xlu2 %3747  ;;  %v3823_v34 = vadd.f32 %v3732_v61, %v3631_v37  ;;  %v3505_v58 = vperm.slane %v8198_v7, 0 }
 0xf3d   :  { %v8223_v22 = vadd.f32 %v3748_v12, %v3639_v44  ;;  %v8255_v44 = vld [vmem:[#allocation3 + $0x88] sm:$0xff] }
 0xf3e   :  { %vm3856_vm4 = vcmp.lt.f32.partialorder %v3824_v41, %v9495_v56  ;;  %vm3855_vm14 = vcmp.lt.f32.partialorder %v3823_v34, %v9495_v56  ;;  %v3546_v63 = vsub.f32 %v8255_v44, %v3505_v58  ;;  %v3545_v61 = vsub.f32 %v7923_v27, %v3505_v58  ;;  %v9498_v41 = vld [vmem:[#allocation50_spill] sm:$0xff]  ;;  %v9500_v58 = vld [vmem:[#allocation11_spill] sm:$0xff] }
 0xf3f   :  { %v3888_v42 = vsel %vm3856_vm4, 0.01, %v9492_v0  ;;  %v3887_v39 = vsel %vm3855_vm14, 0.01, %v9492_v0 }
 0xf40   :  { %3963 = vperm.xlu0 %5584, %v3888_v42   ;;  %3960 = vperm.xlu2 %5585, %v3887_v39   ;;  %v3644_v34 = vmul.f32 %v3546_v63, %v3546_v63  ;;  %v3643_v56 = vmul.f32 %v3545_v61, %v3545_v61  ;;  %v3510_v63 = vperm.slane %v8198_v7, 5 }
 0xf43   :  { %v3738_v19 = vpop.permute.xlu0 %3737  ;;  %v3740_v35 = vpop.permute.xlu1 %3739 }
 0xf44   :  { %v3754_v1 = vpop.permute.xlu2 %3753  ;;  %v3826_v43 = vadd.f32 %v3738_v19, %v3634_v2  ;;  %v3827_v37 = vadd.f32 %v3740_v35, %v3635_v23  ;;  %v3549_v2 = vsub.f32 %v8165_v20, %v3507_v46  ;;  %v3508_v35 = vperm.slane %v8198_v7, 3 }
 0xf45   :  { %v8233_v32 = vadd.f32 %v3754_v1, %v3642_v11  ;;  %v3548_v11 = vsub.f32 %v7938_v33, %v3506_v53 }
 0xf46   :  { %vm3858_vm15 = vcmp.lt.f32.partialorder %v3826_v43, %v9494_v51  ;;  %vm3859_vm3 = vcmp.lt.f32.partialorder %v3827_v37, %v9498_v41  ;;  %v3647_v1 = vmul.f32 %v3549_v2, %v3549_v2  ;;  %v3552_v33 = vsub.f32 %v8173_v59, %v3508_v35 }
 0xf47   :  { %v3890_v16 = vsel %vm3858_vm15, 0.01, %v9492_v0  ;;  %v3891_v12 = vsel %vm3859_vm3, 0.01, %v9492_v0  ;;  %v3646_v43 = vmul.f32 %v3548_v11, %v3548_v11  ;;  %v3551_v53 = vsub.f32 %v7952_v28, %v3508_v35 }
 0xf48   :  { %3969 = vperm.xlu2 %5585, %v3890_v16   ;;  %v3650_v8 = vmul.f32 %v3552_v33, %v3552_v33 }
 0xf4b   :  { %v8239_v9 = vpop.permute.xlu1 %3745  ;;  %v8242_v50 = vpop.permute.xlu0 %3743 }
 0xf4c   :  { %v3760_v6 = vpop.permute.xlu2 %3759 }
 0xf4d   :  { %v3837_v57 = vadd.f32 %v3760_v6, %v3645_v45 }
 0xf4f   :  { %vm3869_vm1 = vcmp.lt.f32.partialorder %v3837_v57, %v9496_v14  ;;  %v3509_v57 = vperm.slane %v8198_v7, 4 }
 0xf50   :  { %v3901_v51 = vsel %vm3869_vm1, 0.01, %v9492_v0 }
 0xf51   :  { %4002 = vperm.xlu2 %5585, %v3901_v51   ;;  %v8275_v51 = vld [vmem:[#allocation3 + $0xc0] sm:$0xff]  ;;  %v3554_v37 = vsub.f32 %v7968_v49, %v3509_v57 }
 0xf52   :  { %v3553_v36 = vsub.f32 %v8275_v51, %v3509_v57  ;;  %v9501_v49 = vld [vmem:[#allocation6_spill] sm:$0xff] }
 0xf53   :  { %v8251_v10 = vpop.permute.xlu1 %3751  ;;  %v8253_v40 = vpop.permute.xlu0 %3749 }
 0xf54   :  { %v3766_v25 = vpop.permute.xlu2 %3765  ;;  %v3651_v28 = vmul.f32 %v3553_v36, %v3553_v36  ;;  %v3511_v36 = vperm.slane %v8198_v7, 6 }
 0xf55   :  { %v3840_v17 = vadd.f32 %v3766_v25, %v3648_v48  ;;  %v3649_v48 = vmul.f32 %v3551_v53, %v3551_v53  ;;  %v5838_v53 = vld [vmem:[#allocation3 + $0x68] sm:$0xff] }
 0xf57   :  { %vm3872_vm2 = vcmp.lt.f32.partialorder %v3840_v17, %v9497_v26 }
 0xf58   :  { %v3904_v15 = vsel %vm3872_vm2, 0.01, %v9492_v0 }
 0xf59   :  { %4011 = vperm.xlu2 %5585, %v3904_v15  }
 0xf5c   :  { %v3772_v15 = vpop.permute.xlu2 %3771 }
 0xf61   :  { %3972 = vperm.xlu2 %5585, %v3891_v12  }
 0xf62   :  { %v3758_v21 = vpop.permute.xlu1 %3757  ;;  %v3756_v18 = vpop.permute.xlu0 %3755 }
 0xf63   :  { %v3836_v42 = vadd.f32 %v3758_v21, %v3644_v34  ;;  %v3835_v39 = vadd.f32 %v3756_v18, %v3643_v56  ;;  %v3843_v34 = vadd.f32 %v3772_v15, %v3651_v28  ;;  %v5835_v56 = vld [vmem:[#allocation3 + $0x58] sm:$0xff]  ;;  %v5836_v18 = vld [vmem:[#allocation3 + $0x50] sm:$0xff]  ;;  %v8311_v15 = vld [vmem:[#allocation3 + $0xe0] sm:$0xff] }
 0xf64   :  { %v3778_v33 = vpop.permute.xlu2 %3777  ;;  %v3557_v28 = vsub.f32 %v8311_v15, %v3511_v36 }
 0xf65   :  { %vm3868_vm4 = vcmp.lt.f32.partialorder %v3836_v42, %v9499_v5  ;;  %vm3867_vm14 = vcmp.lt.f32.partialorder %v3835_v39, %v9499_v5  ;;  %v3652_v39 = vmul.f32 %v3554_v37, %v3554_v37  ;;  %v3555_v5 = vsub.f32 %v8181_v52, %v3510_v63 }
 0xf66   :  { %v3900_v27 = vsel %vm3868_vm4, 0.01, %v9492_v0  ;;  %v3899_v19 = vsel %vm3867_vm14, 0.01, %v9492_v0  ;;  %vm3860_vm4 = vcmp.lt.f32.partialorder %v8214_v62, %v9498_v41  ;;  %vm3875_vm14 = vcmp.lt.f32.partialorder %v3843_v34, %v9501_v49  ;;  %v8295_v41 = vld [vmem:[#allocation3 + $0xd8] sm:$0xff] }
 0xf67   :  { %3999 = vperm.xlu1 %5586, %v3900_v27   ;;  %3996 = vperm.xlu0 %5584, %v3899_v19   ;;  %v3907_v35 = vsel %vm3875_vm14, 0.01, %v9492_v0  ;;  %v3556_v57 = vsub.f32 %v8295_v41, %v3510_v63  ;;  %v9504_v63 = vld [vmem:[#allocation51_spill] sm:$0xff]  ;;  %v3512_v34 = vperm.slane %v8198_v7, 7 }
 0xf6a   :  { %v3764_v16 = vpop.permute.xlu1 %3763  ;;  %v3762_v4 = vpop.permute.xlu0 %3761 }
 0xf6b   :  { %v3839_v45 = vadd.f32 %v3764_v16, %v3647_v1  ;;  %v3838_v6 = vadd.f32 %v3762_v4, %v3646_v43  ;;  %v3653_v43 = vmul.f32 %v3555_v5, %v3555_v5  ;;  %v3892_v16 = vsel %vm3860_vm4, 0.01, %v9492_v0 }
 0xf6c   :  { %vm3863_vm4 = vcmp.lt.f32.partialorder %v8223_v22, %v9504_v63 }
 0xf6d   :  { %vm3871_vm15 = vcmp.lt.f32.partialorder %v3839_v45, %v9497_v26  ;;  %vm3870_vm1 = vcmp.lt.f32.partialorder %v3838_v6, %v9496_v14  ;;  %v3502_v26 = vperm.slane %v8153_v38, 5 }
 0xf6e   :  { %v3903_v46 = vsel %vm3871_vm15, 0.01, %v9492_v0  ;;  %v3902_v3 = vsel %vm3870_vm1, 0.01, %v9492_v0 }
 0xf6f   :  { %4008 = vperm.xlu1 %5586, %v3903_v46   ;;  %4005 = vperm.xlu0 %5584, %v3902_v3   ;;  %v3540_v21 = vsub.f32 %v5835_v56, %v3502_v26  ;;  %v3539_v42 = vsub.f32 %v5836_v18, %v3502_v26  ;;  %v3542_v46 = vsub.f32 %v5838_v53, %v3503_v29  ;;  %v9502_v3 = vld [vmem:[#allocation47_spill] sm:$0xff] }
 0xf71   :  { %v3638_v27 = vmul.f32 %v3540_v21, %v3540_v21  ;;  %v3637_v19 = vmul.f32 %v3539_v42, %v3539_v42  ;;  %v3655_v21 = vmul.f32 %v3557_v28, %v3557_v28  ;;  %v3895_v42 = vsel %vm3863_vm4, 0.01, %v9492_v0 }
 0xf72   :  { %v3770_v25 = vpop.permute.xlu1 %3769  ;;  %v3768_v17 = vpop.permute.xlu0 %3767 }
 0xf73   :  { %v3842_v23 = vadd.f32 %v3770_v25, %v3650_v8  ;;  %v3841_v14 = vadd.f32 %v3768_v17, %v3649_v48  ;;  %v3830_v45 = vadd.f32 %v8239_v9, %v3638_v27  ;;  %v3829_v6 = vadd.f32 %v8242_v50, %v3637_v19  ;;  %v9503_v9 = vld [vmem:[#allocation20_spill] sm:$0xff]  ;;  %v9505_v27 = vld [vmem:[#allocation17_spill] sm:$0xff] }
 0xf74   :  { %v3654_v50 = vmul.f32 %v3556_v57, %v3556_v57  ;;  %v3640_v8 = vmul.f32 %v3542_v46, %v3542_v46 }
 0xf75   :  { %vm3874_vm2 = vcmp.lt.f32.partialorder %v3842_v23, %v9500_v58  ;;  %vm3873_vm3 = vcmp.lt.f32.partialorder %v3841_v14, %v9500_v58  ;;  %vm3862_vm1 = vcmp.lt.f32.partialorder %v3830_v45, %v9502_v3  ;;  %v8308_v14 = vld [vmem:[#allocation3 + $0xe8] sm:$0xff]  ;;  %v5841_v58 = vld [vmem:[#allocation3 + $0x70] sm:$0xff] }
 0xf76   :  { %v3906_v61 = vsel %vm3874_vm2, 0.01, %v9492_v0  ;;  %v3905_v12 = vsel %vm3873_vm3, 0.01, %v9492_v0  ;;  %vm3861_vm2 = vcmp.lt.f32.partialorder %v3829_v6, %v9502_v3  ;;  %v3894_v48 = vsel %vm3862_vm1, 0.01, %v9492_v0 }
 0xf77   :  { %4017 = vperm.xlu1 %5586, %v3906_v61   ;;  %4014 = vperm.xlu0 %5584, %v3905_v12   ;;  %v3893_v25 = vsel %vm3861_vm2, 0.01, %v9492_v0  ;;  %v3846_v17 = vadd.f32 %v3778_v33, %v3654_v50  ;;  %v3832_v29 = vadd.f32 %v8253_v40, %v3640_v8  ;;  %v3558_v26 = vsub.f32 %v8308_v14, %v3511_v36  ;;  %v3784_v61 = vpop.permute.xlu2 %3783  ;;  %v9507_v3 = vld [vmem:[#allocation18_spill] sm:$0xff] }
 0xf78   :  { %v3543_v37 = vsub.f32 %v5841_v58, %v3504_v30  ;;  %v9508_v8 = vmov 0  }
 0xf79   :  { %vm3878_vm14 = vcmp.lt.f32.partialorder %v3846_v17, %v9503_v9  ;;  %v3656_v56 = vmul.f32 %v3558_v26, %v3558_v26 }
 0xf7a   :  { %v3774_v2 = vpop.permute.xlu0 %3773  ;;  %v3776_v1 = vpop.permute.xlu1 %3775  ;;  %v3641_v18 = vmul.f32 %v3543_v37, %v3543_v37  ;;  %v3910_v38 = vsel %vm3878_vm14, 0.01, %v9492_v0 }
 0xf7b   :  { %v3844_v11 = vadd.f32 %v3774_v2, %v3652_v39  ;;  %v3845_v62 = vadd.f32 %v3776_v1, %v3653_v43  ;;  %v8325_v2 = vld [vmem:[#allocation3 + $0xf0] sm:$0xff]  ;;  %v9506_v1 = vld [vmem:[#allocation45_spill] sm:$0xff] }
 0xf7c   :  { %v3833_v5 = vadd.f32 %v8251_v10, %v3641_v18  ;;  %v3559_v7 = vsub.f32 %v8325_v2, %v3512_v34  ;;  %vm3866_vm4 = vcmp.lt.f32.partialorder %v8233_v32, %v9506_v1 }
 0xf7d   :  { %vm3876_vm15 = vcmp.lt.f32.partialorder %v3844_v11, %v9501_v49  ;;  %vm3877_vm3 = vcmp.lt.f32.partialorder %v3845_v62, %v9503_v9  ;;  %v8328_v49 = vld [vmem:[#allocation3 + $0xf8] sm:$0xff]  ;;  %v3898_v50 = vsel %vm3866_vm4, 0.01, %v9492_v0 }
 0xf7e   :  { %v3908_v4 = vsel %vm3876_vm15, 0.01, %v9492_v0  ;;  %v3909_v23 = vsel %vm3877_vm3, 0.01, %v9492_v0  ;;  %vm3864_vm15 = vcmp.lt.f32.partialorder %v3832_v29, %v9504_v63  ;;  %v3560_v11 = vsub.f32 %v8328_v49, %v3512_v34 }
 0xf7f   :  { %4020 = vperm.xlu1 %5586, %v3907_v35   ;;  %3975 = vperm.xlu0 %5584, %v3892_v16   ;;  %v3896_v22 = vsel %vm3864_vm15, 0.01, %v9492_v0  ;;  %vm3865_vm3 = vcmp.lt.f32.partialorder %v3833_v5, %v9506_v1  ;;  %v3657_v10 = vmul.f32 %v3559_v7, %v3559_v7 }
 0xf80   :  { %4023 = vperm.xlu2 %5585, %v3908_v4   ;;  %v3658_v45 = vmul.f32 %v3560_v11, %v3560_v11  ;;  %v3897_v53 = vsel %vm3865_vm3, 0.01, %v9492_v0 }
 0xf81   :  { %v3849_v57 = vadd.f32 %v3784_v61, %v3657_v10 }
 0xf82   :  { %v3780_v40 = vpop.permute.xlu0 %3779  ;;  %v3782_v12 = vpop.permute.xlu1 %3781 }
 0xf83   :  { %v3848_v30 = vadd.f32 %v3782_v12, %v3656_v56  ;;  %v3847_v39 = vadd.f32 %v3780_v40, %v3655_v21  ;;  %vm3881_vm14 = vcmp.lt.f32.partialorder %v3849_v57, %v9507_v3 }
 0xf84   :  { %v3913_v9 = vsel %vm3881_vm14, 0.01, %v9492_v0 }
 0xf85   :  { %vm3880_vm1 = vcmp.lt.f32.partialorder %v3848_v30, %v9505_v27  ;;  %vm3879_vm2 = vcmp.lt.f32.partialorder %v3847_v39, %v9505_v27 }
 0xf86   :  { %v3912_v6 = vsel %vm3880_vm1, 0.01, %v9492_v0  ;;  %v3911_v62 = vsel %vm3879_vm2, 0.01, %v9492_v0  ;;  %vm4110_vm1 = vcmp.gt.f32.partialorder %v8102_v55, 0.0  ;;  %vm4109_vm2 = vcmp.gt.f32.partialorder %v8076_v31, 0.0 }
 0xf87   :  { %3981 = vperm.xlu1 %5586, %v3894_v48   ;;  %3978 = vperm.xlu0 %5584, %v3893_v25  }
 0xf88   :  { %4026 = vperm.xlu2 %5585, %v3909_v23  }
 0xf8a   :  { %v3786_v16 = vpop.permute.xlu0 %3785 }
 0xf8b   :  { %v3850_v46 = vadd.f32 %v3786_v16, %v3658_v45 }
 0xf8d   :  { %vm3882_vm15 = vcmp.lt.f32.partialorder %v3850_v46, %v9507_v3 }
 0xf8e   :  { %v3914_v36 = vsel %vm3882_vm15, 0.01, %v9492_v0 }
 0xf8f   :  { %3984 = vperm.xlu1 %5586, %v3895_v42   ;;  %4029 = vperm.xlu0 %5584, %v3910_v38  }
 0xf90   :  { %3987 = vperm.xlu2 %5585, %v3896_v22  }
 0xf92   :  { %v3952_v19 = vpop.permute.xlu2 %3951 }
 0xf93   :  { %v4044_v43 = vperm.slane %v3952_v19, %v6231_v13  ;;  %v3949_v35 = vpop.permute.xlu1 %3948 }
 0xf94   :  { %v4043_v4 = vperm.slane %v3949_v35, %v6143_v47 }
 0xf96   :  { %v4045_v33 = vsel %vm313_vm5, %v4044_v43, %v4043_v4 }
 0xf97   :  { %4035 = vperm.xlu1 %5586, %v3912_v6   ;;  %4032 = vperm.xlu0 %5584, %v3911_v62  }
 0xf98   :  { %3990 = vperm.xlu2 %5585, %v3897_v53  }
 0xf9a   :  { %v3961_v26 = vpop.permute.xlu2 %3960 }
 0xf9b   :  { %v3958_v32 = vpop.permute.xlu1 %3957  ;;  %v4049_v0 = vperm.slane %v3961_v26, %v6143_v47 }
 0xf9c   :  { %v4047_v25 = vperm.slane %v3958_v32, %v6231_v13 }
 0xf9f   :  { %4038 = vperm.xlu1 %5586, %v3913_v9   ;;  %3993 = vperm.xlu0 %5584, %v3898_v50  }
 0xfa0   :  { %4041 = vperm.xlu2 %5585, %v3914_v36  }
 0xfa2   :  { %v3970_v61 = vpop.permute.xlu2 %3969 }
 0xfa3   :  { %v3967_v12 = vpop.permute.xlu1 %3966  ;;  %v4053_v36 = vperm.slane %v3970_v61, %v6231_v13 }
 0xfa4   :  { %v4052_v50 = vperm.slane %v3967_v12, %v6143_v47 }
 0xfa7   :  { %5588 = vset.pattern.permute.xlu1 %v9508_v8  ;;  %5587 = vset.pattern.permute.xlu0 %v9508_v8 }
 0xfa8   :  { %5589 = vset.pattern.permute.xlu2 %v9508_v8 }
 0xfaa   :  { %v3955_v48 = vpop.permute.xlu0 %3954 }
 0xfab   :  { %v4046_v17 = vperm.slane %v3955_v48, %v6143_v47  ;;  %v4003_v40 = vpop.permute.xlu2 %4002 }
 0xfac   :  { %v4070_v4 = vperm.slane %v4003_v40, %v6143_v47 }
 0xfad   :  { %v4048_v23 = vsel %vm313_vm5, %v4047_v25, %v4046_v17 }
 0xfae   :  { %v4091_v29 = vsel %vm360_vm6, %v4048_v23, %v4045_v33 }
 0xfb2   :  { %v3964_v28 = vpop.permute.xlu0 %3963 }
 0xfb3   :  { %v4050_v58 = vperm.slane %v3964_v28, %v6231_v13  ;;  %v4012_v34 = vpop.permute.xlu2 %4011 }
 0xfb4   :  { %v4074_v57 = vperm.slane %v4012_v34, %v6231_v13 }
 0xfb5   :  { %v4051_v37 = vsel %vm313_vm5, %v4050_v58, %v4049_v0 }
 0xfb6   :  { %v4092_v63 = vsel %vm362_vm7, %v4051_v37, %v4091_v29 }
 0xfbb   :  { %v3973_v18 = vpop.permute.xlu2 %3972 }
 0xfbc   :  { %v4055_v8 = vperm.slane %v3973_v18, %v6143_v47 }
 0xfd9   :  { %v4000_v56 = vpop.permute.xlu1 %3999  ;;  %v3997_v21 = vpop.permute.xlu0 %3996 }
 0xfda   :  { %v4024_v30 = vpop.permute.xlu2 %4023  ;;  %v4068_v45 = vperm.slane %v4000_v56, %v6231_v13  ;;  %v4067_v6 = vperm.slane %v3997_v21, %v6143_v47  ;;  %v4054_v56 = vsel %vm313_vm5, %v4053_v36, %v4052_v50 }
 0xfdb   :  { %v4080_v48 = vperm.slane %v4024_v30, %v6231_v13 }
 0xfdc   :  { %v4069_v25 = vsel %vm313_vm5, %v4068_v45, %v4067_v6 }
 0xfe1   :  { %v4009_v42 = vpop.permute.xlu1 %4008  ;;  %v4006_v38 = vpop.permute.xlu0 %4005 }
 0xfe2   :  { %v4027_v5 = vpop.permute.xlu2 %4026  ;;  %v4071_v10 = vperm.slane %v4006_v38, %v6231_v13  ;;  %v4073_v62 = vperm.slane %v4009_v42, %v6143_v47 }
 0xfe3   :  { %v4082_v12 = vperm.slane %v4027_v5, %v6143_v47 }
 0xfe4   :  { %v4072_v33 = vsel %vm313_vm5, %v4071_v10, %v4070_v4  ;;  %v4075_v17 = vsel %vm313_vm5, %v4074_v57, %v4073_v62 }
 0xfe5   :  { %v4098_v29 = vsel %vm360_vm6, %v4072_v33, %v4069_v25 }
 0xfe6   :  { %v4099_v18 = vsel %vm362_vm7, %v4075_v17, %v4098_v29 }
 0xfe9   :  { %v4018_v39 = vpop.permute.xlu1 %4017  ;;  %v4015_v22 = vpop.permute.xlu0 %4014 }
 0xfea   :  { %v3988_v1 = vpop.permute.xlu2 %3987  ;;  %v4077_v53 = vperm.slane %v4018_v39, %v6231_v13  ;;  %v4076_v46 = vperm.slane %v4015_v22, %v6143_v47  ;;  %v4093_v39 = vsel %vm364_vm8, %v4054_v56, %v4092_v63 }
 0xfeb   :  { %v4062_v21 = vperm.slane %v3988_v1, %v6231_v13 }
 0xfec   :  { %v4078_v58 = vsel %vm313_vm5, %v4077_v53, %v4076_v46 }
 0xfed   :  { %v4100_v30 = vsel %vm364_vm8, %v4078_v58, %v4099_v18 }
 0xff1   :  { %v4021_v7 = vpop.permute.xlu1 %4020  ;;  %v3976_v11 = vpop.permute.xlu0 %3975 }
 0xff2   :  { %v3991_v16 = vpop.permute.xlu2 %3990  ;;  %v4079_v32 = vperm.slane %v4021_v7, %v6143_v47  ;;  %v4056_v23 = vperm.slane %v3976_v11, %v6231_v13 }
 0xff3   :  { %v4064_v11 = vperm.slane %v3991_v16, %v6143_v47 }
 0xff4   :  { %v4081_v34 = vsel %vm313_vm5, %v4080_v48, %v4079_v32  ;;  %v4057_v42 = vsel %vm313_vm5, %v4056_v23, %v4055_v8 }
 0xff5   :  { %v4101_v5 = vsel %vm366_vm9, %v4081_v34, %v4100_v30 }
 0xff9   :  { %v3982_v27 = vpop.permute.xlu1 %3981  ;;  %v3979_v19 = vpop.permute.xlu0 %3978 }
 0xffa   :  { %v4059_v26 = vperm.slane %v3982_v27, %v6231_v13  ;;  %v4058_v28 = vperm.slane %v3979_v19, %v6143_v47  ;;  %v4042_v38 = vpop.permute.xlu2 %4041 }
 0xffb   :  { %v4089_v10 = vperm.slane %v4042_v38, %v6231_v13 }
 0xffc   :  { %v4060_v22 = vsel %vm313_vm5, %v4059_v26, %v4058_v28 }
0x1001   :  { %v3985_v43 = vpop.permute.xlu1 %3984  ;;  %v4030_v35 = vpop.permute.xlu0 %4029 }
0x1002   :  { %v4083_v0 = vperm.slane %v4030_v35, %v6231_v13  ;;  %v4061_v37 = vperm.slane %v3985_v43, %v6143_v47  ;;  %v4094_v35 = vsel %vm366_vm9, %v4057_v42, %v4093_v39 }
0x1003   :  { %v4095_v45 = vsel %vm368_vm10, %v4060_v22, %v4094_v35 }
0x1004   :  { %v4084_v7 = vsel %vm313_vm5, %v4083_v0, %v4082_v12  ;;  %v4063_v27 = vsel %vm313_vm5, %v4062_v21, %v4061_v37 }
0x1005   :  { %v4102_v6 = vsel %vm368_vm10, %v4084_v7, %v4101_v5  ;;  %v4096_v16 = vsel %vm370_vm11, %v4063_v27, %v4095_v45 }
0x1009   :  { %v4036_v3 = vpop.permute.xlu1 %4035  ;;  %v4033_v9 = vpop.permute.xlu0 %4032 }
0x100a   :  { %v4086_v61 = vperm.slane %v4036_v3, %v6231_v13  ;;  %v4085_v40 = vperm.slane %v4033_v9, %v6143_v47 }
0x100c   :  { %v4087_v19 = vsel %vm313_vm5, %v4086_v61, %v4085_v40 }
0x100d   :  { %v4103_v62 = vsel %vm370_vm11, %v4087_v19, %v4102_v6 }
0x1011   :  { %v4039_v1 = vpop.permute.xlu1 %4038  ;;  %v3994_v43 = vpop.permute.xlu0 %3993 }
0x1012   :  { %v4088_v63 = vperm.slane %v4039_v1, %v6143_v47  ;;  %v4065_v4 = vperm.slane %v3994_v43, %v6231_v13 }
0x1014   :  { %v4090_v57 = vsel %vm313_vm5, %v4089_v10, %v4088_v63  ;;  %v4066_v33 = vsel %vm313_vm5, %v4065_v4, %v4064_v11 }
0x1015   :  { %v4104_v53 = vsel %vm9317_vm12, %v4090_v57, %v4103_v62  ;;  %v4097_v46 = vsel %vm9317_vm12, %v4066_v33, %v4096_v16  ;;  %v9510_v33 = vld [vmem:[#allocation39_spill] sm:$0xff] }
0x1016   :  { %v4108_v3 = vmul.f32 %v4104_v53, %v8064_v24  ;;  %v4107_v13 = vmul.f32 %v4097_v46, %v8027_v60  ;;  %v4613_v53 = vperm.slane %v9510_v33, 0 }
0x1018   :  { %v4112_v9 = vsel %vm4110_vm1, -1.0, %v4108_v3  ;;  %v4111_v50 = vsel %vm4109_vm2, -1.0, %v4107_v13  ;;  %vm4653_vm2 = vcmask 128000  }
0x1019   :  { %v4116_v36 = vsel %vm76_vm0, %v4112_v9, -inf  ;;  %v4113_v8 = vsel %vm76_vm0, %v4111_v50, -inf }
0x101a   :  { %4117 = vmax.xlane.f32.xlu1 %v4116_v36  ;;  %4114 = vmax.xlane.f32.xlu0 %v4113_v8 }
0x108d   :  { %v4118_v32 = vpop.xlane.xlu1 %4117  ;;  %v4115_v48 = vpop.xlane.xlu0 %4114 }
0x108e   :  { %vm4120_vm5 = vcmp.eq.f32.partialorder %v4112_v9, %v4118_v32  ;;  %vm4119_vm3 = vcmp.eq.f32.partialorder %v4111_v50, %v4115_v48 }
0x108f   :  { %v4122_v24 = vsel %vm4120_vm5, %v6143_v47, 16  ;;  %v4121_v60 = vsel %vm4119_vm3, %v6143_v47, 16 }
0x1090   :  { %v4138_v55 = vsel %vm76_vm0, %v4122_v24, 2147483647  ;;  %v4123_v31 = vsel %vm76_vm0, %v4121_v60, 2147483647 }
0x1091   :  { %v4140_v25 = vshra.s32 %v4138_v55, 16  ;;  %v4125_v17 = vshra.s32 %v4123_v31, 16  ;;  %v4139_v26 = vand.u32 65535, %v4138_v55  ;;  %v4124_v28 = vand.u32 65535, %v4123_v31 }
0x1093   :  { %v4142_v23 = vcvt.s32.f32 %v4140_v25  ;;  %v4127_v29 = vcvt.s32.f32 %v4125_v17  ;;  %v4126_v37 = vcvt.s32.f32 %v4124_v28  ;;  %v4141_v61 = vcvt.s32.f32 %v4139_v26 }
0x1095   :  { %4143 = vmin.xlane.f32.xlu0 %v4142_v23  ;;  %4128 = vmin.xlane.f32.xlu2 %v4127_v29 }
0x1108   :  { %v4129_v0 = vpop.xlane.xlu2 %4128  ;;  %v4144_v58 = vpop.xlane.xlu0 %4143 }
0x1109   :  { %vm4130_vm4 = vcmp.eq.f32.partialorder %v4127_v29, %v4129_v0  ;;  %vm4145_vm14 = vcmp.eq.f32.partialorder %v4142_v23, %v4144_v58  ;;  %v4135_v34 = vcvt.f32.s32 %v4129_v0  ;;  %v4150_v56 = vcvt.f32.s32 %v4144_v58  ;;  %v5844_v58 = vld [vmem:[#allocation3 + $0x80] sm:$0xff] }
0x110a   :  { %v4131_v40 = vsel %vm4130_vm4, %v4126_v37, inf  ;;  %v4146_v12 = vsel %vm4145_vm14, %v4141_v61, inf }
0x110b   :  { %4132 = vmin.xlane.f32.xlu1 %v4131_v40  ;;  %4147 = vmin.xlane.f32.xlu2 %v4146_v12  ;;  %v4136_v42 = vshll.u32 %v4135_v34, 16  ;;  %v4151_v38 = vshll.u32 %v4150_v56, 16  ;;  %v5845_v40 = vld [vmem:[#allocation3 + $0x98] sm:$0xff]  ;;  %v5846_v12 = vld [vmem:[#allocation3 + $0xa8] sm:$0xff] }
0x117e   :  { %v4133_v21 = vpop.xlane.xlu1 %4132  ;;  %v4148_v18 = vpop.xlane.xlu2 %4147 }
0x117f   :  { %v4134_v30 = vcvt.f32.s32 %v4133_v21  ;;  %v4149_v39 = vcvt.f32.s32 %v4148_v18  ;;  %v5847_v21 = vld [vmem:[#allocation3 + $0x90] sm:$0xff] }
0x1181   :  { %v4137_v22 = vadd.s32 %v4136_v42, %v4134_v30  ;;  %v4152_v7 = vadd.s32 %v4151_v38, %v4149_v39  ;;  %v5848_v38 = vld [vmem:[#allocation3 + $0xb0] sm:$0xff] }
0x1183   :  { %vm4153_vm15 = vcmp.eq.s32.totalorder %v6143_v47, %v4137_v22  ;;  %vm4154_vm1 = vcmp.eq.s32.totalorder %v6143_v47, %v4152_v7 }
0x1184   :  { %v5551_v5 = vsel %vm4153_vm15, 1.0, %v9431_v54  ;;  %v8423_v11 = vsel %vm4154_vm1, 1.0, %v9431_v54  ;;  %v9509_v54 = vld [vmem:[#allocation38_spill] sm:$0xff] }
0x1185   :  { %v4161_v27 = vrot.slane %v5551_v5, 1  ;;  %v4162_v19 = vrot.slane %v5551_v5, 2  ;;  %v4163_v1 = vrot.slane %v5551_v5, 3  ;;  %4189 = vst.msk [vmem:[#allocation2 + $0x5] sm:$0x1] %vm165_vm13, %v5551_v5  ;;  %v4164_v43 = vrot.slane %v5551_v5, 4 }
0x1186   :  { %4197 = vst.msk [vmem:[#allocation2 + $0x45] sm:$0x1] %vm165_vm13, %v8423_v11  ;;  %v4165_v35 = vrot.slane %v5551_v5, 5  ;;  %v4166_v10 = vrot.slane %v5551_v5, 6  ;;  %v4167_v63 = vrot.slane %v5551_v5, 7  ;;  %v4591_v4 = vrot.slane %v9509_v54, 1 }
0x1187   :  { %4190 = vst.msk [vmem:[#allocation2 + $0xd] sm:$0x1] %vm165_vm13, %v4161_v27  ;;  %v4168_v45 = vrot.slane %v8423_v11, 1  ;;  %v4605_v6 = vperm.slane %v9509_v54, 0  ;;  %v4169_v16 = vrot.slane %v8423_v11, 2  ;;  %v4592_v62 = vrot.slane %v9509_v54, 2 }
0x1188   :  { %4191 = vst.msk [vmem:[#allocation2 + $0x15] sm:$0x1] %vm165_vm13, %v4162_v19  ;;  %v4593_v57 = vrot.slane %v9509_v54, 3  ;;  %v4170_v46 = vrot.slane %v8423_v11, 3  ;;  %v4171_v13 = vrot.slane %v8423_v11, 4  ;;  %v4606_v50 = vperm.slane %v4591_v4, 0 }
0x1189   :  { %4192 = vst.msk [vmem:[#allocation2 + $0x1d] sm:$0x1] %vm165_vm13, %v4163_v1  ;;  %v4172_v8 = vrot.slane %v8423_v11, 5  ;;  %v4594_v24 = vrot.slane %v9509_v54, 4  ;;  %v4173_v60 = vrot.slane %v8423_v11, 6  ;;  %v4174_v17 = vrot.slane %v8423_v11, 7 }
0x118a   :  { %4193 = vst.msk [vmem:[#allocation2 + $0x25] sm:$0x1] %vm165_vm13, %v4164_v43  ;;  %v4608_v29 = vperm.slane %v4593_v57, 0  ;;  %v4607_v28 = vperm.slane %v4592_v62, 0  ;;  %v4596_v18 = vrot.slane %v9509_v54, 6  ;;  %v4595_v30 = vrot.slane %v9509_v54, 5 }
0x118b   :  { %4194 = vst.msk [vmem:[#allocation2 + $0x2d] sm:$0x1] %vm165_vm13, %v4165_v35  ;;  %v4609_v61 = vperm.slane %v4594_v24, 0  ;;  %v4597_v7 = vrot.slane %v9509_v54, 7 }
0x118c   :  { %4195 = vst.msk [vmem:[#allocation2 + $0x35] sm:$0x1] %vm165_vm13, %v4166_v10  ;;  %v4205_v3 = vld [vmem:[#allocation2] sm:$0x3f]  ;;  %v4611_v27 = vperm.slane %v4596_v18, 0  ;;  %v4610_v19 = vperm.slane %v4595_v30, 0 }
0x118d   :  { %4196 = vst.msk [vmem:[#allocation2 + $0x3d] sm:$0x1] %vm165_vm13, %v4167_v63  ;;  %5553 = vmatmul.msk.f32.vlgmr.msra.gmra.mxu0 %vm76_vm0, %v4205_v3  ;;  %v4637_v9 = vmul.f32 %v4605_v6, %v4205_v3  ;;  %v8445_v36 = vld [vmem:[#allocation2 + $0x40] sm:$0x3f]  ;;  %v4612_v43 = vperm.slane %v4597_v7, 0  ;;  %v4598_v63 = vrot.slane %v9510_v33, 1 }
0x118e   :  { %4198 = vst.msk [vmem:[#allocation2 + $0x4d] sm:$0x1] %vm165_vm13, %v4168_v45  ;;  %v4206_v32 = vld [vmem:[#allocation2 + $0x8] sm:$0x3f]  ;;  %v4645_v48 = vmul.f32 %v4613_v53, %v8445_v36  ;;  %4422 = vmatpush.msra.mxu0 %v8255_v44 }
0x118f   :  { %4199 = vst.msk [vmem:[#allocation2 + $0x55] sm:$0x1] %vm165_vm13, %v4169_v16  ;;  %5554 = vmatmul.msk.f32.vlgmr.msra.gmra.mxu1 %vm76_vm0, %v4206_v32  ;;  %v4638_v55 = vmul.f32 %v4606_v50, %v4206_v32  ;;  %v4207_v31 = vld [vmem:[#allocation2 + $0x10] sm:$0x3f]  ;;  %v4654_v25 = vsel %vm4653_vm2, %v4637_v9, 0.0 }
0x1190   :  { %4200 = vst.msk [vmem:[#allocation2 + $0x5d] sm:$0x1] %vm165_vm13, %v4170_v46  ;;  %5555 = vmatmul.msk.f32.vlgmr.msra.gmra.mxu2 %vm76_vm0, %v4207_v31  ;;  %v4208_v23 = vld [vmem:[#allocation2 + $0x18] sm:$0x3f]  ;;  %4655 = vadd.xlane.f32.xlu0 %v4654_v25  ;;  %v4678_v44 = vsel %vm4653_vm2, %v4645_v48, 0.0  ;;  %v4639_v34 = vmul.f32 %v4607_v28, %v4207_v31  ;;  %v4601_v46 = vrot.slane %v9510_v33, 4 }
0x1191   :  { %4201 = vst.msk [vmem:[#allocation2 + $0x65] sm:$0x1] %vm165_vm13, %v4171_v13  ;;  %5556 = vmatmul.msk.f32.vlgmr.msra.gmra.mxu3 %vm76_vm0, %v4208_v23  ;;  %4679 = vadd.xlane.f32.xlu2 %v4678_v44  ;;  %v4657_v26 = vsel %vm4653_vm2, %v4638_v55, 0.0  ;;  %v4209_v0 = vld [vmem:[#allocation2 + $0x20] sm:$0x3f]  ;;  %v4640_v37 = vmul.f32 %v4608_v29, %v4208_v23  ;;  %v4603_v13 = vrot.slane %v9510_v33, 6 }
0x1192   :  { %4202 = vst.msk [vmem:[#allocation2 + $0x6d] sm:$0x1] %vm165_vm13, %v4172_v8  ;;  %4658 = vadd.xlane.f32.xlu1 %v4657_v26  ;;  %4423 = vmatpush.msra.mxu0 %v5844_v58  ;;  %v4641_v56 = vmul.f32 %v4609_v61, %v4209_v0  ;;  %v4210_v42 = vld [vmem:[#allocation2 + $0x28] sm:$0x3f]  ;;  %v4660_v11 = vsel %vm4653_vm2, %v4639_v34, 0.0  ;;  %v4617_v24 = vperm.slane %v4601_v46, 0 }
0x1193   :  { %4203 = vst.msk [vmem:[#allocation2 + $0x75] sm:$0x1] %vm165_vm13, %v4173_v60  ;;  %4445 = vmatpush.msra.mxu1 %v5845_v40  ;;  %4468 = vmatpush.msra.mxu2 %v5846_v12  ;;  %v4211_v39 = vld [vmem:[#allocation2 + $0x30] sm:$0x3f]  ;;  %v4663_v22 = vsel %vm4653_vm2, %v4640_v37, 0.0  ;;  %v4642_v35 = vmul.f32 %v4610_v19, %v4210_v42  ;;  %v4619_v60 = vperm.slane %v4603_v13, 0 }
0x1194   :  { %4204 = vst.msk [vmem:[#allocation2 + $0x7d] sm:$0x1] %vm165_vm13, %v4174_v17  ;;  %4491 = vmatpush.msra.mxu3 %v8173_v59  ;;  %v5849_v59 = vld [vmem:[#allocation3 + $0xc8] sm:$0xff]  ;;  %v4212_v5 = vld [vmem:[#allocation2 + $0x38] sm:$0x3f]  ;;  %v4643_v1 = vmul.f32 %v4611_v27, %v4211_v39  ;;  %v4604_v23 = vrot.slane %v9510_v33, 7 }
0x1195   :  { %5557 = vmatmul.msk.f32.vlgmr.msrb.gmra.mxu0 %vm76_vm0, %v4209_v0  ;;  %4446 = vmatpush.msra.mxu1 %v5847_v21  ;;  %v4644_v10 = vmul.f32 %v4612_v43, %v4212_v5  ;;  %v4214_v54 = vld [vmem:[#allocation2 + $0x48] sm:$0x3f]  ;;  %vm9316_vm13 = vcmask 48128  }
0x1196   :  { %4469 = vmatpush.msra.mxu2 %v8165_v20  ;;  %4492 = vmatpush.msra.mxu3 %v5848_v38  ;;  %v4666_v20 = vsel %vm4653_vm2, %v4641_v56, 0.0  ;;  %v4620_v28 = vperm.slane %v4604_v23, 0 }
0x1197   :  { %5558 = vmatmul.msk.f32.vlgmr.msrb.gmra.mxu1 %vm76_vm0, %v4210_v42  ;;  %4514 = vmatpush.msrb.mxu0 %v5849_v59  ;;  %v4216_v4 = vld [vmem:[#allocation2 + $0x58] sm:$0x3f] }
0x1198   :  { %5559 = vmatmul.msk.f32.vlgmr.msrb.gmra.mxu2 %vm76_vm0, %v4211_v39  ;;  %4664 = vadd.xlane.f32.xlu0 %v4663_v22  ;;  %v4217_v62 = vld [vmem:[#allocation2 + $0x60] sm:$0x3f] }
0x1199   :  { %5560 = vmatmul.msk.f32.vlgmr.msrb.gmra.mxu3 %vm76_vm0, %v4212_v5  ;;  %4661 = vadd.xlane.f32.xlu2 %v4660_v11  ;;  %v4218_v3 = vld [vmem:[#allocation2 + $0x68] sm:$0x3f]  ;;  %v4649_v55 = vmul.f32 %v4617_v24, %v4217_v62 }
0x119a   :  { %4667 = vadd.xlane.f32.xlu1 %v4666_v20  ;;  %4515 = vmatpush.msrb.mxu0 %v8275_v51  ;;  %v4600_v51 = vrot.slane %v9510_v33, 3  ;;  %v4219_v9 = vld [vmem:[#allocation2 + $0x70] sm:$0x3f] }
0x119b   :  { %4537 = vmatpush.msrb.mxu1 %v8295_v41  ;;  %4560 = vmatpush.msrb.mxu2 %v8308_v14  ;;  %v4215_v41 = vld [vmem:[#allocation2 + $0x50] sm:$0x3f]  ;;  %v4672_v14 = vsel %vm4653_vm2, %v4643_v1, 0.0  ;;  %v4220_v8 = vld [vmem:[#allocation2 + $0x78] sm:$0x3f]  ;;  %v4651_v25 = vmul.f32 %v4619_v60, %v4219_v9  ;;  %v4690_v44 = vsel %vm4653_vm2, %v4649_v55, 0.0 }
0x119c   :  { %4583 = vmatpush.msrb.mxu3 %v8328_v49  ;;  %v4599_v49 = vrot.slane %v9510_v33, 2  ;;  %v4616_v45 = vperm.slane %v4600_v51, 0  ;;  %v4652_v0 = vmul.f32 %v4620_v28, %v4220_v8 }
0x119d   :  { %5561 = vmatmul.msk.f32.vlgmr.msra.gmra.mxu0 %vm76_vm0, %v8445_v36  ;;  %4538 = vmatpush.msrb.mxu1 %v8181_v52  ;;  %v4669_v52 = vsel %vm4653_vm2, %v4642_v35, 0.0  ;;  %v4602_v36 = vrot.slane %v9510_v33, 5  ;;  %v4696_v29 = vsel %vm4653_vm2, %v4651_v25, 0.0 }
0x119e   :  { %4561 = vmatpush.msrb.mxu2 %v8311_v15  ;;  %4584 = vmatpush.msrb.mxu3 %v8325_v2  ;;  %v4675_v15 = vsel %vm4653_vm2, %v4644_v10, 0.0  ;;  %v4614_v2 = vperm.slane %v4598_v63, 0  ;;  %v4615_v16 = vperm.slane %v4599_v49, 0  ;;  %v4648_v57 = vmul.f32 %v4616_v45, %v4216_v4 }
0x119f   :  { %5562 = vmatmul.msk.f32.vlgmr.msra.gmra.mxu1 %vm76_vm0, %v4214_v54  ;;  %v4618_v31 = vperm.slane %v4602_v36, 0  ;;  %v4699_v58 = vsel %vm4653_vm2, %v4652_v0, 0.0 }
0x11a0   :  { %5563 = vmatmul.msk.f32.vlgmr.msra.gmra.mxu2 %vm76_vm0, %v4215_v41  ;;  %4673 = vadd.xlane.f32.xlu0 %v4672_v14  ;;  %v4646_v6 = vmul.f32 %v4614_v2, %v4214_v54  ;;  %v4647_v53 = vmul.f32 %v4615_v16, %v4215_v41  ;;  %v4687_v32 = vsel %vm4653_vm2, %v4648_v57, 0.0 }
0x11a1   :  { %5564 = vmatmul.msk.f32.vlgmr.msra.gmra.mxu3 %vm76_vm0, %v4216_v4  ;;  %4670 = vadd.xlane.f32.xlu2 %v4669_v52  ;;  %v4650_v17 = vmul.f32 %v4618_v31, %v4218_v3 }
0x11a2   :  { %4676 = vadd.xlane.f32.xlu1 %v4675_v15  ;;  %v4681_v50 = vsel %vm4653_vm2, %v4646_v6, 0.0  ;;  %v4684_v48 = vsel %vm4653_vm2, %v4647_v53, 0.0 }
0x11a3   :  { %v4693_v26 = vsel %vm4653_vm2, %v4650_v17, 0.0 }
0x11a5   :  { %5565 = vmatmul.msk.f32.vlgmr.msrb.gmra.mxu0 %vm76_vm0, %v4217_v62 }
0x11a7   :  { %5566 = vmatmul.msk.f32.vlgmr.msrb.gmra.mxu1 %vm76_vm0, %v4218_v3 }
0x11a8   :  { %5567 = vmatmul.msk.f32.vlgmr.msrb.gmra.mxu2 %vm76_vm0, %v4219_v9  ;;  %4682 = vadd.xlane.f32.xlu0 %v4681_v50 }
0x11a9   :  { %5568 = vmatmul.msk.f32.vlgmr.msrb.gmra.mxu3 %vm76_vm0, %v4220_v8  ;;  %4688 = vadd.xlane.f32.xlu2 %v4687_v32  ;;  %vm5417_vm0 = vcmask 259072  }
0x11aa   :  { %4685 = vadd.xlane.f32.xlu1 %v4684_v48 }
0x11b0   :  { %4691 = vadd.xlane.f32.xlu0 %v4690_v44 }
0x11b1   :  { %4697 = vadd.xlane.f32.xlu2 %v4696_v29 }
0x11b2   :  { %4694 = vadd.xlane.f32.xlu1 %v4693_v26 }
0x11b8   :  { %4700 = vadd.xlane.f32.xlu0 %v4699_v58 }
0x1203   :  { %v8511_v37 = vpop.xlane.xlu0 %4655 }
0x1204   :  { %v8513_v61 = vpop.xlane.xlu2 %4679  ;;  %v4718_v18 = vperm.slane %v8511_v37, %v6143_v47 }
0x1205   :  { %v8515_v40 = vpop.xlane.xlu1 %4658  ;;  %v4726_v62 = vperm.slane %v8513_v61, %v6143_v47 }
0x1206   :  { %v4719_v12 = vperm.slane %v8515_v40, %v6143_v47 }
0x1208   :  { %v4734_v30 = vsel %vm360_vm6, %v4719_v12, %v4718_v18 }
0x120a   :  { %v4241_v33 = vpop.f32.mrf.mxu0 }
0x120b   :  { %5418 = vst.msk [vmem:[%s9178_s3] sm:$0x3f] %vm5417_vm0, %v4241_v33  ;;  %v8523_v34 = vpop.xlane.xlu0 %4664 }
0x120c   :  { %v8525_v56 = vpop.xlane.xlu2 %4661  ;;  %v4264_v21 = vpop.f32.mrf.mxu1  ;;  %v4721_v39 = vperm.slane %v8523_v34, %v6143_v47 }
0x120d   :  { %v4720_v42 = vperm.slane %v8525_v56, %v6143_v47  ;;  %5419 = vst.msk [vmem:[%s9178_s3 + $0x8] sm:$0x3f] %vm5417_vm0, %v4264_v21  ;;  %v8535_v38 = vpop.xlane.xlu1 %4667 }
0x120e   :  { %v4722_v59 = vperm.slane %v8535_v38, %v6143_v47 }
0x120f   :  { %v4735_v22 = vsel %vm362_vm7, %v4720_v42, %v4734_v30 }
0x1210   :  { %v4736_v5 = vsel %vm364_vm8, %v4721_v39, %v4735_v22 }
0x1211   :  { %v4737_v63 = vsel %vm366_vm9, %v4722_v59, %v4736_v5 }
0x1212   :  { %v4333_v7 = vpop.f32.mrf.mxu0 }
0x1213   :  { %v4287_v11 = vpop.f32.mrf.mxu2  ;;  %5422 = vst.msk [vmem:[%s9178_s3 + $0x20] sm:$0x3f] %vm5417_vm0, %v4333_v7  ;;  %v8548_v20 = vpop.xlane.xlu0 %4673 }
0x1214   :  { %5420 = vst.msk [vmem:[%s9178_s3 + $0x10] sm:$0x3f] %vm5417_vm0, %v4287_v11  ;;  %v4310_v27 = vpop.f32.mrf.mxu3  ;;  %v4724_v19 = vperm.slane %v8548_v20, %v6143_v47  ;;  %v8556_v1 = vpop.xlane.xlu2 %4670 }
0x1215   :  { %5421 = vst.msk [vmem:[%s9178_s3 + $0x18] sm:$0x3f] %vm5417_vm0, %v4310_v27  ;;  %v4723_v43 = vperm.slane %v8556_v1, %v6143_v47  ;;  %v4356_v35 = vpop.f32.mrf.mxu1  ;;  %v8564_v10 = vpop.xlane.xlu1 %4676 }
0x1216   :  { %5423 = vst.msk [vmem:[%s9178_s3 + $0x28] sm:$0x3f] %vm5417_vm0, %v4356_v35  ;;  %v4725_v54 = vperm.slane %v8564_v10, %v6143_v47 }
0x1217   :  { %v4738_v51 = vsel %vm368_vm10, %v4723_v43, %v4737_v63 }
0x1218   :  { %v4739_v41 = vsel %vm370_vm11, %v4724_v19, %v4738_v51 }
0x1219   :  { %v4740_v14 = vsel %vm9317_vm12, %v4725_v54, %v4739_v41 }
0x121a   :  { %v4425_v49 = vpop.f32.mrf.mxu0  ;;  %v4751_v4 = vsel %vm9316_vm13, %v4740_v14, 0.0 }
0x121b   :  { %v4379_v52 = vpop.f32.mrf.mxu2  ;;  %5426 = vst.msk [vmem:[%s9178_s3 + $0x40] sm:$0x3f] %vm5417_vm0, %v4425_v49  ;;  %4752 = vadd.xlane.f32.xlu1 %v4751_v4  ;;  %v8581_v15 = vpop.xlane.xlu0 %4682 }
0x121c   :  { %5424 = vst.msk [vmem:[%s9178_s3 + $0x30] sm:$0x3f] %vm5417_vm0, %v4379_v52  ;;  %v4402_v2 = vpop.f32.mrf.mxu3  ;;  %v4727_v45 = vperm.slane %v8581_v15, %v6143_v47  ;;  %v8597_v57 = vpop.xlane.xlu2 %4688 }
0x121d   :  { %5425 = vst.msk [vmem:[%s9178_s3 + $0x38] sm:$0x3f] %vm5417_vm0, %v4402_v2  ;;  %v4448_v6 = vpop.f32.mrf.mxu1  ;;  %v8593_v16 = vpop.xlane.xlu1 %4685  ;;  %v4729_v36 = vperm.slane %v8597_v57, %v6143_v47 }
0x121e   :  { %5427 = vst.msk [vmem:[%s9178_s3 + $0x48] sm:$0x3f] %vm5417_vm0, %v4448_v6  ;;  %v4728_v53 = vperm.slane %v8593_v16, %v6143_v47  ;;  %v4741_v46 = vsel %vm360_vm6, %v4727_v45, %v4726_v62 }
0x1220   :  { %v4742_v13 = vsel %vm362_vm7, %v4728_v53, %v4741_v46 }
0x1221   :  { %v4743_v60 = vsel %vm364_vm8, %v4729_v36, %v4742_v13 }
0x1222   :  { %v4517_v3 = vpop.f32.mrf.mxu0 }
0x1223   :  { %v4471_v9 = vpop.f32.mrf.mxu2  ;;  %5430 = vst.msk [vmem:[%s9178_s3 + $0x60] sm:$0x3f] %vm5417_vm0, %v4517_v3  ;;  %v8611_v50 = vpop.xlane.xlu0 %4691 }
0x1224   :  { %5428 = vst.msk [vmem:[%s9178_s3 + $0x50] sm:$0x3f] %vm5417_vm0, %v4471_v9  ;;  %v4494_v8 = vpop.f32.mrf.mxu3  ;;  %v4730_v32 = vperm.slane %v8611_v50, %v6143_v47  ;;  %v8635_v25 = vpop.xlane.xlu2 %4697 }
0x1225   :  { %5429 = vst.msk [vmem:[%s9178_s3 + $0x58] sm:$0x3f] %vm5417_vm0, %v4494_v8  ;;  %v4540_v48 = vpop.f32.mrf.mxu1  ;;  %v8625_v24 = vpop.xlane.xlu1 %4694  ;;  %v4732_v23 = vperm.slane %v8635_v25, %v6143_v47 }
0x1226   :  { %5431 = vst.msk [vmem:[%s9178_s3 + $0x68] sm:$0x3f] %vm5417_vm0, %v4540_v48  ;;  %v4731_v55 = vperm.slane %v8625_v24, %v6143_v47  ;;  %v4744_v31 = vsel %vm366_vm9, %v4730_v32, %v4743_v60 }
0x1228   :  { %v4745_v17 = vsel %vm368_vm10, %v4731_v55, %v4744_v31 }
0x1229   :  { %v4746_v0 = vsel %vm370_vm11, %v4732_v23, %v4745_v17 }
0x122b   :  { %v4563_v44 = vpop.f32.mrf.mxu2  ;;  %v8640_v29 = vpop.xlane.xlu0 %4700 }
0x122c   :  { %5432 = vst.msk [vmem:[%s9178_s3 + $0x70] sm:$0x3f] %vm5417_vm0, %v4563_v44  ;;  %v4586_v26 = vpop.f32.mrf.mxu3  ;;  %v4733_v28 = vperm.slane %v8640_v29, %v6143_v47 }
0x122d   :  { %5433 = vst.msk [vmem:[%s9178_s3 + $0x78] sm:$0x3f] %vm5417_vm0, %v4586_v26 }
0x122e   :  { %v4747_v58 = vsel %vm9317_vm12, %v4733_v28, %v4746_v0 }
0x122f   :  { %v4754_v33 = vsel %vm9316_vm13, %v4747_v58, 0.0 }
0x1230   :  { %4755 = vadd.xlane.f32.xlu2 %v4754_v33 }
0x128e   :  { %v4753_v12 = vpop.xlane.xlu1 %4752 }
0x128f   :  { %5594 = vrcp.f32 %v4753_v12 }
0x1295   :  { %v5595_v21 = vpop.eup %5594 }
0x1296   :  { %v4762_v18 = vperm.slane %v5595_v21, 1  ;;  %v4761_v42 = vperm.slane %v5595_v21, 0  ;;  %v4763_v30 = vperm.slane %v5595_v21, 2  ;;  %v4764_v39 = vperm.slane %v5595_v21, 3 }
0x1297   :  { %v4768_v22 = vperm.slane %v5595_v21, 7  ;;  %v4765_v11 = vperm.slane %v5595_v21, 4  ;;  %v4766_v35 = vperm.slane %v5595_v21, 5 }
0x1298   :  { %v4794_v59 = vmul.f32 %v4762_v18, %v8515_v40  ;;  %v4793_v7 = vmul.f32 %v4761_v42, %v8511_v37  ;;  %v4795_v5 = vmul.f32 %v4763_v30, %v8525_v56  ;;  %v4796_v27 = vmul.f32 %v4764_v39, %v8523_v34 }
0x1299   :  { %v4800_v19 = vmul.f32 %v4768_v22, %v8564_v10  ;;  %v4797_v43 = vmul.f32 %v4765_v11, %v8535_v38  ;;  %v4767_v40 = vperm.slane %v5595_v21, 6  ;;  %v4798_v41 = vmul.f32 %v4766_v35, %v8556_v1 }
0x129a   :  { %5596 = vlog2.f32 %v4794_v59 }
0x129b   :  { %5598 = vlog2.f32 %v4793_v7  ;;  %v4799_v38 = vmul.f32 %v4767_v40, %v8548_v20 }
0x129c   :  { %5600 = vlog2.f32 %v4795_v5 }
0x129d   :  { %5602 = vlog2.f32 %v4796_v27 }
0x129e   :  { %5604 = vlog2.f32 %v4800_v19 }
0x129f   :  { %5606 = vlog2.f32 %v4797_v43 }
0x12a0   :  { %v5597_v63 = vpop.eup %5596 }
0x12a1   :  { %v5599_v54 = vpop.eup %5598  ;;  %v4812_v37 = vmul.f32 0.6931472, %v5597_v63 }
0x12a2   :  { %v5601_v51 = vpop.eup %5600  ;;  %v4810_v56 = vmul.f32 0.6931472, %v5599_v54 }
0x12a3   :  { %v5603_v34 = vpop.eup %5602  ;;  %v4756_v14 = vpop.xlane.xlu2 %4755  ;;  %v8662_v49 = vmul.f32 2.0, %v4812_v37  ;;  %v4814_v10 = vmul.f32 0.6931472, %v5601_v51 }
0x12a4   :  { %5608 = vrcp.f32 %v4756_v14  ;;  %v8664_v4 = vmul.f32 2.0, %v4810_v56  ;;  %v5605_v52 = vpop.eup %5604  ;;  %v4816_v6 = vmul.f32 0.6931472, %v5603_v34 }
0x12a5   :  { %4877 = vperm.xlu1 %5588, %v8662_v49   ;;  %v8668_v2 = vmul.f32 2.0, %v4814_v10  ;;  %v5607_v45 = vpop.eup %5606  ;;  %5610 = vlog2.f32 %v4798_v41  ;;  %v4824_v1 = vmul.f32 0.6931472, %v5605_v52 }
0x12a6   :  { %4874 = vperm.xlu0 %5587, %v8664_v4   ;;  %5612 = vlog2.f32 %v4799_v38  ;;  %v4818_v62 = vmul.f32 0.6931472, %v5607_v45  ;;  %v8672_v46 = vmul.f32 2.0, %v4816_v6 }
0x12a7   :  { %4880 = vperm.xlu2 %5589, %v8668_v2   ;;  %v8674_v8 = vmul.f32 2.0, %v4824_v1 }
0x12a8   :  { %v8677_v32 = vmul.f32 2.0, %v4818_v62 }
0x12aa   :  { %v5609_v53 = vpop.eup %5608 }
0x12ab   :  { %v4771_v3 = vperm.slane %v5609_v53, 2  ;;  %v4770_v20 = vperm.slane %v5609_v53, 1  ;;  %v4769_v13 = vperm.slane %v5609_v53, 0  ;;  %v4774_v9 = vperm.slane %v5609_v53, 5  ;;  %v5611_v36 = vpop.eup %5610 }
0x12ac   :  { %v5613_v31 = vpop.eup %5612  ;;  %v4772_v17 = vperm.slane %v5609_v53, 3  ;;  %v4820_v23 = vmul.f32 0.6931472, %v5611_v36  ;;  %v4773_v26 = vperm.slane %v5609_v53, 4  ;;  %v4776_v42 = vperm.slane %v5609_v53, 7 }
0x12ad   :  { %4883 = vperm.xlu1 %5588, %v8672_v46   ;;  %v4803_v48 = vmul.f32 %v4771_v3, %v8593_v16  ;;  %v4802_v60 = vmul.f32 %v4770_v20, %v8581_v15  ;;  %v4801_v55 = vmul.f32 %v4769_v13, %v8513_v61  ;;  %v4806_v44 = vmul.f32 %v4774_v9, %v8625_v24 }
0x12ae   :  { %4895 = vperm.xlu0 %5587, %v8674_v8   ;;  %v4822_v28 = vmul.f32 0.6931472, %v5613_v31  ;;  %v4804_v16 = vmul.f32 %v4772_v17, %v8597_v57  ;;  %v8686_v0 = vmul.f32 2.0, %v4820_v23  ;;  %v4805_v61 = vmul.f32 %v4773_v26, %v8611_v50 }
0x12af   :  { %4886 = vperm.xlu2 %5589, %v8677_v32   ;;  %5614 = vlog2.f32 %v4803_v48  ;;  %v4775_v24 = vperm.slane %v5609_v53, 6  ;;  %v4808_v5 = vmul.f32 %v4776_v42, %v8640_v29 }
0x12b0   :  { %5616 = vlog2.f32 %v4802_v60  ;;  %v8690_v58 = vmul.f32 2.0, %v4822_v28 }
0x12b1   :  { %5618 = vlog2.f32 %v4801_v55  ;;  %v4807_v50 = vmul.f32 %v4775_v24, %v8635_v25 }
0x12b2   :  { %5620 = vlog2.f32 %v4806_v44 }
0x12b3   :  { %5622 = vlog2.f32 %v4804_v16 }
0x12b4   :  { %5624 = vlog2.f32 %v4805_v61 }
0x12b5   :  { %v5615_v15 = vpop.eup %5614  ;;  %4889 = vperm.xlu1 %5588, %v8686_v0   ;;  %5626 = vlog2.f32 %v4807_v50 }
0x12b6   :  { %v5617_v33 = vpop.eup %5616  ;;  %v4830_v12 = vmul.f32 0.6931472, %v5615_v15  ;;  %5628 = vlog2.f32 %v4808_v5 }
0x12b7   :  { %v5619_v21 = vpop.eup %5618  ;;  %4892 = vperm.xlu2 %5589, %v8690_v58   ;;  %v4828_v39 = vmul.f32 0.6931472, %v5617_v33 }
0x12b8   :  { %v8693_v18 = vmul.f32 2.0, %v4830_v12  ;;  %v4826_v57 = vmul.f32 0.6931472, %v5619_v21  ;;  %v5621_v30 = vpop.eup %5620 }
0x12b9   :  { %v5623_v59 = vpop.eup %5622  ;;  %v4836_v7 = vmul.f32 0.6931472, %v5621_v30  ;;  %v8700_v11 = vmul.f32 2.0, %v4828_v39 }
0x12ba   :  { %4904 = vperm.xlu0 %5587, %v8693_v18   ;;  %v8697_v22 = vmul.f32 2.0, %v4826_v57  ;;  %v5625_v27 = vpop.eup %5624  ;;  %v4832_v19 = vmul.f32 0.6931472, %v5623_v59 }
0x12bb   :  { %v8704_v43 = vmul.f32 2.0, %v4836_v7  ;;  %v4834_v35 = vmul.f32 0.6931472, %v5625_v27  ;;  %v5627_v63 = vpop.eup %5626 }
0x12bc   :  { %v8707_v25 = vmul.f32 2.0, %v4832_v19  ;;  %v5629_v29 = vpop.eup %5628  ;;  %v4838_v54 = vmul.f32 0.6931472, %v5627_v63 }
0x12bd   :  { %4898 = vperm.xlu1 %5588, %v8697_v22   ;;  %v8709_v40 = vmul.f32 2.0, %v4834_v35  ;;  %v4840_v37 = vmul.f32 0.6931472, %v5629_v29 }
0x12be   :  { %v8713_v51 = vmul.f32 2.0, %v4838_v54 }
0x12bf   :  { %4901 = vperm.xlu2 %5589, %v8700_v11   ;;  %v8715_v56 = vmul.f32 2.0, %v4840_v37 }
0x12c2   :  { %4913 = vperm.xlu0 %5587, %v8704_v43  }
0x12c5   :  { %4907 = vperm.xlu1 %5588, %v8707_v25  }
0x12c7   :  { %4910 = vperm.xlu2 %5589, %v8709_v40  }
0x12cd   :  { %4916 = vperm.xlu1 %5588, %v8713_v51  }
0x12cf   :  { %4919 = vperm.xlu2 %5589, %v8715_v56  }
0x1301   :  { %v4881_v41 = vpop.permute.xlu2 %4880 }
0x1302   :  { %v4923_v53 = vperm.slane %v4881_v41, %v6143_v47 }
0x1309   :  { %v4887_v34 = vpop.permute.xlu2 %4886 }
0x130a   :  { %v4925_v13 = vperm.slane %v4887_v34, %v6143_v47 }
0x1311   :  { %v4893_v6 = vpop.permute.xlu2 %4892 }
0x1312   :  { %v4927_v60 = vperm.slane %v4893_v6, %v6143_v47 }
0x1317   :  { %v4878_v14 = vpop.permute.xlu1 %4877 }
0x1318   :  { %v4875_v10 = vpop.permute.xlu0 %4874  ;;  %v4922_v38 = vperm.slane %v4878_v14, %v6143_v47 }
0x1319   :  { %v4921_v52 = vperm.slane %v4875_v10, %v6143_v47  ;;  %v4902_v31 = vpop.permute.xlu2 %4901 }
0x131a   :  { %v4930_v12 = vperm.slane %v4902_v31, %v6143_v47 }
0x131b   :  { %v4937_v1 = vsel %vm360_vm6, %v4922_v38, %v4921_v52 }
0x131c   :  { %v4938_v3 = vsel %vm362_vm7, %v4923_v53, %v4937_v1 }
0x131f   :  { %v4884_v45 = vpop.permute.xlu1 %4883 }
0x1320   :  { %v4924_v62 = vperm.slane %v4884_v45, %v6143_v47  ;;  %v4896_v9 = vpop.permute.xlu0 %4895 }
0x1321   :  { %v4928_v17 = vperm.slane %v4896_v9, %v6143_v47  ;;  %v4911_v33 = vpop.permute.xlu2 %4910 }
0x1322   :  { %v4939_v20 = vsel %vm364_vm8, %v4924_v62, %v4938_v3  ;;  %v4933_v50 = vperm.slane %v4911_v33, %v6143_v47 }
0x1323   :  { %v4940_v55 = vsel %vm366_vm9, %v4925_v13, %v4939_v20 }
0x1327   :  { %v4890_v36 = vpop.permute.xlu1 %4889 }
0x1328   :  { %v4926_v48 = vperm.slane %v4890_v36, %v6143_v47 }
0x1329   :  { %v4920_v7 = vpop.permute.xlu2 %4919 }
0x132a   :  { %v4941_v23 = vsel %vm368_vm10, %v4926_v48, %v4940_v55  ;;  %v4936_v63 = vperm.slane %v4920_v7, %v6143_v47 }
0x132b   :  { %v4942_v44 = vsel %vm370_vm11, %v4927_v60, %v4941_v23 }
0x132c   :  { %v4943_v26 = vsel %vm9317_vm12, %v4928_v17, %v4942_v44  ;;  %v4905_v61 = vpop.permute.xlu0 %4904 }
0x132d   :  { %v4953_v28 = vsel %vm9316_vm13, %v4943_v26, -inf  ;;  %v4931_v57 = vperm.slane %v4905_v61, %v6143_v47 }
0x132e   :  { %4954 = vmax.xlane.f32.xlu0 %v4953_v28 }
0x132f   :  { %v4899_v16 = vpop.permute.xlu1 %4898 }
0x1330   :  { %v4929_v15 = vperm.slane %v4899_v16, %v6143_v47 }
0x1332   :  { %v4944_v24 = vsel %vm360_vm6, %v4930_v12, %v4929_v15 }
0x1333   :  { %v4945_v30 = vsel %vm362_vm7, %v4931_v57, %v4944_v24 }
0x1334   :  { %v4914_v59 = vpop.permute.xlu0 %4913 }
0x1335   :  { %v4934_v27 = vperm.slane %v4914_v59, %v6143_v47 }
0x1337   :  { %v4908_v21 = vpop.permute.xlu1 %4907 }
0x1338   :  { %v4932_v42 = vperm.slane %v4908_v21, %v6143_v47 }
0x133a   :  { %v4946_v39 = vsel %vm364_vm8, %v4932_v42, %v4945_v30 }
0x133b   :  { %v4947_v5 = vsel %vm366_vm9, %v4933_v50, %v4946_v39 }
0x133c   :  { %v4948_v29 = vsel %vm368_vm10, %v4934_v27, %v4947_v5 }
0x133f   :  { %v4917_v19 = vpop.permute.xlu1 %4916 }
0x1340   :  { %v4935_v35 = vperm.slane %v4917_v19, %v6143_v47 }
0x1342   :  { %v4949_v54 = vsel %vm370_vm11, %v4935_v35, %v4948_v29 }
0x1343   :  { %v4950_v37 = vsel %vm9317_vm12, %v4936_v63, %v4949_v54 }
0x1344   :  { %v4956_v41 = vsel %vm9316_vm13, %v4950_v37, -inf }
0x1345   :  { %4957 = vmax.xlane.f32.xlu1 %v4956_v41 }
0x13a1   :  { %v4955_v34 = vpop.xlane.xlu0 %4954 }
0x13a2   :  { %v4961_v14 = vperm.slane %v4955_v34, 0  ;;  %v4966_v10 = vperm.slane %v4955_v34, 5  ;;  %v4968_v38 = vperm.slane %v4955_v34, 7  ;;  %v4962_v52 = vperm.slane %v4955_v34, 1 }
0x13a3   :  { %v4963_v13 = vperm.slane %v4955_v34, 2  ;;  %v4964_v48 = vperm.slane %v4955_v34, 3  ;;  %v4965_v44 = vperm.slane %v4955_v34, 4  ;;  %v4967_v21 = vperm.slane %v4955_v34, 6 }
0x13a4   :  { %v4993_v45 = vsub.f32 %v8664_v4, %v4961_v14  ;;  %v4998_v6 = vsub.f32 %v8686_v0, %v4966_v10  ;;  %v5000_v62 = vsub.f32 %v8674_v8, %v4968_v38  ;;  %v4994_v53 = vsub.f32 %v8662_v49, %v4962_v52 }
0x13a5   :  { %v4995_v4 = vsub.f32 %v8668_v2, %v4963_v13  ;;  %v4996_v55 = vsub.f32 %v8672_v46, %v4964_v48  ;;  %v4997_v46 = vsub.f32 %v8677_v32, %v4965_v44  ;;  %v4999_v50 = vsub.f32 %v8690_v58, %v4967_v21 }
0x13a6   :  { %v5009_v1 = vmul.f32 1.442695, %v4993_v45  ;;  %v5019_v3 = vmul.f32 1.442695, %v4998_v6  ;;  %v5023_v20 = vmul.f32 1.442695, %v5000_v62 }
0x13a7   :  { %v5011_v9 = vmul.f32 1.442695, %v4994_v53  ;;  %v5013_v8 = vmul.f32 1.442695, %v4995_v4  ;;  %v5015_v26 = vmul.f32 1.442695, %v4996_v55 }
0x13a8   :  { %5630 = vpow2.f32 %v5009_v1  ;;  %v5017_v57 = vmul.f32 1.442695, %v4997_v46 }
0x13a9   :  { %5632 = vpow2.f32 %v5019_v3 }
0x13aa   :  { %5634 = vpow2.f32 %v5023_v20 }
0x13ab   :  { %5636 = vpow2.f32 %v5011_v9 }
0x13ac   :  { %5638 = vpow2.f32 %v5013_v8 }
0x13ad   :  { %5640 = vpow2.f32 %v5015_v26 }
0x13ae   :  { %v8755_v36 = vpop.eup %5630 }
0x13af   :  { %5058 = vperm.xlu2 %5589, %v8755_v36   ;;  %v8759_v0 = vpop.eup %5632 }
0x13b0   :  { %5073 = vperm.xlu0 %5587, %v8759_v0   ;;  %v8762_v49 = vpop.eup %5634 }
0x13b1   :  { %v8764_v60 = vpop.eup %5636  ;;  %5079 = vperm.xlu1 %5588, %v8762_v49  }
0x13b2   :  { %v8771_v15 = vpop.eup %5638 }
0x13b3   :  { %v8777_v42 = vpop.eup %5640 }
0x13b7   :  { %5061 = vperm.xlu2 %5589, %v8764_v60  }
0x13b8   :  { %v4958_v31 = vpop.xlane.xlu1 %4957 }
0x13b9   :  { %v4971_v2 = vperm.slane %v4958_v31, 2  ;;  %v4973_v17 = vperm.slane %v4958_v31, 4  ;;  %v4974_v16 = vperm.slane %v4958_v31, 5  ;;  %v4976_v33 = vperm.slane %v4958_v31, 7 }
0x13ba   :  { %v4970_v27 = vperm.slane %v4958_v31, 1  ;;  %v4972_v29 = vperm.slane %v4958_v31, 3  ;;  %v4975_v41 = vperm.slane %v4958_v31, 6 }
0x13bb   :  { %v5003_v23 = vsub.f32 %v8693_v18, %v4971_v2  ;;  %v5005_v28 = vsub.f32 %v8709_v40, %v4973_v17  ;;  %v5006_v24 = vsub.f32 %v8704_v43, %v4974_v16  ;;  %v5008_v18 = vsub.f32 %v8715_v56, %v4976_v33 }
0x13bc   :  { %v5021_v43 = vmul.f32 1.442695, %v4999_v50  ;;  %v4969_v56 = vperm.slane %v4958_v31, 0  ;;  %v5002_v63 = vsub.f32 %v8700_v11, %v4970_v27  ;;  %v5007_v10 = vsub.f32 %v8713_v51, %v4975_v41 }
0x13bd   :  { %v5029_v61 = vmul.f32 1.442695, %v5003_v23  ;;  %v5033_v12 = vmul.f32 1.442695, %v5005_v28  ;;  %v5035_v40 = vmul.f32 1.442695, %v5006_v24 }
0x13be   :  { %v5039_v39 = vmul.f32 1.442695, %v5008_v18  ;;  %v5001_v58 = vsub.f32 %v8697_v22, %v4969_v56  ;;  %v5027_v54 = vmul.f32 1.442695, %v5002_v63  ;;  %v5004_v22 = vsub.f32 %v8707_v25, %v4972_v29 }
0x13bf   :  { %5064 = vperm.xlu2 %5589, %v8771_v15   ;;  %5642 = vpow2.f32 %v5029_v61  ;;  %v5037_v11 = vmul.f32 1.442695, %v5007_v10 }
0x13c0   :  { %5644 = vpow2.f32 %v5033_v12  ;;  %v5025_v19 = vmul.f32 1.442695, %v5001_v58  ;;  %v5031_v34 = vmul.f32 1.442695, %v5004_v22 }
0x13c1   :  { %5646 = vpow2.f32 %v5017_v57 }
0x13c2   :  { %5648 = vpow2.f32 %v5035_v40 }
0x13c3   :  { %5650 = vpow2.f32 %v5039_v39 }
0x13c4   :  { %5652 = vpow2.f32 %v5021_v43 }
0x13c5   :  { %v8779_v30 = vpop.eup %5642  ;;  %5654 = vpow2.f32 %v5025_v19 }
0x13c6   :  { %5088 = vperm.xlu0 %5587, %v8779_v30   ;;  %v8784_v32 = vpop.eup %5644  ;;  %5656 = vpow2.f32 %v5027_v54 }
0x13c7   :  { %5067 = vperm.xlu2 %5589, %v8777_v42   ;;  %5094 = vperm.xlu1 %5588, %v8784_v32   ;;  %v8787_v59 = vpop.eup %5646  ;;  %5658 = vpow2.f32 %v5031_v34 }
0x13c8   :  { %v8789_v7 = vpop.eup %5648  ;;  %5660 = vpow2.f32 %v5037_v11 }
0x13c9   :  { %v8794_v5 = vpop.eup %5650 }
0x13ca   :  { %v8797_v35 = vpop.eup %5652 }
0x13cb   :  { %v8801_v37 = vpop.eup %5654 }
0x13cc   :  { %v8805_v14 = vpop.eup %5656 }
0x13cd   :  { %v8809_v38 = vpop.eup %5658 }
0x13ce   :  { %5097 = vperm.xlu0 %5587, %v8789_v7   ;;  %v8812_v52 = vpop.eup %5660 }
0x13cf   :  { %5070 = vperm.xlu2 %5589, %v8787_v59   ;;  %5103 = vperm.xlu1 %5588, %v8794_v5  }
0x13d7   :  { %5076 = vperm.xlu2 %5589, %v8797_v35  }
0x13df   :  { %5082 = vperm.xlu2 %5589, %v8801_v37  }
0x13e7   :  { %5085 = vperm.xlu2 %5589, %v8805_v14  }
0x13ef   :  { %5091 = vperm.xlu2 %5589, %v8809_v38  }
0x13f7   :  { %5100 = vperm.xlu2 %5589, %v8812_v52  }
0x1409   :  { %v5059_v25 = vpop.permute.xlu2 %5058 }
0x140a   :  { %v5105_v3 = vperm.slane %v5059_v25, %v6143_v47 }
0x1411   :  { %v5062_v45 = vpop.permute.xlu2 %5061 }
0x1412   :  { %v5106_v62 = vperm.slane %v5062_v45, %v6143_v47 }
0x1414   :  { %v5121_v9 = vsel %vm360_vm6, %v5106_v62, %v5105_v3 }
0x1419   :  { %v5065_v6 = vpop.permute.xlu2 %5064 }
0x141a   :  { %v5107_v51 = vperm.slane %v5065_v6, %v6143_v47 }
0x141c   :  { %v5122_v4 = vsel %vm362_vm7, %v5107_v51, %v5121_v9 }
0x1421   :  { %v5068_v1 = vpop.permute.xlu2 %5067 }
0x1422   :  { %v5108_v20 = vperm.slane %v5068_v1, %v6143_v47  ;;  %v5074_v48 = vpop.permute.xlu0 %5073 }
0x1423   :  { %v5080_v55 = vpop.permute.xlu1 %5079  ;;  %v5110_v2 = vperm.slane %v5074_v48, %v6143_v47 }
0x1424   :  { %v5123_v8 = vsel %vm364_vm8, %v5108_v20, %v5122_v4  ;;  %v5112_v44 = vperm.slane %v5080_v55, %v6143_v47 }
0x1429   :  { %v5071_v53 = vpop.permute.xlu2 %5070 }
0x142a   :  { %v5109_v13 = vperm.slane %v5071_v53, %v6143_v47 }
0x142c   :  { %v5124_v31 = vsel %vm366_vm9, %v5109_v13, %v5123_v8 }
0x142d   :  { %v5125_v26 = vsel %vm368_vm10, %v5110_v2, %v5124_v31 }
0x1431   :  { %v5077_v17 = vpop.permute.xlu2 %5076 }
0x1432   :  { %v5111_v23 = vperm.slane %v5077_v17, %v6143_v47 }
0x1434   :  { %v5126_v28 = vsel %vm370_vm11, %v5111_v23, %v5125_v26 }
0x1435   :  { %v5127_v16 = vsel %vm9317_vm12, %v5112_v44, %v5126_v28 }
0x1436   :  { %v5137_v61 = vsel %vm9316_vm13, %v5127_v16, 0.0 }
0x1437   :  { %5138 = vadd.xlane.f32.xlu0 %v5137_v61 }
0x1438   :  { %v5089_v46 = vpop.permute.xlu0 %5088 }
0x1439   :  { %v5083_v33 = vpop.permute.xlu2 %5082  ;;  %v5095_v18 = vpop.permute.xlu1 %5094  ;;  %v5115_v39 = vperm.slane %v5089_v46, %v6143_v47 }
0x143a   :  { %v5113_v21 = vperm.slane %v5083_v33, %v6143_v47  ;;  %v5117_v58 = vperm.slane %v5095_v18, %v6143_v47 }
0x1440   :  { %v5098_v27 = vpop.permute.xlu0 %5097 }
0x1441   :  { %v5086_v12 = vpop.permute.xlu2 %5085  ;;  %v5104_v19 = vpop.permute.xlu1 %5103  ;;  %v5118_v29 = vperm.slane %v5098_v27, %v6143_v47 }
0x1442   :  { %v5114_v24 = vperm.slane %v5086_v12, %v6143_v47  ;;  %v5120_v41 = vperm.slane %v5104_v19, %v6143_v47 }
0x1444   :  { %v5128_v57 = vsel %vm360_vm6, %v5114_v24, %v5113_v21 }
0x1445   :  { %v5129_v43 = vsel %vm362_vm7, %v5115_v39, %v5128_v57 }
0x1449   :  { %v5092_v40 = vpop.permute.xlu2 %5091 }
0x144a   :  { %v5116_v50 = vperm.slane %v5092_v40, %v6143_v47 }
0x144c   :  { %v5130_v56 = vsel %vm364_vm8, %v5116_v50, %v5129_v43 }
0x144d   :  { %v5131_v63 = vsel %vm366_vm9, %v5117_v58, %v5130_v56 }
0x144e   :  { %v5132_v34 = vsel %vm368_vm10, %v5118_v29, %v5131_v63 }
0x1451   :  { %v5101_v54 = vpop.permute.xlu2 %5100 }
0x1452   :  { %v5119_v22 = vperm.slane %v5101_v54, %v6143_v47 }
0x1454   :  { %v5133_v10 = vsel %vm370_vm11, %v5119_v22, %v5132_v34 }
0x1455   :  { %v5134_v11 = vsel %vm9317_vm12, %v5120_v41, %v5133_v10 }
0x1456   :  { %v5140_v25 = vsel %vm9316_vm13, %v5134_v11, 0.0 }
0x1457   :  { %5141 = vadd.xlane.f32.xlu2 %v5140_v25 }
0x14aa   :  { %v5139_v45 = vpop.xlane.xlu0 %5138 }
0x14ab   :  { %v5145_v6 = vperm.slane %v5139_v45, 0  ;;  %v8847_v1 = vperm.slane %v5139_v45, 1  ;;  %v8849_v62 = vperm.slane %v5139_v45, 2  ;;  %v8851_v53 = vperm.slane %v5139_v45, 3 }
0x14ac   :  { %v8853_v51 = vperm.slane %v5139_v45, 5  ;;  %v8856_v3 = vperm.slane %v5139_v45, 6  ;;  %v8861_v13 = vperm.slane %v5139_v45, 4  ;;  %v8868_v31 = vperm.slane %v5139_v45, 7 }
0x14ad   :  { %5662 = vrcp.f32 %v5145_v6  ;;  %v5186_v9 = vand.u32 2147483647, %v5145_v6  ;;  %v5188_v4 = vand.u32 2147483648, %v5145_v6  ;;  %vm5182_vm5 = vweird.f32 %v5145_v6 }
0x14ae   :  { %5664 = vrcp.f32 %v8847_v1  ;;  %v5261_v23 = vand.u32 2147483647, %v8853_v51  ;;  %v5263_v44 = vand.u32 2147483648, %v8853_v51  ;;  %vm5257_vm3 = vweird.f32 %v8853_v51 }
0x14af   :  { %5666 = vrcp.f32 %v8849_v62  ;;  %vm8880_vm4 = vcmp.eq.f32.partialorder %v5186_v9, 8.507059e+37  ;;  %v5189_v61 = vor.u32 1.1754944e-38, %v5188_v4  ;;  %vm5272_vm15 = vweird.f32 %v8856_v3 }
0x14b0   :  { %5668 = vrcp.f32 %v8851_v53  ;;  %v5276_v24 = vand.u32 2147483647, %v8856_v3  ;;  %v5278_v57 = vand.u32 2147483648, %v8856_v3  ;;  %vm5197_vm1 = vweird.f32 %v8847_v1 }
0x14b1   :  { %5670 = vrcp.f32 %v8853_v51  ;;  %v5201_v27 = vand.u32 2147483647, %v8847_v1  ;;  %v5203_v19 = vand.u32 2147483648, %v8847_v1  ;;  %v5264_v9 = vor.u32 1.1754944e-38, %v5263_v44 }
0x14b2   :  { %5672 = vrcp.f32 %v8856_v3 }
0x14b3   :  { %v5663_v20 = vpop.eup %5662  ;;  %5674 = vrcp.f32 %v8861_v13 }
0x14b4   :  { %v8864_v48 = vpop.eup %5664  ;;  %v5178_v8 = vmul.f32 %v5663_v20, %v5145_v6  ;;  %vm5183_vm14 = vweird.f32 %v5663_v20  ;;  %5676 = vrcp.f32 %v8868_v31 }
0x14b5   :  { %v8866_v55 = vpop.eup %5666  ;;  %v5193_v2 = vmul.f32 %v8864_v48, %v8847_v1  ;;  %vm5184_vm2 = vmor %vm5182_vm5, %vm5183_vm14  ;;  %vm5198_vm0 = vweird.f32 %v8864_v48  ;;  %vm8905_vm14 = vcmp.eq.f32.partialorder %v5261_v23, 8.507059e+37 }
0x14b6   :  { %v8872_v17 = vpop.eup %5668  ;;  %v5179_v26 = vsub.f32 1.0, %v5178_v8  ;;  %v5208_v28 = vmul.f32 %v8866_v55, %v8849_v62 }
0x14b7   :  { %v5194_v33 = vsub.f32 1.0, %v5193_v2  ;;  %v5671_v12 = vpop.eup %5670  ;;  %v5223_v39 = vmul.f32 %v8872_v17, %v8851_v53  ;;  %v5279_v2 = vor.u32 1.1754944e-38, %v5278_v57 }
0x14b8   :  { %v5180_v46 = vmul.f32 %v5663_v20, %v5179_v26  ;;  %v5673_v18 = vpop.eup %5672  ;;  %v5253_v21 = vmul.f32 %v5671_v12, %v8853_v51  ;;  %v5209_v56 = vsub.f32 1.0, %v5208_v28  ;;  %vm5258_vm13 = vweird.f32 %v5671_v12 }
0x14b9   :  { %v5195_v40 = vmul.f32 %v8864_v48, %v5194_v33  ;;  %v5268_v43 = vmul.f32 %v5673_v18, %v8856_v3  ;;  %v8899_v22 = vpop.eup %5674  ;;  %v5224_v10 = vsub.f32 1.0, %v5223_v39  ;;  %vm5273_vm5 = vweird.f32 %v5673_v18  ;;  %vm5259_vm12 = vmor %vm5257_vm3, %vm5258_vm13 }
0x14ba   :  { %v5181_v50 = vadd.f32 %v5663_v20, %v5180_v46  ;;  %v5254_v58 = vsub.f32 1.0, %v5253_v21  ;;  %v5210_v45 = vmul.f32 %v8866_v55, %v5209_v56  ;;  %v5238_v44 = vmul.f32 %v8899_v22, %v8861_v13  ;;  %v8926_v26 = vpop.eup %5676 }
0x14bb   :  { %v5269_v29 = vsub.f32 1.0, %v5268_v43  ;;  %v5196_v54 = vadd.f32 %v8864_v48, %v5195_v40  ;;  %v5204_v51 = vor.u32 1.1754944e-38, %v5203_v19  ;;  %vm5213_vm13 = vweird.f32 %v8866_v55 }
0x14bc   :  { %v5185_v63 = vsel %vm5184_vm2, %v5663_v20, %v5181_v50  ;;  %v5255_v41 = vmul.f32 %v5671_v12, %v5254_v58  ;;  %vm8909_vm2 = vcmp.eq.f32.partialorder %v5276_v24, 8.507059e+37  ;;  %v5239_v3 = vsub.f32 1.0, %v5238_v44 }
0x14bd   :  { %v5190_v34 = vsel %vm8880_vm4, %v5189_v61, %v5185_v63  ;;  %v5270_v25 = vmul.f32 %v5673_v18, %v5269_v29  ;;  %vm8915_vm4 = vmor %vm5197_vm1, %vm5198_vm0  ;;  %vm5202_vm0 = vcmp.eq.f32.partialorder %v5201_v27, 8.507059e+37  ;;  %v5225_v61 = vmul.f32 %v8872_v17, %v5224_v10 }
0x14be   :  { %v5191_v11 = vmul.f32 %v8755_v36, %v5190_v34  ;;  %v5256_v6 = vadd.f32 %v5671_v12, %v5255_v41  ;;  %v5200_v23 = vsel %vm8915_vm4, %v8864_v48, %v5196_v54  ;;  %vm5274_vm1 = vmor %vm5272_vm15, %vm5273_vm5  ;;  %v5211_v48 = vadd.f32 %v8866_v55, %v5210_v45 }
0x14bf   :  { %v5271_v36 = vadd.f32 %v5673_v18, %v5270_v25  ;;  %v5205_v46 = vsel %vm5202_vm0, %v5204_v51, %v5200_v23  ;;  %v5218_v21 = vand.u32 2147483648, %v8849_v62  ;;  %vm5228_vm15 = vweird.f32 %v8872_v17 }
0x14c0   :  { %5451 = vperm.xlu1 %5588, %v5191_v11   ;;  %v5260_v1 = vsel %vm5259_vm12, %v5671_v12, %v5256_v6  ;;  %vm5212_vm12 = vweird.f32 %v8849_v62  ;;  %v5206_v57 = vmul.f32 %v8764_v60, %v5205_v46  ;;  %v5283_v39 = vmul.f32 %v8926_v26, %v8868_v31 }
0x14c1   :  { %v5265_v28 = vsel %vm8905_vm14, %v5264_v9, %v5260_v1  ;;  %v5275_v16 = vsel %vm5274_vm1, %v5673_v18, %v5271_v36  ;;  %v5216_v18 = vand.u32 2147483647, %v8849_v62  ;;  %vm5214_vm3 = vmor %vm5212_vm12, %vm5213_vm13  ;;  %v5219_v50 = vor.u32 1.1754944e-38, %v5218_v21 }
0x14c2   :  { %v5266_v33 = vmul.f32 %v8759_v0, %v5265_v28  ;;  %v5280_v12 = vsel %vm8909_vm2, %v5279_v2, %v5275_v16  ;;  %v5226_v0 = vadd.f32 %v8872_v17, %v5225_v61  ;;  %v5215_v40 = vsel %vm5214_vm3, %v8866_v55, %v5211_v48 }
0x14c3   :  { %v5281_v24 = vmul.f32 %v8797_v35, %v5280_v12  ;;  %v5240_v35 = vmul.f32 %v8899_v22, %v5239_v3  ;;  %vm5227_vm5 = vweird.f32 %v8851_v53  ;;  %v5233_v60 = vand.u32 2147483648, %v8851_v53 }
0x14c4   :  { %5466 = vperm.xlu0 %5587, %v5266_v33   ;;  %vm5217_vm14 = vcmp.eq.f32.partialorder %v5216_v18, 8.507059e+37  ;;  %vm8954_vm2 = vmor %vm5227_vm5, %vm5228_vm15  ;;  %v5231_v43 = vand.u32 2147483647, %v8851_v53  ;;  %vm5243_vm4 = vweird.f32 %v8899_v22  ;;  %v5284_v29 = vsub.f32 1.0, %v5283_v39 }
0x14c5   :  { %5469 = vperm.xlu2 %5589, %v5281_v24   ;;  %v5220_v55 = vsel %vm5217_vm14, %v5219_v50, %v5215_v40  ;;  %v5230_v58 = vsel %vm8954_vm2, %v8872_v17, %v5226_v0  ;;  %v5241_v63 = vadd.f32 %v8899_v22, %v5240_v35  ;;  %v5234_v41 = vor.u32 1.1754944e-38, %v5233_v60 }
0x14c6   :  { %v5248_v53 = vand.u32 2147483648, %v8861_v13  ;;  %vm5232_vm1 = vcmp.eq.f32.partialorder %v5231_v43, 8.507059e+37  ;;  %vm5242_vm0 = vweird.f32 %v8861_v13  ;;  %v5246_v17 = vand.u32 2147483647, %v8861_v13 }
0x14c7   :  { %v5221_v10 = vmul.f32 %v8771_v15, %v5220_v55  ;;  %v5235_v11 = vsel %vm5232_vm1, %v5234_v41, %v5230_v58  ;;  %vm5244_vm13 = vmor %vm5242_vm0, %vm5243_vm4  ;;  %v5285_v6 = vmul.f32 %v8926_v26, %v5284_v29  ;;  %v5291_v15 = vand.u32 2147483647, %v8868_v31 }
0x14c8   :  { %5454 = vperm.xlu1 %5588, %v5206_v57   ;;  %v5245_v45 = vsel %vm5244_vm13, %v8899_v22, %v5241_v63  ;;  %v5249_v13 = vor.u32 1.1754944e-38, %v5248_v53  ;;  %vm5247_vm12 = vcmp.eq.f32.partialorder %v5246_v17, 8.507059e+37  ;;  %v5293_v9 = vand.u32 2147483648, %v8868_v31 }
0x14c9   :  { %v5236_v4 = vmul.f32 %v8777_v42, %v5235_v11  ;;  %vm5287_vm3 = vweird.f32 %v8868_v31  ;;  %v5286_v36 = vadd.f32 %v8926_v26, %v5285_v6  ;;  %vm5288_vm15 = vweird.f32 %v8926_v26 }
0x14ca   :  { %v5142_v56 = vpop.xlane.xlu2 %5141  ;;  %v5250_v8 = vsel %vm5247_vm12, %v5249_v13, %v5245_v45  ;;  %vm9000_vm5 = vcmp.eq.f32.partialorder %v5291_v15, 8.507059e+37  ;;  %v5294_v48 = vor.u32 1.1754944e-38, %v5293_v9  ;;  %vm9020_vm4 = vmor %vm5287_vm3, %vm5288_vm15 }
0x14cb   :  { %v8963_v27 = vperm.slane %v5142_v56, 0  ;;  %v8965_v19 = vperm.slane %v5142_v56, 1  ;;  %v8968_v54 = vperm.slane %v5142_v56, 3  ;;  %v8971_v34 = vperm.slane %v5142_v56, 4 }
0x14cc   :  { %v8979_v25 = vperm.slane %v5142_v56, 6  ;;  %v8984_v20 = vperm.slane %v5142_v56, 7  ;;  %v8992_v22 = vperm.slane %v5142_v56, 2  ;;  %v5251_v51 = vmul.f32 %v8787_v59, %v5250_v8 }
0x14cd   :  { %5678 = vrcp.f32 %v8965_v19  ;;  %v5321_v23 = vand.u32 2147483647, %v8965_v19  ;;  %v5323_v44 = vand.u32 2147483648, %v8965_v19  ;;  %v5366_v28 = vand.u32 2147483647, %v8971_v34 }
0x14ce   :  { %5680 = vrcp.f32 %v8963_v27  ;;  %v9011_v33 = vperm.slane %v5142_v56, 5  ;;  %vm5362_vm14 = vweird.f32 %v8971_v34  ;;  %v5368_v12 = vand.u32 2147483648, %v8971_v34 }
0x14cf   :  { %5682 = vrcp.f32 %v8968_v54  ;;  %vm5317_vm2 = vweird.f32 %v8965_v19  ;;  %v5290_v24 = vsel %vm9020_vm4, %v8926_v26, %v5286_v36  ;;  %vm9031_vm1 = vcmp.eq.f32.partialorder %v5321_v23, 8.507059e+37 }
0x14d0   :  { %5457 = vperm.xlu1 %5588, %v5221_v10   ;;  %5684 = vrcp.f32 %v8971_v34  ;;  %v5324_v57 = vor.u32 1.1754944e-38, %v5323_v44  ;;  %vm9039_vm0 = vcmp.eq.f32.partialorder %v5366_v28, 8.507059e+37  ;;  %v5369_v62 = vor.u32 1.1754944e-38, %v5368_v12 }
0x14d1   :  { %5686 = vrcp.f32 %v8979_v25  ;;  %v5295_v43 = vsel %vm9000_vm5, %v5294_v48, %v5290_v24  ;;  %v5413_v15 = vand.u32 2147483648, %v8984_v20  ;;  %v5353_v9 = vand.u32 2147483648, %v8968_v54 }
0x14d2   :  { %5688 = vrcp.f32 %v8984_v20  ;;  %v5351_v8 = vand.u32 2147483647, %v8968_v54  ;;  %v5296_v12 = vmul.f32 %v8762_v49, %v5295_v43  ;;  %v5308_v24 = vand.u32 2147483648, %v8963_v27 }
0x14d3   :  { %v5679_v2 = vpop.eup %5678  ;;  %5690 = vrcp.f32 %v8992_v22  ;;  %v5354_v48 = vor.u32 1.1754944e-38, %v5353_v9 }
0x14d4   :  { %v9004_v1 = vpop.eup %5680  ;;  %v5313_v16 = vmul.f32 %v5679_v2, %v8965_v19  ;;  %vm5318_vm13 = vweird.f32 %v5679_v2  ;;  %5692 = vrcp.f32 %v9011_v33 }
0x14d5   :  { %v9009_v61 = vpop.eup %5682  ;;  %v5298_v0 = vmul.f32 %v9004_v1, %v8963_v27  ;;  %vm5319_vm3 = vmor %vm5317_vm2, %vm5318_vm13  ;;  %vm5347_vm2 = vweird.f32 %v8968_v54  ;;  %vm5352_vm13 = vcmp.eq.f32.partialorder %v5351_v8, 8.507059e+37 }
0x14d6   :  { %v5685_v46 = vpop.eup %5684  ;;  %v5314_v3 = vsub.f32 1.0, %v5313_v16  ;;  %v5343_v21 = vmul.f32 %v9009_v61, %v8968_v54  ;;  %vm5348_vm15 = vweird.f32 %v9009_v61  ;;  %v5411_v16 = vand.u32 2147483647, %v8984_v20 }
0x14d7   :  { %v5358_v18 = vmul.f32 %v5685_v46, %v8971_v34  ;;  %v9037_v40 = vpop.eup %5686  ;;  %vm5363_vm12 = vweird.f32 %v5685_v46  ;;  %v5299_v41 = vsub.f32 1.0, %v5298_v0  ;;  %v5396_v0 = vand.u32 2147483647, %v8979_v25 }
0x14d8   :  { %5460 = vperm.xlu1 %5588, %v5236_v4   ;;  %v5315_v26 = vmul.f32 %v5679_v2, %v5314_v3  ;;  %v5344_v39 = vsub.f32 1.0, %v5343_v21  ;;  %v9043_v50 = vpop.eup %5688  ;;  %v5388_v56 = vmul.f32 %v9037_v40, %v8979_v25  ;;  %vm5364_vm5 = vmor %vm5362_vm14, %vm5363_vm12  ;;  %vm5407_vm14 = vweird.f32 %v8984_v20 }
0x14d9   :  { %v5359_v60 = vsub.f32 1.0, %v5358_v18  ;;  %v5403_v58 = vmul.f32 %v9043_v50, %v8984_v20  ;;  %v9056_v53 = vpop.eup %5690  ;;  %vm5408_vm4 = vweird.f32 %v9043_v50  ;;  %v5300_v34 = vmul.f32 %v9004_v1, %v5299_v41 }
0x14da   :  { %v5316_v55 = vadd.f32 %v5679_v2, %v5315_v26  ;;  %v5345_v63 = vmul.f32 %v9009_v61, %v5344_v39  ;;  %v5389_v45 = vsub.f32 1.0, %v5388_v56  ;;  %v9079_v23 = vpop.eup %5692  ;;  %vm5303_vm12 = vweird.f32 %v9004_v1 }
0x14db   :  { %v5360_v29 = vmul.f32 %v5685_v46, %v5359_v60  ;;  %v5404_v10 = vsub.f32 1.0, %v5403_v58  ;;  %v5301_v20 = vadd.f32 %v9004_v1, %v5300_v34  ;;  %v5414_v3 = vor.u32 1.1754944e-38, %v5413_v15 }
0x14dc   :  { %v5320_v17 = vsel %vm5319_vm3, %v5679_v2, %v5316_v55  ;;  %v5346_v11 = vadd.f32 %v9009_v61, %v5345_v63  ;;  %vm5393_vm3 = vweird.f32 %v9037_v40  ;;  %v5398_v21 = vand.u32 2147483648, %v8979_v25 }
0x14dd   :  { %v5361_v6 = vadd.f32 %v5685_v46, %v5360_v29  ;;  %v5325_v13 = vsel %vm9031_vm1, %v5324_v57, %v5320_v17  ;;  %v5405_v4 = vmul.f32 %v9043_v50, %v5404_v10  ;;  %vm9072_vm1 = vmor %vm5347_vm2, %vm5348_vm15  ;;  %vm5412_vm15 = vcmp.eq.f32.partialorder %v5411_v16, 8.507059e+37 }
0x14de   :  { %v5326_v19 = vmul.f32 %v8805_v14, %v5325_v13  ;;  %v5328_v14 = vmul.f32 %v9056_v53, %v8992_v22  ;;  %v5350_v42 = vsel %vm9072_vm1, %v9009_v61, %v5346_v11  ;;  %v5306_v18 = vand.u32 2147483647, %v8963_v27 }
0x14df   :  { %v5365_v36 = vsel %vm5364_vm5, %v5685_v46, %v5361_v6  ;;  %v5406_v44 = vadd.f32 %v9043_v50, %v5405_v4  ;;  %v5355_v61 = vsel %vm5352_vm13, %v5354_v48, %v5350_v42  ;;  %vm5302_vm5 = vweird.f32 %v8963_v27 }
0x14e0   :  { %5463 = vperm.xlu1 %5588, %v5251_v51   ;;  %v5370_v54 = vsel %vm9039_vm0, %v5369_v62, %v5365_v36  ;;  %5478 = vperm.xlu0 %5587, %v5326_v19   ;;  %v5390_v51 = vmul.f32 %v9037_v40, %v5389_v45  ;;  %vm9094_vm0 = vmor %vm5407_vm14, %vm5408_vm4  ;;  %v5329_v46 = vsub.f32 1.0, %v5328_v14  ;;  %v5356_v57 = vmul.f32 %v8809_v38, %v5355_v61 }
0x14e1   :  { %v5371_v28 = vmul.f32 %v8784_v32, %v5370_v54  ;;  %v5410_v32 = vsel %vm9094_vm0, %v9043_v50, %v5406_v44  ;;  %vm5392_vm2 = vweird.f32 %v8979_v25  ;;  %vm5304_vm4 = vmor %vm5302_vm5, %vm5303_vm12  ;;  %v5373_v39 = vmul.f32 %v9079_v23, %v9011_v33 }
0x14e2   :  { %v5391_v49 = vadd.f32 %v9037_v40, %v5390_v51  ;;  %v5415_v31 = vsel %vm5412_vm15, %v5414_v3, %v5410_v32  ;;  %vm5394_vm1 = vmor %vm5392_vm2, %vm5393_vm3  ;;  %v5305_v35 = vsel %vm5304_vm4, %v9004_v1, %v5301_v20  ;;  %v5330_v26 = vmul.f32 %v9056_v53, %v5329_v46 }
0x14e3   :  { %5487 = vperm.xlu2 %5589, %v5371_v28   ;;  %v5309_v38 = vor.u32 1.1754944e-38, %v5308_v24  ;;  %v5416_v50 = vmul.f32 %v8794_v5, %v5415_v31  ;;  %v5399_v60 = vor.u32 1.1754944e-38, %v5398_v21  ;;  %vm5307_vm14 = vcmp.eq.f32.partialorder %v5306_v18, 8.507059e+37 }
0x14e4   :  { %v5395_v27 = vsel %vm5394_vm1, %v9037_v40, %v5391_v49  ;;  %vm5397_vm0 = vcmp.eq.f32.partialorder %v5396_v0, 8.507059e+37  ;;  %v5331_v43 = vadd.f32 %v9056_v53, %v5330_v26  ;;  %vm5333_vm13 = vweird.f32 %v9056_v53 }
0x14e5   :  { %v5310_v25 = vsel %vm5307_vm14, %v5309_v38, %v5305_v35  ;;  %v5400_v62 = vsel %vm5397_vm0, %v5399_v60, %v5395_v27  ;;  %v5374_v1 = vsub.f32 1.0, %v5373_v39  ;;  %v5338_v56 = vand.u32 2147483648, %v8992_v22 }
0x14e6   :  { %v5311_v55 = vmul.f32 %v8801_v37, %v5310_v25  ;;  %vm5332_vm12 = vweird.f32 %v8992_v22  ;;  %v5336_v40 = vand.u32 2147483647, %v8992_v22  ;;  %v5401_v5 = vmul.f32 %v8812_v52, %v5400_v62 }
0x14e7   :  { %vm5334_vm3 = vmor %vm5332_vm12, %vm5333_vm13  ;;  %v5375_v63 = vmul.f32 %v9079_v23, %v5374_v1  ;;  %v5339_v29 = vor.u32 1.1754944e-38, %v5338_v56  ;;  %vm5378_vm5 = vweird.f32 %v9079_v23  ;;  %v5383_v37 = vand.u32 2147483648, %v9011_v33 }
0x14e8   :  { %5472 = vperm.xlu1 %5588, %v5296_v12   ;;  %5484 = vperm.xlu0 %5587, %v5356_v57   ;;  %v5335_v58 = vsel %vm5334_vm3, %v9056_v53, %v5331_v43  ;;  %vm5337_vm15 = vcmp.eq.f32.partialorder %v5336_v40, 8.507059e+37  ;;  %vm5377_vm2 = vweird.f32 %v9011_v33  ;;  %v5381_v52 = vand.u32 2147483647, %v9011_v33 }
0x14e9   :  { %v5340_v41 = vsel %vm5337_vm15, %v5339_v29, %v5335_v58  ;;  %v5376_v17 = vadd.f32 %v9079_v23, %v5375_v63  ;;  %vm5379_vm4 = vmor %vm5377_vm2, %vm5378_vm5  ;;  %v5384_v10 = vor.u32 1.1754944e-38, %v5383_v37  ;;  %vm9533_vm14 = vcmask 1047559  }
0x14ea   :  { %v5341_v22 = vmul.f32 %v8779_v30, %v5340_v41  ;;  %vm5382_vm1 = vcmp.eq.f32.partialorder %v5381_v52, 8.507059e+37  ;;  %vm9534_vm0 = vcmask 48128  }
0x14eb   :  { %5496 = vperm.xlu2 %5589, %v5416_v50   ;;  %v5380_v53 = vsel %vm5379_vm4, %v9079_v23, %v5376_v17 }
0x14ec   :  { %v5385_v11 = vsel %vm5382_vm1, %v5384_v10, %v5380_v53 }
0x14ed   :  { %v5386_v45 = vmul.f32 %v8789_v7, %v5385_v11 }
0x14f0   :  { %5475 = vperm.xlu1 %5588, %v5311_v55   ;;  %5493 = vperm.xlu0 %5587, %v5401_v5  }
0x14f8   :  { %5481 = vperm.xlu1 %5588, %v5341_v22  }
0x1500   :  { %5490 = vperm.xlu1 %5588, %v5386_v45  }
0x151f   :  { %v5470_v54 = vpop.permute.xlu2 %5469 }
0x1520   :  { %v5504_v51 = vperm.slane %v5470_v54, %v6143_v47 }
0x1532   :  { %v5452_v6 = vpop.permute.xlu1 %5451 }
0x1533   :  { %v5498_v33 = vperm.slane %v5452_v6, %v6143_v47 }
0x1536   :  { %v5467_v34 = vpop.permute.xlu0 %5466 }
0x1537   :  { %v5503_v44 = vperm.slane %v5467_v34, %v6143_v47 }
0x153a   :  { %v5455_v13 = vpop.permute.xlu1 %5454 }
0x153b   :  { %v5499_v30 = vperm.slane %v5455_v13, %v6143_v47 }
0x153d   :  { %v5514_v36 = vsel %vm360_vm6, %v5499_v30, %v5498_v33  ;;  %v5488_v20 = vpop.permute.xlu2 %5487 }
0x153e   :  { %v5510_v35 = vperm.slane %v5488_v20, %v6143_v47 }
0x1542   :  { %v5458_v15 = vpop.permute.xlu1 %5457 }
0x1543   :  { %v5500_v19 = vperm.slane %v5458_v15, %v6143_v47 }
0x1545   :  { %v5515_v7 = vsel %vm362_vm7, %v5500_v19, %v5514_v36  ;;  %v5497_v26 = vpop.permute.xlu2 %5496 }
0x1546   :  { %v5513_v60 = vperm.slane %v5497_v26, %v6143_v47 }
0x154a   :  { %v5461_v9 = vpop.permute.xlu1 %5460 }
0x154b   :  { %v5501_v4 = vperm.slane %v5461_v9, %v6143_v47 }
0x154d   :  { %v5516_v14 = vsel %vm364_vm8, %v5501_v4, %v5515_v7 }
0x1552   :  { %v5464_v8 = vpop.permute.xlu1 %5463  ;;  %v5479_v12 = vpop.permute.xlu0 %5478 }
0x1553   :  { %v5502_v2 = vperm.slane %v5464_v8, %v6143_v47  ;;  %v5507_v49 = vperm.slane %v5479_v12, %v6143_v47 }
0x1555   :  { %v5517_v23 = vsel %vm366_vm9, %v5502_v2, %v5516_v14 }
0x1556   :  { %v5518_v42 = vsel %vm368_vm10, %v5503_v44, %v5517_v23 }
0x1557   :  { %v5519_v48 = vsel %vm370_vm11, %v5504_v51, %v5518_v42 }
0x155a   :  { %v5473_v28 = vpop.permute.xlu1 %5472  ;;  %v5485_v61 = vpop.permute.xlu0 %5484 }
0x155b   :  { %v5505_v16 = vperm.slane %v5473_v28, %v6143_v47  ;;  %v5509_v31 = vperm.slane %v5485_v61, %v6143_v47 }
0x155d   :  { %v5520_v59 = vsel %vm9533_vm14, %v5505_v16, %v5519_v48 }
0x155e   :  { %5530 = vst.msk [vmem:[%s9179_s4] sm:$0xff] %vm9534_vm0, %v5520_v59 }
0x1562   :  { %v5476_v32 = vpop.permute.xlu1 %5475  ;;  %v5494_v57 = vpop.permute.xlu0 %5493 }
0x1563   :  { %v5506_v46 = vperm.slane %v5476_v32, %v6143_v47  ;;  %v5512_v38 = vperm.slane %v5494_v57, %v6143_v47 }
0x1565   :  { %v5521_v21 = vsel %vm360_vm6, %v5507_v49, %v5506_v46  ;;  %vm9535_vm6 = vmmov %vm9533_vm14 }
0x156a   :  { %v5482_v3 = vpop.permute.xlu1 %5481 }
0x156b   :  { %v5508_v24 = vperm.slane %v5482_v3, %v6143_v47 }
0x156d   :  { %v5522_v18 = vsel %vm362_vm7, %v5508_v24, %v5521_v21  ;;  %vm9536_vm7 = vmmov %vm9534_vm0 }
0x156e   :  { %v5523_v0 = vsel %vm364_vm8, %v5509_v31, %v5522_v18 }
0x156f   :  { %v5524_v50 = vsel %vm366_vm9, %v5510_v35, %v5523_v0 }
0x1572   :  { %v5491_v39 = vpop.permute.xlu1 %5490 }
0x1573   :  { %v5511_v27 = vperm.slane %v5491_v39, %v6143_v47 }
0x1575   :  { %v5525_v25 = vsel %vm368_vm10, %v5511_v27, %v5524_v50 }
0x1576   :  { %v5526_v62 = vsel %vm370_vm11, %v5512_v38, %v5525_v25 }
0x1577   :  { %v5527_v43 = vsel %vm9535_vm6, %v5513_v60, %v5526_v62 }
0x1578   :  { %5531 = vst.msk [vmem:[%s9179_s4 + $0x8] sm:$0xff] %vm9536_vm7, %v5527_v43 }
0x1579   :  { %5540 = vsyncpa [#allocation4], 1 }

</bundles_post_ra>
